<compile_context>
chip_gen: v5e
topology: v5e:2x2
jax: 0.10.0
libtpu: 0.0.40
codegen_flags: <defaults>
</compile_context>

<pallas_src>
import jax
import jax.numpy as jnp
from jax.experimental import pallas as pl
from jax.experimental.pallas import tpu as pltpu


# ----------------------------------------------------------------------------
# Helpers
# ----------------------------------------------------------------------------
def _bcast_spec(shape):
    """Full-array block that is identical for every grid step (weights)."""
    zeros = (0,) * len(shape)
    return pl.BlockSpec(shape, lambda *args: zeros)


def _pick_tile(n):
    """Lane-dense N tile (n is a multiple of 128): largest divisor <= 1024."""
    if n <= 1024:
        return n
    for t in range(1024, 0, -128):
        if n % t == 0:
            return t
    return 128


# ----------------------------------------------------------------------------
# Kernels
# ----------------------------------------------------------------------------
def _make_stn_feat_kernel(tn, n_valid, n_padded):
    """STN3d conv stack + running channel max, tiled over N.  grid=(B, T)."""
    masked = n_valid < n_padded

    def kernel(x_ref, w1, sh1, w2, sh2, w3, sh3, g_ref):
        t = pl.program_id(1)

        @pl.when(t == 0)
        def _():
            g_ref[...] = jnp.full(g_ref.shape, -jnp.inf, dtype=g_ref.dtype)

        x = x_ref[0].astype(jnp.float32)                              # (D, TN)
        w1f = w1[...].astype(jnp.float32)                             # (64, D)
        d = x.shape[0]
        # K = D (tiny): VPU broadcast-FMAs instead of an f32 MXU pass.
        h = w1f[:, 0:1] * x[0:1, :]
        for j in range(1, d):
            h = h + w1f[:, j:j + 1] * x[j:j + 1, :]
        h = jnp.maximum(h + sh1[...], 0.0)                            # (64, TN)
        h = jnp.dot(w2[...], h.astype(jnp.bfloat16),
                    preferred_element_type=jnp.float32)
        h = jnp.maximum(h + sh2[...], 0.0)                            # (128, TN)
        h = jnp.dot(w3[...], h.astype(jnp.bfloat16),
                    preferred_element_type=jnp.float32)
        h = jnp.maximum(h + sh3[...], 0.0)                            # (1024, TN)
        if masked:
            col = jax.lax.broadcasted_iota(jnp.int32, (1, tn), 1) + t * tn
            h = jnp.where(col < n_valid, h, -jnp.inf)
        g_ref[0] = jnp.maximum(g_ref[0], jnp.max(h, axis=1, keepdims=True))

    return kernel


def _stn_fc_kernel(g_ref, fw1, fsh1, fw2, fsh2, fw3, fb3, out_ref):
    """Batched STN3d FC head: (B, 1024) -> (B, 9). Identity pre-folded in fb3."""
    f = jnp.dot(g_ref[...], fw1[...].astype(jnp.float32),
                preferred_element_type=jnp.float32)
    f = jnp.maximum(f + fsh1[...], 0.0)                               # (B, 512)
    f = jnp.dot(f, fw2[...].astype(jnp.float32),
                preferred_element_type=jnp.float32)
    f = jnp.maximum(f + fsh2[...], 0.0)                               # (B, 256)
    f = jnp.dot(f, fw3[...].astype(jnp.float32),
                preferred_element_type=jnp.float32) + fb3[...]        # (B, 9)
    out_ref[...] = f


def _make_encoder_kernel(tn, n_valid, n_padded):
    """Encoder conv stack, two-phase over N tiles.  grid=(B, 2, T).

    phase 0: conv stack on the tile, write pw into cat rows [1024:2048),
             update running channel-max in the resident g_ref block.
    phase 1: broadcast the finished global feature into cat rows [0:1024).
    """
    masked = n_valid < n_padded

    def kernel(x_ref, w1_ref, sh1, w2, sh2, w3, sh3, g_ref, cat_ref):
        ph = pl.program_id(1)
        t = pl.program_id(2)

        @pl.when(jnp.logical_and(ph == 0, t == 0))
        def _():
            g_ref[...] = jnp.full(g_ref.shape, -jnp.inf, dtype=g_ref.dtype)

        @pl.when(ph == 0)
        def _():
            x = x_ref[0].astype(jnp.float32)                          # (D, TN)
            w1 = w1_ref[0].astype(jnp.float32)                        # (64, D), trans-fused
            d = x.shape[0]
            h = w1[:, 0:1] * x[0:1, :]                                # VPU FMAs
            for j in range(1, d):
                h = h + w1[:, j:j + 1] * x[j:j + 1, :]
            h = jnp.maximum(h + sh1[...], 0.0)                        # (64, TN)
            h = jnp.dot(w2[...], h.astype(jnp.bfloat16),
                        preferred_element_type=jnp.float32)
            h = jnp.maximum(h + sh2[...], 0.0)                        # (128, TN)
            pw = jnp.dot(w3[...], h.astype(jnp.bfloat16),
                         preferred_element_type=jnp.float32)
            pw = pw + sh3[...]                                        # (1024, TN), no relu
            if masked:
                col = jax.lax.broadcasted_iota(jnp.int32, (1, tn), 1) + t * tn
                pw_max = jnp.where(col < n_valid, pw, -jnp.inf)
            else:
                pw_max = pw
            g_ref[0] = jnp.maximum(g_ref[0],
                                   jnp.max(pw_max, axis=1, keepdims=True))
            cat_ref[0] = pw                                           # pw half

        @pl.when(ph == 1)
        def _():
            cat_ref[0] = jnp.broadcast_to(g_ref[0], cat_ref.shape[1:])

    return kernel


# ----------------------------------------------------------------------------
# Wrappers
# ----------------------------------------------------------------------------
def _stn_feat(x_bdn, p, tn, n_valid):
    B, D, n_pad = x_bdn.shape
    weights = [p["s_w1"], p["s_sh1"], p["s_w2"], p["s_sh2"], p["s_w3"], p["s_sh3"]]
    kernel = _make_stn_feat_kernel(tn, n_valid, n_pad)
    return pl.pallas_call(
        kernel,
        out_shape=jax.ShapeDtypeStruct((B, 1024, 1), jnp.float32),
        grid=(B, n_pad // tn),
        in_specs=[pl.BlockSpec((1, D, tn), lambda b, t: (b, 0, t))]
                + [_bcast_spec(w.shape) for w in weights],
        out_specs=pl.BlockSpec((1, 1024, 1), lambda b, t: (b, 0, 0)),
        compiler_params=pltpu.CompilerParams(
            dimension_semantics=("parallel", "arbitrary"),
            vmem_limit_bytes=32 * 1024 * 1024),
    )(x_bdn, *weights)


def _stn_fc(g_b1024, p):
    B = g_b1024.shape[0]
    # Fold the 3x3 identity into the final bias OUTSIDE the kernel (an array
    # literal inside the kernel would be a captured constant -> trace error).
    iden = jnp.array([1., 0., 0., 0., 1., 0., 0., 0., 1.],
                     dtype=jnp.float32).reshape(1, 9)
    fb3 = p["s_fb3"] + iden
    weights = [p["s_fw1"], p["s_fsh1"], p["s_fw2"], p["s_fsh2"], p["s_fw3"], fb3]
    return pl.pallas_call(
        _stn_fc_kernel,
        out_shape=jax.ShapeDtypeStruct((B, 9), jnp.float32),
        grid=(1,),
        in_specs=[_bcast_spec((B, 1024))] + [_bcast_spec(w.shape) for w in weights],
        out_specs=_bcast_spec((B, 9)),
        compiler_params=pltpu.CompilerParams(
            dimension_semantics=("arbitrary",)),
    )(g_b1024, *weights)


def _encoder(x_bdn, w1_fused, p, tn, n_valid):
    B, D, n_pad = x_bdn.shape
    weights = [p["e_sh1"], p["e_w2"], p["e_sh2"], p["e_w3"], p["e_sh3"]]
    kernel = _make_encoder_kernel(tn, n_valid, n_pad)
    gmax, cat = pl.pallas_call(
        kernel,
        out_shape=(jax.ShapeDtypeStruct((B, 1024, 1), jnp.float32),
                   jax.ShapeDtypeStruct((B, 2048, n_pad), jnp.float32)),
        grid=(B, 2, n_pad // tn),
        in_specs=[pl.BlockSpec((1, D, tn), lambda b, ph, t: (b, 0, t * (1 - ph))),
                  pl.BlockSpec((1, 64, D), lambda b, ph, t: (b, 0, 0))]
                + [_bcast_spec(w.shape) for w in weights],
        out_specs=[pl.BlockSpec((1, 1024, 1), lambda b, ph, t: (b, 0, 0)),
                   pl.BlockSpec((1, 1024, tn), lambda b, ph, t: (b, 1 - ph, t))],
        compiler_params=pltpu.CompilerParams(
            dimension_semantics=("parallel", "arbitrary", "arbitrary"),
            vmem_limit_bytes=48 * 1024 * 1024),
    )(x_bdn, w1_fused, *weights)
    return gmax, cat


def pointnet_encoder_forward(x_bdn, params):
    """Equivalent of PointNetEncoder.forward (feature_transform=False, eval BN).

    x_bdn: (B, D, N) float32 (PyTorch NCW layout).
    Returns (global_feat (B,1024), trans (B,3,3), trans_feat None,
             cat (B, 2048, N)).
    """
    B, D, N = x_bdn.shape

    # Pad points up to a multiple of 128 (lane-dense unmasked stores); padded
    # columns are masked to -inf before the channel max inside the kernels.
    n_pad = ((N + 127) // 128) * 128
    x_p = jnp.pad(x_bdn, ((0, 0), (0, 0), (0, n_pad - N))) if n_pad != N else x_bdn
    tn = _pick_tile(n_pad)

    gstn = _stn_feat(x_p, params, tn, N)                      # (B, 1024, 1)
    out9 = _stn_fc(gstn[:, :, 0], params)                     # (B, 9)
    trans = out9.reshape(B, 3, 3)

    # Fuse the 3x3 spatial transform into conv1's weight (tiny, once per batch):
    #   W1 @ [trans^T @ xyz ; rest] == [W1[:, :3] @ trans^T | W1[:, 3:]] @ x
    w1 = params["e_w1"].astype(jnp.float32)                   # (64, D)
    w1_xyz = jnp.einsum("oj,bij->boi", w1[:, :3], trans)      # (B, 64, 3)
    if D > 3:
        rest = jnp.broadcast_to(w1[None, :, 3:], (B, 64, D - 3))
        w1_fused = jnp.concatenate([w1_xyz, rest], axis=2)
    else:
        w1_fused = w1_xyz                                     # (B, 64, 3)

    gmax, cat = _encoder(x_p, w1_fused, params, tn, N)
    if n_pad != N:
        cat = cat[:, :, :N]
    return gmax[:, :, 0], trans, None, cat


# ----------------------------------------------------------------------------
# Deterministic parameters: eval-mode BN scale folded into bf16 weights,
# bias+BN shift kept as an f32 per-channel shift.
# ----------------------------------------------------------------------------
def _fold_conv_bn(key, cin, cout, eps=1e-5):
    kw, kb, kg, kbe, km, kv = jax.random.split(key, 6)
    w = 0.1 * jax.random.normal(kw, (cout, cin), jnp.float32)     # channels-first
    b = 0.1 * jax.random.normal(kb, (cout,), jnp.float32)
    gamma = 1.0 + 0.1 * jax.random.normal(kg, (cout,), jnp.float32)
    beta = 0.1 * jax.random.normal(kbe, (cout,), jnp.float32)
    mean = 0.1 * jax.random.normal(km, (cout,), jnp.float32)
    var = 1.0 + 0.1 * jnp.abs(jax.random.normal(kv, (cout,), jnp.float32))
    scale = gamma / jnp.sqrt(var + eps)
    w_fold = (w * scale[:, None]).astype(jnp.bfloat16)            # (cout, cin)
    shift = (scale * (b - mean) + beta).reshape(cout, 1)          # f32
    return w_fold, shift


def _fold_fc_bn(key, cin, cout, eps=1e-5):
    kw, kb, kg, kbe, km, kv = jax.random.split(key, 6)
    w = 0.1 * jax.random.normal(kw, (cin, cout), jnp.float32)
    b = 0.1 * jax.random.normal(kb, (cout,), jnp.float32)
    gamma = 1.0 + 0.1 * jax.random.normal(kg, (cout,), jnp.float32)
    beta = 0.1 * jax.random.normal(kbe, (cout,), jnp.float32)
    mean = 0.1 * jax.random.normal(km, (cout,), jnp.float32)
    var = 1.0 + 0.1 * jnp.abs(jax.random.normal(kv, (cout,), jnp.float32))
    scale = gamma / jnp.sqrt(var + eps)
    w_fold = (w * scale[None, :]).astype(jnp.bfloat16)            # (cin, cout)
    shift = (scale * (b - mean) + beta).reshape(1, cout)          # f32
    return w_fold, shift


def make_params(channel, seed=42):
    ks = jax.random.split(jax.random.PRNGKey(seed), 10)
    p = {}
    # STN3d conv stack
    p["s_w1"], p["s_sh1"] = _fold_conv_bn(ks[0], channel, 64)
    p["s_w2"], p["s_sh2"] = _fold_conv_bn(ks[1], 64, 128)
    p["s_w3"], p["s_sh3"] = _fold_conv_bn(ks[2], 128, 1024)
    # STN3d FC head
    p["s_fw1"], p["s_fsh1"] = _fold_fc_bn(ks[3], 1024, 512)
    p["s_fw2"], p["s_fsh2"] = _fold_fc_bn(ks[4], 512, 256)
    kw, kb = jax.random.split(ks[5])
    p["s_fw3"] = (0.1 * jax.random.normal(kw, (256, 9), jnp.float32)).astype(jnp.bfloat16)
    p["s_fb3"] = 0.1 * jax.random.normal(kb, (1, 9), jnp.float32)
    # Encoder conv stack
    p["e_w1"], p["e_sh1"] = _fold_conv_bn(ks[6], channel, 64)
    p["e_w2"], p["e_sh2"] = _fold_conv_bn(ks[7], 64, 128)
    p["e_w3"], p["e_sh3"] = _fold_conv_bn(ks[8], 128, 1024)
    return p


# ----------------------------------------------------------------------------
# Pure-JAX f32 reference (same folded / bf16-quantized parameters)
# ----------------------------------------------------------------------------
def _reference(x_bdn, p):
    B, D, N = x_bdn.shape
    f32 = lambda a: a.astype(jnp.float32)

    def conv(h, w, sh, relu=True):
        y = jnp.einsum("oc,bcn->bon", f32(w), h) + sh[None]
        return jnp.maximum(y, 0.0) if relu else y

    def fc(h, w, sh, relu=True):
        y = h @ f32(w) + sh
        return jnp.maximum(y, 0.0) if relu else y

    h = conv(x_bdn, p["s_w1"], p["s_sh1"])
    h = conv(h, p["s_w2"], p["s_sh2"])
    h = conv(h, p["s_w3"], p["s_sh3"])
    g = jnp.max(h, axis=2)                                            # (B, 1024)
    f = fc(g, p["s_fw1"], p["s_fsh1"])
    f = fc(f, p["s_fw2"], p["s_fsh2"])
    f = f @ f32(p["s_fw3"]) + p["s_fb3"]
    trans = f.reshape(B, 3, 3) + jnp.eye(3, dtype=jnp.float32)

    xt = jnp.einsum("bji,bjn->bin", trans, x_bdn[:, :3, :])           # trans^T @ xyz
    if D > 3:
        xt = jnp.concatenate([xt, x_bdn[:, 3:, :]], axis=1)
    h = conv(xt, p["e_w1"], p["e_sh1"])
    h = conv(h, p["e_w2"], p["e_sh2"])
    pw = conv(h, p["e_w3"], p["e_sh3"], relu=False)                   # (B, 1024, N)
    gf = jnp.max(pw, axis=2)                                          # (B, 1024)
    cat = jnp.concatenate(
        [jnp.broadcast_to(gf[:, :, None], pw.shape), pw], axis=1)     # (B, 2048, N)
    return gf, trans, cat


# ----------------------------------------------------------------------------
if __name__ == "__main__":
    B, D, N = 2, 3, 128                     # small batch, channel=3, 128 points
    x = jax.random.normal(jax.random.PRNGKey(0), (B, D, N), jnp.float32)
    params = make_params(channel=D)

    fwd = jax.jit(pointnet_encoder_forward)
    global_feat, trans, trans_feat, cat = jax.block_until_ready(fwd(x, params))

    assert global_feat.shape == (B, 1024)
    assert trans.shape == (B, 3, 3)
    assert trans_feat is None
    assert cat.shape == (B, 2048, N)

    gf_ref, trans_ref, cat_ref = _reference(x, params)
    assert jnp.allclose(trans, trans_ref, rtol=3e-2, atol=3e-2), \
        float(jnp.max(jnp.abs(trans - trans_ref)))
    assert jnp.allclose(global_feat, gf_ref, rtol=3e-2, atol=3e-2), \
        float(jnp.max(jnp.abs(global_feat - gf_ref)))
    assert jnp.allclose(cat, cat_ref, rtol=3e-2, atol=3e-2), \
        float(jnp.max(jnp.abs(cat - cat_ref)))

    print("KERNEL_OK")
</pallas_src>

<mosaic_0001>
module attributes {stable_mosaic.version = 11 : i64} {
  func.func @kernel(%arg0: i32, %arg1: i32, %arg2: memref<1x3x128xf32, #tpu.memory_space<vmem>>, %arg3: memref<64x3xbf16, #tpu.memory_space<vmem>>, %arg4: memref<64x1xf32, #tpu.memory_space<vmem>>, %arg5: memref<128x64xbf16, #tpu.memory_space<vmem>>, %arg6: memref<128x1xf32, #tpu.memory_space<vmem>>, %arg7: memref<1024x128xbf16, #tpu.memory_space<vmem>>, %arg8: memref<1024x1xf32, #tpu.memory_space<vmem>>, %arg9: memref<1x1024x1xf32, #tpu.memory_space<vmem>>) attributes {dimension_semantics = [#tpu.dimension_semantics<parallel>, #tpu.dimension_semantics<arbitrary>], iteration_bounds = array<i64: 2, 1>, scalar_prefetch = 0 : i64, scratch_operands = 0 : i64, tpu.core_type = #tpu.core_type<tc>, window_params = [{transform_indices = @transform_0, window_bounds = array<i64: 1, 3, 128>}, {pipeline_mode = #tpu.pipeline_mode<synchronous>, transform_indices = @transform_1, window_bounds = array<i64: 64, 3>}, {pipeline_mode = #tpu.pipeline_mode<synchronous>, transform_indices = @transform_2, window_bounds = array<i64: 64, 1>}, {pipeline_mode = #tpu.pipeline_mode<synchronous>, transform_indices = @transform_3, window_bounds = array<i64: 128, 64>}, {pipeline_mode = #tpu.pipeline_mode<synchronous>, transform_indices = @transform_4, window_bounds = array<i64: 128, 1>}, {pipeline_mode = #tpu.pipeline_mode<synchronous>, transform_indices = @transform_5, window_bounds = array<i64: 1024, 128>}, {pipeline_mode = #tpu.pipeline_mode<synchronous>, transform_indices = @transform_6, window_bounds = array<i64: 1024, 1>}, {transform_indices = @transform_7, window_bounds = array<i64: 1, 1024, 1>}]} {
    %c0_i32 = arith.constant 0 : i32
    %0 = arith.cmpi eq, %arg1, %c0_i32 : i32
    %1 = arith.extui %0 : i1 to i32
    %c0_i32_0 = arith.constant 0 : i32
    %2 = arith.cmpi ne, %1, %c0_i32_0 : i32
    scf.if %2 {
      %cst_26 = arith.constant 0xFF800000 : f32
      %53 = vector.broadcast %cst_26 : f32 to vector<1x1024x1xf32>
      %c0_27 = arith.constant 0 : index
      %c0_28 = arith.constant 0 : index
      %c0_29 = arith.constant 0 : index
      %54 = vector.load %arg9[%c0_27, %c0_28, %c0_29] : memref<1x1024x1xf32, #tpu.memory_space<vmem>>, vector<1x1024x1xf32>
      tpu.vector_store %arg9[%c0_27, %c0_28, %c0_29], %53 {strides = array<i32>} : memref<1x1024x1xf32, #tpu.memory_space<vmem>>, vector<1x1024x1xf32>,
    } else {
    }
    %c0 = arith.constant 0 : index
    %c0_1 = arith.constant 0 : index
    %c0_2 = arith.constant 0 : index
    %3 = vector.load %arg2[%c0, %c0_1, %c0_2] : memref<1x3x128xf32, #tpu.memory_space<vmem>>, vector<1x3x128xf32>
    %4 = vector.shape_cast %3 : vector<1x3x128xf32> to vector<3x128xf32>
    %c0_3 = arith.constant 0 : index
    %c0_4 = arith.constant 0 : index
    %5 = vector.load %arg3[%c0_3, %c0_4] : memref<64x3xbf16, #tpu.memory_space<vmem>>, vector<64x3xbf16>
    %6 = arith.extf %5 : vector<64x3xbf16> to vector<64x3xf32>
    %7 = vector.extract_strided_slice %6 {offsets = [0, 0], sizes = [64, 1], strides = [1, 1]} : vector<64x3xf32> to vector<64x1xf32>
    %8 = vector.extract_strided_slice %4 {offsets = [0, 0], sizes = [1, 128], strides = [1, 1]} : vector<3x128xf32> to vector<1x128xf32>
    %9 = vector.broadcast %7 : vector<64x1xf32> to vector<64x128xf32>
    %10 = vector.broadcast %8 : vector<1x128xf32> to vector<64x128xf32>
    %11 = arith.mulf %9, %10 : vector<64x128xf32>
    %12 = vector.extract_strided_slice %6 {offsets = [0, 1], sizes = [64, 1], strides = [1, 1]} : vector<64x3xf32> to vector<64x1xf32>
    %13 = vector.extract_strided_slice %4 {offsets = [1, 0], sizes = [1, 128], strides = [1, 1]} : vector<3x128xf32> to vector<1x128xf32>
    %14 = vector.broadcast %12 : vector<64x1xf32> to vector<64x128xf32>
    %15 = vector.broadcast %13 : vector<1x128xf32> to vector<64x128xf32>
    %16 = arith.mulf %14, %15 : vector<64x128xf32>
    %17 = arith.addf %11, %16 : vector<64x128xf32>
    %18 = vector.extract_strided_slice %6 {offsets = [0, 2], sizes = [64, 1], strides = [1, 1]} : vector<64x3xf32> to vector<64x1xf32>
    %19 = vector.extract_strided_slice %4 {offsets = [2, 0], sizes = [1, 128], strides = [1, 1]} : vector<3x128xf32> to vector<1x128xf32>
    %20 = vector.broadcast %18 : vector<64x1xf32> to vector<64x128xf32>
    %21 = vector.broadcast %19 : vector<1x128xf32> to vector<64x128xf32>
    %22 = arith.mulf %20, %21 : vector<64x128xf32>
    %23 = arith.addf %17, %22 : vector<64x128xf32>
    %c0_5 = arith.constant 0 : index
    %c0_6 = arith.constant 0 : index
    %24 = vector.load %arg4[%c0_5, %c0_6] : memref<64x1xf32, #tpu.memory_space<vmem>>, vector<64x1xf32>
    %25 = vector.broadcast %24 : vector<64x1xf32> to vector<64x128xf32>
    %26 = arith.addf %23, %25 : vector<64x128xf32>
    %cst = arith.constant 0.000000e+00 : f32
    %27 = vector.broadcast %cst : f32 to vector<64x128xf32>
    %28 = arith.maximumf %26, %27 : vector<64x128xf32>
    %c0_7 = arith.constant 0 : index
    %c0_8 = arith.constant 0 : index
    %29 = vector.load %arg5[%c0_7, %c0_8] : memref<128x64xbf16, #tpu.memory_space<vmem>>, vector<128x64xbf16>
    %30 = arith.truncf %28 : vector<64x128xf32> to vector<64x128xbf16>
    %cst_9 = arith.constant dense<0.000000e+00> : vector<128x128xf32>
    %31 = tpu.matmul %29, %30, %cst_9 {dimension_numbers = #tpu.dot_dimension_numbers<[1], [0], [0], [1], [0, 0, 1, 1], [], []>} : vector<128x64xbf16>, vector<64x128xbf16>, vector<128x128xf32> -> vector<128x128xf32>
    %c0_10 = arith.constant 0 : index
    %c0_11 = arith.constant 0 : index
    %32 = vector.load %arg6[%c0_10, %c0_11] : memref<128x1xf32, #tpu.memory_space<vmem>>, vector<128x1xf32>
    %33 = vector.broadcast %32 : vector<128x1xf32> to vector<128x128xf32>
    %34 = arith.addf %31, %33 : vector<128x128xf32>
    %cst_12 = arith.constant 0.000000e+00 : f32
    %35 = vector.broadcast %cst_12 : f32 to vector<128x128xf32>
    %36 = arith.maximumf %34, %35 : vector<128x128xf32>
    %c0_13 = arith.constant 0 : index
    %c0_14 = arith.constant 0 : index
    %37 = vector.load %arg7[%c0_13, %c0_14] : memref<1024x128xbf16, #tpu.memory_space<vmem>>, vector<1024x128xbf16>
    %38 = arith.truncf %36 : vector<128x128xf32> to vector<128x128xbf16>
    %cst_15 = arith.constant dense<0.000000e+00> : vector<1024x128xf32>
    %39 = tpu.matmul %37, %38, %cst_15 {dimension_numbers = #tpu.dot_dimension_numbers<[1], [0], [0], [1], [0, 0, 1, 1], [], []>} : vector<1024x128xbf16>, vector<128x128xbf16>, vector<1024x128xf32> -> vector<1024x128xf32>
    %c0_16 = arith.constant 0 : index
    %c0_17 = arith.constant 0 : index
    %40 = vector.load %arg8[%c0_16, %c0_17] : memref<1024x1xf32, #tpu.memory_space<vmem>>, vector<1024x1xf32>
    %41 = vector.broadcast %40 : vector<1024x1xf32> to vector<1024x128xf32>
    %42 = arith.addf %39, %41 : vector<1024x128xf32>
    %cst_18 = arith.constant 0.000000e+00 : f32
    %43 = vector.broadcast %cst_18 : f32 to vector<1024x128xf32>
    %44 = arith.maximumf %42, %43 : vector<1024x128xf32>
    %c0_19 = arith.constant 0 : index
    %c0_20 = arith.constant 0 : index
    %c0_21 = arith.constant 0 : index
    %45 = vector.load %arg9[%c0_19, %c0_20, %c0_21] : memref<1x1024x1xf32, #tpu.memory_space<vmem>>, vector<1x1024x1xf32>
    %46 = vector.shape_cast %45 : vector<1x1024x1xf32> to vector<1024x1xf32>
    %cst_22 = arith.constant dense<0xFF800000> : vector<1024xf32>
    %47 = vector.multi_reduction <maximumf>, %44, %cst_22 [1] : vector<1024x128xf32> to vector<1024xf32>
    %48 = vector.shape_cast %47 : vector<1024xf32> to vector<1024x1xf32>
    %49 = arith.maximumf %46, %48 : vector<1024x1xf32>
    %c0_23 = arith.constant 0 : index
    %c0_24 = arith.constant 0 : index
    %c0_25 = arith.constant 0 : index
    %50 = vector.load %arg9[%c0_23, %c0_24, %c0_25] : memref<1x1024x1xf32, #tpu.memory_space<vmem>>, vector<1x1024x1xf32>
    %51 = vector.shape_cast %50 : vector<1x1024x1xf32> to vector<1024x1xf32>
    %52 = vector.shape_cast %49 : vector<1024x1xf32> to vector<1x1024x1xf32>
    tpu.vector_store %arg9[%c0_23, %c0_24, %c0_25], %52 {strides = array<i32>} : memref<1x1024x1xf32, #tpu.memory_space<vmem>>, vector<1x1024x1xf32>,
    return
  }
  func.func @transform_0(%arg0: i32, %arg1: i32) -> (i32, i32, i32) {
    %c0_i32 = arith.constant 0 : i32
    %c0_i32_0 = arith.constant 0 : i32
    return %arg0, %c0_i32, %arg1 : i32, i32, i32
  }
  func.func @transform_1(%arg0: i32, %arg1: i32) -> (i32, i32) {
    %c0_i32 = arith.constant 0 : i32
    %c0_i32_0 = arith.constant 0 : i32
    %c0_i32_1 = arith.constant 0 : i32
    return %c0_i32, %c0_i32_0 : i32, i32
  }
  func.func @transform_2(%arg0: i32, %arg1: i32) -> (i32, i32) {
    %c0_i32 = arith.constant 0 : i32
    %c0_i32_0 = arith.constant 0 : i32
    %c0_i32_1 = arith.constant 0 : i32
    return %c0_i32, %c0_i32_0 : i32, i32
  }
  func.func @transform_3(%arg0: i32, %arg1: i32) -> (i32, i32) {
    %c0_i32 = arith.constant 0 : i32
    %c0_i32_0 = arith.constant 0 : i32
    %c0_i32_1 = arith.constant 0 : i32
    return %c0_i32, %c0_i32_0 : i32, i32
  }
  func.func @transform_4(%arg0: i32, %arg1: i32) -> (i32, i32) {
    %c0_i32 = arith.constant 0 : i32
    %c0_i32_0 = arith.constant 0 : i32
    %c0_i32_1 = arith.constant 0 : i32
    return %c0_i32, %c0_i32_0 : i32, i32
  }
  func.func @transform_5(%arg0: i32, %arg1: i32) -> (i32, i32) {
    %c0_i32 = arith.constant 0 : i32
    %c0_i32_0 = arith.constant 0 : i32
    %c0_i32_1 = arith.constant 0 : i32
    return %c0_i32, %c0_i32_0 : i32, i32
  }
  func.func @transform_6(%arg0: i32, %arg1: i32) -> (i32, i32) {
    %c0_i32 = arith.constant 0 : i32
    %c0_i32_0 = arith.constant 0 : i32
    %c0_i32_1 = arith.constant 0 : i32
    return %c0_i32, %c0_i32_0 : i32, i32
  }
  func.func @transform_7(%arg0: i32, %arg1: i32) -> (i32, i32, i32) {
    %c0_i32 = arith.constant 0 : i32
    %c0_i32_0 = arith.constant 0 : i32
    %c0_i32_1 = arith.constant 0 : i32
    return %arg0, %c0_i32, %c0_i32_0 : i32, i32, i32
  }
}

module attributes {stable_mosaic.version = 11 : i64} {
  func.func @_stn_fc_kernel(%arg0: i32, %arg1: memref<2x1024xf32, #tpu.memory_space<vmem>>, %arg2: memref<1024x512xbf16, #tpu.memory_space<vmem>>, %arg3: memref<1x512xf32, #tpu.memory_space<vmem>>, %arg4: memref<512x256xbf16, #tpu.memory_space<vmem>>, %arg5: memref<1x256xf32, #tpu.memory_space<vmem>>, %arg6: memref<256x9xbf16, #tpu.memory_space<vmem>>, %arg7: memref<1x9xf32, #tpu.memory_space<vmem>>, %arg8: memref<2x9xf32, #tpu.memory_space<vmem>>) attributes {dimension_semantics = [#tpu.dimension_semantics<arbitrary>], iteration_bounds = array<i64: 1>, scalar_prefetch = 0 : i64, scratch_operands = 0 : i64, tpu.core_type = #tpu.core_type<tc>, window_params = [{pipeline_mode = #tpu.pipeline_mode<synchronous>, transform_indices = @transform_0, window_bounds = array<i64: 2, 1024>}, {pipeline_mode = #tpu.pipeline_mode<synchronous>, transform_indices = @transform_1, window_bounds = array<i64: 1024, 512>}, {pipeline_mode = #tpu.pipeline_mode<synchronous>, transform_indices = @transform_2, window_bounds = array<i64: 1, 512>}, {pipeline_mode = #tpu.pipeline_mode<synchronous>, transform_indices = @transform_3, window_bounds = array<i64: 512, 256>}, {pipeline_mode = #tpu.pipeline_mode<synchronous>, transform_indices = @transform_4, window_bounds = array<i64: 1, 256>}, {pipeline_mode = #tpu.pipeline_mode<synchronous>, transform_indices = @transform_5, window_bounds = array<i64: 256, 9>}, {pipeline_mode = #tpu.pipeline_mode<synchronous>, transform_indices = @transform_6, window_bounds = array<i64: 1, 9>}, {pipeline_mode = #tpu.pipeline_mode<synchronous>, transform_indices = @transform_7, window_bounds = array<i64: 2, 9>}]} {
    %c0 = arith.constant 0 : index
    %c0_0 = arith.constant 0 : index
    %0 = vector.load %arg1[%c0, %c0_0] : memref<2x1024xf32, #tpu.memory_space<vmem>>, vector<2x1024xf32>
    %c0_1 = arith.constant 0 : index
    %c0_2 = arith.constant 0 : index
    %1 = vector.load %arg2[%c0_1, %c0_2] : memref<1024x512xbf16, #tpu.memory_space<vmem>>, vector<1024x512xbf16>
    %2 = arith.extf %1 : vector<1024x512xbf16> to vector<1024x512xf32>
    %cst = arith.constant dense<0.000000e+00> : vector<2x512xf32>
    %3 = tpu.matmul %0, %2, %cst {dimension_numbers = #tpu.dot_dimension_numbers<[1], [0], [0], [1], [0, 0, 1, 1], [], []>} : vector<2x1024xf32>, vector<1024x512xf32>, vector<2x512xf32> -> vector<2x512xf32>
    %c0_3 = arith.constant 0 : index
    %c0_4 = arith.constant 0 : index
    %4 = vector.load %arg3[%c0_3, %c0_4] : memref<1x512xf32, #tpu.memory_space<vmem>>, vector<1x512xf32>
    %5 = vector.broadcast %4 : vector<1x512xf32> to vector<2x512xf32>
    %6 = arith.addf %3, %5 : vector<2x512xf32>
    %cst_5 = arith.constant 0.000000e+00 : f32
    %7 = vector.broadcast %cst_5 : f32 to vector<2x512xf32>
    %8 = arith.maximumf %6, %7 : vector<2x512xf32>
    %c0_6 = arith.constant 0 : index
    %c0_7 = arith.constant 0 : index
    %9 = vector.load %arg4[%c0_6, %c0_7] : memref<512x256xbf16, #tpu.memory_space<vmem>>, vector<512x256xbf16>
    %10 = arith.extf %9 : vector<512x256xbf16> to vector<512x256xf32>
    %cst_8 = arith.constant dense<0.000000e+00> : vector<2x256xf32>
    %11 = tpu.matmul %8, %10, %cst_8 {dimension_numbers = #tpu.dot_dimension_numbers<[1], [0], [0], [1], [0, 0, 1, 1], [], []>} : vector<2x512xf32>, vector<512x256xf32>, vector<2x256xf32> -> vector<2x256xf32>
    %c0_9 = arith.constant 0 : index
    %c0_10 = arith.constant 0 : index
    %12 = vector.load %arg5[%c0_9, %c0_10] : memref<1x256xf32, #tpu.memory_space<vmem>>, vector<1x256xf32>
    %13 = vector.broadcast %12 : vector<1x256xf32> to vector<2x256xf32>
    %14 = arith.addf %11, %13 : vector<2x256xf32>
    %cst_11 = arith.constant 0.000000e+00 : f32
    %15 = vector.broadcast %cst_11 : f32 to vector<2x256xf32>
    %16 = arith.maximumf %14, %15 : vector<2x256xf32>
    %c0_12 = arith.constant 0 : index
    %c0_13 = arith.constant 0 : index
    %17 = vector.load %arg6[%c0_12, %c0_13] : memref<256x9xbf16, #tpu.memory_space<vmem>>, vector<256x9xbf16>
    %18 = arith.extf %17 : vector<256x9xbf16> to vector<256x9xf32>
    %cst_14 = arith.constant dense<0.000000e+00> : vector<2x9xf32>
    %19 = tpu.matmul %16, %18, %cst_14 {dimension_numbers = #tpu.dot_dimension_numbers<[1], [0], [0], [1], [0, 0, 1, 1], [], []>} : vector<2x256xf32>, vector<256x9xf32>, vector<2x9xf32> -> vector<2x9xf32>
    %c0_15 = arith.constant 0 : index
    %c0_16 = arith.constant 0 : index
    %20 = vector.load %arg7[%c0_15, %c0_16] : memref<1x9xf32, #tpu.memory_space<vmem>>, vector<1x9xf32>
    %21 = vector.broadcast %20 : vector<1x9xf32> to vector<2x9xf32>
    %22 = arith.addf %19, %21 : vector<2x9xf32>
    %c0_17 = arith.constant 0 : index
    %c0_18 = arith.constant 0 : index
    %23 = vector.load %arg8[%c0_17, %c0_18] : memref<2x9xf32, #tpu.memory_space<vmem>>, vector<2x9xf32>
    tpu.vector_store %arg8[%c0_17, %c0_18], %22 {strides = array<i32>} : memref<2x9xf32, #tpu.memory_space<vmem>>, vector<2x9xf32>,
    return
  }
  func.func @transform_0(%arg0: i32) -> (i32, i32) {
    %c0_i32 = arith.constant 0 : i32
    %c0_i32_0 = arith.constant 0 : i32
    %c0_i32_1 = arith.constant 0 : i32
    return %c0_i32, %c0_i32_0 : i32, i32
  }
  func.func @transform_1(%arg0: i32) -> (i32, i32) {
    %c0_i32 = arith.constant 0 : i32
    %c0_i32_0 = arith.constant 0 : i32
    %c0_i32_1 = arith.constant 0 : i32
    return %c0_i32, %c0_i32_0 : i32, i32
  }
  func.func @transform_2(%arg0: i32) -> (i32, i32) {
    %c0_i32 = arith.constant 0 : i32
    %c0_i32_0 = arith.constant 0 : i32
    %c0_i32_1 = arith.constant 0 : i32
    return %c0_i32, %c0_i32_0 : i32, i32
  }
  func.func @transform_3(%arg0: i32) -> (i32, i32) {
    %c0_i32 = arith.constant 0 : i32
    %c0_i32_0 = arith.constant 0 : i32
    %c0_i32_1 = arith.constant 0 : i32
    return %c0_i32, %c0_i32_0 : i32, i32
  }
  func.func @transform_4(%arg0: i32) -> (i32, i32) {
    %c0_i32 = arith.constant 0 : i32
    %c0_i32_0 = arith.constant 0 : i32
    %c0_i32_1 = arith.constant 0 : i32
    return %c0_i32, %c0_i32_0 : i32, i32
  }
  func.func @transform_5(%arg0: i32) -> (i32, i32) {
    %c0_i32 = arith.constant 0 : i32
    %c0_i32_0 = arith.constant 0 : i32
    %c0_i32_1 = arith.constant 0 : i32
    return %c0_i32, %c0_i32_0 : i32, i32
  }
  func.func @transform_6(%arg0: i32) -> (i32, i32) {
    %c0_i32 = arith.constant 0 : i32
    %c0_i32_0 = arith.constant 0 : i32
    %c0_i32_1 = arith.constant 0 : i32
    return %c0_i32, %c0_i32_0 : i32, i32
  }
  func.func @transform_7(%arg0: i32) -> (i32, i32) {
    %c0_i32 = arith.constant 0 : i32
    %c0_i32_0 = arith.constant 0 : i32
    %c0_i32_1 = arith.constant 0 : i32
    return %c0_i32, %c0_i32_0 : i32, i32
  }
}

module attributes {stable_mosaic.version = 11 : i64} {
  func.func @kernel(%arg0: i32, %arg1: i32, %arg2: i32, %arg3: memref<1x3x128xf32, #tpu.memory_space<vmem>>, %arg4: memref<1x64x3xf32, #tpu.memory_space<vmem>>, %arg5: memref<64x1xf32, #tpu.memory_space<vmem>>, %arg6: memref<128x64xbf16, #tpu.memory_space<vmem>>, %arg7: memref<128x1xf32, #tpu.memory_space<vmem>>, %arg8: memref<1024x128xbf16, #tpu.memory_space<vmem>>, %arg9: memref<1024x1xf32, #tpu.memory_space<vmem>>, %arg10: memref<1x1024x1xf32, #tpu.memory_space<vmem>>, %arg11: memref<1x1024x128xf32, #tpu.memory_space<vmem>>) attributes {dimension_semantics = [#tpu.dimension_semantics<parallel>, #tpu.dimension_semantics<arbitrary>, #tpu.dimension_semantics<arbitrary>], iteration_bounds = array<i64: 2, 2, 1>, scalar_prefetch = 0 : i64, scratch_operands = 0 : i64, tpu.core_type = #tpu.core_type<tc>, window_params = [{transform_indices = @transform_0, window_bounds = array<i64: 1, 3, 128>}, {transform_indices = @transform_1, window_bounds = array<i64: 1, 64, 3>}, {pipeline_mode = #tpu.pipeline_mode<synchronous>, transform_indices = @transform_2, window_bounds = array<i64: 64, 1>}, {pipeline_mode = #tpu.pipeline_mode<synchronous>, transform_indices = @transform_3, window_bounds = array<i64: 128, 64>}, {pipeline_mode = #tpu.pipeline_mode<synchronous>, transform_indices = @transform_4, window_bounds = array<i64: 128, 1>}, {pipeline_mode = #tpu.pipeline_mode<synchronous>, transform_indices = @transform_5, window_bounds = array<i64: 1024, 128>}, {pipeline_mode = #tpu.pipeline_mode<synchronous>, transform_indices = @transform_6, window_bounds = array<i64: 1024, 1>}, {transform_indices = @transform_7, window_bounds = array<i64: 1, 1024, 1>}, {transform_indices = @transform_8, window_bounds = array<i64: 1, 1024, 128>}]} {
    %c0_i32 = arith.constant 0 : i32
    %0 = arith.cmpi eq, %arg1, %c0_i32 : i32
    %c0_i32_0 = arith.constant 0 : i32
    %1 = arith.cmpi eq, %arg2, %c0_i32_0 : i32
    %2 = arith.andi %0, %1 : i1
    %3 = arith.extui %2 : i1 to i32
    %c0_i32_1 = arith.constant 0 : i32
    %4 = arith.cmpi ne, %3, %c0_i32_1 : i32
    scf.if %4 {
      %cst = arith.constant 0xFF800000 : f32
      %11 = vector.broadcast %cst : f32 to vector<1x1024x1xf32>
      %c0 = arith.constant 0 : index
      %c0_5 = arith.constant 0 : index
      %c0_6 = arith.constant 0 : index
      %12 = vector.load %arg10[%c0, %c0_5, %c0_6] : memref<1x1024x1xf32, #tpu.memory_space<vmem>>, vector<1x1024x1xf32>
      tpu.vector_store %arg10[%c0, %c0_5, %c0_6], %11 {strides = array<i32>} : memref<1x1024x1xf32, #tpu.memory_space<vmem>>, vector<1x1024x1xf32>,
    } else {
    }
    %c0_i32_2 = arith.constant 0 : i32
    %5 = arith.cmpi eq, %arg1, %c0_i32_2 : i32
    %6 = arith.extui %5 : i1 to i32
    %c0_i32_3 = arith.constant 0 : i32
    %7 = arith.cmpi ne, %6, %c0_i32_3 : i32
    scf.if %7 {
      %c0 = arith.constant 0 : index
      %c0_5 = arith.constant 0 : index
      %c0_6 = arith.constant 0 : index
      %11 = vector.load %arg3[%c0, %c0_5, %c0_6] : memref<1x3x128xf32, #tpu.memory_space<vmem>>, vector<1x3x128xf32>
      %12 = vector.shape_cast %11 : vector<1x3x128xf32> to vector<3x128xf32>
      %c0_7 = arith.constant 0 : index
      %c0_8 = arith.constant 0 : index
      %c0_9 = arith.constant 0 : index
      %13 = vector.load %arg4[%c0_7, %c0_8, %c0_9] : memref<1x64x3xf32, #tpu.memory_space<vmem>>, vector<1x64x3xf32>
      %14 = vector.shape_cast %13 : vector<1x64x3xf32> to vector<64x3xf32>
      %15 = vector.extract_strided_slice %14 {offsets = [0, 0], sizes = [64, 1], strides = [1, 1]} : vector<64x3xf32> to vector<64x1xf32>
      %16 = vector.extract_strided_slice %12 {offsets = [0, 0], sizes = [1, 128], strides = [1, 1]} : vector<3x128xf32> to vector<1x128xf32>
      %17 = vector.broadcast %15 : vector<64x1xf32> to vector<64x128xf32>
      %18 = vector.broadcast %16 : vector<1x128xf32> to vector<64x128xf32>
      %19 = arith.mulf %17, %18 : vector<64x128xf32>
      %20 = vector.extract_strided_slice %14 {offsets = [0, 1], sizes = [64, 1], strides = [1, 1]} : vector<64x3xf32> to vector<64x1xf32>
      %21 = vector.extract_strided_slice %12 {offsets = [1, 0], sizes = [1, 128], strides = [1, 1]} : vector<3x128xf32> to vector<1x128xf32>
      %22 = vector.broadcast %20 : vector<64x1xf32> to vector<64x128xf32>
      %23 = vector.broadcast %21 : vector<1x128xf32> to vector<64x128xf32>
      %24 = arith.mulf %22, %23 : vector<64x128xf32>
      %25 = arith.addf %19, %24 : vector<64x128xf32>
      %26 = vector.extract_strided_slice %14 {offsets = [0, 2], sizes = [64, 1], strides = [1, 1]} : vector<64x3xf32> to vector<64x1xf32>
      %27 = vector.extract_strided_slice %12 {offsets = [2, 0], sizes = [1, 128], strides = [1, 1]} : vector<3x128xf32> to vector<1x128xf32>
      %28 = vector.broadcast %26 : vector<64x1xf32> to vector<64x128xf32>
      %29 = vector.broadcast %27 : vector<1x128xf32> to vector<64x128xf32>
      %30 = arith.mulf %28, %29 : vector<64x128xf32>
      %31 = arith.addf %25, %30 : vector<64x128xf32>
      %c0_10 = arith.constant 0 : index
      %c0_11 = arith.constant 0 : index
      %32 = vector.load %arg5[%c0_10, %c0_11] : memref<64x1xf32, #tpu.memory_space<vmem>>, vector<64x1xf32>
      %33 = vector.broadcast %32 : vector<64x1xf32> to vector<64x128xf32>
      %34 = arith.addf %31, %33 : vector<64x128xf32>
      %cst = arith.constant 0.000000e+00 : f32
      %35 = vector.broadcast %cst : f32 to vector<64x128xf32>
      %36 = arith.maximumf %34, %35 : vector<64x128xf32>
      %c0_12 = arith.constant 0 : index
      %c0_13 = arith.constant 0 : index
      %37 = vector.load %arg6[%c0_12, %c0_13] : memref<128x64xbf16, #tpu.memory_space<vmem>>, vector<128x64xbf16>
      %38 = arith.truncf %36 : vector<64x128xf32> to vector<64x128xbf16>
      %cst_14 = arith.constant dense<0.000000e+00> : vector<128x128xf32>
      %39 = tpu.matmul %37, %38, %cst_14 {dimension_numbers = #tpu.dot_dimension_numbers<[1], [0], [0], [1], [0, 0, 1, 1], [], []>} : vector<128x64xbf16>, vector<64x128xbf16>, vector<128x128xf32> -> vector<128x128xf32>
      %c0_15 = arith.constant 0 : index
      %c0_16 = arith.constant 0 : index
      %40 = vector.load %arg7[%c0_15, %c0_16] : memref<128x1xf32, #tpu.memory_space<vmem>>, vector<128x1xf32>
      %41 = vector.broadcast %40 : vector<128x1xf32> to vector<128x128xf32>
      %42 = arith.addf %39, %41 : vector<128x128xf32>
      %cst_17 = arith.constant 0.000000e+00 : f32
      %43 = vector.broadcast %cst_17 : f32 to vector<128x128xf32>
      %44 = arith.maximumf %42, %43 : vector<128x128xf32>
      %c0_18 = arith.constant 0 : index
      %c0_19 = arith.constant 0 : index
      %45 = vector.load %arg8[%c0_18, %c0_19] : memref<1024x128xbf16, #tpu.memory_space<vmem>>, vector<1024x128xbf16>
      %46 = arith.truncf %44 : vector<128x128xf32> to vector<128x128xbf16>
      %cst_20 = arith.constant dense<0.000000e+00> : vector<1024x128xf32>
      %47 = tpu.matmul %45, %46, %cst_20 {dimension_numbers = #tpu.dot_dimension_numbers<[1], [0], [0], [1], [0, 0, 1, 1], [], []>} : vector<1024x128xbf16>, vector<128x128xbf16>, vector<1024x128xf32> -> vector<1024x128xf32>
      %c0_21 = arith.constant 0 : index
      %c0_22 = arith.constant 0 : index
      %48 = vector.load %arg9[%c0_21, %c0_22] : memref<1024x1xf32, #tpu.memory_space<vmem>>, vector<1024x1xf32>
      %49 = vector.broadcast %48 : vector<1024x1xf32> to vector<1024x128xf32>
      %50 = arith.addf %47, %49 : vector<1024x128xf32>
      %c0_23 = arith.constant 0 : index
      %c0_24 = arith.constant 0 : index
      %c0_25 = arith.constant 0 : index
      %51 = vector.load %arg10[%c0_23, %c0_24, %c0_25] : memref<1x1024x1xf32, #tpu.memory_space<vmem>>, vector<1x1024x1xf32>
      %52 = vector.shape_cast %51 : vector<1x1024x1xf32> to vector<1024x1xf32>
      %cst_26 = arith.constant dense<0xFF800000> : vector<1024xf32>
      %53 = vector.multi_reduction <maximumf>, %50, %cst_26 [1] : vector<1024x128xf32> to vector<1024xf32>
      %54 = vector.shape_cast %53 : vector<1024xf32> to vector<1024x1xf32>
      %55 = arith.maximumf %52, %54 : vector<1024x1xf32>
      %c0_27 = arith.constant 0 : index
      %c0_28 = arith.constant 0 : index
      %c0_29 = arith.constant 0 : index
      %56 = vector.load %arg10[%c0_27, %c0_28, %c0_29] : memref<1x1024x1xf32, #tpu.memory_space<vmem>>, vector<1x1024x1xf32>
      %57 = vector.shape_cast %56 : vector<1x1024x1xf32> to vector<1024x1xf32>
      %58 = vector.shape_cast %55 : vector<1024x1xf32> to vector<1x1024x1xf32>
      tpu.vector_store %arg10[%c0_27, %c0_28, %c0_29], %58 {strides = array<i32>} : memref<1x1024x1xf32, #tpu.memory_space<vmem>>, vector<1x1024x1xf32>,
      %c0_30 = arith.constant 0 : index
      %c0_31 = arith.constant 0 : index
      %c0_32 = arith.constant 0 : index
      %59 = vector.load %arg11[%c0_30, %c0_31, %c0_32] : memref<1x1024x128xf32, #tpu.memory_space<vmem>>, vector<1x1024x128xf32>
      %60 = vector.shape_cast %59 : vector<1x1024x128xf32> to vector<1024x128xf32>
      %61 = vector.shape_cast %50 : vector<1024x128xf32> to vector<1x1024x128xf32>
      tpu.vector_store %arg11[%c0_30, %c0_31, %c0_32], %61 {strides = array<i32>} : memref<1x1024x128xf32, #tpu.memory_space<vmem>>, vector<1x1024x128xf32>,
    } else {
    }
    %c1_i32 = arith.constant 1 : i32
    %8 = arith.cmpi eq, %arg1, %c1_i32 : i32
    %9 = arith.extui %8 : i1 to i32
    %c0_i32_4 = arith.constant 0 : i32
    %10 = arith.cmpi ne, %9, %c0_i32_4 : i32
    scf.if %10 {
      %c0 = arith.constant 0 : index
      %c0_5 = arith.constant 0 : index
      %c0_6 = arith.constant 0 : index
      %11 = vector.load %arg10[%c0, %c0_5, %c0_6] : memref<1x1024x1xf32, #tpu.memory_space<vmem>>, vector<1x1024x1xf32>
      %12 = vector.shape_cast %11 : vector<1x1024x1xf32> to vector<1024x1xf32>
      %13 = vector.shape_cast %12 : vector<1024x1xf32> to vector<1024x1xf32>
      %14 = vector.broadcast %13 : vector<1024x1xf32> to vector<1024x128xf32>
      %c0_7 = arith.constant 0 : index
      %c0_8 = arith.constant 0 : index
      %c0_9 = arith.constant 0 : index
      %15 = vector.load %arg11[%c0_7, %c0_8, %c0_9] : memref<1x1024x128xf32, #tpu.memory_space<vmem>>, vector<1x1024x128xf32>
      %16 = vector.shape_cast %15 : vector<1x1024x128xf32> to vector<1024x128xf32>
      %17 = vector.shape_cast %14 : vector<1024x128xf32> to vector<1x1024x128xf32>
      tpu.vector_store %arg11[%c0_7, %c0_8, %c0_9], %17 {strides = array<i32>} : memref<1x1024x128xf32, #tpu.memory_space<vmem>>, vector<1x1024x128xf32>,
    } else {
    }
    return
  }
  func.func @transform_0(%arg0: i32, %arg1: i32, %arg2: i32) -> (i32, i32, i32) {
    %c1_i32 = arith.constant 1 : i32
    %0 = arith.subi %c1_i32, %arg1 : i32
    %1 = arith.muli %arg2, %0 : i32
    %c0_i32 = arith.constant 0 : i32
    %c0_i32_0 = arith.constant 0 : i32
    return %arg0, %c0_i32, %1 : i32, i32, i32
  }
  func.func @transform_1(%arg0: i32, %arg1: i32, %arg2: i32) -> (i32, i32, i32) {
    %c0_i32 = arith.constant 0 : i32
    %c0_i32_0 = arith.constant 0 : i32
    %c0_i32_1 = arith.constant 0 : i32
    return %arg0, %c0_i32, %c0_i32_0 : i32, i32, i32
  }
  func.func @transform_2(%arg0: i32, %arg1: i32, %arg2: i32) -> (i32, i32) {
    %c0_i32 = arith.constant 0 : i32
    %c0_i32_0 = arith.constant 0 : i32
    %c0_i32_1 = arith.constant 0 : i32
    return %c0_i32, %c0_i32_0 : i32, i32
  }
  func.func @transform_3(%arg0: i32, %arg1: i32, %arg2: i32) -> (i32, i32) {
    %c0_i32 = arith.constant 0 : i32
    %c0_i32_0 = arith.constant 0 : i32
    %c0_i32_1 = arith.constant 0 : i32
    return %c0_i32, %c0_i32_0 : i32, i32
  }
  func.func @transform_4(%arg0: i32, %arg1: i32, %arg2: i32) -> (i32, i32) {
    %c0_i32 = arith.constant 0 : i32
    %c0_i32_0 = arith.constant 0 : i32
    %c0_i32_1 = arith.constant 0 : i32
    return %c0_i32, %c0_i32_0 : i32, i32
  }
  func.func @transform_5(%arg0: i32, %arg1: i32, %arg2: i32) -> (i32, i32) {
    %c0_i32 = arith.constant 0 : i32
    %c0_i32_0 = arith.constant 0 : i32
    %c0_i32_1 = arith.constant 0 : i32
    return %c0_i32, %c0_i32_0 : i32, i32
  }
  func.func @transform_6(%arg0: i32, %arg1: i32, %arg2: i32) -> (i32, i32) {
    %c0_i32 = arith.constant 0 : i32
    %c0_i32_0 = arith.constant 0 : i32
    %c0_i32_1 = arith.constant 0 : i32
    return %c0_i32, %c0_i32_0 : i32, i32
  }
  func.func @transform_7(%arg0: i32, %arg1: i32, %arg2: i32) -> (i32, i32, i32) {
    %c0_i32 = arith.constant 0 : i32
    %c0_i32_0 = arith.constant 0 : i32
    %c0_i32_1 = arith.constant 0 : i32
    return %arg0, %c0_i32, %c0_i32_0 : i32, i32, i32
  }
  func.func @transform_8(%arg0: i32, %arg1: i32, %arg2: i32) -> (i32, i32, i32) {
    %c1_i32 = arith.constant 1 : i32
    %0 = arith.subi %c1_i32, %arg1 : i32
    %c0_i32 = arith.constant 0 : i32
    return %arg0, %0, %arg2 : i32, i32, i32
  }
}

</mosaic_0001>

<bundles_post_ra>
// kernel: pointnet_encoder_forward.3
= control target key start
LH: loop header
LB: loop body
LE: loop exit
PB: predicated region body
PF: predicated region fallthrough
CT: control target
= control target key end

     0   :  { %12 = vsyncpa [#allocation3], 0  ;;  %s4029_s24 = smov 0   ;;  %s4031_s25 = smov 0   ;;  %s5905_s0 = inlined_call_operand.vmem [shape: f32[2,3,128], index: 0, kind: input, shape index: {}]   ;;  %s5906_s1 = inlined_call_operand.vmem [shape: bf16[64,3], index: 1, kind: input, shape index: {}]   ;;  %s5907_s2 = inlined_call_operand.vmem [shape: f32[64,1], index: 2, kind: input, shape index: {}]   ;;  %s5908_s3 = inlined_call_operand.vmem [shape: bf16[128,64], index: 3, kind: input, shape index: {}]   ;;  %s5909_s4 = inlined_call_operand.vmem [shape: f32[128,1], index: 4, kind: input, shape index: {}]   ;;  %s5910_s5 = inlined_call_operand.hbm [shape: bf16[1024,128], index: 5, kind: input, shape index: {}]   ;;  %s5911_s6 = inlined_call_operand.vmem [shape: f32[1024,1], index: 6, kind: input, shape index: {}]   ;;  %s5912_s7 = inlined_call_operand.vmem [shape: f32[2,1024,1], index: 7, kind: output, shape index: {}]  }
   0x1   :  { %s4033_s26 = smov 0  }
   0x2 LB: > { %s3389_s27 = sadd.s32 4294967295, %s3980_s26   ;;  %s30_s28 = sadd.s32 1, %s3976_s25  ;;  %s3980_s26 = sphi %s4033_s26, %s18_s26   ;;  %s3976_s25 = sphi %s4031_s25, %s6000_s25   ;;  %s3972_s24 = sphi %s4029_s24, %s5999_s24  }
   0x3   : > { %p32_p0 = scmp.ge.s32.totalorder %s30_s28, 2  ;;  %p3391_p1 = scmp.ge.s32.totalorder %s3980_s26, 1 }
   0x4   : > { %p215_p2 = scmp.lt.s32.totalorder %s3980_s26, 3  ;;  %p3821_p4 = scmp.eq.s32.totalorder %s3389_s27, 0 }
   0x5   : > { %s6002_s28 = smov (%p32_p0, %s30_s28), 0  ;;  %s238_s8 = sshll.u32 %s5910_s5, 4  ;;  %s239_s8 = int_to_ptr.hbm [resolvable:$true] %s238_s8 }
   0x6   : > { %p216_p3 = pnand %p3391_p1, %p215_p2  ;;  %s3982_s9 = smov [#allocation2]  }
   0x7   : > { %s240_s10 = sshll.u32 %s3982_s9, 4  ;;  %s3983_s11 = smov 64   ;;  %s241_s10 = int_to_ptr.vmem [resolvable:$true] %s240_s10 }
   0x8   : > { %p3817_p5 = pneg %p216_p3  ;;  %s3984_s12 = smov 4  }
   0x9   : > { %269 = sbr.rel (%p216_p3) target bundleno = 1132 (0x46c), region = 48 }
   0xa   : > { %p3818_p6 = pnand %p3821_p4, %p3817_p5 }
   0xc   : > { %3820 = dma.hbm_to_vmem [thread:$0]  (!%p3818_p6), %s239_s8, 8192, %s241_s10, [#allocation3], %s3983_s11, %s3983_s11, %s3984_s12  }
   0xe   : > { %3967 = dma.done.wait (%p3821_p4), [#allocation3], 8192  }
   0xf   : > { %3969 = vsyncadd (%p3821_p4), [#allocation3], 4294959104  ;;  %v3985_v0 = vmov 1   ;;  %v3986_v1 = vmov 0   ;;  %v3787_v2 = vld [vmem:[%s5906_s1 + $0x10] sm:$0xff]   ;;  %v3771_v3 = vld [vmem:[%s5906_s1] sm:$0xff]  }
  0x10   : > { %3876 = vset.pattern.permute.xlu0 %v3985_v0  ;;  %3865 = vset.pattern.permute.xlu2 %v3985_v0  ;;  %v3780_v4 = vunpack.c.l.bf16 %v3787_v2  ;;  %v3781_v5 = vunpack.c.h.bf16 %v3787_v2  ;;  %v3772_v6 = vunpack.c.l.bf16 %v3771_v3  ;;  %v3773_v7 = vunpack.c.h.bf16 %v3771_v3  ;;  %v3788_v8 = vld [vmem:[%s5906_s1 + $0x18] sm:$0xff]   ;;  %v3786_v11 = vld [vmem:[%s5906_s1 + $0x8] sm:$0xff]   ;;  %v618_v19 = vld [vmem:[%s5907_s2 + $0x20] sm:$0xff]  ;;  %p304_p7 = scmp.lt.s32.totalorder %s3972_s24, 1 }
  0x11   : > { %3854 = vset.pattern.permute.xlu1 %v3986_v1  ;;  %v3784_v12 = vunpack.c.l.bf16 %v3788_v8  ;;  %v3785_v13 = vunpack.c.h.bf16 %v3788_v8  ;;  %v3776_v14 = vunpack.c.l.bf16 %v3786_v11  ;;  %v3777_v15 = vunpack.c.h.bf16 %v3786_v11  ;;  %v615_v20 = vld [vmem:[%s5907_s2 + $0x8] sm:$0xff]  ;;  %v614_v21 = vld [vmem:[%s5907_s2] sm:$0xff]  ;;  %v617_v23 = vld [vmem:[%s5907_s2 + $0x18] sm:$0xff] }
  0x12   : > { %v3877_v9 = vpack.i.bf16 %v3781_v5, %v3780_v4  ;;  %v3866_v10 = vpack.i.bf16 %v3773_v7, %v3772_v6  ;;  %v3987_v18 = vmov 2   ;;  %v699_v22 = vld [vmem:[%s5909_s4 + $0x8] sm:$0xff]  ;;  %v616_v24 = vld [vmem:[%s5907_s2 + $0x10] sm:$0xff]  ;;  %v702_v25 = vld [vmem:[%s5909_s4 + $0x20] sm:$0xff]  ;;  %s6004_s24 = smov (!%p304_p7, %s3972_s24), 1  ;;  %vm834_vm0 = vcmask 523264  }
  0x13   : > { %v3860_v16 = vpack.i.bf16 %v3785_v13, %v3784_v12  ;;  %v3871_v17 = vpack.i.bf16 %v3777_v15, %v3776_v14  ;;  %v620_v26 = vld [vmem:[%s5907_s2 + $0x30] sm:$0xff]  ;;  %v619_v27 = vld [vmem:[%s5907_s2 + $0x28] sm:$0xff]  ;;  %v705_v28 = vld [vmem:[%s5909_s4 + $0x38] sm:$0xff]  ;;  %s3396_s16 = sshll.u32 %s6004_s24, 2  ;;  %s3697_s22 = sshll.u32 %s6004_s24, 10  ;;  %vm321_vm1 = vcmask 7168  }
  0x14   : > { %3878 = vperm.xlu0 %3876, %v3877_v9   ;;  %3856 = vperm.xlu1 %3854, %v3877_v9   ;;  %v698_v29 = vld [vmem:[%s5909_s4] sm:$0xff]  ;;  %v621_v30 = vld [vmem:[%s5907_s2 + $0x38] sm:$0xff]  ;;  %v708_v31 = vld [vmem:[%s5909_s4 + $0x50] sm:$0xff]  ;;  %s310_s19 = scalar_lea.vmem %s5905_s0, %s3396_s16  ;;  %s4936_s29 = scalar_lea.vmem %s5912_s7, %s3697_s22 }
  0x15   : > { %3867 = vperm.xlu2 %3865, %v3866_v10   ;;  %v701_v32 = vld [vmem:[%s5909_s4 + $0x18] sm:$0xff]  ;;  %v700_v33 = vld [vmem:[%s5909_s4 + $0x10] sm:$0xff]  ;;  %v711_v34 = vld [vmem:[%s5909_s4 + $0x68] sm:$0xff] }
  0x16   : > { %v704_v35 = vld [vmem:[%s5909_s4 + $0x30] sm:$0xff]  ;;  %v703_v36 = vld [vmem:[%s5909_s4 + $0x28] sm:$0xff]  ;;  %v1060_v37 = vld [vmem:[%s5911_s6] sm:$0xff] }
  0x17   : > { %v707_v38 = vld [vmem:[%s5909_s4 + $0x48] sm:$0xff]  ;;  %v706_v39 = vld [vmem:[%s5909_s4 + $0x40] sm:$0xff]  ;;  %v1063_v40 = vld [vmem:[%s5911_s6 + $0x18] sm:$0xff] }
  0x18   : > { %v710_v41 = vld [vmem:[%s5909_s4 + $0x60] sm:$0xff]  ;;  %v709_v42 = vld [vmem:[%s5909_s4 + $0x58] sm:$0xff]  ;;  %v1066_v43 = vld [vmem:[%s5911_s6 + $0x30] sm:$0xff] }
  0x19   : > { %v713_v44 = vld [vmem:[%s5909_s4 + $0x78] sm:$0xff]  ;;  %v712_v45 = vld [vmem:[%s5909_s4 + $0x70] sm:$0xff]  ;;  %v1069_v46 = vld [vmem:[%s5911_s6 + $0x48] sm:$0xff] }
  0x1a   : > { %v1062_v47 = vld [vmem:[%s5911_s6 + $0x10] sm:$0xff]  ;;  %v1061_v48 = vld [vmem:[%s5911_s6 + $0x8] sm:$0xff]  ;;  %v1072_v50 = vld [vmem:[%s5911_s6 + $0x60] sm:$0xff] }
  0x1b   : > { %v1065_v51 = vld [vmem:[%s5911_s6 + $0x28] sm:$0xff]  ;;  %v1064_v52 = vld [vmem:[%s5911_s6 + $0x20] sm:$0xff]  ;;  %v1075_v55 = vld [vmem:[%s5911_s6 + $0x78] sm:$0xff] }
  0x1c   : > { %3905 = vset.pattern.permute.xlu0 %v3987_v18  ;;  %3861 = vperm.xlu1 %3854, %v3860_v16   ;;  %v1068_v56 = vld [vmem:[%s5911_s6 + $0x40] sm:$0xff]  ;;  %v1067_v57 = vld [vmem:[%s5911_s6 + $0x38] sm:$0xff]  ;;  %v1078_v59 = vld [vmem:[%s5911_s6 + $0x90] sm:$0xff] }
  0x1d   : > { %3872 = vperm.xlu2 %3865, %v3871_v17   ;;  %3907 = vperm.xlu0 %3905, %v3860_v16   ;;  %v1071_v61 = vld [vmem:[%s5911_s6 + $0x58] sm:$0xff]  ;;  %v1070_v62 = vld [vmem:[%s5911_s6 + $0x50] sm:$0xff]  ;;  %v1073_v3 = vld [vmem:[%s5911_s6 + $0x68] sm:$0xff] }
  0x1e   : > { %v1074_v2 = vld [vmem:[%s5911_s6 + $0x70] sm:$0xff]  ;;  %v1084_v7 = vld [vmem:[%s5911_s6 + $0xc0] sm:$0xff]  ;;  %v1077_v8 = vld [vmem:[%s5911_s6 + $0x88] sm:$0xff] }
  0x1f   : > { %v1087_v13 = vld [vmem:[%s5911_s6 + $0xd8] sm:$0xff]  ;;  %v1080_v14 = vld [vmem:[%s5911_s6 + $0xa0] sm:$0xff] }
  0x20   : > { %v1079_v15 = vld [vmem:[%s5911_s6 + $0x98] sm:$0xff] }
  0x24   : > { %3882 = vset.pattern.permute.xlu1 %v3985_v0 }
  0x25   : > { %3888 = vset.pattern.permute.xlu2 %v3987_v18  ;;  %3911 = vset.pattern.permute.xlu0 %v3986_v1 }
  0x26   : > { %3884 = vperm.xlu1 %3882, %v3860_v16   ;;  %3890 = vperm.xlu2 %3888, %v3866_v10   ;;  %v450_v16 = vld [vmem:[%s310_s19] sm:$0x7] }
  0x27   : > { %3913 = vperm.xlu0 %3911, %v3866_v10  }
  0x2e   : > { %3894 = vset.pattern.permute.xlu1 %v3987_v18  ;;  %3901 = vperm.xlu2 %3888, %v3877_v9   ;;  %v1076_v9 = vld [vmem:[%s5911_s6 + $0x80] sm:$0xff]  ;;  %v4241_v18 = vperm.slane %v450_v16, 1 }
  0x2f   : > { %3896 = vperm.xlu1 %3894, %v3871_v17   ;;  %3918 = vperm.xlu0 %3911, %v3871_v17  }
  0x36   : > { %3923 = vset.pattern.permute.xlu2 %v3986_v1 }
  0x37   : > { %3922 = vset.pattern.permute.xlu1 %v3986_v1  ;;  %644 = vperm.xlu0 %3911, %v618_v19   ;;  %v1081_v1 = vld [vmem:[%s5911_s6 + $0xa8] sm:$0xff] }
  0x38   : > { %629 = vperm.xlu2 %3923, %v615_v20   ;;  %624 = vperm.xlu1 %3922, %v614_v21  }
  0x3f   : > { %721 = vperm.xlu0 %3911, %v699_v22  }
  0x40   : > { %639 = vperm.xlu2 %3923, %v617_v23   ;;  %634 = vperm.xlu1 %3922, %v616_v24   ;;  %v507_v23 = vperm.slane %v450_v16, 0 }
  0x47   : > { %736 = vperm.xlu0 %3911, %v702_v25  }
  0x48   : > { %654 = vperm.xlu2 %3923, %v620_v26   ;;  %649 = vperm.xlu1 %3922, %v619_v27   ;;  %v1090_v27 = vld [vmem:[%s5911_s6 + $0xf0] sm:$0xff] }
  0x4f   : > { %751 = vperm.xlu0 %3911, %v705_v28  }
  0x50   : > { %716 = vperm.xlu2 %3923, %v698_v29   ;;  %659 = vperm.xlu1 %3922, %v621_v30   ;;  %v1083_v29 = vld [vmem:[%s5911_s6 + $0xb8] sm:$0xff]  ;;  %v1082_v30 = vld [vmem:[%s5911_s6 + $0xb0] sm:$0xff] }
  0x57   : > { %766 = vperm.xlu0 %3911, %v708_v31   ;;  %v4261_v31 = vperm.slane %v450_v16, 2 }
  0x58   : > { %731 = vperm.xlu2 %3923, %v701_v32   ;;  %726 = vperm.xlu1 %3922, %v700_v33  }
  0x5f   : > { %781 = vperm.xlu0 %3911, %v711_v34  }
  0x60   : > { %746 = vperm.xlu2 %3923, %v704_v35   ;;  %741 = vperm.xlu1 %3922, %v703_v36  }
  0x67   : > { %1190 = vperm.xlu0 %3911, %v1060_v37  }
  0x68   : > { %761 = vperm.xlu2 %3923, %v707_v38   ;;  %756 = vperm.xlu1 %3922, %v706_v39  }
  0x6f   : > { %1205 = vperm.xlu0 %3911, %v1063_v40   ;;  %v4155_v49 = vpop.permute.xlu2 %3867 }
  0x70   : > { %776 = vperm.xlu2 %3923, %v710_v41   ;;  %771 = vperm.xlu1 %3922, %v709_v42  }
  0x77   : > { %1220 = vperm.xlu0 %3911, %v1066_v43   ;;  %v4168_v54 = vpop.permute.xlu2 %3872 }
  0x78   : > { %791 = vperm.xlu2 %3923, %v713_v44   ;;  %786 = vperm.xlu1 %3922, %v712_v45  }
  0x7f   : > { %1235 = vperm.xlu0 %3911, %v1069_v46   ;;  %v3870_v46 = vunpack.i.h.bf16 %v4155_v49 }
  0x80   : > { %1200 = vperm.xlu2 %3923, %v1062_v47   ;;  %1195 = vperm.xlu1 %3922, %v1061_v48   ;;  %v4184_v60 = vpop.permute.xlu2 %3890 }
  0x81   : > { %v3893_v16 = vunpack.i.h.bf16 %v4184_v60 }
  0x86   : > { %v4166_v53 = vpop.permute.xlu1 %3856  ;;  %v4192_v0 = vpop.permute.xlu0 %3878 }
  0x87   : > { %1250 = vperm.xlu0 %3911, %v1072_v50   ;;  %v3881_v21 = vunpack.i.h.bf16 %v4192_v0  ;;  %v3859_v22 = vunpack.i.h.bf16 %v4166_v53  ;;  %v3880_v32 = vunpack.i.l.bf16 %v4192_v0  ;;  %v3858_v33 = vunpack.i.l.bf16 %v4166_v53 }
  0x88   : > { %1215 = vperm.xlu2 %3923, %v1065_v51   ;;  %1210 = vperm.xlu1 %3922, %v1064_v52   ;;  %v4203_v4 = vpop.permute.xlu2 %3901  ;;  %v3875_v52 = vunpack.i.h.bf16 %v4168_v54  ;;  %v3874_v53 = vunpack.i.l.bf16 %v4168_v54  ;;  %v1086_v54 = vld [vmem:[%s5911_s6 + $0xd0] sm:$0xff] }
  0x89   : > { %v554_v36 = vmul.f32 %v3881_v21, %v4241_v18  ;;  %v513_v37 = vmul.f32 %v3859_v22, %v507_v23  ;;  %v3904_v39 = vunpack.i.h.bf16 %v4203_v4  ;;  %v553_v47 = vmul.f32 %v3880_v32, %v4241_v18 }
  0x8a   : > { %v512_v48 = vmul.f32 %v3858_v33, %v507_v23  ;;  %v3903_v50 = vunpack.i.l.bf16 %v4203_v4 }
  0x8e   : > { %v4179_v58 = vpop.permute.xlu1 %3861 }
  0x8f   : > { %1265 = vperm.xlu0 %3911, %v1075_v55   ;;  %v4208_v6 = vpop.permute.xlu0 %3907  ;;  %v3863_v19 = vunpack.i.l.bf16 %v4179_v58  ;;  %v3864_v38 = vunpack.i.h.bf16 %v4179_v58 }
  0x90   : > { %1230 = vperm.xlu2 %3923, %v1068_v56   ;;  %1225 = vperm.xlu1 %3922, %v1067_v57   ;;  %v3909_v25 = vunpack.i.l.bf16 %v4208_v6  ;;  %v3910_v42 = vunpack.i.h.bf16 %v4208_v6  ;;  %v562_v56 = vadd.f32 %v554_v36, %v513_v37  ;;  %v603_v57 = vmul.f32 %v3904_v39, %v4261_v31 }
  0x91   : > { %v514_v34 = vmul.f32 %v3863_v19, %v507_v23  ;;  %v515_v55 = vmul.f32 %v3864_v38, %v507_v23  ;;  %v3869_v6 = vunpack.i.l.bf16 %v4155_v49  ;;  %v1096_v38 = vld [vmem:[%s5911_s6 + $0x120] sm:$0xff] }
  0x92   : > { %v4223_v10 = vpop.permute.xlu2 %629  ;;  %v604_v40 = vmul.f32 %v3909_v25, %v4261_v31  ;;  %v611_v25 = vadd.f32 %v603_v57, %v562_v56  ;;  %v1099_v56 = vld [vmem:[%s5911_s6 + $0x138] sm:$0xff] }
  0x93   : > { %v1091_v57 = vld [vmem:[%s5911_s6 + $0xf8] sm:$0xff] }
  0x97   : > { %1280 = vperm.xlu0 %3911, %v1078_v59  }
  0x98   : > { %1245 = vperm.xlu2 %3923, %v1071_v61   ;;  %v3885_v63 = vpop.permute.xlu1 %3884  ;;  %1240 = vperm.xlu1 %3922, %v1070_v62   ;;  %v1093_v62 = vld [vmem:[%s5911_s6 + $0x108] sm:$0xff] }
  0x99   : > { %v4230_v12 = vpop.permute.xlu0 %3913  ;;  %v3886_v17 = vunpack.i.l.bf16 %v3885_v63  ;;  %v3887_v28 = vunpack.i.h.bf16 %v3885_v63  ;;  %v605_v63 = vmul.f32 %v3910_v42, %v4261_v31  ;;  %v1088_v42 = vld [vmem:[%s5911_s6 + $0xe0] sm:$0xff] }
  0x9a   : > { %v4248_v24 = vpop.permute.xlu2 %639  ;;  %v3916_v58 = vunpack.i.h.bf16 %v4230_v12  ;;  %v3915_v59 = vunpack.i.l.bf16 %v4230_v12  ;;  %v551_v12 = vmul.f32 %v3874_v53, %v4241_v18 }
  0x9b   : > { %v555_v26 = vmul.f32 %v3886_v17, %v4241_v18  ;;  %v556_v43 = vmul.f32 %v3887_v28, %v4241_v18  ;;  %v550_v28 = vmul.f32 %v3870_v46, %v4241_v18 }
  0x9c   : > { %v508_v17 = vmul.f32 %v3915_v59, %v507_v23  ;;  %v509_v19 = vmul.f32 %v3916_v58, %v507_v23 }
  0x9d   : > { %v563_v41 = vadd.f32 %v555_v26, %v514_v34  ;;  %v564_v4 = vadd.f32 %v556_v43, %v515_v55 }
  0x9e   : > { %v558_v36 = vadd.f32 %v550_v28, %v509_v19  ;;  %v1117_v19 = vld [vmem:[%s5911_s6 + $0x1c8] sm:$0xff] }
  0x9f   : > { %1295 = vperm.xlu0 %3911, %v1081_v1   ;;  %v612_v61 = vadd.f32 %v604_v40, %v563_v41  ;;  %v613_v26 = vadd.f32 %v605_v63, %v564_v4  ;;  %v1089_v41 = vld [vmem:[%s5911_s6 + $0xe8] sm:$0xff]  ;;  %v1102_v63 = vld [vmem:[%s5911_s6 + $0x150] sm:$0xff]  ;;  %v1108_v4 = vld [vmem:[%s5911_s6 + $0x180] sm:$0xff] }
  0xa0   : > { %1260 = vperm.xlu2 %3923, %v1074_v2   ;;  %1255 = vperm.xlu1 %3922, %v1073_v3   ;;  %v1085_v3 = vld [vmem:[%s5911_s6 + $0xc8] sm:$0xff] }
  0xa1   : > { %v4206_v5 = vpop.permute.xlu1 %3896  ;;  %v3919_v35 = vpop.permute.xlu0 %3918 }
  0xa2   : > { %v3921_v44 = vunpack.i.h.bf16 %v3919_v35  ;;  %v3920_v45 = vunpack.i.l.bf16 %v3919_v35  ;;  %v655_v2 = vpop.permute.xlu2 %654  ;;  %v599_v35 = vmul.f32 %v3893_v16, %v4261_v31  ;;  %v1106_v16 = vld [vmem:[%s5911_s6 + $0x170] sm:$0xff] }
  0xa3   : > { %v668_v21 = vadd.f32 %v655_v2, %v612_v61  ;;  %v1105_v2 = vld [vmem:[%s5911_s6 + $0x168] sm:$0xff] }
  0xa4   : > { %v510_v0 = vmul.f32 %v3920_v45, %v507_v23  ;;  %v511_v1 = vmul.f32 %v3921_v44, %v507_v23 }
  0xa6   : > { %v559_v22 = vadd.f32 %v551_v12, %v510_v0  ;;  %v1095_v0 = vld [vmem:[%s5911_s6 + $0x118] sm:$0xff]  ;;  %v1104_v12 = vld [vmem:[%s5911_s6 + $0x160] sm:$0xff] }
  0xa7   : > { %1310 = vperm.xlu0 %3911, %v1084_v7   ;;  %v3892_v7 = vunpack.i.l.bf16 %v4184_v60 }
  0xa8   : > { %1275 = vperm.xlu2 %3923, %v1077_v8   ;;  %1270 = vperm.xlu1 %3922, %v1076_v9   ;;  %v602_v8 = vmul.f32 %v3903_v50, %v4261_v31  ;;  %v561_v9 = vadd.f32 %v553_v47, %v512_v48 }
  0xaa   : > { %v4225_v11 = vpop.permute.xlu1 %624 }
  0xaf   : > { %1325 = vperm.xlu0 %3911, %v1087_v13   ;;  %v552_v13 = vmul.f32 %v3875_v52, %v4241_v18 }
  0xb0   : > { %1290 = vperm.xlu2 %3923, %v1080_v14   ;;  %1285 = vperm.xlu1 %3922, %v1079_v15   ;;  %v3899_v14 = vunpack.i.h.bf16 %v4206_v5  ;;  %v3898_v15 = vunpack.i.l.bf16 %v4206_v5  ;;  %v610_v5 = vadd.f32 %v602_v8, %v561_v9  ;;  %v3699_v8 = vld [vmem:[%s5908_s3 + $0x8] sm:$0xff]  ;;  %v1111_v9 = vld [vmem:[%s5911_s6 + $0x198] sm:$0xff] }
  0xb1   : > { %v560_v49 = vadd.f32 %v552_v13, %v511_v1  ;;  %v3698_v1 = vld [vmem:[%s5908_s3] sm:$0xff]  ;;  %v1103_v13 = vld [vmem:[%s5911_s6 + $0x158] sm:$0xff] }
  0xb2   : > { %v4244_v20 = vpop.permute.xlu1 %634  ;;  %v600_v60 = vmul.f32 %v3898_v15, %v4261_v31  ;;  %v601_v23 = vmul.f32 %v3899_v14, %v4261_v31  ;;  %v1114_v14 = vld [vmem:[%s5911_s6 + $0x1b0] sm:$0xff]  ;;  %v1107_v15 = vld [vmem:[%s5911_s6 + $0x178] sm:$0xff] }
  0xb4   : > { %v608_v40 = vadd.f32 %v600_v60, %v559_v22  ;;  %v609_v44 = vadd.f32 %v601_v23, %v560_v49  ;;  %v1109_v49 = vld [vmem:[%s5911_s6 + $0x188] sm:$0xff]  ;;  %v1120_v22 = vld [vmem:[%s5911_s6 + $0x1e0] sm:$0xff]  ;;  %v1119_v23 = vld [vmem:[%s5911_s6 + $0x1d8] sm:$0xff] }
  0xb6   : > { %v665_v50 = vadd.f32 %v4248_v24, %v609_v44 }
  0xb7   : > { %1340 = vperm.xlu0 %3911, %v1090_v27   ;;  %v549_v27 = vmul.f32 %v3869_v6, %v4241_v18  ;;  %v676_v18 = vmax.f32 %v668_v21, 0.0  ;;  %v1101_v6 = vld [vmem:[%s5911_s6 + $0x148] sm:$0xff]  ;;  %v1110_v21 = vld [vmem:[%s5911_s6 + $0x190] sm:$0xff] }
  0xb8   : > { %1305 = vperm.xlu2 %3923, %v1083_v29   ;;  %1300 = vperm.xlu1 %3922, %v1082_v30   ;;  %v598_v29 = vmul.f32 %v3892_v7, %v4261_v31  ;;  %v645_v30 = vpop.permute.xlu0 %644  ;;  %v664_v31 = vadd.f32 %v4244_v20, %v608_v40  ;;  %v1092_v20 = vld [vmem:[%s5911_s6 + $0x100] sm:$0xff]  ;;  %v673_v58 = vmax.f32 %v665_v50, 0.0 }
  0xb9   : > { %v557_v37 = vadd.f32 %v549_v27, %v508_v17  ;;  %v666_v39 = vadd.f32 %v645_v30, %v610_v5  ;;  %v1100_v7 = vld [vmem:[%s5911_s6 + $0x140] sm:$0xff]  ;;  %v3700_v17 = vld [vmem:[%s5908_s3 + $0x10] sm:$0xff]  ;;  %v3701_v27 = vld [vmem:[%s5908_s3 + $0x18] sm:$0xff] }
  0xba   : > { %v650_v51 = vpop.permute.xlu1 %649  ;;  %v672_v53 = vmax.f32 %v664_v31, 0.0  ;;  %v1116_v30 = vld [vmem:[%s5911_s6 + $0x1c0] sm:$0xff]  ;;  %v1115_v5 = vld [vmem:[%s5911_s6 + $0x1b8] sm:$0xff] }
  0xbb   : > { %v667_v33 = vadd.f32 %v650_v51, %v611_v25  ;;  %v674_v47 = vmax.f32 %v666_v39, 0.0  ;;  %v606_v48 = vadd.f32 %v598_v29, %v557_v37  ;;  %v607_v51 = vadd.f32 %v599_v35, %v558_v36  ;;  %v1113_v25 = vld [vmem:[%s5911_s6 + $0x1a8] sm:$0xff]  ;;  %v1123_v29 = vld [vmem:[%s5911_s6 + $0x1f8] sm:$0xff]  ;;  %v4429_v35 = vpop.permute.xlu2 %716  ;;  %v1122_v37 = vld [vmem:[%s5911_s6 + $0x1f0] sm:$0xff] }
  0xbc   : > { %v1129_v36 = vld [vmem:[%s5911_s6 + $0x228] sm:$0xff]  ;;  %v1132_v40 = vld [vmem:[%s5911_s6 + $0x240] sm:$0xff] }
  0xbd   : > { %v675_v45 = vmax.f32 %v667_v33, 0.0  ;;  %v662_v52 = vadd.f32 %v4225_v11, %v606_v48  ;;  %v663_v24 = vadd.f32 %v4223_v10, %v607_v51  ;;  %v695_v11 = vpack.c.bf16 %v673_v58, %v672_v53  ;;  %v1094_v10 = vld [vmem:[%s5911_s6 + $0x110] sm:$0xff]  ;;  %v1127_v48 = vld [vmem:[%s5911_s6 + $0x218] sm:$0xff]  ;;  %v1141_v58 = vld [vmem:[%s5911_s6 + $0x288] sm:$0xff] }
  0xbe   : > { %v1118_v33 = vld [vmem:[%s5911_s6 + $0x1d0] sm:$0xff] }
  0xbf   : > { %1355 = vperm.xlu0 %3911, %v1093_v62   ;;  %v696_v55 = vpack.c.bf16 %v675_v45, %v674_v47  ;;  %v670_v59 = vmax.f32 %v662_v52, 0.0  ;;  %v671_v61 = vmax.f32 %v663_v24, 0.0  ;;  %v1128_v47 = vld [vmem:[%s5911_s6 + $0x220] sm:$0xff]  ;;  %v1138_v52 = vld [vmem:[%s5911_s6 + $0x270] sm:$0xff] }
  0xc0   : > { %1320 = vperm.xlu2 %3923, %v1086_v54   ;;  %1315 = vperm.xlu1 %3922, %v1085_v3   ;;  %v1098_v54 = vld [vmem:[%s5911_s6 + $0x130] sm:$0xff]  ;;  %v1097_v3 = vld [vmem:[%s5911_s6 + $0x128] sm:$0xff]  ;;  %v4404_v28 = vpop.permute.xlu0 %721 }
  0xc1   : > { %v694_v62 = vpack.c.bf16 %v671_v61, %v670_v59  ;;  %v1134_v59 = vld [vmem:[%s5911_s6 + $0x250] sm:$0xff] }
  0xc2   : > { %v660_v32 = vpop.permute.xlu1 %659 }
  0xc3   : > { %v669_v34 = vadd.f32 %v660_v32, %v613_v26  ;;  %v1112_v26 = vld [vmem:[%s5911_s6 + $0x1a0] sm:$0xff]  ;;  %v1126_v32 = vld [vmem:[%s5911_s6 + $0x210] sm:$0xff]  ;;  %v4443_v39 = vpop.permute.xlu2 %731 }
  0xc5   : > { %v677_v43 = vmax.f32 %v669_v34, 0.0  ;;  %v3702_v34 = vld [vmem:[%s5908_s3 + $0x20] sm:$0xff] }
  0xc7   : > { %1370 = vperm.xlu0 %3911, %v1096_v38   ;;  %v697_v46 = vpack.c.bf16 %v677_v43, %v676_v18  ;;  %v1121_v38 = vld [vmem:[%s5911_s6 + $0x1e8] sm:$0xff] }
  0xc8   : > { %1335 = vperm.xlu2 %3923, %v1089_v41   ;;  %1330 = vperm.xlu1 %3922, %v1088_v42   ;;  %v4418_v60 = vpop.permute.xlu0 %736  ;;  %v1125_v41 = vld [vmem:[%s5911_s6 + $0x208] sm:$0xff]  ;;  %v1124_v42 = vld [vmem:[%s5911_s6 + $0x200] sm:$0xff] }
  0xc9   : > { %863 = vmatpush.bf16.msra.mxu0 %v697_v46  ;;  %v3703_v43 = vld [vmem:[%s5908_s3 + $0x28] sm:$0xff]  ;;  %v1135_v46 = vld [vmem:[%s5911_s6 + $0x258] sm:$0xff] }
  0xca   : > { %v4457_v44 = vpop.permute.xlu1 %726 }
  0xcb   : > { %v4462_v45 = vpop.permute.xlu2 %746 }
  0xcd   : > { %864 = vmatpush.bf16.msra.mxu0 %v696_v55  ;;  %v1131_v55 = vld [vmem:[%s5911_s6 + $0x238] sm:$0xff] }
  0xcf   : > { %1385 = vperm.xlu0 %3911, %v1099_v56   ;;  %v1130_v56 = vld [vmem:[%s5911_s6 + $0x230] sm:$0xff] }
  0xd0   : > { %1350 = vperm.xlu2 %3923, %v1092_v20   ;;  %1345 = vperm.xlu1 %3922, %v1091_v57   ;;  %v4441_v18 = vpop.permute.xlu0 %751  ;;  %v3704_v20 = vld [vmem:[%s5908_s3 + $0x30] sm:$0xff] }
  0xd1   : > { %865 = vmatpush.bf16.msra.mxu0 %v695_v11  ;;  %v1133_v11 = vld [vmem:[%s5911_s6 + $0x248] sm:$0xff] }
  0xd2   : > { %v4473_v50 = vpop.permute.xlu1 %741 }
  0xd3   : > { %v4480_v53 = vpop.permute.xlu2 %761 }
  0xd5   : > { %866 = vmatpush.bf16.msra.mxu0 %v694_v62  ;;  %v1144_v62 = vld [vmem:[%s5911_s6 + $0x2a0] sm:$0xff] }
  0xd7   : > { %1400 = vperm.xlu0 %3911, %v1102_v63   ;;  %v1137_v63 = vld [vmem:[%s5911_s6 + $0x268] sm:$0xff] }
  0xd8   : > { %1365 = vperm.xlu2 %3923, %v1095_v0   ;;  %1360 = vperm.xlu1 %3922, %v1094_v10   ;;  %v4459_v31 = vpop.permute.xlu0 %766  ;;  %v1136_v0 = vld [vmem:[%s5911_s6 + $0x260] sm:$0xff]  ;;  %v3705_v10 = vld [vmem:[%s5908_s3 + $0x38] sm:$0xff] }
  0xd9   : > { %3431 = vmatmul.msk.bf16.vlgmr.msra.gmra.mxu0 %vm834_vm0, %v3698_v1 }
  0xda   : > { %v4492_v57 = vpop.permute.xlu1 %756 }
  0xdb   : > { %v4505_v61 = vpop.permute.xlu2 %776 }
  0xdf   : > { %1415 = vperm.xlu0 %3911, %v1105_v2  }
  0xe0   : > { %1380 = vperm.xlu2 %3923, %v1098_v54   ;;  %1375 = vperm.xlu1 %3922, %v1097_v3   ;;  %v4475_v51 = vpop.permute.xlu0 %781  ;;  %v1147_v3 = vld [vmem:[%s5911_s6 + $0x2b8] sm:$0xff] }
  0xe2   : > { %v4519_v1 = vpop.permute.xlu1 %771 }
  0xe3   : > { %v4523_v54 = vpop.permute.xlu2 %791 }
  0xe7   : > { %1430 = vperm.xlu0 %3911, %v1108_v4   ;;  %v1140_v4 = vld [vmem:[%s5911_s6 + $0x280] sm:$0xff] }
  0xe8   : > { %1395 = vperm.xlu2 %3923, %v1101_v6   ;;  %1390 = vperm.xlu1 %3922, %v1100_v7   ;;  %v4497_v24 = vpop.permute.xlu0 %1190  ;;  %v1139_v6 = vld [vmem:[%s5911_s6 + $0x278] sm:$0xff] }
  0xe9   : > { %3432 = vmatmul.msk.bf16.gmra.mxu0 %vm834_vm0, %v3699_v8 }
  0xea   : > { %v4535_v7 = vpop.permute.xlu1 %786 }
  0xef   : > { %1445 = vperm.xlu0 %3911, %v1111_v9   ;;  %v4539_v9 = vpop.permute.xlu2 %1200 }
  0xf0   : > { %1410 = vperm.xlu2 %3923, %v1104_v12   ;;  %1405 = vperm.xlu1 %3922, %v1103_v13   ;;  %v4521_v2 = vpop.permute.xlu0 %1205  ;;  %v1150_v12 = vld [vmem:[%s5911_s6 + $0x2d0] sm:$0xff]  ;;  %v1143_v13 = vld [vmem:[%s5911_s6 + $0x298] sm:$0xff] }
  0xf7   : > { %1460 = vperm.xlu0 %3911, %v1114_v14   ;;  %v1142_v14 = vld [vmem:[%s5911_s6 + $0x290] sm:$0xff] }
  0xf8   : > { %1425 = vperm.xlu2 %3923, %v1107_v15   ;;  %1420 = vperm.xlu1 %3922, %v1106_v16   ;;  %v4537_v8 = vpop.permute.xlu0 %1220  ;;  %v4552_v16 = vpop.permute.xlu1 %1195 }
  0xf9   : > { %3433 = vmatmul.msk.bf16.gmra.mxu0 %vm834_vm0, %v3700_v17 }
  0xff   : > { %1475 = vperm.xlu0 %3911, %v1117_v19   ;;  %v1153_v19 = vld [vmem:[%s5911_s6 + $0x2e8] sm:$0xff] }
 0x100   : > { %1440 = vperm.xlu2 %3923, %v1110_v21   ;;  %1435 = vperm.xlu1 %3922, %v1109_v49   ;;  %v4554_v17 = vpop.permute.xlu0 %1235  ;;  %v4559_v21 = vpop.permute.xlu2 %1215  ;;  %v1146_v49 = vld [vmem:[%s5911_s6 + $0x2b0] sm:$0xff] }
 0x107   : > { %1490 = vperm.xlu0 %3911, %v1120_v22   ;;  %v1145_v22 = vld [vmem:[%s5911_s6 + $0x2a8] sm:$0xff] }
 0x108   : > { %1455 = vperm.xlu2 %3923, %v1113_v25   ;;  %1450 = vperm.xlu1 %3922, %v1112_v26   ;;  %v4569_v26 = vpop.permute.xlu1 %1210 }
 0x109   : > { %3434 = vmatmul.msk.bf16.gmra.mxu0 %vm834_vm0, %v3701_v27  ;;  %v1156_v27 = vld [vmem:[%s5911_s6 + $0x300] sm:$0xff] }
 0x10f   : > { %1505 = vperm.xlu0 %3911, %v1123_v29   ;;  %v4574_v29 = vpop.permute.xlu0 %1250 }
 0x110   : > { %1470 = vperm.xlu2 %3923, %v1116_v30   ;;  %1465 = vperm.xlu1 %3922, %v1115_v5   ;;  %5913 = vst [vmem:[#allocation5_spill] sm:$0xff] %v4574_v29  ;;  %v1149_v30 = vld [vmem:[%s5911_s6 + $0x2c8] sm:$0xff]  ;;  %v1148_v5 = vld [vmem:[%s5911_s6 + $0x2c0] sm:$0xff] }
 0x117   : > { %1520 = vperm.xlu0 %3911, %v1126_v32  }
 0x118   : > { %1485 = vperm.xlu2 %3923, %v1119_v23   ;;  %1480 = vperm.xlu1 %3922, %v1118_v33   ;;  %v4584_v23 = vpop.permute.xlu2 %1230  ;;  %v1159_v33 = vld [vmem:[%s5911_s6 + $0x318] sm:$0xff] }
 0x119   : > { %3435 = vmatmul.msk.bf16.gmra.mxu0 %vm834_vm0, %v3702_v34  ;;  %v1152_v34 = vld [vmem:[%s5911_s6 + $0x2e0] sm:$0xff] }
 0x11f   : > { %1535 = vperm.xlu0 %3911, %v1129_v36   ;;  %v1151_v36 = vld [vmem:[%s5911_s6 + $0x2d8] sm:$0xff] }
 0x120   : > { %1500 = vperm.xlu2 %3923, %v1122_v37   ;;  %1495 = vperm.xlu1 %3922, %v1121_v38   ;;  %v4595_v37 = vpop.permute.xlu1 %1225 }
 0x127   : > { %1550 = vperm.xlu0 %3911, %v1132_v40   ;;  %v4599_v40 = vpop.permute.xlu0 %1265 }
 0x128   : > { %1515 = vperm.xlu2 %3923, %v1125_v41   ;;  %1510 = vperm.xlu1 %3922, %v1124_v42   ;;  %5914 = vst [vmem:[#allocation6_spill] sm:$0xff] %v4599_v40  ;;  %v4601_v41 = vpop.permute.xlu2 %1245  ;;  %v1162_v42 = vld [vmem:[%s5911_s6 + $0x330] sm:$0xff] }
 0x129   : > { %3436 = vmatmul.msk.bf16.gmra.mxu0 %vm834_vm0, %v3703_v43  ;;  %5915 = vst [vmem:[#allocation7_spill] sm:$0xff] %v4601_v41  ;;  %v1155_v43 = vld [vmem:[%s5911_s6 + $0x2f8] sm:$0xff] }
 0x12f   : > { %1565 = vperm.xlu0 %3911, %v1135_v46   ;;  %v1154_v46 = vld [vmem:[%s5911_s6 + $0x2f0] sm:$0xff] }
 0x130   : > { %1530 = vperm.xlu2 %3923, %v1128_v47   ;;  %1525 = vperm.xlu1 %3922, %v1127_v48   ;;  %v4614_v48 = vpop.permute.xlu1 %1240 }
 0x131   : > { %5916 = vst [vmem:[#allocation8_spill] sm:$0xff] %v4614_v48 }
 0x137   : > { %1580 = vperm.xlu0 %3911, %v1138_v52   ;;  %v4616_v52 = vpop.permute.xlu0 %1280 }
 0x138   : > { %1545 = vperm.xlu2 %3923, %v1131_v55   ;;  %1540 = vperm.xlu1 %3922, %v1130_v56   ;;  %5917 = vst [vmem:[#allocation9_spill] sm:$0xff] %v4616_v52  ;;  %v4618_v55 = vpop.permute.xlu2 %1260  ;;  %v1165_v56 = vld [vmem:[%s5911_s6 + $0x348] sm:$0xff]  ;;  %v1179_v52 = vld [vmem:[%s5911_s6 + $0x3b8] sm:$0xff] }
 0x139   : > { %3437 = vmatmul.msk.bf16.gmra.mxu0 %vm834_vm0, %v3704_v20  ;;  %5918 = vst [vmem:[#allocation10_spill] sm:$0xff] %v4618_v55  ;;  %v1158_v20 = vld [vmem:[%s5911_s6 + $0x310] sm:$0xff] }
 0x13f   : > { %1595 = vperm.xlu0 %3911, %v1141_v58   ;;  %v1157_v58 = vld [vmem:[%s5911_s6 + $0x308] sm:$0xff] }
 0x140   : > { %1560 = vperm.xlu2 %3923, %v1134_v59   ;;  %1555 = vperm.xlu1 %3922, %v1133_v11   ;;  %v4631_v11 = vpop.permute.xlu1 %1255 }
 0x141   : > { %5919 = vst [vmem:[#allocation11_spill] sm:$0xff] %v4631_v11 }
 0x147   : > { %1610 = vperm.xlu0 %3911, %v1144_v62   ;;  %v4633_v62 = vpop.permute.xlu0 %1295 }
 0x148   : > { %1575 = vperm.xlu2 %3923, %v1137_v63   ;;  %1570 = vperm.xlu1 %3922, %v1136_v0   ;;  %v1168_v63 = vld [vmem:[%s5911_s6 + $0x360] sm:$0xff]  ;;  %v4638_v0 = vpop.permute.xlu2 %1275 }
 0x149   : > { %3438 = vmatmul.msk.bf16.gmra.mxu0 %vm834_vm0, %v3705_v10  ;;  %5920 = vst [vmem:[#allocation12_spill] sm:$0xff] %v4638_v0  ;;  %v1161_v10 = vld [vmem:[%s5911_s6 + $0x328] sm:$0xff]  ;;  %v1178_v0 = vld [vmem:[%s5911_s6 + $0x3b0] sm:$0xff] }
 0x14f   : > { %1625 = vperm.xlu0 %3911, %v1147_v3   ;;  %v1160_v3 = vld [vmem:[%s5911_s6 + $0x320] sm:$0xff] }
 0x150   : > { %1590 = vperm.xlu2 %3923, %v1140_v4   ;;  %1585 = vperm.xlu1 %3922, %v1139_v6   ;;  %v4648_v6 = vpop.permute.xlu1 %1270 }
 0x151   : > { %5921 = vst [vmem:[#allocation13_spill] sm:$0xff] %v4648_v6 }
 0x156   : > { %v4550_v15 = vpop.f32.mrf.mxu0 }
 0x157   : > { %1640 = vperm.xlu0 %3911, %v1150_v12   ;;  %v1171_v12 = vld [vmem:[%s5911_s6 + $0x378] sm:$0xff] }
 0x158   : > { %1605 = vperm.xlu2 %3923, %v1143_v13   ;;  %1600 = vperm.xlu1 %3922, %v1142_v14   ;;  %v4653_v13 = vpop.permute.xlu0 %1310  ;;  %v1164_v14 = vld [vmem:[%s5911_s6 + $0x340] sm:$0xff] }
 0x15e   : > { %v4567_v25 = vpop.f32.mrf.mxu0 }
 0x15f   : > { %1655 = vperm.xlu0 %3911, %v1153_v19   ;;  %v1163_v19 = vld [vmem:[%s5911_s6 + $0x338] sm:$0xff] }
 0x160   : > { %1620 = vperm.xlu2 %3923, %v1146_v49   ;;  %1615 = vperm.xlu1 %3922, %v1145_v22   ;;  %v4663_v22 = vpop.permute.xlu2 %1290 }
 0x166   : > { %v4582_v32 = vpop.f32.mrf.mxu0 }
 0x167   : > { %1670 = vperm.xlu0 %3911, %v1156_v27   ;;  %v1174_v27 = vld [vmem:[%s5911_s6 + $0x390] sm:$0xff] }
 0x168   : > { %1635 = vperm.xlu2 %3923, %v1149_v30   ;;  %1630 = vperm.xlu1 %3922, %v1148_v5   ;;  %v1167_v30 = vld [vmem:[%s5911_s6 + $0x358] sm:$0xff]  ;;  %v1166_v5 = vld [vmem:[%s5911_s6 + $0x350] sm:$0xff] }
 0x16e   : > { %v4597_v38 = vpop.f32.mrf.mxu0 }
 0x16f   : > { %1685 = vperm.xlu0 %3911, %v1159_v33   ;;  %v4674_v33 = vpop.permute.xlu1 %1285 }
 0x170   : > { %1650 = vperm.xlu2 %3923, %v1152_v34   ;;  %1645 = vperm.xlu1 %3922, %v1151_v36   ;;  %5922 = vst [vmem:[#allocation14_spill] sm:$0xff] %v4674_v33  ;;  %v4678_v36 = vpop.permute.xlu0 %1325 }
 0x176   : > { %v4612_v47 = vpop.f32.mrf.mxu0 }
 0x177   : > { %1700 = vperm.xlu0 %3911, %v1162_v42   ;;  %v4680_v42 = vpop.permute.xlu2 %1305 }
 0x178   : > { %1665 = vperm.xlu2 %3923, %v1155_v43   ;;  %1660 = vperm.xlu1 %3922, %v1154_v46   ;;  %v1177_v43 = vld [vmem:[%s5911_s6 + $0x3a8] sm:$0xff]  ;;  %v1170_v46 = vld [vmem:[%s5911_s6 + $0x370] sm:$0xff] }
 0x17e   : > { %v4629_v59 = vpop.f32.mrf.mxu0 }
 0x17f   : > { %1715 = vperm.xlu0 %3911, %v1165_v56   ;;  %v1169_v56 = vld [vmem:[%s5911_s6 + $0x368] sm:$0xff] }
 0x180   : > { %1680 = vperm.xlu2 %3923, %v1158_v20   ;;  %1675 = vperm.xlu1 %3922, %v1157_v58   ;;  %v4693_v58 = vpop.permute.xlu1 %1300 }
 0x186   : > { %v4646_v4 = vpop.f32.mrf.mxu0 }
 0x187   : > { %1730 = vperm.xlu0 %3911, %v1168_v63   ;;  %v4695_v63 = vpop.permute.xlu0 %1340 }
 0x188   : > { %1695 = vperm.xlu2 %3923, %v1161_v10   ;;  %1690 = vperm.xlu1 %3922, %v1160_v3   ;;  %5923 = vst [vmem:[#allocation15_spill] sm:$0xff] %v4695_v63  ;;  %v4697_v10 = vpop.permute.xlu2 %1320  ;;  %v1180_v3 = vld [vmem:[%s5911_s6 + $0x3c0] sm:$0xff] }
 0x18e   : > { %v4661_v49 = vpop.f32.mrf.mxu0 }
 0x18f   : > { %1745 = vperm.xlu0 %3911, %v1171_v12   ;;  %v1173_v12 = vld [vmem:[%s5911_s6 + $0x388] sm:$0xff] }
 0x190   : > { %1710 = vperm.xlu2 %3923, %v1164_v14   ;;  %1705 = vperm.xlu1 %3922, %v1163_v19   ;;  %v1172_v14 = vld [vmem:[%s5911_s6 + $0x380] sm:$0xff] }
 0x196   : > { %v4676_v34 = vpop.f32.mrf.mxu0 }
 0x197   : > { %1760 = vperm.xlu0 %3911, %v1174_v27   ;;  %v4708_v27 = vpop.permute.xlu1 %1315 }
 0x198   : > { %1725 = vperm.xlu2 %3923, %v1167_v30   ;;  %1720 = vperm.xlu1 %3922, %v1166_v5   ;;  %v4710_v30 = vpop.permute.xlu0 %1355  ;;  %v1183_v5 = vld [vmem:[%s5911_s6 + $0x3d8] sm:$0xff] }
 0x199   : > { %5924 = vst [vmem:[#allocation16_spill] sm:$0xff] %v4710_v30 }
 0x19e   : > { %v4691_v20 = vpop.f32.mrf.mxu0 }
 0x19f   : > { %1775 = vperm.xlu0 %3911, %v1177_v43   ;;  %v4715_v43 = vpop.permute.xlu2 %1335 }
 0x1a0   : > { %1740 = vperm.xlu2 %3923, %v1170_v46   ;;  %1735 = vperm.xlu1 %3922, %v1169_v56   ;;  %v1176_v46 = vld [vmem:[%s5911_s6 + $0x3a0] sm:$0xff]  ;;  %v1175_v56 = vld [vmem:[%s5911_s6 + $0x398] sm:$0xff]  ;;  %v4728_v33 = vpop.permute.xlu0 %1370 }
 0x1a1   : > { %5925 = vst [vmem:[#allocation17_spill] sm:$0xff] %v4728_v33 }
 0x1a6   : > { %v893_v19 = vpop.f32.mrf.mxu0 }
 0x1a7   : > { %1790 = vperm.xlu0 %3911, %v1180_v3   ;;  %v894_v63 = vadd.f32 %v893_v19, %v4459_v31  ;;  %v886_v31 = vadd.f32 %v4661_v49, %v4441_v18 }
 0x1a8   : > { %1755 = vperm.xlu2 %3923, %v1173_v12   ;;  %1750 = vperm.xlu1 %3922, %v1172_v14   ;;  %v4723_v12 = vpop.permute.xlu1 %1330  ;;  %v1186_v14 = vld [vmem:[%s5911_s6 + $0x3f0] sm:$0xff]  ;;  %v4746_v55 = vpop.permute.xlu0 %1385 }
 0x1a9   : > { %5928 = vst [vmem:[#allocation20_spill] sm:$0xff] %v4746_v55  ;;  %v915_v18 = vmax.f32 %v886_v31, 0.0  ;;  %v3717_v31 = vld [vmem:[#allocation2 + $0x58] sm:$0xff] }
 0x1ae   : > { %v895_v3 = vpop.f32.mrf.mxu0 }
 0x1af   : > { %1805 = vperm.xlu0 %3911, %v1183_v5   ;;  %v4736_v5 = vpop.permute.xlu2 %1350 }
 0x1b0   : > { %1770 = vperm.xlu2 %3923, %v1176_v46   ;;  %1765 = vperm.xlu1 %3922, %v1175_v56   ;;  %5926 = vst [vmem:[#allocation18_spill] sm:$0xff] %v4736_v5  ;;  %v1182_v46 = vld [vmem:[%s5911_s6 + $0x3d0] sm:$0xff]  ;;  %v1181_v56 = vld [vmem:[%s5911_s6 + $0x3c8] sm:$0xff]  ;;  %v4744_v33 = vpop.permute.xlu1 %1345  ;;  %v4758_v5 = vpop.permute.xlu0 %1400 }
 0x1b1   : > { %5927 = vst [vmem:[#allocation19_spill] sm:$0xff] %v4744_v33 }
 0x1b2   : > { %5931 = vst [vmem:[#allocation23_spill] sm:$0xff] %v4758_v5 }
 0x1b6   : > { %v898_v6 = vpop.f32.mrf.mxu0 }
 0x1b7   : > { %1820 = vperm.xlu0 %3911, %v1186_v14   ;;  %v4748_v11 = vpop.permute.xlu2 %1365 }
 0x1b8   : > { %1785 = vperm.xlu2 %3923, %v1179_v52   ;;  %1780 = vperm.xlu1 %3922, %v1178_v0   ;;  %5929 = vst [vmem:[#allocation21_spill] sm:$0xff] %v4748_v11  ;;  %v1185_v52 = vld [vmem:[%s5911_s6 + $0x3e8] sm:$0xff]  ;;  %v1184_v0 = vld [vmem:[%s5911_s6 + $0x3e0] sm:$0xff]  ;;  %v4756_v30 = vpop.permute.xlu1 %1360  ;;  %v4771_v5 = vpop.permute.xlu0 %1415 }
 0x1b9   : > { %5930 = vst [vmem:[#allocation22_spill] sm:$0xff] %v4756_v30  ;;  %v899_v30 = vadd.f32 %v898_v6, %v4505_v61  ;;  %v891_v61 = vadd.f32 %v4691_v20, %v4480_v53  ;;  %v884_v53 = vadd.f32 %v4646_v4, %v4462_v45  ;;  %v876_v45 = vadd.f32 %v4597_v38, %v4443_v39 }
 0x1ba   : > { %5933 = vst [vmem:[#allocation25_spill] sm:$0xff] %v4771_v5  ;;  %v869_v38 = vadd.f32 %v4550_v15, %v4429_v35  ;;  %v3734_v35 = vld [vmem:[#allocation2 + $0xe0] sm:$0xff]  ;;  %v3752_v15 = vld [vmem:[#allocation2 + $0x170] sm:$0xff] }
 0x1bb   : > { %v914_v19 = vmax.f32 %v884_v53, 0.0  ;;  %v3760_v5 = vld [vmem:[#allocation2 + $0x1b0] sm:$0xff] }
 0x1be   : > { %v900_v40 = vpop.f32.mrf.mxu0 }
 0x1bf   : > { %v4760_v55 = vpop.permute.xlu2 %1380  ;;  %v901_v29 = vadd.f32 %v900_v40, %v4475_v51  ;;  %v920_v51 = vmax.f32 %v899_v30, 0.0  ;;  %v1055_v30 = vpack.c.bf16 %v915_v18, %v914_v19  ;;  %v3718_v19 = vld [vmem:[#allocation2 + $0x60] sm:$0xff] }
 0x1c0   : > { %1800 = vperm.xlu2 %3923, %v1182_v46   ;;  %1795 = vperm.xlu1 %3922, %v1181_v56   ;;  %5932 = vst [vmem:[#allocation24_spill] sm:$0xff] %v4760_v55  ;;  %v1187_v56 = vld [vmem:[%s5911_s6 + $0x3f8] sm:$0xff]  ;;  %v4769_v41 = vpop.permute.xlu1 %1375 }
 0x1c6   : > { %v903_v14 = vpop.f32.mrf.mxu0 }
 0x1c7   : > { %v904_v46 = vadd.f32 %v903_v14, %v4535_v7  ;;  %v896_v7 = vadd.f32 %v895_v3, %v4519_v1  ;;  %v921_v14 = vmax.f32 %v901_v29, 0.0  ;;  %v4774_v48 = vpop.permute.xlu2 %1395  ;;  %v918_v1 = vmax.f32 %v894_v63, 0.0 }
 0x1c8   : > { %1815 = vperm.xlu2 %3923, %v1185_v52   ;;  %1810 = vperm.xlu1 %3922, %v1184_v0   ;;  %v917_v29 = vmax.f32 %v891_v61, 0.0  ;;  %v879_v63 = vadd.f32 %v4612_v47, %v4418_v60  ;;  %v874_v3 = vadd.f32 %v4582_v32, %v4457_v44  ;;  %v871_v60 = vadd.f32 %v4567_v25, %v4404_v28 }
 0x1c9   : > { %v922_v52 = vmax.f32 %v904_v46, 0.0  ;;  %v1058_v40 = vpack.c.bf16 %v921_v14, %v920_v51  ;;  %v3716_v14 = vld [vmem:[#allocation2 + $0x50] sm:$0xff] }
 0x1ca   : > { %v912_v46 = vmax.f32 %v879_v63, 0.0  ;;  %v910_v44 = vmax.f32 %v874_v3, 0.0  ;;  %v909_v32 = vmax.f32 %v871_v60, 0.0  ;;  %v3708_v63 = vld [vmem:[#allocation2 + $0x10] sm:$0xff] }
 0x1ce   : > { %v905_v11 = vpop.f32.mrf.mxu0 }
 0x1cf   : > { %v906_v33 = vadd.f32 %v905_v11, %v4523_v54  ;;  %v919_v54 = vmax.f32 %v896_v7, 0.0  ;;  %v889_v11 = vadd.f32 %v4676_v34, %v4492_v57  ;;  %v4789_v57 = vpop.permute.xlu2 %1410  ;;  %v881_v34 = vadd.f32 %v4629_v59, %v4473_v50  ;;  %v3706_v7 = vld [vmem:[#allocation2] sm:$0xff] }
 0x1d0   : > { %1825 = vperm.xlu1 %3922, %v1187_v56   ;;  %v911_v59 = vmax.f32 %v876_v45, 0.0 }
 0x1d1   : > { %v923_v0 = vmax.f32 %v906_v33, 0.0  ;;  %v1057_v6 = vpack.c.bf16 %v919_v54, %v918_v1  ;;  %v4783_v33 = vpop.permute.xlu1 %1390  ;;  %v916_v20 = vmax.f32 %v889_v11, 0.0  ;;  %v913_v4 = vmax.f32 %v881_v34, 0.0  ;;  %v3707_v1 = vld [vmem:[#allocation2 + $0x8] sm:$0xff] }
 0x1d3   : > { %v1059_v55 = vpack.c.bf16 %v923_v0, %v922_v52  ;;  %v1056_v49 = vpack.c.bf16 %v917_v29, %v916_v20  ;;  %v1054_v56 = vpack.c.bf16 %v913_v4, %v912_v46  ;;  %v1053_v52 = vpack.c.bf16 %v911_v59, %v910_v44  ;;  %v3735_v29 = vld [vmem:[#allocation2 + $0xe8] sm:$0xff]  ;;  %v3736_v4 = vld [vmem:[#allocation2 + $0xf0] sm:$0xff]  ;;  %v3709_v59 = vld [vmem:[#allocation2 + $0x18] sm:$0xff] }
 0x1d4   : > { %v908_v0 = vmax.f32 %v869_v38, 0.0  ;;  %v3737_v38 = vld [vmem:[#allocation2 + $0xf8] sm:$0xff]  ;;  %v3755_v44 = vld [vmem:[#allocation2 + $0x188] sm:$0xff] }
 0x1d5   : > { %2212 = vmatpush.bf16.msrb.mxu0 %v1059_v55  ;;  %3789 = vmatpush.bf16.msra.mxu1 %v1059_v55 }
 0x1d6   : > { %3790 = vmatpush.bf16.msra.mxu2 %v1059_v55  ;;  %3791 = vmatpush.bf16.msra.mxu3 %v1059_v55  ;;  %v4785_v55 = vpop.permute.xlu0 %1430  ;;  %v1052_v28 = vpack.c.bf16 %v909_v32, %v908_v0 }
 0x1d7   : > { %5934 = vst [vmem:[#allocation26_spill] sm:$0xff] %v4785_v55  ;;  %v4805_v39 = vpop.permute.xlu2 %1425  ;;  %v3741_v55 = vld [vmem:[#allocation2 + $0x118] sm:$0xff] }
 0x1d8   : > { %5936 = vst [vmem:[#allocation28_spill] sm:$0xff] %v4805_v39  ;;  %v3759_v39 = vld [vmem:[#allocation2 + $0x1a8] sm:$0xff] }
 0x1d9   : > { %2213 = vmatpush.bf16.msrb.mxu0 %v1058_v40  ;;  %3792 = vmatpush.bf16.msra.mxu1 %v1058_v40  ;;  %v4799_v50 = vpop.permute.xlu1 %1405 }
 0x1da   : > { %3793 = vmatpush.bf16.msra.mxu2 %v1058_v40  ;;  %3794 = vmatpush.bf16.msra.mxu3 %v1058_v40 }
 0x1dd   : > { %2214 = vmatpush.bf16.msrb.mxu0 %v1057_v6  ;;  %3795 = vmatpush.bf16.msra.mxu1 %v1057_v6 }
 0x1de   : > { %3796 = vmatpush.bf16.msra.mxu2 %v1057_v6  ;;  %3797 = vmatpush.bf16.msra.mxu3 %v1057_v6  ;;  %v4803_v47 = vpop.permute.xlu0 %1445  ;;  %v3753_v6 = vld [vmem:[#allocation2 + $0x178] sm:$0xff] }
 0x1df   : > { %5935 = vst [vmem:[#allocation27_spill] sm:$0xff] %v4803_v47  ;;  %v4813_v61 = vpop.permute.xlu2 %1440 }
 0x1e0   : > { %5939 = vst [vmem:[#allocation31_spill] sm:$0xff] %v4813_v61  ;;  %v3723_v61 = vld [vmem:[#allocation2 + $0x88] sm:$0xff] }
 0x1e1   : > { %2215 = vmatpush.bf16.msrb.mxu0 %v1056_v49  ;;  %3798 = vmatpush.bf16.msra.mxu1 %v1056_v49  ;;  %v4809_v25 = vpop.permute.xlu1 %1420 }
 0x1e2   : > { %3799 = vmatpush.bf16.msra.mxu2 %v1056_v49  ;;  %3800 = vmatpush.bf16.msra.mxu3 %v1056_v49  ;;  %5937 = vst [vmem:[#allocation29_spill] sm:$0xff] %v4809_v25 }
 0x1e5   : > { %2216 = vmatpush.bf16.msrb.mxu0 %v1055_v30  ;;  %3801 = vmatpush.bf16.msra.mxu1 %v1055_v30 }
 0x1e6   : > { %3802 = vmatpush.bf16.msra.mxu2 %v1055_v30  ;;  %3803 = vmatpush.bf16.msra.mxu3 %v1055_v30  ;;  %v4811_v51 = vpop.permute.xlu0 %1460  ;;  %v3754_v30 = vld [vmem:[#allocation2 + $0x180] sm:$0xff] }
 0x1e7   : > { %5938 = vst [vmem:[#allocation30_spill] sm:$0xff] %v4811_v51  ;;  %v4819_v11 = vpop.permute.xlu2 %1455  ;;  %v3740_v51 = vld [vmem:[#allocation2 + $0x110] sm:$0xff] }
 0x1e8   : > { %5941 = vst [vmem:[#allocation33_spill] sm:$0xff] %v4819_v11  ;;  %v3758_v11 = vld [vmem:[#allocation2 + $0x1a0] sm:$0xff] }
 0x1e9   : > { %2217 = vmatpush.bf16.msrb.mxu0 %v1054_v56  ;;  %3804 = vmatpush.bf16.msra.mxu1 %v1054_v56  ;;  %v4815_v54 = vpop.permute.xlu1 %1435 }
 0x1ea   : > { %3805 = vmatpush.bf16.msra.mxu2 %v1054_v56  ;;  %3806 = vmatpush.bf16.msra.mxu3 %v1054_v56  ;;  %5940 = vst [vmem:[#allocation32_spill] sm:$0xff] %v4815_v54  ;;  %v3719_v56 = vld [vmem:[#allocation2 + $0x68] sm:$0xff] }
 0x1ed   : > { %2218 = vmatpush.bf16.msrb.mxu0 %v1053_v52  ;;  %3807 = vmatpush.bf16.msra.mxu1 %v1053_v52 }
 0x1ee   : > { %3808 = vmatpush.bf16.msra.mxu2 %v1053_v52  ;;  %3809 = vmatpush.bf16.msra.mxu3 %v1053_v52  ;;  %v4817_v40 = vpop.permute.xlu0 %1475 }
 0x1ef   : > { %v4825_v34 = vpop.permute.xlu2 %1470 }
 0x1f1   : > { %2219 = vmatpush.bf16.msrb.mxu0 %v1052_v28  ;;  %3810 = vmatpush.bf16.msra.mxu1 %v1052_v28  ;;  %v4821_v53 = vpop.permute.xlu1 %1450 }
 0x1f2   : > { %3811 = vmatpush.bf16.msra.mxu2 %v1052_v28  ;;  %3812 = vmatpush.bf16.msra.mxu3 %v1052_v28  ;;  %5942 = vst [vmem:[#allocation34_spill] sm:$0xff] %v4821_v53 }
 0x1f4   : > { %2220 = vmatmul.bf16.vlgmr.msrb.gmra.mxu0 %v3706_v7  ;;  %2270 = vmatmul.bf16.vlgmr.msra.gmra.mxu1 %v3716_v14 }
 0x1f5   : > { %2360 = vmatmul.bf16.vlgmr.msra.gmra.mxu2 %v3734_v35  ;;  %2450 = vmatmul.bf16.vlgmr.msra.gmra.mxu3 %v3752_v15  ;;  %v3710_v35 = vld [vmem:[#allocation2 + $0x20] sm:$0xff]  ;;  %v3720_v15 = vld [vmem:[#allocation2 + $0x70] sm:$0xff] }
 0x1f6   : > { %v4823_v20 = vpop.permute.xlu0 %1490 }
 0x1f7   : > { %v4831_v45 = vpop.permute.xlu2 %1485 }
 0x1f9   : > { %v4827_v18 = vpop.permute.xlu1 %1465 }
 0x1fa   : > { %5943 = vst [vmem:[#allocation35_spill] sm:$0xff] %v4827_v18  ;;  %v3722_v18 = vld [vmem:[#allocation2 + $0x80] sm:$0xff] }
 0x1fe   : > { %v4829_v49 = vpop.permute.xlu0 %1505 }
 0x1ff   : > { %v4837_v60 = vpop.permute.xlu2 %1500 }
 0x201   : > { %v4833_v3 = vpop.permute.xlu1 %1480 }
 0x204   : > { %2225 = vmatmul.bf16.gmra.mxu0 %v3707_v1  ;;  %2275 = vmatmul.bf16.gmra.mxu1 %v3717_v31  ;;  %v3738_v1 = vld [vmem:[#allocation2 + $0x100] sm:$0xff]  ;;  %v3756_v31 = vld [vmem:[#allocation2 + $0x190] sm:$0xff] }
 0x205   : > { %2365 = vmatmul.bf16.gmra.mxu2 %v3735_v29  ;;  %2455 = vmatmul.bf16.gmra.mxu3 %v3753_v6 }
 0x206   : > { %v4835_v46 = vpop.permute.xlu0 %1520 }
 0x207   : > { %v4843_v0 = vpop.permute.xlu2 %1515 }
 0x209   : > { %v4839_v32 = vpop.permute.xlu1 %1495 }
 0x20e   : > { %v4841_v52 = vpop.permute.xlu0 %1535 }
 0x20f   : > { %v4849_v14 = vpop.permute.xlu2 %1530 }
 0x211   : > { %v4845_v28 = vpop.permute.xlu1 %1510 }
 0x214   : > { %2230 = vmatmul.bf16.gmra.mxu0 %v3708_v63  ;;  %2280 = vmatmul.bf16.gmra.mxu1 %v3718_v19 }
 0x215   : > { %2370 = vmatmul.bf16.gmra.mxu2 %v3736_v4  ;;  %2460 = vmatmul.bf16.gmra.mxu3 %v3754_v30  ;;  %v3711_v4 = vld [vmem:[#allocation2 + $0x28] sm:$0xff]  ;;  %v3721_v30 = vld [vmem:[#allocation2 + $0x78] sm:$0xff] }
 0x216   : > { %v4847_v7 = vpop.permute.xlu0 %1550 }
 0x217   : > { %v4855_v63 = vpop.permute.xlu2 %1545 }
 0x219   : > { %v4851_v29 = vpop.permute.xlu1 %1525 }
 0x21e   : > { %v4853_v6 = vpop.permute.xlu0 %1565 }
 0x221   : > { %v4857_v19 = vpop.permute.xlu1 %1540 }
 0x224   : > { %2235 = vmatmul.bf16.gmra.mxu0 %v3709_v59  ;;  %2285 = vmatmul.bf16.gmra.mxu1 %v3719_v56  ;;  %v3739_v56 = vld [vmem:[#allocation2 + $0x108] sm:$0xff] }
 0x225   : > { %2375 = vmatmul.bf16.gmra.mxu2 %v3737_v38  ;;  %2465 = vmatmul.bf16.gmra.mxu3 %v3755_v44  ;;  %v3757_v38 = vld [vmem:[#allocation2 + $0x198] sm:$0xff]  ;;  %v4861_v44 = vpop.permute.xlu2 %1560 }
 0x226   : > { %v4859_v59 = vpop.permute.xlu0 %1580 }
 0x234   : > { %2240 = vmatmul.bf16.gmra.mxu0 %v3710_v35  ;;  %2290 = vmatmul.bf16.gmra.mxu1 %v3720_v15  ;;  %v4863_v35 = vpop.permute.xlu1 %1555  ;;  %v4865_v15 = vpop.permute.xlu0 %1595 }
 0x235   : > { %2380 = vmatmul.bf16.gmra.mxu2 %v3738_v1  ;;  %2470 = vmatmul.bf16.gmra.mxu3 %v3756_v31  ;;  %5944 = vst [vmem:[#allocation36_spill] sm:$0xff] %v4865_v15  ;;  %v4867_v1 = vpop.permute.xlu2 %1575  ;;  %v3712_v31 = vld [vmem:[#allocation2 + $0x30] sm:$0xff]  ;;  %v3742_v15 = vld [vmem:[#allocation2 + $0x120] sm:$0xff] }
 0x23c   : > { %v4869_v53 = vpop.permute.xlu1 %1570  ;;  %v4871_v47 = vpop.permute.xlu0 %1610 }
 0x23d   : > { %5945 = vst [vmem:[#allocation37_spill] sm:$0xff] %v4871_v47  ;;  %v3724_v47 = vld [vmem:[#allocation2 + $0x90] sm:$0xff] }
 0x244   : > { %2245 = vmatmul.bf16.gmra.mxu0 %v3711_v4  ;;  %2295 = vmatmul.bf16.gmra.mxu1 %v3721_v30  ;;  %v4873_v4 = vpop.permute.xlu2 %1590  ;;  %v4875_v30 = vpop.permute.xlu1 %1585 }
 0x245   : > { %2385 = vmatmul.bf16.gmra.mxu2 %v3739_v56  ;;  %2475 = vmatmul.bf16.gmra.mxu3 %v3757_v38  ;;  %5946 = vst [vmem:[#allocation38_spill] sm:$0xff] %v4873_v4  ;;  %v4877_v56 = vpop.permute.xlu0 %1625  ;;  %v3713_v38 = vld [vmem:[#allocation2 + $0x38] sm:$0xff] }
 0x246   : > { %5947 = vst [vmem:[#allocation39_spill] sm:$0xff] %v4875_v30 }
 0x247   : > { %5948 = vst [vmem:[#allocation40_spill] sm:$0xff] %v4877_v56 }
 0x24c   : > { %v4879_v54 = vpop.permute.xlu2 %1605 }
 0x24d   : > { %5949 = vst [vmem:[#allocation41_spill] sm:$0xff] %v4879_v54 }
 0x254   : > { %2250 = vmatmul.bf16.gmra.mxu0 %v3712_v31  ;;  %2300 = vmatmul.bf16.gmra.mxu1 %v3722_v18  ;;  %v4881_v18 = vpop.permute.xlu1 %1600  ;;  %v3714_v31 = vld [vmem:[#allocation2 + $0x40] sm:$0xff] }
 0x255   : > { %2390 = vmatmul.bf16.gmra.mxu2 %v3740_v51  ;;  %2480 = vmatmul.bf16.gmra.mxu3 %v3758_v11  ;;  %5950 = vst [vmem:[#allocation42_spill] sm:$0xff] %v4881_v18  ;;  %v4883_v51 = vpop.permute.xlu0 %1640  ;;  %v4885_v11 = vpop.permute.xlu2 %1620 }
 0x256   : > { %5951 = vst [vmem:[#allocation43_spill] sm:$0xff] %v4883_v51 }
 0x257   : > { %5952 = vst [vmem:[#allocation44_spill] sm:$0xff] %v4885_v11 }
 0x25c   : > { %v4887_v4 = vpop.permute.xlu1 %1615 }
 0x25d   : > { %5953 = vst [vmem:[#allocation45_spill] sm:$0xff] %v4887_v4  ;;  %v4891_v51 = vpop.permute.xlu2 %1635 }
 0x25e   : > { %5954 = vst [vmem:[#allocation46_spill] sm:$0xff] %v4891_v51  ;;  %v3761_v51 = vld [vmem:[#allocation2 + $0x1b8] sm:$0xff] }
 0x264   : > { %2255 = vmatmul.bf16.gmra.mxu0 %v3713_v38  ;;  %2305 = vmatmul.bf16.gmra.mxu1 %v3723_v61 }
 0x265   : > { %2395 = vmatmul.bf16.gmra.mxu2 %v3741_v55  ;;  %2485 = vmatmul.bf16.gmra.mxu3 %v3759_v39  ;;  %v1656_v55 = vpop.permute.xlu0 %1655 }
 0x271   : > { %v2221_v25 = vpop.f32.mrf.mxu0  ;;  %v2271_v56 = vpop.f32.mrf.mxu1 }
 0x272   : > { %v2222_v54 = vadd.f32 %v2221_v25, %v4497_v24  ;;  %v2272_v61 = vadd.f32 %v2271_v56, %v4663_v22  ;;  %v4895_v22 = vpop.permute.xlu1 %1630 }
 0x273   : > { %5955 = vst [vmem:[#allocation47_spill] sm:$0xff] %v4895_v22 }
 0x274   : > { %v2541_v39 = vmax.f32 %v2222_v54, 0.0  ;;  %v2561_v38 = vmax.f32 %v2272_v61, 0.0  ;;  %2260 = vmatmul.bf16.gmra.mxu0 %v3714_v31  ;;  %2310 = vmatmul.bf16.gmra.mxu1 %v3724_v47  ;;  %v4897_v31 = vpop.permute.xlu0 %1670  ;;  %v1651_v47 = vpop.permute.xlu2 %1650  ;;  %v3715_v61 = vld [vmem:[#allocation2 + $0x48] sm:$0xff] }
 0x275   : > { %2400 = vmatmul.bf16.gmra.mxu2 %v3742_v15  ;;  %2490 = vmatmul.bf16.gmra.mxu3 %v3760_v5 }
 0x276   : > { %2837 = vmax.xlane.f32.xlu0 %v2561_v38  ;;  %2797 = vmax.xlane.f32.xlu2 %v2541_v39  ;;  %v3725_v39 = vld [vmem:[#allocation2 + $0x98] sm:$0xff]  ;;  %v3743_v38 = vld [vmem:[#allocation2 + $0x128] sm:$0xff] }
 0x278   : > { %v2361_v11 = vpop.f32.mrf.mxu2  ;;  %v2451_v4 = vpop.f32.mrf.mxu3 }
 0x279   : > { %v2362_v18 = vadd.f32 %v2361_v11, %v4825_v34  ;;  %v2273_v30 = vpop.f32.mrf.mxu1  ;;  %v2223_v25 = vpop.f32.mrf.mxu0  ;;  %v2452_v5 = vadd.f32 %v2451_v4, %v1651_v47 }
 0x27a   : > { %v2274_v24 = vadd.f32 %v2273_v30, %v4633_v62  ;;  %v4901_v4 = vpop.permute.xlu1 %1645 }
 0x27b   : > { %v2597_v54 = vmax.f32 %v2362_v18, 0.0  ;;  %v2633_v30 = vmax.f32 %v2452_v5, 0.0 }
 0x27c   : > { %v2562_v56 = vmax.f32 %v2274_v24, 0.0 }
 0x27e   : > { %2839 = vmax.xlane.f32.xlu1 %v2562_v56  ;;  %2909 = vmax.xlane.f32.xlu0 %v2597_v54  ;;  %v4903_v54 = vpop.permute.xlu0 %1685 }
 0x280   : > { %v2363_v15 = vpop.f32.mrf.mxu2  ;;  %v2453_v18 = vpop.f32.mrf.mxu3 }
 0x281   : > { %v2364_v34 = vadd.f32 %v2363_v15, %v4817_v40  ;;  %v2276_v11 = vpop.f32.mrf.mxu1  ;;  %v2226_v56 = vpop.f32.mrf.mxu0  ;;  %v2224_v40 = vadd.f32 %v2223_v25, %v4552_v16  ;;  %v2454_v47 = vadd.f32 %v2453_v18, %v1656_v55  ;;  %v3744_v25 = vld [vmem:[#allocation2 + $0x130] sm:$0xff] }
 0x282   : > { %v2277_v62 = vadd.f32 %v2276_v11, %v4693_v58 }
 0x283   : > { %v2598_v22 = vmax.f32 %v2364_v34, 0.0  ;;  %v2542_v34 = vmax.f32 %v2224_v40, 0.0 }
 0x284   : > { %v2563_v24 = vmax.f32 %v2277_v62, 0.0  ;;  %2265 = vmatmul.bf16.gmra.mxu0 %v3715_v61  ;;  %2315 = vmatmul.bf16.gmra.mxu1 %v3725_v39  ;;  %v2634_v61 = vmax.f32 %v2454_v47, 0.0 }
 0x285   : > { %2405 = vmatmul.bf16.gmra.mxu2 %v3743_v38  ;;  %2495 = vmatmul.bf16.gmra.mxu3 %v3761_v51  ;;  %v2227_v38 = vadd.f32 %v2226_v56, %v4539_v9 }
 0x286   : > { %2911 = vmax.xlane.f32.xlu1 %v2598_v22  ;;  %2981 = vmax.xlane.f32.xlu0 %v2633_v30  ;;  %v1661_v22 = vpop.permute.xlu1 %1660  ;;  %v3726_v30 = vld [vmem:[#allocation2 + $0xa0] sm:$0xff]  ;;  %v4909_v16 = vpop.permute.xlu0 %1700 }
 0x287   : > { %2841 = vmax.xlane.f32.xlu2 %v2563_v24  ;;  %v2543_v24 = vmax.f32 %v2227_v38, 0.0  ;;  %v1666_v38 = vpop.permute.xlu2 %1665 }
 0x288   : > { %v2366_v58 = vpop.f32.mrf.mxu2  ;;  %v2456_v11 = vpop.f32.mrf.mxu3 }
 0x289   : > { %v2367_v5 = vadd.f32 %v2366_v58, %v4833_v3  ;;  %v2278_v15 = vpop.f32.mrf.mxu1  ;;  %v2228_v51 = vpop.f32.mrf.mxu0  ;;  %v2457_v55 = vadd.f32 %v2456_v11, %v1661_v22  ;;  %v3762_v3 = vld [vmem:[#allocation2 + $0x1c0] sm:$0xff] }
 0x28a   : > { %v2279_v62 = vadd.f32 %v2278_v15, %v4680_v42  ;;  %v2229_v56 = vadd.f32 %v2228_v51, %v4521_v2  ;;  %v3745_v2 = vld [vmem:[#allocation2 + $0x138] sm:$0xff]  ;;  %v3763_v51 = vld [vmem:[#allocation2 + $0x1c8] sm:$0xff] }
 0x28b   : > { %v2599_v39 = vmax.f32 %v2367_v5, 0.0  ;;  %v2635_v47 = vmax.f32 %v2457_v55, 0.0 }
 0x28c   : > { %v2564_v40 = vmax.f32 %v2279_v62, 0.0  ;;  %v2544_v11 = vmax.f32 %v2229_v56, 0.0 }
 0x28e   : > { %2983 = vmax.xlane.f32.xlu1 %v2634_v61  ;;  %2799 = vmax.xlane.f32.xlu0 %v2542_v34  ;;  %v4914_v15 = vpop.permute.xlu0 %1715 }
 0x28f   : > { %2913 = vmax.xlane.f32.xlu2 %v2599_v39 }
 0x290   : > { %v2368_v18 = vpop.f32.mrf.mxu2  ;;  %v2458_v34 = vpop.f32.mrf.mxu3 }
 0x291   : > { %v2281_v58 = vpop.f32.mrf.mxu1  ;;  %v2369_v9 = vadd.f32 %v2368_v18, %v4831_v45  ;;  %v2231_v5 = vpop.f32.mrf.mxu0  ;;  %v2459_v62 = vadd.f32 %v2458_v34, %v1666_v38  ;;  %v3727_v45 = vld [vmem:[#allocation2 + $0xa8] sm:$0xff] }
 0x292   : > { %v2282_v42 = vadd.f32 %v2281_v58, %v4653_v13  ;;  %v2232_v13 = vadd.f32 %v2231_v5, %v4569_v26 }
 0x293   : > { %v2600_v61 = vmax.f32 %v2369_v9, 0.0 }
 0x294   : > { %2320 = vmatmul.bf16.gmra.mxu1 %v3726_v30  ;;  %v2565_v39 = vmax.f32 %v2282_v42, 0.0 }
 0x295   : > { %2410 = vmatmul.bf16.gmra.mxu2 %v3744_v25  ;;  %2500 = vmatmul.bf16.gmra.mxu3 %v3762_v3  ;;  %v2636_v3 = vmax.f32 %v2459_v62, 0.0  ;;  %v3764_v62 = vld [vmem:[#allocation2 + $0x1d0] sm:$0xff] }
 0x296   : > { %2801 = vmax.xlane.f32.xlu1 %v2543_v24  ;;  %2843 = vmax.xlane.f32.xlu0 %v2564_v40  ;;  %v4918_v24 = vpop.permute.xlu0 %1730  ;;  %v2545_v40 = vmax.f32 %v2232_v13, 0.0 }
 0x297   : > { %2985 = vmax.xlane.f32.xlu2 %v2635_v47 }
 0x298   : > { %v2371_v22 = vpop.f32.mrf.mxu2  ;;  %v2461_v47 = vpop.f32.mrf.mxu3 }
 0x299   : > { %v2372_v30 = vadd.f32 %v2371_v22, %v4823_v20  ;;  %v2283_v55 = vpop.f32.mrf.mxu1  ;;  %v2233_v25 = vpop.f32.mrf.mxu0  ;;  %v2462_v20 = vadd.f32 %v2461_v47, %v4897_v31  ;;  %v3728_v31 = vld [vmem:[#allocation2 + $0xb0] sm:$0xff] }
 0x29a   : > { %v2234_v26 = vadd.f32 %v2233_v25, %v4559_v21  ;;  %v2284_v58 = vadd.f32 %v2283_v55, %v4708_v27  ;;  %v3746_v27 = vld [vmem:[#allocation2 + $0x140] sm:$0xff] }
 0x29b   : > { %v2601_v18 = vmax.f32 %v2372_v30, 0.0  ;;  %v2637_v56 = vmax.f32 %v2462_v20, 0.0 }
 0x29c   : > { %v2546_v5 = vmax.f32 %v2234_v26, 0.0  ;;  %v2566_v34 = vmax.f32 %v2284_v58, 0.0  ;;  %v1681_v58 = vpop.permute.xlu2 %1680 }
 0x29e   : > { %2845 = vmax.xlane.f32.xlu1 %v2565_v39  ;;  %2915 = vmax.xlane.f32.xlu0 %v2600_v61  ;;  %v4923_v39 = vpop.permute.xlu0 %1745 }
 0x29f   : > { %2803 = vmax.xlane.f32.xlu2 %v2544_v11 }
 0x2a0   : > { %v2373_v9 = vpop.f32.mrf.mxu2  ;;  %v2463_v38 = vpop.f32.mrf.mxu3 }
 0x2a1   : > { %v2286_v42 = vpop.f32.mrf.mxu1  ;;  %v2236_v61 = vpop.f32.mrf.mxu0  ;;  %v2374_v21 = vadd.f32 %v2373_v9, %v4839_v32  ;;  %v3729_v9 = vld [vmem:[#allocation2 + $0xb8] sm:$0xff] }
 0x2a2   : > { %v2237_v11 = vadd.f32 %v2236_v61, %v4537_v8  ;;  %v2287_v22 = vadd.f32 %v2286_v42, %v4697_v10  ;;  %v1676_v8 = vpop.permute.xlu1 %1675 }
 0x2a3   : > { %v2602_v55 = vmax.f32 %v2374_v21, 0.0  ;;  %v2464_v25 = vadd.f32 %v2463_v38, %v1676_v8 }
 0x2a4   : > { %2325 = vmatmul.bf16.gmra.mxu1 %v3727_v45  ;;  %v2547_v45 = vmax.f32 %v2237_v11, 0.0  ;;  %v2567_v13 = vmax.f32 %v2287_v22, 0.0 }
 0x2a5   : > { %2415 = vmatmul.bf16.gmra.mxu2 %v3745_v2  ;;  %2505 = vmatmul.bf16.gmra.mxu3 %v3763_v51  ;;  %v2638_v20 = vmax.f32 %v2464_v25, 0.0 }
 0x2a6   : > { %2917 = vmax.xlane.f32.xlu1 %v2601_v18  ;;  %2987 = vmax.xlane.f32.xlu0 %v2636_v3  ;;  %v4930_v51 = vpop.permute.xlu0 %1760 }
 0x2a7   : > { %2805 = vmax.xlane.f32.xlu2 %v2545_v40 }
 0x2a8   : > { %v2376_v30 = vpop.f32.mrf.mxu2  ;;  %v2466_v18 = vpop.f32.mrf.mxu3 }
 0x2a9   : > { %v2288_v2 = vpop.f32.mrf.mxu1  ;;  %v2377_v10 = vadd.f32 %v2376_v30, %v4837_v60  ;;  %v2238_v3 = vpop.f32.mrf.mxu0 }
 0x2aa   : > { %v2289_v32 = vadd.f32 %v2288_v2, %v4678_v36  ;;  %v2467_v36 = vadd.f32 %v2466_v18, %v1681_v58  ;;  %v2239_v42 = vadd.f32 %v2238_v3, %v4595_v37  ;;  %v4940_v61 = vpop.permute.xlu1 %1690  ;;  %v3730_v3 = vld [vmem:[#allocation2 + $0xc0] sm:$0xff] }
 0x2ab   : > { %v2603_v40 = vmax.f32 %v2377_v10, 0.0 }
 0x2ac   : > { %v2568_v47 = vmax.f32 %v2289_v32, 0.0  ;;  %v2548_v37 = vmax.f32 %v2239_v42, 0.0 }
 0x2ae   : > { %2989 = vmax.xlane.f32.xlu1 %v2637_v56  ;;  %2807 = vmax.xlane.f32.xlu0 %v2546_v5  ;;  %v3747_v5 = vld [vmem:[#allocation2 + $0x148] sm:$0xff]  ;;  %v4942_v11 = vpop.permute.xlu0 %1775 }
 0x2af   : > { %2847 = vmax.xlane.f32.xlu2 %v2566_v34  ;;  %v3765_v34 = vld [vmem:[#allocation2 + $0x1d8] sm:$0xff] }
 0x2b0   : > { %v2378_v26 = vpop.f32.mrf.mxu2  ;;  %v2468_v38 = vpop.f32.mrf.mxu3 }
 0x2b1   : > { %v2379_v60 = vadd.f32 %v2378_v26, %v4829_v49  ;;  %v2291_v56 = vpop.f32.mrf.mxu1  ;;  %v2241_v22 = vpop.f32.mrf.mxu0  ;;  %v2639_v49 = vmax.f32 %v2467_v36, 0.0 }
 0x2b2   : > { %v2242_v30 = vadd.f32 %v2241_v22, %v4584_v23 }
 0x2b3   : > { %v2604_v21 = vmax.f32 %v2379_v60, 0.0 }
 0x2b4   : > { %2330 = vmatmul.bf16.gmra.mxu1 %v3728_v31  ;;  %v3988_v31 = vmov -inf   ;;  %v2549_v2 = vmax.f32 %v2242_v30, 0.0 }
 0x2b5   : > { %2420 = vmatmul.bf16.gmra.mxu2 %v3746_v27  ;;  %2510 = vmatmul.bf16.gmra.mxu3 %v3764_v62  ;;  %342 = vst.msk [vmem:[%s4936_s29 + $0xa0] sm:$0xff] %vm321_vm1, %v3988_v31  ;;  %v4959_v27 = vpop.permute.xlu2 %1695  ;;  %v2469_v62 = vadd.f32 %v2468_v38, %v4903_v54  ;;  %v4976_v54 = vpop.permute.xlu1 %1705 }
 0x2b6   : > { %2809 = vmax.xlane.f32.xlu1 %v2547_v45  ;;  %2849 = vmax.xlane.f32.xlu0 %v2567_v13  ;;  %322 = vst.msk [vmem:[%s4936_s29] sm:$0xff] %vm321_vm1, %v3988_v31  ;;  %v2292_v45 = vadd.f32 %v2291_v56, %v4723_v12  ;;  %v4981_v12 = vpop.permute.xlu0 %1790  ;;  %v5956_v56 = vld [vmem:[#allocation15_spill] sm:$0xff] }
 0x2b7   : > { %2919 = vmax.xlane.f32.xlu2 %v2602_v55  ;;  %323 = vst.msk [vmem:[%s4936_s29 + $0x8] sm:$0xff] %vm321_vm1, %v3988_v31  ;;  %v2640_v23 = vmax.f32 %v2469_v62, 0.0 }
 0x2b8   : > { %324 = vst.msk [vmem:[%s4936_s29 + $0x10] sm:$0xff] %vm321_vm1, %v3988_v31  ;;  %v2381_v13 = vpop.f32.mrf.mxu2  ;;  %v2569_v8 = vmax.f32 %v2292_v45, 0.0 }
 0x2b9   : > { %325 = vst.msk [vmem:[%s4936_s29 + $0x18] sm:$0xff] %vm321_vm1, %v3988_v31  ;;  %v2293_v55 = vpop.f32.mrf.mxu1  ;;  %v2243_v10 = vpop.f32.mrf.mxu0  ;;  %v2382_v18 = vadd.f32 %v2381_v13, %v4845_v28  ;;  %v3731_v13 = vld [vmem:[#allocation2 + $0xc8] sm:$0xff] }
 0x2ba   : > { %326 = vst.msk [vmem:[%s4936_s29 + $0x20] sm:$0xff] %vm321_vm1, %v3988_v31  ;;  %v2244_v32 = vadd.f32 %v2243_v10, %v4554_v17  ;;  %v2294_v25 = vadd.f32 %v2293_v55, %v4715_v43  ;;  %v3749_v10 = vld [vmem:[#allocation2 + $0x158] sm:$0xff] }
 0x2bb   : > { %327 = vst.msk [vmem:[%s4936_s29 + $0x28] sm:$0xff] %vm321_vm1, %v3988_v31  ;;  %v2605_v58 = vmax.f32 %v2382_v18, 0.0 }
 0x2bc   : > { %328 = vst.msk [vmem:[%s4936_s29 + $0x30] sm:$0xff] %vm321_vm1, %v3988_v31  ;;  %v2550_v43 = vmax.f32 %v2244_v32, 0.0  ;;  %v2570_v28 = vmax.f32 %v2294_v25, 0.0  ;;  %v3767_v32 = vld [vmem:[#allocation2 + $0x1e8] sm:$0xff] }
 0x2bd   : > { %329 = vst.msk [vmem:[%s4936_s29 + $0x38] sm:$0xff] %vm321_vm1, %v3988_v31  ;;  %v5001_v26 = vpop.permute.xlu2 %1710  ;;  %v5015_v60 = vpop.permute.xlu1 %1720 }
 0x2be   : > { %2851 = vmax.xlane.f32.xlu1 %v2568_v47  ;;  %2921 = vmax.xlane.f32.xlu0 %v2603_v40  ;;  %330 = vst.msk [vmem:[%s4936_s29 + $0x40] sm:$0xff] %vm321_vm1, %v3988_v31  ;;  %v2471_v40 = vpop.f32.mrf.mxu3  ;;  %v3748_v47 = vld [vmem:[#allocation2 + $0x150] sm:$0xff] }
 0x2bf   : > { %2991 = vmax.xlane.f32.xlu2 %v2638_v20  ;;  %331 = vst.msk [vmem:[%s4936_s29 + $0x48] sm:$0xff] %vm321_vm1, %v3988_v31  ;;  %v3766_v20 = vld [vmem:[#allocation2 + $0x1e0] sm:$0xff] }
 0x2c0   : > { %332 = vst.msk [vmem:[%s4936_s29 + $0x50] sm:$0xff] %vm321_vm1, %v3988_v31  ;;  %v2383_v17 = vpop.f32.mrf.mxu2 }
 0x2c1   : > { %333 = vst.msk [vmem:[%s4936_s29 + $0x58] sm:$0xff] %vm321_vm1, %v3988_v31  ;;  %v2296_v36 = vpop.f32.mrf.mxu1  ;;  %v2384_v42 = vadd.f32 %v2383_v17, %v4843_v0  ;;  %v2246_v22 = vpop.f32.mrf.mxu0  ;;  %v5958_v17 = vld [vmem:[#allocation7_spill] sm:$0xff] }
 0x2c2   : > { %334 = vst.msk [vmem:[%s4936_s29 + $0x60] sm:$0xff] %vm321_vm1, %v3988_v31 }
 0x2c3   : > { %335 = vst.msk [vmem:[%s4936_s29 + $0x68] sm:$0xff] %vm321_vm1, %v3988_v31 }
 0x2c4   : > { %2335 = vmatmul.bf16.gmra.mxu1 %v3729_v9  ;;  %336 = vst.msk [vmem:[%s4936_s29 + $0x70] sm:$0xff] %vm321_vm1, %v3988_v31  ;;  %v5020_v9 = vpop.permute.xlu0 %1805 }
 0x2c5   : > { %2425 = vmatmul.bf16.gmra.mxu2 %v3747_v5  ;;  %2515 = vmatmul.bf16.gmra.mxu3 %v3765_v34  ;;  %337 = vst.msk [vmem:[%s4936_s29 + $0x78] sm:$0xff] %vm321_vm1, %v3988_v31  ;;  %v2297_v5 = vadd.f32 %v2296_v36, %v5956_v56  ;;  %v2472_v34 = vadd.f32 %v2471_v40, %v4940_v61  ;;  %v5040_v0 = vpop.permute.xlu2 %1725  ;;  %v5054_v62 = vpop.permute.xlu1 %1735 }
 0x2c6   : > { %2923 = vmax.xlane.f32.xlu1 %v2604_v21  ;;  %2993 = vmax.xlane.f32.xlu0 %v2639_v49  ;;  %338 = vst.msk [vmem:[%s4936_s29 + $0x80] sm:$0xff] %vm321_vm1, %v3988_v31  ;;  %v2473_v49 = vpop.f32.mrf.mxu3  ;;  %v2606_v21 = vmax.f32 %v2384_v42, 0.0 }
 0x2c7   : > { %2811 = vmax.xlane.f32.xlu2 %v2548_v37  ;;  %339 = vst.msk [vmem:[%s4936_s29 + $0x88] sm:$0xff] %vm321_vm1, %v3988_v31  ;;  %v2571_v37 = vmax.f32 %v2297_v5, 0.0  ;;  %v2641_v61 = vmax.f32 %v2472_v34, 0.0  ;;  %v2474_v30 = vadd.f32 %v2473_v49, %v4959_v27 }
 0x2c8   : > { %340 = vst.msk [vmem:[%s4936_s29 + $0x90] sm:$0xff] %vm321_vm1, %v3988_v31  ;;  %v2386_v38 = vpop.f32.mrf.mxu2 }
 0x2c9   : > { %341 = vst.msk [vmem:[%s4936_s29 + $0x98] sm:$0xff] %vm321_vm1, %v3988_v31  ;;  %v2387_v45 = vadd.f32 %v2386_v38, %v4835_v46  ;;  %v2248_v46 = vpop.f32.mrf.mxu0  ;;  %v2642_v27 = vmax.f32 %v2474_v30, 0.0  ;;  %v5961_v30 = vld [vmem:[#allocation18_spill] sm:$0xff] }
 0x2ca   : > { %343 = vst.msk [vmem:[%s4936_s29 + $0xa8] sm:$0xff] %vm321_vm1, %v3988_v31 }
 0x2cb   : > { %344 = vst.msk [vmem:[%s4936_s29 + $0xb0] sm:$0xff] %vm321_vm1, %v3988_v31  ;;  %v2607_v25 = vmax.f32 %v2387_v45, 0.0 }
 0x2cc   : > { %345 = vst.msk [vmem:[%s4936_s29 + $0xb8] sm:$0xff] %vm321_vm1, %v3988_v31  ;;  %v5061_v55 = vpop.permute.xlu0 %1820 }
 0x2cd   : > { %346 = vst.msk [vmem:[%s4936_s29 + $0xc0] sm:$0xff] %vm321_vm1, %v3988_v31  ;;  %v5079_v40 = vpop.permute.xlu2 %1740 }
 0x2ce   : > { %2995 = vmax.xlane.f32.xlu1 %v2640_v23  ;;  %2813 = vmax.xlane.f32.xlu0 %v2549_v2  ;;  %347 = vst.msk [vmem:[%s4936_s29 + $0xc8] sm:$0xff] %vm321_vm1, %v3988_v31  ;;  %v5957_v23 = vld [vmem:[#allocation8_spill] sm:$0xff]  ;;  %v2476_v18 = vpop.f32.mrf.mxu3 }
 0x2cf   : > { %2853 = vmax.xlane.f32.xlu2 %v2569_v8  ;;  %348 = vst.msk [vmem:[%s4936_s29 + $0xd0] sm:$0xff] %vm321_vm1, %v3988_v31  ;;  %v2247_v2 = vadd.f32 %v2246_v22, %v5957_v23  ;;  %v2298_v8 = vpop.f32.mrf.mxu1 }
 0x2d0   : > { %349 = vst.msk [vmem:[%s4936_s29 + $0xd8] sm:$0xff] %vm321_vm1, %v3988_v31  ;;  %v2388_v36 = vpop.f32.mrf.mxu2 }
 0x2d1   : > { %350 = vst.msk [vmem:[%s4936_s29 + $0xe0] sm:$0xff] %vm321_vm1, %v3988_v31 }
 0x2d2   : > { %351 = vst.msk [vmem:[%s4936_s29 + $0xe8] sm:$0xff] %vm321_vm1, %v3988_v31 }
 0x2d3   : > { %352 = vst.msk [vmem:[%s4936_s29 + $0xf0] sm:$0xff] %vm321_vm1, %v3988_v31 }
 0x2d4   : > { %2340 = vmatmul.bf16.gmra.mxu1 %v3730_v3  ;;  %353 = vst.msk [vmem:[%s4936_s29 + $0xf8] sm:$0xff] %vm321_vm1, %v3988_v31  ;;  %v2551_v3 = vmax.f32 %v2247_v2, 0.0 }
 0x2d5   : > { %2430 = vmatmul.bf16.gmra.mxu2 %v3748_v47  ;;  %2520 = vmatmul.bf16.gmra.mxu3 %v3766_v20  ;;  %354 = vst.msk [vmem:[%s4936_s29 + $0x100] sm:$0xff] %vm321_vm1, %v3988_v31  ;;  %v2689_v47 = vld [vmem:[%s4936_s29 + $0xa0] sm:$0xff]  ;;  %v2477_v20 = vadd.f32 %v2476_v18, %v4909_v16  ;;  %v5100_v16 = vpop.permute.xlu1 %1750 }
 0x2d6   : > { %2815 = vmax.xlane.f32.xlu1 %v2550_v43  ;;  %2855 = vmax.xlane.f32.xlu0 %v2570_v28  ;;  %355 = vst.msk [vmem:[%s4936_s29 + $0x108] sm:$0xff] %vm321_vm1, %v3988_v31  ;;  %v2249_v43 = vadd.f32 %v2248_v46, %v5958_v17  ;;  %v5959_v28 = vld [vmem:[#allocation19_spill] sm:$0xff]  ;;  %v2478_v23 = vpop.f32.mrf.mxu3 }
 0x2d7   : > { %2925 = vmax.xlane.f32.xlu2 %v2605_v58  ;;  %356 = vst.msk [vmem:[%s4936_s29 + $0x110] sm:$0xff] %vm321_vm1, %v3988_v31  ;;  %v2299_v58 = vadd.f32 %v2298_v8, %v5959_v28  ;;  %v2301_v5 = vpop.f32.mrf.mxu1  ;;  %v2643_v34 = vmax.f32 %v2477_v20, 0.0  ;;  %v2479_v18 = vadd.f32 %v2478_v23, %v4976_v54  ;;  %v5965_v23 = vld [vmem:[#allocation22_spill] sm:$0xff] }
 0x2d8   : > { %357 = vst.msk [vmem:[%s4936_s29 + $0x118] sm:$0xff] %vm321_vm1, %v3988_v31  ;;  %v2552_v22 = vmax.f32 %v2249_v43, 0.0  ;;  %v2302_v45 = vadd.f32 %v2301_v5, %v5961_v30  ;;  %v2391_v2 = vpop.f32.mrf.mxu2  ;;  %v5964_v30 = vld [vmem:[#allocation10_spill] sm:$0xff] }
 0x2d9   : > { %358 = vst.msk [vmem:[%s4936_s29 + $0x120] sm:$0xff] %vm321_vm1, %v3988_v31  ;;  %v2572_v49 = vmax.f32 %v2299_v58, 0.0  ;;  %v2644_v54 = vmax.f32 %v2479_v18, 0.0 }
 0x2da   : > { %359 = vst.msk [vmem:[%s4936_s29 + $0x128] sm:$0xff] %vm321_vm1, %v3988_v31 }
 0x2db   : > { %360 = vst.msk [vmem:[%s4936_s29 + $0x130] sm:$0xff] %vm321_vm1, %v3988_v31 }
 0x2dc   : > { %361 = vst.msk [vmem:[%s4936_s29 + $0x138] sm:$0xff] %vm321_vm1, %v3988_v31 }
 0x2dd   : > { %362 = vst.msk [vmem:[%s4936_s29 + $0x140] sm:$0xff] %vm321_vm1, %v3988_v31 }
 0x2de   : > { %2857 = vmax.xlane.f32.xlu1 %v2571_v37  ;;  %2927 = vmax.xlane.f32.xlu0 %v2606_v21  ;;  %v2251_v21 = vpop.f32.mrf.mxu0  ;;  %363 = vst.msk [vmem:[%s4936_s29 + $0x148] sm:$0xff] %vm321_vm1, %v3988_v31  ;;  %v5116_v37 = vpop.permute.xlu2 %1755 }
 0x2df   : > { %2997 = vmax.xlane.f32.xlu2 %v2641_v61  ;;  %364 = vst.msk [vmem:[%s4936_s29 + $0x150] sm:$0xff] %vm321_vm1, %v3988_v31  ;;  %v5960_v61 = vld [vmem:[#allocation5_spill] sm:$0xff]  ;;  %v2303_v46 = vpop.f32.mrf.mxu1  ;;  %v2481_v17 = vpop.f32.mrf.mxu3 }
 0x2e0   : > { %365 = vst.msk [vmem:[%s4936_s29 + $0x158] sm:$0xff] %vm321_vm1, %v3988_v31  ;;  %v2252_v38 = vadd.f32 %v2251_v21, %v5960_v61  ;;  %v2393_v28 = vpop.f32.mrf.mxu2 }
 0x2e1   : > { %366 = vst.msk [vmem:[%s4936_s29 + $0x160] sm:$0xff] %vm321_vm1, %v3988_v31 }
 0x2e2   : > { %367 = vst.msk [vmem:[%s4936_s29 + $0x168] sm:$0xff] %vm321_vm1, %v3988_v31  ;;  %v2553_v8 = vmax.f32 %v2252_v38, 0.0 }
 0x2e3   : > { %368 = vst.msk [vmem:[%s4936_s29 + $0x170] sm:$0xff] %vm321_vm1, %v3988_v31 }
 0x2e4   : > { %2345 = vmatmul.bf16.gmra.mxu1 %v3731_v13  ;;  %v2389_v13 = vadd.f32 %v2388_v36, %v4851_v29  ;;  %369 = vst.msk [vmem:[%s4936_s29 + $0x178] sm:$0xff] %vm321_vm1, %v3988_v31  ;;  %v5136_v29 = vpop.permute.xlu1 %1765  ;;  %v2482_v36 = vadd.f32 %v2481_v17, %v5001_v26 }
 0x2e5   : > { %2435 = vmatmul.bf16.gmra.mxu2 %v3749_v10  ;;  %2525 = vmatmul.bf16.gmra.mxu3 %v3767_v32  ;;  %v2573_v10 = vmax.f32 %v2302_v45, 0.0  ;;  %370 = vst.msk [vmem:[%s4936_s29 + $0x180] sm:$0xff] %vm321_vm1, %v3988_v31 }
 0x2e6   : > { %2929 = vmax.xlane.f32.xlu1 %v2607_v25  ;;  %2999 = vmax.xlane.f32.xlu0 %v2642_v27  ;;  %v2608_v32 = vmax.f32 %v2389_v13, 0.0  ;;  %371 = vst.msk [vmem:[%s4936_s29 + $0x188] sm:$0xff] %vm321_vm1, %v3988_v31  ;;  %v2392_v27 = vadd.f32 %v2391_v2, %v4849_v14  ;;  %v5962_v25 = vld [vmem:[#allocation16_spill] sm:$0xff]  ;;  %v5156_v20 = vpop.permute.xlu2 %1770 }
 0x2e7   : > { %2817 = vmax.xlane.f32.xlu2 %v2551_v3  ;;  %372 = vst.msk [vmem:[%s4936_s29 + $0x190] sm:$0xff] %vm321_vm1, %v3988_v31  ;;  %v2304_v3 = vadd.f32 %v2303_v46, %v5962_v25  ;;  %v2483_v61 = vpop.f32.mrf.mxu3 }
 0x2e8   : > { %373 = vst.msk [vmem:[%s4936_s29 + $0x198] sm:$0xff] %vm321_vm1, %v3988_v31  ;;  %v2609_v14 = vmax.f32 %v2392_v27, 0.0  ;;  %v2484_v38 = vadd.f32 %v2483_v61, %v4914_v15  ;;  %v2396_v25 = vpop.f32.mrf.mxu2 }
 0x2e9   : > { %v2838_v42 = vpop.xlane.xlu0 %2837  ;;  %374 = vst.msk [vmem:[%s4936_s29 + $0x1a0] sm:$0xff] %vm321_vm1, %v3988_v31  ;;  %v2574_v43 = vmax.f32 %v2304_v3, 0.0  ;;  %v5966_v3 = vld [vmem:[#allocation21_spill] sm:$0xff] }
 0x2ea   : > { %v3073_v56 = vmax.f32 %v2689_v47, %v2838_v42  ;;  %v2253_v47 = vpop.f32.mrf.mxu0  ;;  %375 = vst.msk [vmem:[%s4936_s29 + $0x1a8] sm:$0xff] %vm321_vm1, %v3988_v31  ;;  %v2394_v42 = vadd.f32 %v2393_v28, %v4841_v52  ;;  %v2645_v52 = vmax.f32 %v2482_v36, 0.0  ;;  %v2646_v15 = vmax.f32 %v2484_v38, 0.0  ;;  %v5968_v38 = vld [vmem:[#allocation17_spill] sm:$0xff] }
 0x2eb   : > { %376 = vst.msk [vmem:[%s4936_s29 + $0x1b0] sm:$0xff] %vm321_vm1, %v3988_v31 }
 0x2ec   : > { %3202 = vst.msk [vmem:[%s4936_s29 + $0xa0] sm:$0xff] %vm321_vm1, %v3073_v56  ;;  %v5173_v58 = vpop.permute.xlu1 %1780  ;;  %v5963_v56 = vld [vmem:[#allocation11_spill] sm:$0xff] }
 0x2ed   : > { %377 = vst.msk [vmem:[%s4936_s29 + $0x1b8] sm:$0xff] %vm321_vm1, %v3988_v31  ;;  %v2254_v5 = vadd.f32 %v2253_v47, %v5963_v56  ;;  %v5967_v47 = vld [vmem:[#allocation6_spill] sm:$0xff] }
 0x2ee   : > { %3001 = vmax.xlane.f32.xlu1 %v2643_v34  ;;  %2819 = vmax.xlane.f32.xlu0 %v2552_v22  ;;  %378 = vst.msk [vmem:[%s4936_s29 + $0x1c0] sm:$0xff] %vm321_vm1, %v3988_v31  ;;  %v2306_v22 = vpop.f32.mrf.mxu1  ;;  %v5193_v26 = vpop.permute.xlu2 %1785 }
 0x2ef   : > { %2859 = vmax.xlane.f32.xlu2 %v2572_v49  ;;  %379 = vst.msk [vmem:[%s4936_s29 + $0x1c8] sm:$0xff] %vm321_vm1, %v3988_v31  ;;  %v2610_v49 = vmax.f32 %v2394_v42, 0.0  ;;  %v2554_v21 = vmax.f32 %v2254_v5, 0.0  ;;  %v2307_v2 = vadd.f32 %v2306_v22, %v5965_v23  ;;  %v2486_v36 = vpop.f32.mrf.mxu3 }
 0x2f0   : > { %380 = vst.msk [vmem:[%s4936_s29 + $0x1d0] sm:$0xff] %vm321_vm1, %v3988_v31  ;;  %v2487_v56 = vadd.f32 %v2486_v36, %v5015_v60  ;;  %v2398_v22 = vpop.f32.mrf.mxu2 }
 0x2f1   : > { %381 = vst.msk [vmem:[%s4936_s29 + $0x1d8] sm:$0xff] %vm321_vm1, %v3988_v31 }
 0x2f2   : > { %382 = vst.msk [vmem:[%s4936_s29 + $0x1e0] sm:$0xff] %vm321_vm1, %v3988_v31  ;;  %v2256_v34 = vpop.f32.mrf.mxu0 }
 0x2f3   : > { %383 = vst.msk [vmem:[%s4936_s29 + $0x1e8] sm:$0xff] %vm321_vm1, %v3988_v31  ;;  %v2257_v45 = vadd.f32 %v2256_v34, %v5964_v30  ;;  %v2647_v34 = vmax.f32 %v2487_v56, 0.0 }
 0x2f4   : > { %384 = vst.msk [vmem:[%s4936_s29 + $0x1f0] sm:$0xff] %vm321_vm1, %v3988_v31  ;;  %v5212_v13 = vpop.permute.xlu1 %1795 }
 0x2f5   : > { %385 = vst.msk [vmem:[%s4936_s29 + $0x1f8] sm:$0xff] %vm321_vm1, %v3988_v31 }
 0x2f6   : > { %2821 = vmax.xlane.f32.xlu1 %v2553_v8  ;;  %2861 = vmax.xlane.f32.xlu0 %v2573_v10  ;;  %386 = vst.msk [vmem:[%s4936_s29 + $0x200] sm:$0xff] %vm321_vm1, %v3988_v31  ;;  %v2555_v8 = vmax.f32 %v2257_v45, 0.0  ;;  %v2575_v10 = vmax.f32 %v2307_v2, 0.0  ;;  %v5230_v27 = vpop.permute.xlu2 %1800  ;;  %v5323_v45 = vpop.xlane.xlu0 %2909  ;;  %v3732_v2 = vld [vmem:[#allocation2 + $0xd0] sm:$0xff] }
 0x2f7   : > { %2931 = vmax.xlane.f32.xlu2 %v2608_v32  ;;  %387 = vst.msk [vmem:[%s4936_s29 + $0x208] sm:$0xff] %vm321_vm1, %v3988_v31  ;;  %v2308_v32 = vpop.f32.mrf.mxu1  ;;  %2350 = vmatmul.bf16.gmra.mxu1 %v3732_v2 }
 0x2f8   : > { %388 = vst.msk [vmem:[%s4936_s29 + $0x210] sm:$0xff] %vm321_vm1, %v3988_v31  ;;  %v2309_v18 = vadd.f32 %v2308_v32, %v5966_v3 }
 0x2f9   : > { %389 = vst.msk [vmem:[%s4936_s29 + $0x218] sm:$0xff] %vm321_vm1, %v3988_v31 }
 0x2fa   : > { %390 = vst.msk [vmem:[%s4936_s29 + $0x220] sm:$0xff] %vm321_vm1, %v3988_v31  ;;  %v2258_v46 = vpop.f32.mrf.mxu0 }
 0x2fb   : > { %391 = vst.msk [vmem:[%s4936_s29 + $0x228] sm:$0xff] %vm321_vm1, %v3988_v31  ;;  %v2259_v17 = vadd.f32 %v2258_v46, %v5967_v47  ;;  %v2401_v47 = vpop.f32.mrf.mxu2 }
 0x2fc   : > { %392 = vst.msk [vmem:[%s4936_s29 + $0x230] sm:$0xff] %vm321_vm1, %v3988_v31 }
 0x2fd   : > { %393 = vst.msk [vmem:[%s4936_s29 + $0x238] sm:$0xff] %vm321_vm1, %v3988_v31 }
 0x2fe   : > { %2863 = vmax.xlane.f32.xlu1 %v2574_v43  ;;  %2933 = vmax.xlane.f32.xlu0 %v2609_v14  ;;  %394 = vst.msk [vmem:[%s4936_s29 + $0x240] sm:$0xff] %vm321_vm1, %v3988_v31  ;;  %v2397_v14 = vadd.f32 %v2396_v25, %v4857_v19  ;;  %v5250_v43 = vpop.permute.xlu1 %1810  ;;  %v2556_v19 = vmax.f32 %v2259_v17, 0.0  ;;  %v5267_v42 = vpop.permute.xlu2 %1815 }
 0x2ff   : > { %3003 = vmax.xlane.f32.xlu2 %v2644_v54  ;;  %395 = vst.msk [vmem:[%s4936_s29 + $0x248] sm:$0xff] %vm321_vm1, %v3988_v31  ;;  %v2576_v54 = vmax.f32 %v2309_v18, 0.0 }
 0x300   : > { %396 = vst.msk [vmem:[%s4936_s29 + $0x250] sm:$0xff] %vm321_vm1, %v3988_v31  ;;  %v2611_v28 = vmax.f32 %v2397_v14, 0.0  ;;  %v2402_v14 = vadd.f32 %v2401_v47, %v4847_v7 }
 0x301   : > { %397 = vst.msk [vmem:[%s4936_s29 + $0x258] sm:$0xff] %vm321_vm1, %v3988_v31 }
 0x302   : > { %398 = vst.msk [vmem:[%s4936_s29 + $0x260] sm:$0xff] %vm321_vm1, %v3988_v31  ;;  %v2261_v23 = vpop.f32.mrf.mxu0  ;;  %v2613_v7 = vmax.f32 %v2402_v14, 0.0 }
 0x303   : > { %399 = vst.msk [vmem:[%s4936_s29 + $0x268] sm:$0xff] %vm321_vm1, %v3988_v31 }
 0x304   : > { %400 = vst.msk [vmem:[%s4936_s29 + $0x270] sm:$0xff] %vm321_vm1, %v3988_v31 }
 0x305   : > { %401 = vst.msk [vmem:[%s4936_s29 + $0x278] sm:$0xff] %vm321_vm1, %v3988_v31 }
 0x306   : > { %2935 = vmax.xlane.f32.xlu1 %v2610_v49  ;;  %3005 = vmax.xlane.f32.xlu0 %v2645_v52  ;;  %402 = vst.msk [vmem:[%s4936_s29 + $0x280] sm:$0xff] %vm321_vm1, %v3988_v31  ;;  %v5285_v5 = vpop.permute.xlu1 %1825  ;;  %v5299_v60 = vpop.xlane.xlu2 %2797  ;;  %v2399_v49 = vadd.f32 %v2398_v22, %v4855_v63 }
 0x307   : > { %2823 = vmax.xlane.f32.xlu2 %v2554_v21  ;;  %403 = vst.msk [vmem:[%s4936_s29 + $0x288] sm:$0xff] %vm321_vm1, %v3988_v31  ;;  %v2488_v52 = vpop.f32.mrf.mxu3  ;;  %v2311_v21 = vpop.f32.mrf.mxu1 }
 0x308   : > { %404 = vst.msk [vmem:[%s4936_s29 + $0x290] sm:$0xff] %vm321_vm1, %v3988_v31  ;;  %v2312_v30 = vadd.f32 %v2311_v21, %v5968_v38  ;;  %v2612_v63 = vmax.f32 %v2399_v49, 0.0  ;;  %v2489_v18 = vadd.f32 %v2488_v52, %v5040_v0  ;;  %v2403_v21 = vpop.f32.mrf.mxu2 }
 0x309   : > { %405 = vst.msk [vmem:[%s4936_s29 + $0x298] sm:$0xff] %vm321_vm1, %v3988_v31  ;;  %v2404_v2 = vadd.f32 %v2403_v21, %v4863_v35 }
 0x30a   : > { %406 = vst.msk [vmem:[%s4936_s29 + $0x2a0] sm:$0xff] %vm321_vm1, %v3988_v31  ;;  %v2577_v46 = vmax.f32 %v2312_v30, 0.0  ;;  %v2263_v36 = vpop.f32.mrf.mxu0  ;;  %v2648_v56 = vmax.f32 %v2489_v18, 0.0  ;;  %v3733_v30 = vld [vmem:[#allocation2 + $0xd8] sm:$0xff] }
 0x30b   : > { %407 = vst.msk [vmem:[%s4936_s29 + $0x2a8] sm:$0xff] %vm321_vm1, %v3988_v31  ;;  %2355 = vmatmul.bf16.gmra.mxu1 %v3733_v30  ;;  %v5971_v18 = vld [vmem:[#allocation24_spill] sm:$0xff] }
 0x30c   : > { %408 = vst.msk [vmem:[%s4936_s29 + $0x2b0] sm:$0xff] %vm321_vm1, %v3988_v31 }
 0x30d   : > { %409 = vst.msk [vmem:[%s4936_s29 + $0x2b8] sm:$0xff] %vm321_vm1, %v3988_v31 }
 0x30e   : > { %3007 = vmax.xlane.f32.xlu1 %v2646_v15  ;;  %2825 = vmax.xlane.f32.xlu0 %v2555_v8  ;;  %410 = vst.msk [vmem:[%s4936_s29 + $0x2c0] sm:$0xff] %vm321_vm1, %v3988_v31  ;;  %v5317_v61 = vpop.xlane.xlu1 %2839  ;;  %v3750_v15 = vld [vmem:[#allocation2 + $0x160] sm:$0xff]  ;;  %v3768_v8 = vld [vmem:[#allocation2 + $0x1f0] sm:$0xff]  ;;  %v5332_v25 = vpop.xlane.xlu2 %2841 }
 0x30f   : > { %2865 = vmax.xlane.f32.xlu2 %v2575_v10  ;;  %411 = vst.msk [vmem:[%s4936_s29 + $0x2c8] sm:$0xff] %vm321_vm1, %v3988_v31  ;;  %v5969_v10 = vld [vmem:[#allocation13_spill] sm:$0xff]  ;;  %2440 = vmatmul.bf16.gmra.mxu2 %v3750_v15  ;;  %v2491_v17 = vpop.f32.mrf.mxu3 }
 0x310   : > { %412 = vst.msk [vmem:[%s4936_s29 + $0x2d0] sm:$0xff] %vm321_vm1, %v3988_v31  ;;  %v2262_v32 = vadd.f32 %v2261_v23, %v5969_v10  ;;  %2530 = vmatmul.bf16.gmra.mxu3 %v3768_v8  ;;  %v2492_v49 = vadd.f32 %v2491_v17, %v4918_v24  ;;  %v3751_v23 = vld [vmem:[#allocation2 + $0x168] sm:$0xff]  ;;  %v5972_v17 = vld [vmem:[#allocation9_spill] sm:$0xff] }
 0x311   : > { %413 = vst.msk [vmem:[%s4936_s29 + $0x2d8] sm:$0xff] %vm321_vm1, %v3988_v31 }
 0x312   : > { %414 = vst.msk [vmem:[%s4936_s29 + $0x2e0] sm:$0xff] %vm321_vm1, %v3988_v31  ;;  %v2557_v3 = vmax.f32 %v2262_v32, 0.0  ;;  %v2649_v35 = vmax.f32 %v2492_v49, 0.0  ;;  %v2266_v32 = vpop.f32.mrf.mxu0  ;;  %v2725_v49 = vld [vmem:[%s4936_s29 + $0x1c0] sm:$0xff] }
 0x313   : > { %415 = vst.msk [vmem:[%s4936_s29 + $0x2e8] sm:$0xff] %vm321_vm1, %v3988_v31  ;;  %v2267_v14 = vadd.f32 %v2266_v32, %v5972_v17 }
 0x314   : > { %416 = vst.msk [vmem:[%s4936_s29 + $0x2f0] sm:$0xff] %vm321_vm1, %v3988_v31 }
 0x315   : > { %417 = vst.msk [vmem:[%s4936_s29 + $0x2f8] sm:$0xff] %vm321_vm1, %v3988_v31  ;;  %v2559_v30 = vmax.f32 %v2267_v14, 0.0 }
 0x316   : > { %2827 = vmax.xlane.f32.xlu1 %v2556_v19  ;;  %2867 = vmax.xlane.f32.xlu0 %v2576_v54  ;;  %418 = vst.msk [vmem:[%s4936_s29 + $0x300] sm:$0xff] %vm321_vm1, %v3988_v31  ;;  %v2313_v54 = vpop.f32.mrf.mxu1  ;;  %v5351_v19 = vpop.xlane.xlu1 %2911 }
 0x317   : > { %2937 = vmax.xlane.f32.xlu2 %v2611_v28  ;;  %419 = vst.msk [vmem:[%s4936_s29 + $0x308] sm:$0xff] %vm321_vm1, %v3988_v31  ;;  %v2314_v0 = vadd.f32 %v2313_v54, %v4769_v41  ;;  %v5357_v28 = vpop.xlane.xlu0 %2981  ;;  %v5970_v41 = vld [vmem:[#allocation12_spill] sm:$0xff]  ;;  %v2493_v38 = vpop.f32.mrf.mxu3 }
 0x318   : > { %420 = vst.msk [vmem:[%s4936_s29 + $0x310] sm:$0xff] %vm321_vm1, %v3988_v31  ;;  %v2264_v52 = vadd.f32 %v2263_v36, %v5970_v41  ;;  %v2406_v54 = vpop.f32.mrf.mxu2  ;;  %v2669_v36 = vld [vmem:[%s4936_s29] sm:$0xff]  ;;  %v2690_v41 = vld [vmem:[%s4936_s29 + $0xa8] sm:$0xff] }
 0x319   : > { %421 = vst.msk [vmem:[%s4936_s29 + $0x318] sm:$0xff] %vm321_vm1, %v3988_v31  ;;  %v2578_v22 = vmax.f32 %v2314_v0, 0.0 }
 0x31a   : > { %422 = vst.msk [vmem:[%s4936_s29 + $0x320] sm:$0xff] %vm321_vm1, %v3988_v31  ;;  %v2558_v10 = vmax.f32 %v2264_v52, 0.0 }
 0x31b   : > { %423 = vst.msk [vmem:[%s4936_s29 + $0x328] sm:$0xff] %vm321_vm1, %v3988_v31 }
 0x31c   : > { %424 = vst.msk [vmem:[%s4936_s29 + $0x330] sm:$0xff] %vm321_vm1, %v3988_v31 }
 0x31d   : > { %425 = vst.msk [vmem:[%s4936_s29 + $0x338] sm:$0xff] %vm321_vm1, %v3988_v31 }
 0x31e   : > { %2939 = vmax.xlane.f32.xlu0 %v2612_v63  ;;  %2869 = vmax.xlane.f32.xlu1 %v2577_v46  ;;  %426 = vst.msk [vmem:[%s4936_s29 + $0x340] sm:$0xff] %vm321_vm1, %v3988_v31  ;;  %v2316_v15 = vpop.f32.mrf.mxu1  ;;  %v5385_v8 = vpop.xlane.xlu1 %2983  ;;  %v3769_v63 = vld [vmem:[#allocation2 + $0x1f8] sm:$0xff] }
 0x31f   : > { %3009 = vmax.xlane.f32.xlu2 %v2647_v34  ;;  %427 = vst.msk [vmem:[%s4936_s29 + $0x348] sm:$0xff] %vm321_vm1, %v3988_v31  ;;  %v5365_v34 = vpop.xlane.xlu2 %2913  ;;  %v5390_v24 = vpop.xlane.xlu0 %2799  ;;  %2445 = vmatmul.bf16.gmra.mxu2 %v3751_v23  ;;  %v2317_v47 = vadd.f32 %v2316_v15, %v5971_v18  ;;  %v2761_v15 = vld [vmem:[%s4936_s29 + $0x2e0] sm:$0xff]  ;;  %v2670_v18 = vld [vmem:[%s4936_s29 + $0x8] sm:$0xff] }
 0x320   : > { %428 = vst.msk [vmem:[%s4936_s29 + $0x350] sm:$0xff] %vm321_vm1, %v3988_v31  ;;  %2535 = vmatmul.bf16.gmra.mxu3 %v3769_v63  ;;  %v5414_v0 = vpop.f32.mrf.mxu3  ;;  %v2408_v14 = vpop.f32.mrf.mxu2 }
 0x321   : > { %429 = vst.msk [vmem:[%s4936_s29 + $0x358] sm:$0xff] %vm321_vm1, %v3988_v31  ;;  %v2579_v21 = vmax.f32 %v2317_v47, 0.0  ;;  %v5973_v47 = vld [vmem:[#allocation20_spill] sm:$0xff] }
 0x322   : > { %430 = vst.msk [vmem:[%s4936_s29 + $0x360] sm:$0xff] %vm321_vm1, %v3988_v31 }
 0x323   : > { %431 = vst.msk [vmem:[%s4936_s29 + $0x368] sm:$0xff] %vm321_vm1, %v3988_v31 }
 0x324   : > { %432 = vst.msk [vmem:[%s4936_s29 + $0x370] sm:$0xff] %vm321_vm1, %v3988_v31 }
 0x325   : > { %433 = vst.msk [vmem:[%s4936_s29 + $0x378] sm:$0xff] %vm321_vm1, %v3988_v31 }
 0x326   : > { %3011 = vmax.xlane.f32.xlu0 %v2648_v56  ;;  %2941 = vmax.xlane.f32.xlu1 %v2613_v7  ;;  %434 = vst.msk [vmem:[%s4936_s29 + $0x380] sm:$0xff] %vm321_vm1, %v3988_v31  ;;  %v2494_v56 = vadd.f32 %v2493_v38, %v5054_v62  ;;  %v2318_v7 = vpop.f32.mrf.mxu1  ;;  %v3053_v62 = vmax.f32 %v2669_v36, %v5299_v60  ;;  %v2726_v38 = vld [vmem:[%s4936_s29 + $0x1c8] sm:$0xff] }
 0x327   : > { %2829 = vmax.xlane.f32.xlu2 %v2557_v3  ;;  %435 = vst.msk [vmem:[%s4936_s29 + $0x388] sm:$0xff] %vm321_vm1, %v3988_v31  ;;  %v5398_v46 = vpop.xlane.xlu2 %2985  ;;  %v2614_v3 = vmax.f32 %v2404_v2, 0.0  ;;  %v5427_v52 = vpop.xlane.xlu0 %2843  ;;  %v3074_v2 = vmax.f32 %v2690_v41, %v5317_v61  ;;  %v3109_v60 = vmax.f32 %v2725_v49, %v5323_v45  ;;  %v3110_v32 = vmax.f32 %v2726_v38, %v5351_v19  ;;  %v2762_v61 = vld [vmem:[%s4936_s29 + $0x2e8] sm:$0xff] }
 0x328   : > { %436 = vst.msk [vmem:[%s4936_s29 + $0x390] sm:$0xff] %vm321_vm1, %v3988_v31  ;;  %v2650_v63 = vmax.f32 %v2494_v56, 0.0  ;;  %v3145_v45 = vmax.f32 %v2761_v15, %v5357_v28  ;;  %v2319_v17 = vadd.f32 %v2318_v7, %v5973_v47  ;;  %v3146_v28 = vmax.f32 %v2762_v61, %v5385_v8  ;;  %v2671_v7 = vld [vmem:[%s4936_s29 + $0x10] sm:$0xff]  ;;  %v2411_v61 = vpop.f32.mrf.mxu2  ;;  %v2764_v47 = vld [vmem:[%s4936_s29 + $0x2f8] sm:$0xff] }
 0x329   : > { %437 = vst.msk [vmem:[%s4936_s29 + $0x398] sm:$0xff] %vm321_vm1, %v3988_v31 }
 0x32a   : > { %438 = vst.msk [vmem:[%s4936_s29 + $0x3a0] sm:$0xff] %vm321_vm1, %v3988_v31 }
 0x32b   : > { %439 = vst.msk [vmem:[%s4936_s29 + $0x3a8] sm:$0xff] %vm321_vm1, %v3988_v31 }
 0x32c   : > { %440 = vst.msk [vmem:[%s4936_s29 + $0x3b0] sm:$0xff] %vm321_vm1, %v3988_v31 }
 0x32d   : > { %441 = vst.msk [vmem:[%s4936_s29 + $0x3b8] sm:$0xff] %vm321_vm1, %v3988_v31 }
 0x32e   : > { %2831 = vmax.xlane.f32.xlu0 %v2558_v10  ;;  %3013 = vmax.xlane.f32.xlu1 %v2649_v35  ;;  %442 = vst.msk [vmem:[%s4936_s29 + $0x3c0] sm:$0xff] %vm321_vm1, %v3988_v31  ;;  %v2691_v10 = vld [vmem:[%s4936_s29 + $0xb0] sm:$0xff]  ;;  %v2268_v35 = vpop.f32.mrf.mxu0  ;;  %v2321_v56 = vpop.f32.mrf.mxu1 }
 0x32f   : > { %2871 = vmax.xlane.f32.xlu2 %v2578_v22  ;;  %443 = vst.msk [vmem:[%s4936_s29 + $0x3c8] sm:$0xff] %vm321_vm1, %v3988_v31  ;;  %v5421_v22 = vpop.xlane.xlu1 %2801  ;;  %v5438_v23 = vpop.xlane.xlu2 %2803  ;;  %v3075_v19 = vmax.f32 %v2691_v10, %v5332_v25  ;;  %v3054_v25 = vmax.f32 %v2670_v18, %v5390_v24  ;;  %v2728_v10 = vld [vmem:[%s4936_s29 + $0x1d8] sm:$0xff] }
 0x330   : > { %444 = vst.msk [vmem:[%s4936_s29 + $0x3d0] sm:$0xff] %vm321_vm1, %v3988_v31  ;;  %v2916_v49 = vpop.xlane.xlu0 %2915 }
 0x331   : > { %445 = vst.msk [vmem:[%s4936_s29 + $0x3d8] sm:$0xff] %vm321_vm1, %v3988_v31 }
 0x332   : > { %446 = vst.msk [vmem:[%s4936_s29 + $0x3e0] sm:$0xff] %vm321_vm1, %v3988_v31 }
 0x333   : > { %447 = vst.msk [vmem:[%s4936_s29 + $0x3e8] sm:$0xff] %vm321_vm1, %v3988_v31 }
 0x334   : > { %448 = vst.msk [vmem:[%s4936_s29 + $0x3f0] sm:$0xff] %vm321_vm1, %v3988_v31 }
 0x335   : > { %449 = vst.msk [vmem:[%s4936_s29 + $0x3f8] sm:$0xff] %vm321_vm1, %v3988_v31  ;;  %v5461_v31 = vpop.f32.mrf.mxu3 }
 0x336   : > { %2873 = vmax.xlane.f32.xlu0 %v2579_v21  ;;  %2833 = vmax.xlane.f32.xlu1 %v2559_v30  ;;  %3182 = vst.msk [vmem:[%s4936_s29] sm:$0xff] %vm321_vm1, %v3053_v62  ;;  %v2692_v62 = vld [vmem:[%s4936_s29 + $0xb8] sm:$0xff]  ;;  %v2580_v30 = vmax.f32 %v2319_v17, 0.0 }
 0x337   : > { %2943 = vmax.xlane.f32.xlu2 %v2614_v3  ;;  %v2407_v3 = vadd.f32 %v2406_v54, %v4861_v44  ;;  %3203 = vst.msk [vmem:[%s4936_s29 + $0xa8] sm:$0xff] %vm321_vm1, %v3074_v2  ;;  %v2727_v44 = vld [vmem:[%s4936_s29 + $0x1d0] sm:$0xff]  ;;  %v5974_v54 = vld [vmem:[#allocation14_spill] sm:$0xff]  ;;  %v2846_v41 = vpop.xlane.xlu1 %2845  ;;  %v2806_v8 = vpop.xlane.xlu2 %2805  ;;  %v3076_v24 = vmax.f32 %v2692_v62, %v5427_v52 }
 0x338   : > { %v2269_v36 = vadd.f32 %v2268_v35, %v5974_v54  ;;  %3238 = vst.msk [vmem:[%s4936_s29 + $0x1c0] sm:$0xff] %vm321_vm1, %v3109_v60  ;;  %v3111_v38 = vmax.f32 %v2727_v44, %v5365_v34  ;;  %v2763_v2 = vld [vmem:[%s4936_s29 + $0x2f0] sm:$0xff]  ;;  %v2693_v60 = vld [vmem:[%s4936_s29 + $0xc0] sm:$0xff]  ;;  %v2497_v34 = vadd.f32 %v5414_v0, %v5079_v40  ;;  %v2322_v40 = vadd.f32 %v2321_v56, %v4783_v33  ;;  %v2988_v17 = vpop.xlane.xlu0 %2987  ;;  %v2694_v54 = vld [vmem:[%s4936_s29 + $0xc8] sm:$0xff] }
 0x339   : > { %3239 = vst.msk [vmem:[%s4936_s29 + $0x1c8] sm:$0xff] %vm321_vm1, %v3110_v32  ;;  %v2615_v21 = vmax.f32 %v2407_v3, 0.0  ;;  %v3147_v35 = vmax.f32 %v2763_v2, %v5398_v46  ;;  %v2409_v32 = vadd.f32 %v2408_v14, %v4853_v6  ;;  %v3077_v52 = vmax.f32 %v2693_v60, %v2846_v41  ;;  %v2323_v46 = vpop.f32.mrf.mxu1  ;;  %v2673_v14 = vld [vmem:[%s4936_s29 + $0x20] sm:$0xff] }
 0x33a   : > { %3274 = vst.msk [vmem:[%s4936_s29 + $0x2e0] sm:$0xff] %vm321_vm1, %v3145_v45  ;;  %v2560_v15 = vmax.f32 %v2269_v36, 0.0  ;;  %v2729_v45 = vld [vmem:[%s4936_s29 + $0x1e0] sm:$0xff]  ;;  %v3112_v0 = vmax.f32 %v2728_v10, %v2916_v49  ;;  %v3148_v36 = vmax.f32 %v2764_v47, %v2988_v17  ;;  %v2581_v41 = vmax.f32 %v2322_v40, 0.0 }
 0x33b   : > { %3204 = vst.msk [vmem:[%s4936_s29 + $0xb0] sm:$0xff] %vm321_vm1, %v3075_v19  ;;  %v2651_v19 = vmax.f32 %v2497_v34, 0.0  ;;  %v2616_v33 = vmax.f32 %v2409_v32, 0.0  ;;  %v2765_v49 = vld [vmem:[%s4936_s29 + $0x300] sm:$0xff] }
 0x33c   : > { %3275 = vst.msk [vmem:[%s4936_s29 + $0x2e8] sm:$0xff] %vm321_vm1, %v3146_v28 }
 0x33d   : > { %3183 = vst.msk [vmem:[%s4936_s29 + $0x8] sm:$0xff] %vm321_vm1, %v3054_v25  ;;  %v2501_v3 = vpop.f32.mrf.mxu3  ;;  %v2499_v25 = vadd.f32 %v5461_v31, %v4923_v39  ;;  %v2730_v39 = vld [vmem:[%s4936_s29 + $0x1e8] sm:$0xff] }
 0x33e   : > { %2945 = vmax.xlane.f32.xlu0 %v2615_v21  ;;  %2875 = vmax.xlane.f32.xlu1 %v2580_v30  ;;  %3240 = vst.msk [vmem:[%s4936_s29 + $0x1d0] sm:$0xff] %vm321_vm1, %v3111_v38  ;;  %v2413_v21 = vpop.f32.mrf.mxu2  ;;  %v2674_v38 = vld [vmem:[%s4936_s29 + $0x28] sm:$0xff]  ;;  %v2412_v30 = vadd.f32 %v2411_v61, %v4869_v53  ;;  %v2502_v40 = vadd.f32 %v2501_v3, %v5100_v16  ;;  %v2696_v3 = vld [vmem:[%s4936_s29 + $0xd8] sm:$0xff] }
 0x33f   : > { %3015 = vmax.xlane.f32.xlu2 %v2650_v63  ;;  %v3055_v63 = vmax.f32 %v2671_v7, %v5421_v22  ;;  %v2672_v22 = vld [vmem:[%s4936_s29 + $0x18] sm:$0xff]  ;;  %v2918_v18 = vpop.xlane.xlu1 %2917  ;;  %3205 = vst.msk [vmem:[%s4936_s29 + $0xb8] sm:$0xff] %vm321_vm1, %v3076_v24  ;;  %v2848_v56 = vpop.xlane.xlu2 %2847  ;;  %v2324_v7 = vadd.f32 %v2323_v46, %v4774_v48  ;;  %v2652_v60 = vmax.f32 %v2499_v25, 0.0  ;;  %v2414_v34 = vadd.f32 %v2413_v21, %v4867_v1  ;;  %v2766_v1 = vld [vmem:[%s4936_s29 + $0x308] sm:$0xff] }
 0x340   : > { %v3056_v6 = vmax.f32 %v2672_v22, %v5438_v23  ;;  %3276 = vst.msk [vmem:[%s4936_s29 + $0x2f0] sm:$0xff] %vm321_vm1, %v3147_v35  ;;  %v3113_v44 = vmax.f32 %v2729_v45, %v2918_v18  ;;  %v3057_v23 = vmax.f32 %v2673_v14, %v2806_v8  ;;  %v3078_v28 = vmax.f32 %v2694_v54, %v2848_v56  ;;  %v2675_v35 = vld [vmem:[%s4936_s29 + $0x30] sm:$0xff] }
 0x341   : > { %3184 = vst.msk [vmem:[%s4936_s29 + $0x10] sm:$0xff] %vm321_vm1, %v3055_v63  ;;  %v2326_v48 = vpop.f32.mrf.mxu1  ;;  %v2582_v31 = vmax.f32 %v2324_v7, 0.0  ;;  %v2617_v10 = vmax.f32 %v2412_v30, 0.0  ;;  %v5975_v22 = vld [vmem:[#allocation23_spill] sm:$0xff] }
 0x342   : > { %3206 = vst.msk [vmem:[%s4936_s29 + $0xc0] sm:$0xff] %vm321_vm1, %v3077_v52  ;;  %v2327_v32 = vadd.f32 %v2326_v48, %v5975_v22  ;;  %v2695_v45 = vld [vmem:[%s4936_s29 + $0xd0] sm:$0xff] }
 0x343   : > { %3241 = vst.msk [vmem:[%s4936_s29 + $0x1d8] sm:$0xff] %vm321_vm1, %v3112_v0 }
 0x344   : > { %3185 = vst.msk [vmem:[%s4936_s29 + $0x18] sm:$0xff] %vm321_vm1, %v3056_v6  ;;  %v2618_v6 = vmax.f32 %v2414_v34, 0.0  ;;  %v2583_v14 = vmax.f32 %v2327_v32, 0.0 }
 0x345   : > { %3242 = vst.msk [vmem:[%s4936_s29 + $0x1e0] sm:$0xff] %vm321_vm1, %v3113_v44  ;;  %v2503_v62 = vpop.f32.mrf.mxu3  ;;  %v2653_v44 = vmax.f32 %v2502_v40, 0.0 }
 0x346   : > { %3017 = vmax.xlane.f32.xlu0 %v2651_v19  ;;  %2947 = vmax.xlane.f32.xlu1 %v2616_v33  ;;  %3277 = vst.msk [vmem:[%s4936_s29 + $0x2f8] sm:$0xff] %vm321_vm1, %v3148_v36  ;;  %v2416_v52 = vpop.f32.mrf.mxu2  ;;  %v2504_v16 = vadd.f32 %v2503_v62, %v5116_v37  ;;  %v2676_v37 = vld [vmem:[%s4936_s29 + $0x38] sm:$0xff] }
 0x347   : > { %2835 = vmax.xlane.f32.xlu2 %v2560_v15  ;;  %3186 = vst.msk [vmem:[%s4936_s29 + $0x20] sm:$0xff] %vm321_vm1, %v3057_v23  ;;  %v2990_v2 = vpop.xlane.xlu1 %2989  ;;  %v2808_v15 = vpop.xlane.xlu0 %2807  ;;  %v2417_v33 = vadd.f32 %v2416_v52, %v4859_v59 }
 0x348   : > { %v3149_v8 = vmax.f32 %v2765_v49, %v2990_v2  ;;  %3207 = vst.msk [vmem:[%s4936_s29 + $0xc8] sm:$0xff] %vm321_vm1, %v3078_v28  ;;  %v3058_v63 = vmax.f32 %v2674_v38, %v2808_v15  ;;  %v2920_v24 = vpop.xlane.xlu2 %2919  ;;  %v2654_v21 = vmax.f32 %v2504_v16, 0.0  ;;  %v2732_v2 = vld [vmem:[%s4936_s29 + $0x1f8] sm:$0xff]  ;;  %v2733_v16 = vld [vmem:[%s4936_s29 + $0x200] sm:$0xff] }
 0x349   : > { %v3114_v53 = vmax.f32 %v2730_v39, %v2920_v24  ;;  %v2328_v0 = vpop.f32.mrf.mxu1  ;;  %v2619_v38 = vmax.f32 %v2417_v33, 0.0 }
 0x34a   : > { %3278 = vst.msk [vmem:[%s4936_s29 + $0x300] sm:$0xff] %vm321_vm1, %v3149_v8  ;;  %v2329_v23 = vadd.f32 %v2328_v0, %v4799_v50  ;;  %v2768_v0 = vld [vmem:[%s4936_s29 + $0x318] sm:$0xff] }
 0x34b   : > { %3187 = vst.msk [vmem:[%s4936_s29 + $0x28] sm:$0xff] %vm321_vm1, %v3058_v63  ;;  %v5976_v63 = vld [vmem:[#allocation39_spill] sm:$0xff] }
 0x34c   : > { %3243 = vst.msk [vmem:[%s4936_s29 + $0x1e8] sm:$0xff] %vm321_vm1, %v3114_v53  ;;  %v2584_v30 = vmax.f32 %v2329_v23, 0.0 }
 0x34d   : > { %v2506_v61 = vpop.f32.mrf.mxu3 }
 0x34e   : > { %2879 = vmax.xlane.f32.xlu0 %v2582_v31  ;;  %3019 = vmax.xlane.f32.xlu1 %v2652_v60  ;;  %v2418_v36 = vpop.f32.mrf.mxu2  ;;  %v2507_v8 = vadd.f32 %v2506_v61, %v4930_v51  ;;  %v2767_v31 = vld [vmem:[%s4936_s29 + $0x310] sm:$0xff] }
 0x34f   : > { %2877 = vmax.xlane.f32.xlu2 %v2581_v41  ;;  %v2810_v46 = vpop.xlane.xlu1 %2809  ;;  %v2850_v47 = vpop.xlane.xlu0 %2849  ;;  %v2731_v41 = vld [vmem:[%s4936_s29 + $0x1f0] sm:$0xff]  ;;  %v2419_v60 = vadd.f32 %v2418_v36, %v5976_v63 }
 0x350   : > { %v3059_v18 = vmax.f32 %v2675_v35, %v2810_v46  ;;  %v3079_v17 = vmax.f32 %v2695_v45, %v2850_v47  ;;  %v2992_v19 = vpop.xlane.xlu2 %2991  ;;  %v2655_v32 = vmax.f32 %v2507_v8, 0.0  ;;  %v5977_v45 = vld [vmem:[#allocation38_spill] sm:$0xff]  ;;  %v5978_v46 = vld [vmem:[#allocation25_spill] sm:$0xff] }
 0x351   : > { %v3150_v54 = vmax.f32 %v2766_v1, %v2992_v19  ;;  %v2331_v28 = vpop.f32.mrf.mxu1  ;;  %v2620_v52 = vmax.f32 %v2419_v60, 0.0  ;;  %v5981_v60 = vld [vmem:[#allocation28_spill] sm:$0xff] }
 0x352   : > { %3188 = vst.msk [vmem:[%s4936_s29 + $0x30] sm:$0xff] %vm321_vm1, %v3059_v18  ;;  %v2332_v50 = vadd.f32 %v2331_v28, %v4789_v57  ;;  %v2697_v57 = vld [vmem:[%s4936_s29 + $0xe0] sm:$0xff] }
 0x353   : > { %3208 = vst.msk [vmem:[%s4936_s29 + $0xd0] sm:$0xff] %vm321_vm1, %v3079_v17 }
 0x354   : > { %3279 = vst.msk [vmem:[%s4936_s29 + $0x308] sm:$0xff] %vm321_vm1, %v3150_v54  ;;  %v2585_v35 = vmax.f32 %v2332_v50, 0.0 }
 0x355   : > { %v2508_v56 = vpop.f32.mrf.mxu3 }
 0x356   : > { %2951 = vmax.xlane.f32.xlu0 %v2618_v6  ;;  %2881 = vmax.xlane.f32.xlu1 %v2583_v14  ;;  %v2421_v15 = vpop.f32.mrf.mxu2  ;;  %v2677_v6 = vld [vmem:[%s4936_s29 + $0x40] sm:$0xff]  ;;  %v2509_v17 = vadd.f32 %v2508_v56, %v5136_v29  ;;  %v2678_v56 = vld [vmem:[%s4936_s29 + $0x48] sm:$0xff] }
 0x357   : > { %2949 = vmax.xlane.f32.xlu2 %v2617_v10  ;;  %v2852_v7 = vpop.xlane.xlu1 %2851  ;;  %v2922_v25 = vpop.xlane.xlu0 %2921  ;;  %v2422_v40 = vadd.f32 %v2421_v15, %v5977_v45 }
 0x358   : > { %v3080_v49 = vmax.f32 %v2696_v3, %v2852_v7  ;;  %v3115_v62 = vmax.f32 %v2731_v41, %v2922_v25  ;;  %v2812_v59 = vpop.xlane.xlu2 %2811  ;;  %v2656_v23 = vmax.f32 %v2509_v17, 0.0  ;;  %v5979_v7 = vld [vmem:[#allocation36_spill] sm:$0xff] }
 0x359   : > { %v3060_v48 = vmax.f32 %v2676_v37, %v2812_v59  ;;  %v2333_v24 = vpop.f32.mrf.mxu1  ;;  %v2621_v3 = vmax.f32 %v2422_v40, 0.0  ;;  %v2679_v40 = vld [vmem:[%s4936_s29 + $0x50] sm:$0xff] }
 0x35a   : > { %3209 = vst.msk [vmem:[%s4936_s29 + $0xd8] sm:$0xff] %vm321_vm1, %v3080_v49  ;;  %v2334_v18 = vadd.f32 %v2333_v24, %v5978_v46 }
 0x35b   : > { %3244 = vst.msk [vmem:[%s4936_s29 + $0x1f0] sm:$0xff] %vm321_vm1, %v3115_v62  ;;  %v5980_v62 = vld [vmem:[#allocation29_spill] sm:$0xff] }
 0x35c   : > { %3189 = vst.msk [vmem:[%s4936_s29 + $0x38] sm:$0xff] %vm321_vm1, %v3060_v48  ;;  %v2586_v36 = vmax.f32 %v2334_v18, 0.0 }
 0x35d   : > { %v2511_v39 = vpop.f32.mrf.mxu3 }
 0x35e   : > { %3023 = vmax.xlane.f32.xlu0 %v2654_v21  ;;  %2953 = vmax.xlane.f32.xlu1 %v2619_v38  ;;  %v2423_v47 = vpop.f32.mrf.mxu2  ;;  %v2512_v29 = vadd.f32 %v2511_v39, %v5156_v20  ;;  %v2698_v21 = vld [vmem:[%s4936_s29 + $0xe8] sm:$0xff]  ;;  %v2769_v20 = vld [vmem:[%s4936_s29 + $0x320] sm:$0xff] }
 0x35f   : > { %3021 = vmax.xlane.f32.xlu2 %v2653_v44  ;;  %v2924_v10 = vpop.xlane.xlu1 %2923  ;;  %v2994_v34 = vpop.xlane.xlu0 %2993  ;;  %v2424_v49 = vadd.f32 %v2423_v47, %v5979_v7 }
 0x360   : > { %v3116_v53 = vmax.f32 %v2732_v2, %v2924_v10  ;;  %v3151_v22 = vmax.f32 %v2767_v31, %v2994_v34  ;;  %v2854_v51 = vpop.xlane.xlu2 %2853  ;;  %v2657_v2 = vmax.f32 %v2512_v29, 0.0  ;;  %v2699_v10 = vld [vmem:[%s4936_s29 + $0xf0] sm:$0xff]  ;;  %v2700_v29 = vld [vmem:[%s4936_s29 + $0xf8] sm:$0xff] }
 0x361   : > { %v3081_v61 = vmax.f32 %v2697_v57, %v2854_v51  ;;  %v2336_v14 = vpop.f32.mrf.mxu1  ;;  %v2622_v15 = vmax.f32 %v2424_v49, 0.0 }
 0x362   : > { %3245 = vst.msk [vmem:[%s4936_s29 + $0x1f8] sm:$0xff] %vm321_vm1, %v3116_v53  ;;  %v2337_v38 = vadd.f32 %v2336_v14, %v5980_v62  ;;  %v2735_v14 = vld [vmem:[%s4936_s29 + $0x210] sm:$0xff] }
 0x363   : > { %3280 = vst.msk [vmem:[%s4936_s29 + $0x310] sm:$0xff] %vm321_vm1, %v3151_v22  ;;  %v5982_v22 = vld [vmem:[#allocation42_spill] sm:$0xff] }
 0x364   : > { %3210 = vst.msk [vmem:[%s4936_s29 + $0xe0] sm:$0xff] %vm321_vm1, %v3081_v61  ;;  %v2587_v31 = vmax.f32 %v2337_v38, 0.0  ;;  %v5985_v38 = vld [vmem:[#allocation37_spill] sm:$0xff] }
 0x365   : > { %v2513_v1 = vpop.f32.mrf.mxu3 }
 0x366   : > { %2885 = vmax.xlane.f32.xlu0 %v2585_v35  ;;  %3025 = vmax.xlane.f32.xlu1 %v2655_v32  ;;  %v2426_v25 = vpop.f32.mrf.mxu2  ;;  %v2514_v53 = vadd.f32 %v2513_v1, %v4942_v11  ;;  %v2734_v35 = vld [vmem:[%s4936_s29 + $0x208] sm:$0xff] }
 0x367   : > { %2883 = vmax.xlane.f32.xlu2 %v2584_v30  ;;  %v2996_v19 = vpop.xlane.xlu1 %2995  ;;  %v2814_v54 = vpop.xlane.xlu0 %2813  ;;  %v2427_v32 = vadd.f32 %v2426_v25, %v5982_v22  ;;  %v2681_v22 = vld [vmem:[%s4936_s29 + $0x60] sm:$0xff] }
 0x368   : > { %v3152_v44 = vmax.f32 %v2768_v0, %v2996_v19  ;;  %v3061_v33 = vmax.f32 %v2677_v6, %v2814_v54  ;;  %v2926_v41 = vpop.xlane.xlu2 %2925  ;;  %v2658_v18 = vmax.f32 %v2514_v53, 0.0  ;;  %v5983_v6 = vld [vmem:[#allocation41_spill] sm:$0xff]  ;;  %v5984_v19 = vld [vmem:[#allocation26_spill] sm:$0xff] }
 0x369   : > { %v3117_v28 = vmax.f32 %v2733_v16, %v2926_v41  ;;  %v2338_v59 = vpop.f32.mrf.mxu1  ;;  %v2623_v47 = vmax.f32 %v2427_v32, 0.0 }
 0x36a   : > { %3281 = vst.msk [vmem:[%s4936_s29 + $0x318] sm:$0xff] %vm321_vm1, %v3152_v44  ;;  %v2339_v24 = vadd.f32 %v2338_v59, %v5981_v60 }
 0x36b   : > { %3190 = vst.msk [vmem:[%s4936_s29 + $0x40] sm:$0xff] %vm321_vm1, %v3061_v33 }
 0x36c   : > { %3246 = vst.msk [vmem:[%s4936_s29 + $0x200] sm:$0xff] %vm321_vm1, %v3117_v28  ;;  %v2588_v0 = vmax.f32 %v2339_v24, 0.0 }
 0x36d   : > { %v2516_v37 = vpop.f32.mrf.mxu3 }
 0x36e   : > { %2957 = vmax.xlane.f32.xlu0 %v2621_v3  ;;  %2887 = vmax.xlane.f32.xlu1 %v2586_v36  ;;  %v2428_v34 = vpop.f32.mrf.mxu2  ;;  %v2770_v3 = vld [vmem:[%s4936_s29 + $0x328] sm:$0xff]  ;;  %v2517_v33 = vadd.f32 %v2516_v37, %v5173_v58  ;;  %v2771_v37 = vld [vmem:[%s4936_s29 + $0x330] sm:$0xff] }
 0x36f   : > { %2955 = vmax.xlane.f32.xlu2 %v2620_v52  ;;  %v2816_v30 = vpop.xlane.xlu1 %2815  ;;  %v2856_v50 = vpop.xlane.xlu0 %2855  ;;  %v2429_v17 = vadd.f32 %v2428_v34, %v5983_v6 }
 0x370   : > { %v3062_v48 = vmax.f32 %v2678_v56, %v2816_v30  ;;  %v3082_v8 = vmax.f32 %v2698_v21, %v2856_v50  ;;  %v2998_v39 = vpop.xlane.xlu2 %2997  ;;  %v2659_v21 = vmax.f32 %v2517_v33, 0.0  ;;  %v5986_v50 = vld [vmem:[#allocation32_spill] sm:$0xff] }
 0x371   : > { %v3153_v63 = vmax.f32 %v2769_v20, %v2998_v39  ;;  %v2341_v51 = vpop.f32.mrf.mxu1  ;;  %v2624_v56 = vmax.f32 %v2429_v17, 0.0 }
 0x372   : > { %3191 = vst.msk [vmem:[%s4936_s29 + $0x48] sm:$0xff] %vm321_vm1, %v3062_v48  ;;  %v2342_v44 = vadd.f32 %v2341_v51, %v5984_v19  ;;  %v2680_v48 = vld [vmem:[%s4936_s29 + $0x58] sm:$0xff] }
 0x373   : > { %3211 = vst.msk [vmem:[%s4936_s29 + $0xe8] sm:$0xff] %vm321_vm1, %v3082_v8 }
 0x374   : > { %3282 = vst.msk [vmem:[%s4936_s29 + $0x320] sm:$0xff] %vm321_vm1, %v3153_v63  ;;  %v2589_v49 = vmax.f32 %v2342_v44, 0.0  ;;  %v5989_v44 = vld [vmem:[#allocation44_spill] sm:$0xff] }
 0x375   : > { %v2518_v57 = vpop.f32.mrf.mxu3 }
 0x376   : > { %3029 = vmax.xlane.f32.xlu0 %v2657_v2  ;;  %2959 = vmax.xlane.f32.xlu1 %v2622_v15  ;;  %v2431_v54 = vpop.f32.mrf.mxu2  ;;  %v2519_v58 = vadd.f32 %v2518_v57, %v5193_v26  ;;  %v2736_v26 = vld [vmem:[%s4936_s29 + $0x218] sm:$0xff]  ;;  %v5987_v57 = vld [vmem:[#allocation31_spill] sm:$0xff] }
 0x377   : > { %3027 = vmax.xlane.f32.xlu2 %v2656_v23  ;;  %v2858_v52 = vpop.xlane.xlu1 %2857  ;;  %v2928_v45 = vpop.xlane.xlu0 %2927  ;;  %v2432_v59 = vadd.f32 %v2431_v54, %v5985_v38 }
 0x378   : > { %v3083_v61 = vmax.f32 %v2699_v10, %v2858_v52  ;;  %v3118_v46 = vmax.f32 %v2734_v35, %v2928_v45  ;;  %v2818_v11 = vpop.xlane.xlu2 %2817  ;;  %v2660_v63 = vmax.f32 %v2519_v58, 0.0  ;;  %v2701_v52 = vld [vmem:[%s4936_s29 + $0x100] sm:$0xff] }
 0x379   : > { %v3063_v1 = vmax.f32 %v2679_v40, %v2818_v11  ;;  %v2343_v36 = vpop.f32.mrf.mxu1  ;;  %v2625_v24 = vmax.f32 %v2432_v59, 0.0  ;;  %v2772_v11 = vld [vmem:[%s4936_s29 + $0x338] sm:$0xff] }
 0x37a   : > { %3212 = vst.msk [vmem:[%s4936_s29 + $0xf0] sm:$0xff] %vm321_vm1, %v3083_v61  ;;  %v2344_v20 = vadd.f32 %v2343_v36, %v5986_v50  ;;  %v5988_v61 = vld [vmem:[#allocation45_spill] sm:$0xff] }
 0x37b   : > { %3247 = vst.msk [vmem:[%s4936_s29 + $0x208] sm:$0xff] %vm321_vm1, %v3118_v46 }
 0x37c   : > { %3192 = vst.msk [vmem:[%s4936_s29 + $0x50] sm:$0xff] %vm321_vm1, %v3063_v1  ;;  %v2590_v53 = vmax.f32 %v2344_v20, 0.0 }
 0x37d   : > { %v2521_v16 = vpop.f32.mrf.mxu3 }
 0x37e   : > { %2891 = vmax.xlane.f32.xlu0 %v2588_v0  ;;  %3031 = vmax.xlane.f32.xlu1 %v2658_v18  ;;  %v2433_v30 = vpop.f32.mrf.mxu2  ;;  %v2522_v32 = vadd.f32 %v2521_v16, %v4981_v12  ;;  %v2702_v16 = vld [vmem:[%s4936_s29 + $0x108] sm:$0xff] }
 0x37f   : > { %2889 = vmax.xlane.f32.xlu2 %v2587_v31  ;;  %v2930_v41 = vpop.xlane.xlu1 %2929  ;;  %v3000_v28 = vpop.xlane.xlu0 %2999  ;;  %v2434_v45 = vadd.f32 %v2433_v30, %v5988_v61  ;;  %v2738_v30 = vld [vmem:[%s4936_s29 + $0x228] sm:$0xff]  ;;  %v2683_v61 = vld [vmem:[%s4936_s29 + $0x70] sm:$0xff] }
 0x380   : > { %v3119_v23 = vmax.f32 %v2735_v14, %v2930_v41  ;;  %v3154_v7 = vmax.f32 %v2770_v3, %v3000_v28  ;;  %v2860_v25 = vpop.xlane.xlu2 %2859  ;;  %v2661_v6 = vmax.f32 %v2522_v32, 0.0  ;;  %v5990_v3 = vld [vmem:[#allocation27_spill] sm:$0xff]  ;;  %v2737_v41 = vld [vmem:[%s4936_s29 + $0x220] sm:$0xff]  ;;  %v2774_v32 = vld [vmem:[%s4936_s29 + $0x348] sm:$0xff] }
 0x381   : > { %v3084_v62 = vmax.f32 %v2700_v29, %v2860_v25  ;;  %v2346_v2 = vpop.f32.mrf.mxu1  ;;  %v2626_v14 = vmax.f32 %v2434_v45, 0.0  ;;  %v5994_v45 = vld [vmem:[#allocation47_spill] sm:$0xff] }
 0x382   : > { %3248 = vst.msk [vmem:[%s4936_s29 + $0x210] sm:$0xff] %vm321_vm1, %v3119_v23  ;;  %v2347_v35 = vadd.f32 %v2346_v2, %v5987_v57  ;;  %v2773_v2 = vld [vmem:[%s4936_s29 + $0x340] sm:$0xff] }
 0x383   : > { %3283 = vst.msk [vmem:[%s4936_s29 + $0x328] sm:$0xff] %vm321_vm1, %v3154_v7 }
 0x384   : > { %3213 = vst.msk [vmem:[%s4936_s29 + $0xf8] sm:$0xff] %vm321_vm1, %v3084_v62 }
 0x385   : > { %v2523_v15 = vpop.f32.mrf.mxu3 }
 0x386   : > { %2963 = vmax.xlane.f32.xlu0 %v2624_v56  ;;  %2893 = vmax.xlane.f32.xlu1 %v2589_v49  ;;  %v2436_v51 = vpop.f32.mrf.mxu2  ;;  %v2524_v23 = vadd.f32 %v2523_v15, %v5212_v13  ;;  %v2682_v49 = vld [vmem:[%s4936_s29 + $0x68] sm:$0xff] }
 0x387   : > { %2961 = vmax.xlane.f32.xlu2 %v2623_v47  ;;  %v3002_v8 = vpop.xlane.xlu1 %3001  ;;  %v2820_v31 = vpop.xlane.xlu0 %2819  ;;  %v2591_v47 = vmax.f32 %v2347_v35, 0.0  ;;  %v2437_v54 = vadd.f32 %v2436_v51, %v5989_v44  ;;  %v5993_v35 = vld [vmem:[#allocation33_spill] sm:$0xff]  ;;  %v5995_v44 = vld [vmem:[#allocation46_spill] sm:$0xff] }
 0x388   : > { %v3155_v39 = vmax.f32 %v2771_v37, %v3002_v8  ;;  %v3064_v60 = vmax.f32 %v2680_v48, %v2820_v31  ;;  %v2932_v10 = vpop.xlane.xlu2 %2931  ;;  %v2662_v37 = vmax.f32 %v2524_v23, 0.0  ;;  %v5991_v48 = vld [vmem:[#allocation40_spill] sm:$0xff]  ;;  %v5992_v8 = vld [vmem:[#allocation34_spill] sm:$0xff] }
 0x389   : > { %v3120_v34 = vmax.f32 %v2736_v26, %v2932_v10  ;;  %v2348_v40 = vpop.f32.mrf.mxu1  ;;  %v2627_v25 = vmax.f32 %v2437_v54, 0.0 }
 0x38a   : > { %3284 = vst.msk [vmem:[%s4936_s29 + $0x330] sm:$0xff] %vm321_vm1, %v3155_v39  ;;  %v2349_v33 = vadd.f32 %v2348_v40, %v5990_v3  ;;  %v5996_v3 = vld [vmem:[#allocation30_spill] sm:$0xff] }
 0x38b   : > { %3193 = vst.msk [vmem:[%s4936_s29 + $0x58] sm:$0xff] %vm321_vm1, %v3064_v60  ;;  %v2703_v60 = vld [vmem:[%s4936_s29 + $0x110] sm:$0xff] }
 0x38c   : > { %3249 = vst.msk [vmem:[%s4936_s29 + $0x218] sm:$0xff] %vm321_vm1, %v3120_v34  ;;  %v2592_v62 = vmax.f32 %v2349_v33, 0.0 }
 0x38d   : > { %v2526_v17 = vpop.f32.mrf.mxu3 }
 0x38e   : > { %3035 = vmax.xlane.f32.xlu0 %v2660_v63  ;;  %2965 = vmax.xlane.f32.xlu1 %v2625_v24  ;;  %v2438_v36 = vpop.f32.mrf.mxu2  ;;  %v2527_v59 = vadd.f32 %v2526_v17, %v5230_v27 }
 0x38f   : > { %3033 = vmax.xlane.f32.xlu2 %v2659_v21  ;;  %v2822_v0 = vpop.xlane.xlu1 %2821  ;;  %v2862_v18 = vpop.xlane.xlu0 %2861  ;;  %v2439_v50 = vadd.f32 %v2438_v36, %v5991_v48  ;;  %v2704_v36 = vld [vmem:[%s4936_s29 + $0x118] sm:$0xff] }
 0x390   : > { %v3065_v46 = vmax.f32 %v2681_v22, %v2822_v0  ;;  %v3085_v1 = vmax.f32 %v2701_v52, %v2862_v18  ;;  %v3004_v12 = vpop.xlane.xlu2 %3003  ;;  %v2663_v27 = vmax.f32 %v2527_v59, 0.0  ;;  %v2705_v59 = vld [vmem:[%s4936_s29 + $0x120] sm:$0xff] }
 0x391   : > { %v3156_v19 = vmax.f32 %v2772_v11, %v3004_v12  ;;  %v2351_v28 = vpop.f32.mrf.mxu1  ;;  %v2628_v10 = vmax.f32 %v2439_v50, 0.0  ;;  %v2740_v50 = vld [vmem:[%s4936_s29 + $0x238] sm:$0xff] }
 0x392   : > { %3194 = vst.msk [vmem:[%s4936_s29 + $0x60] sm:$0xff] %vm321_vm1, %v3065_v46  ;;  %v2352_v15 = vadd.f32 %v2351_v28, %v5992_v8 }
 0x393   : > { %3214 = vst.msk [vmem:[%s4936_s29 + $0x100] sm:$0xff] %vm321_vm1, %v3085_v1 }
 0x394   : > { %3285 = vst.msk [vmem:[%s4936_s29 + $0x338] sm:$0xff] %vm321_vm1, %v3156_v19  ;;  %v2593_v34 = vmax.f32 %v2352_v15, 0.0 }
 0x395   : > { %v2528_v13 = vpop.f32.mrf.mxu3 }
 0x396   : > { %2897 = vmax.xlane.f32.xlu0 %v2591_v47  ;;  %3037 = vmax.xlane.f32.xlu1 %v2661_v6  ;;  %v2441_v20 = vpop.f32.mrf.mxu2  ;;  %v2529_v51 = vadd.f32 %v2528_v13, %v5020_v9  ;;  %v2739_v47 = vld [vmem:[%s4936_s29 + $0x230] sm:$0xff] }
 0x397   : > { %2895 = vmax.xlane.f32.xlu2 %v2590_v53  ;;  %v2864_v29 = vpop.xlane.xlu1 %2863  ;;  %v2934_v7 = vpop.xlane.xlu0 %2933  ;;  %v2442_v40 = vadd.f32 %v2441_v20, %v5994_v45  ;;  %v5998_v20 = vld [vmem:[#allocation35_spill] sm:$0xff] }
 0x398   : > { %v3086_v56 = vmax.f32 %v2702_v16, %v2864_v29  ;;  %v3121_v21 = vmax.f32 %v2737_v41, %v2934_v7  ;;  %v2824_v58 = vpop.xlane.xlu2 %2823  ;;  %v2664_v17 = vmax.f32 %v2529_v51, 0.0  ;;  %v2684_v16 = vld [vmem:[%s4936_s29 + $0x78] sm:$0xff]  ;;  %v2775_v7 = vld [vmem:[%s4936_s29 + $0x350] sm:$0xff] }
 0x399   : > { %v3066_v38 = vmax.f32 %v2682_v49, %v2824_v58  ;;  %v2353_v31 = vpop.f32.mrf.mxu1 }
 0x39a   : > { %3215 = vst.msk [vmem:[%s4936_s29 + $0x108] sm:$0xff] %vm321_vm1, %v3086_v56  ;;  %v2354_v22 = vadd.f32 %v2353_v31, %v5993_v35  ;;  %v2685_v31 = vld [vmem:[%s4936_s29 + $0x80] sm:$0xff]  ;;  %v2776_v35 = vld [vmem:[%s4936_s29 + $0x358] sm:$0xff] }
 0x39b   : > { %3250 = vst.msk [vmem:[%s4936_s29 + $0x220] sm:$0xff] %vm321_vm1, %v3121_v21 }
 0x39c   : > { %3195 = vst.msk [vmem:[%s4936_s29 + $0x68] sm:$0xff] %vm321_vm1, %v3066_v38  ;;  %v2594_v1 = vmax.f32 %v2354_v22, 0.0 }
 0x39d   : > { %v2531_v52 = vpop.f32.mrf.mxu3 }
 0x39e   : > { %2969 = vmax.xlane.f32.xlu0 %v2627_v25  ;;  %2899 = vmax.xlane.f32.xlu1 %v2592_v62  ;;  %v2443_v46 = vpop.f32.mrf.mxu2  ;;  %v2532_v41 = vadd.f32 %v2531_v52, %v5250_v43 }
 0x39f   : > { %2967 = vmax.xlane.f32.xlu2 %v2626_v14  ;;  %v2936_v39 = vpop.xlane.xlu1 %2935  ;;  %v3006_v63 = vpop.xlane.xlu0 %3005  ;;  %v2629_v14 = vmax.f32 %v2442_v40, 0.0  ;;  %v2444_v54 = vadd.f32 %v2443_v46, %v5995_v44 }
 0x3a0   : > { %v3122_v26 = vmax.f32 %v2738_v30, %v2936_v39  ;;  %v3157_v24 = vmax.f32 %v2773_v2, %v3006_v63  ;;  %v2866_v53 = vpop.xlane.xlu2 %2865  ;;  %v5997_v30 = vld [vmem:[#allocation43_spill] sm:$0xff] }
 0x3a1   : > { %v3087_v57 = vmax.f32 %v2703_v60, %v2866_v53  ;;  %v2356_v12 = vpop.f32.mrf.mxu1  ;;  %v2630_v49 = vmax.f32 %v2444_v54, 0.0  ;;  %v2687_v54 = vld [vmem:[%s4936_s29 + $0x90] sm:$0xff] }
 0x3a2   : > { %3251 = vst.msk [vmem:[%s4936_s29 + $0x228] sm:$0xff] %vm321_vm1, %v3122_v26  ;;  %v2357_v33 = vadd.f32 %v2356_v12, %v5996_v3  ;;  %v2742_v12 = vld [vmem:[%s4936_s29 + $0x248] sm:$0xff] }
 0x3a3   : > { %3286 = vst.msk [vmem:[%s4936_s29 + $0x340] sm:$0xff] %vm321_vm1, %v3157_v24 }
 0x3a4   : > { %3216 = vst.msk [vmem:[%s4936_s29 + $0x110] sm:$0xff] %vm321_vm1, %v3087_v57  ;;  %v2595_v21 = vmax.f32 %v2357_v33, 0.0 }
 0x3a5   : > { %v2533_v28 = vpop.f32.mrf.mxu3 }
 0x3a6   : > { %3041 = vmax.xlane.f32.xlu0 %v2663_v27  ;;  %2971 = vmax.xlane.f32.xlu1 %v2628_v10  ;;  %v2446_v62 = vpop.f32.mrf.mxu2  ;;  %v2534_v13 = vadd.f32 %v2533_v28, %v5267_v42 }
 0x3a7   : > { %3039 = vmax.xlane.f32.xlu2 %v2662_v37  ;;  %v3008_v0 = vpop.xlane.xlu1 %3007  ;;  %v2826_v11 = vpop.xlane.xlu0 %2825  ;;  %v2665_v37 = vmax.f32 %v2532_v41, 0.0  ;;  %v2447_v48 = vadd.f32 %v2446_v62, %v5997_v30 }
 0x3a8   : > { %v3158_v18 = vmax.f32 %v2774_v32, %v3008_v0  ;;  %v3067_v6 = vmax.f32 %v2683_v61, %v2826_v11  ;;  %v2938_v9 = vpop.xlane.xlu2 %2937  ;;  %v2666_v26 = vmax.f32 %v2534_v13, 0.0  ;;  %v2706_v61 = vld [vmem:[%s4936_s29 + $0x128] sm:$0xff] }
 0x3a9   : > { %v3123_v19 = vmax.f32 %v2739_v47, %v2938_v9  ;;  %v2358_v38 = vpop.f32.mrf.mxu1  ;;  %v2631_v42 = vmax.f32 %v2447_v48, 0.0  ;;  %v2686_v11 = vld [vmem:[%s4936_s29 + $0x88] sm:$0xff]  ;;  %v2709_v48 = vld [vmem:[%s4936_s29 + $0x140] sm:$0xff] }
 0x3aa   : > { %3287 = vst.msk [vmem:[%s4936_s29 + $0x348] sm:$0xff] %vm321_vm1, %v3158_v18  ;;  %v2359_v2 = vadd.f32 %v2358_v38, %v5998_v20  ;;  %v2779_v38 = vld [vmem:[%s4936_s29 + $0x370] sm:$0xff] }
 0x3ab   : > { %3196 = vst.msk [vmem:[%s4936_s29 + $0x70] sm:$0xff] %vm321_vm1, %v3067_v6 }
 0x3ac   : > { %3252 = vst.msk [vmem:[%s4936_s29 + $0x230] sm:$0xff] %vm321_vm1, %v3123_v19  ;;  %v2596_v24 = vmax.f32 %v2359_v2, 0.0 }
 0x3ad   : > { %v2536_v60 = vpop.f32.mrf.mxu3 }
 0x3ae   : > { %2903 = vmax.xlane.f32.xlu0 %v2594_v1  ;;  %3043 = vmax.xlane.f32.xlu1 %v2664_v17  ;;  %v2448_v53 = vpop.f32.mrf.mxu2  ;;  %v2537_v57 = vadd.f32 %v2536_v60, %v5061_v55 }
 0x3af   : > { %2901 = vmax.xlane.f32.xlu2 %v2593_v34  ;;  %v2828_v23 = vpop.xlane.xlu1 %2827  ;;  %v2868_v56 = vpop.xlane.xlu0 %2867  ;;  %v2741_v34 = vld [vmem:[%s4936_s29 + $0x240] sm:$0xff]  ;;  %v2449_v22 = vadd.f32 %v2448_v53, %v4901_v4 }
 0x3b0   : > { %v3068_v29 = vmax.f32 %v2684_v16, %v2828_v23  ;;  %v3088_v25 = vmax.f32 %v2704_v36, %v2868_v56  ;;  %v3010_v58 = vpop.xlane.xlu2 %3009  ;;  %v2667_v40 = vmax.f32 %v2537_v57, 0.0  ;;  %v2777_v4 = vld [vmem:[%s4936_s29 + $0x360] sm:$0xff]  ;;  %v2778_v36 = vld [vmem:[%s4936_s29 + $0x368] sm:$0xff]  ;;  %v2743_v56 = vld [vmem:[%s4936_s29 + $0x250] sm:$0xff] }
 0x3b1   : > { %v3159_v43 = vmax.f32 %v2775_v7, %v3010_v58  ;;  %v2632_v46 = vmax.f32 %v2449_v22, 0.0 }
 0x3b2   : > { %3197 = vst.msk [vmem:[%s4936_s29 + $0x78] sm:$0xff] %vm321_vm1, %v3068_v29  ;;  %v2708_v29 = vld [vmem:[%s4936_s29 + $0x138] sm:$0xff] }
 0x3b3   : > { %3217 = vst.msk [vmem:[%s4936_s29 + $0x118] sm:$0xff] %vm321_vm1, %v3088_v25 }
 0x3b4   : > { %3288 = vst.msk [vmem:[%s4936_s29 + $0x350] sm:$0xff] %vm321_vm1, %v3159_v43  ;;  %v2744_v43 = vld [vmem:[%s4936_s29 + $0x258] sm:$0xff] }
 0x3b5   : > { %v2538_v18 = vpop.f32.mrf.mxu3 }
 0x3b6   : > { %2975 = vmax.xlane.f32.xlu0 %v2630_v49  ;;  %2905 = vmax.xlane.f32.xlu1 %v2595_v21  ;;  %v2539_v47 = vadd.f32 %v2538_v18, %v5285_v5  ;;  %v2707_v5 = vld [vmem:[%s4936_s29 + $0x130] sm:$0xff]  ;;  %v2688_v21 = vld [vmem:[%s4936_s29 + $0x98] sm:$0xff] }
 0x3b7   : > { %2973 = vmax.xlane.f32.xlu2 %v2629_v14  ;;  %v2870_v8 = vpop.xlane.xlu1 %2869  ;;  %v2940_v39 = vpop.xlane.xlu0 %2939 }
 0x3b8   : > { %v3089_v15 = vmax.f32 %v2705_v59, %v2870_v8  ;;  %v3124_v63 = vmax.f32 %v2740_v50, %v2940_v39  ;;  %v2830_v27 = vpop.xlane.xlu2 %2829  ;;  %v2668_v19 = vmax.f32 %v2539_v47, 0.0  ;;  %v2780_v8 = vld [vmem:[%s4936_s29 + $0x378] sm:$0xff]  ;;  %v2713_v47 = vld [vmem:[%s4936_s29 + $0x160] sm:$0xff] }
 0x3b9   : > { %v3069_v10 = vmax.f32 %v2685_v31, %v2830_v27 }
 0x3ba   : > { %3218 = vst.msk [vmem:[%s4936_s29 + $0x120] sm:$0xff] %vm321_vm1, %v3089_v15  ;;  %v2710_v15 = vld [vmem:[%s4936_s29 + $0x148] sm:$0xff] }
 0x3bb   : > { %3253 = vst.msk [vmem:[%s4936_s29 + $0x238] sm:$0xff] %vm321_vm1, %v3124_v63  ;;  %v2745_v63 = vld [vmem:[%s4936_s29 + $0x260] sm:$0xff] }
 0x3bc   : > { %3198 = vst.msk [vmem:[%s4936_s29 + $0x80] sm:$0xff] %vm321_vm1, %v3069_v10  ;;  %v2746_v10 = vld [vmem:[%s4936_s29 + $0x268] sm:$0xff] }
 0x3be   : > { %3047 = vmax.xlane.f32.xlu0 %v2666_v26  ;;  %2977 = vmax.xlane.f32.xlu1 %v2631_v42 }
 0x3bf   : > { %3045 = vmax.xlane.f32.xlu2 %v2665_v37  ;;  %v2942_v32 = vpop.xlane.xlu1 %2941  ;;  %v3012_v52 = vpop.xlane.xlu0 %3011 }
 0x3c0   : > { %v3125_v51 = vmax.f32 %v2741_v34, %v2942_v32  ;;  %v3160_v45 = vmax.f32 %v2776_v35, %v3012_v52  ;;  %v2872_v0 = vpop.xlane.xlu2 %2871  ;;  %v2781_v35 = vld [vmem:[%s4936_s29 + $0x380] sm:$0xff]  ;;  %v2747_v52 = vld [vmem:[%s4936_s29 + $0x270] sm:$0xff] }
 0x3c1   : > { %v3090_v55 = vmax.f32 %v2706_v61, %v2872_v0  ;;  %v2782_v61 = vld [vmem:[%s4936_s29 + $0x388] sm:$0xff] }
 0x3c2   : > { %3254 = vst.msk [vmem:[%s4936_s29 + $0x240] sm:$0xff] %vm321_vm1, %v3125_v51 }
 0x3c3   : > { %3289 = vst.msk [vmem:[%s4936_s29 + $0x358] sm:$0xff] %vm321_vm1, %v3160_v45 }
 0x3c4   : > { %3219 = vst.msk [vmem:[%s4936_s29 + $0x128] sm:$0xff] %vm321_vm1, %v3090_v55 }
 0x3c6   : > { %3049 = vmax.xlane.f32.xlu1 %v2667_v40 }
 0x3c7   : > { %2907 = vmax.xlane.f32.xlu2 %v2596_v24  ;;  %v3014_v1 = vpop.xlane.xlu1 %3013  ;;  %v2832_v17 = vpop.xlane.xlu0 %2831  ;;  %v2711_v24 = vld [vmem:[%s4936_s29 + $0x150] sm:$0xff] }
 0x3c8   : > { %v3161_v6 = vmax.f32 %v2777_v4, %v3014_v1  ;;  %v3070_v9 = vmax.f32 %v2686_v11, %v2832_v17  ;;  %v2944_v14 = vpop.xlane.xlu2 %2943  ;;  %v2783_v11 = vld [vmem:[%s4936_s29 + $0x390] sm:$0xff] }
 0x3c9   : > { %v3126_v44 = vmax.f32 %v2742_v12, %v2944_v14  ;;  %v2748_v12 = vld [vmem:[%s4936_s29 + $0x278] sm:$0xff] }
 0x3ca   : > { %3290 = vst.msk [vmem:[%s4936_s29 + $0x360] sm:$0xff] %vm321_vm1, %v3161_v6 }
 0x3cb   : > { %3199 = vst.msk [vmem:[%s4936_s29 + $0x88] sm:$0xff] %vm321_vm1, %v3070_v9 }
 0x3cc   : > { %3255 = vst.msk [vmem:[%s4936_s29 + $0x248] sm:$0xff] %vm321_vm1, %v3126_v44  ;;  %v2714_v44 = vld [vmem:[%s4936_s29 + $0x168] sm:$0xff] }
 0x3cf   : > { %2979 = vmax.xlane.f32.xlu2 %v2632_v46  ;;  %v2834_v16 = vpop.xlane.xlu1 %2833  ;;  %v2874_v33 = vpop.xlane.xlu0 %2873  ;;  %v2712_v46 = vld [vmem:[%s4936_s29 + $0x158] sm:$0xff] }
 0x3d0   : > { %v3071_v3 = vmax.f32 %v2687_v54, %v2834_v16  ;;  %v3091_v41 = vmax.f32 %v2707_v5, %v2874_v33  ;;  %v3016_v23 = vpop.xlane.xlu2 %3015  ;;  %v2749_v54 = vld [vmem:[%s4936_s29 + $0x280] sm:$0xff]  ;;  %v2784_v33 = vld [vmem:[%s4936_s29 + $0x398] sm:$0xff] }
 0x3d1   : > { %v3162_v28 = vmax.f32 %v2778_v36, %v3016_v23 }
 0x3d2   : > { %3200 = vst.msk [vmem:[%s4936_s29 + $0x90] sm:$0xff] %vm321_vm1, %v3071_v3 }
 0x3d3   : > { %3220 = vst.msk [vmem:[%s4936_s29 + $0x130] sm:$0xff] %vm321_vm1, %v3091_v41 }
 0x3d4   : > { %3291 = vst.msk [vmem:[%s4936_s29 + $0x368] sm:$0xff] %vm321_vm1, %v3162_v28  ;;  %v2750_v28 = vld [vmem:[%s4936_s29 + $0x288] sm:$0xff] }
 0x3d7   : > { %3051 = vmax.xlane.f32.xlu2 %v2668_v19  ;;  %v2876_v7 = vpop.xlane.xlu1 %2875  ;;  %v2946_v25 = vpop.xlane.xlu0 %2945 }
 0x3d8   : > { %v3092_v49 = vmax.f32 %v2708_v29, %v2876_v7  ;;  %v3127_v62 = vmax.f32 %v2743_v56, %v2946_v25  ;;  %v2836_v58 = vpop.xlane.xlu2 %2835  ;;  %v2785_v29 = vld [vmem:[%s4936_s29 + $0x3a0] sm:$0xff]  ;;  %v2715_v25 = vld [vmem:[%s4936_s29 + $0x170] sm:$0xff] }
 0x3d9   : > { %v3072_v37 = vmax.f32 %v2688_v21, %v2836_v58 }
 0x3da   : > { %3221 = vst.msk [vmem:[%s4936_s29 + $0x138] sm:$0xff] %vm321_vm1, %v3092_v49 }
 0x3db   : > { %3256 = vst.msk [vmem:[%s4936_s29 + $0x250] sm:$0xff] %vm321_vm1, %v3127_v62 }
 0x3dc   : > { %3201 = vst.msk [vmem:[%s4936_s29 + $0x98] sm:$0xff] %vm321_vm1, %v3072_v37  ;;  %v2786_v37 = vld [vmem:[%s4936_s29 + $0x3a8] sm:$0xff] }
 0x3df   : > { %v2948_v13 = vpop.xlane.xlu1 %2947  ;;  %v3018_v30 = vpop.xlane.xlu0 %3017 }
 0x3e0   : > { %v3128_v59 = vmax.f32 %v2744_v43, %v2948_v13  ;;  %v3163_v50 = vmax.f32 %v2779_v38, %v3018_v30  ;;  %v2878_v20 = vpop.xlane.xlu2 %2877  ;;  %v2716_v43 = vld [vmem:[%s4936_s29 + $0x178] sm:$0xff]  ;;  %v2751_v30 = vld [vmem:[%s4936_s29 + $0x290] sm:$0xff] }
 0x3e1   : > { %v3093_v2 = vmax.f32 %v2709_v48, %v2878_v20 }
 0x3e2   : > { %3257 = vst.msk [vmem:[%s4936_s29 + $0x258] sm:$0xff] %vm321_vm1, %v3128_v59 }
 0x3e3   : > { %3292 = vst.msk [vmem:[%s4936_s29 + $0x370] sm:$0xff] %vm321_vm1, %v3163_v50 }
 0x3e4   : > { %3222 = vst.msk [vmem:[%s4936_s29 + $0x140] sm:$0xff] %vm321_vm1, %v3093_v2  ;;  %v2717_v2 = vld [vmem:[%s4936_s29 + $0x180] sm:$0xff] }
 0x3e7   : > { %v3020_v39 = vpop.xlane.xlu1 %3019  ;;  %v2880_v26 = vpop.xlane.xlu0 %2879 }
 0x3e8   : > { %v3164_v31 = vmax.f32 %v2780_v8, %v3020_v39  ;;  %v3094_v42 = vmax.f32 %v2710_v15, %v2880_v26  ;;  %v2950_v60 = vpop.xlane.xlu2 %2949  ;;  %v2752_v8 = vld [vmem:[%s4936_s29 + $0x298] sm:$0xff]  ;;  %v2787_v26 = vld [vmem:[%s4936_s29 + $0x3b0] sm:$0xff] }
 0x3e9   : > { %v3129_v27 = vmax.f32 %v2745_v63, %v2950_v60 }
 0x3ea   : > { %3293 = vst.msk [vmem:[%s4936_s29 + $0x378] sm:$0xff] %vm321_vm1, %v3164_v31 }
 0x3eb   : > { %3223 = vst.msk [vmem:[%s4936_s29 + $0x148] sm:$0xff] %vm321_vm1, %v3094_v42 }
 0x3ec   : > { %3258 = vst.msk [vmem:[%s4936_s29 + $0x260] sm:$0xff] %vm321_vm1, %v3129_v27  ;;  %v2753_v27 = vld [vmem:[%s4936_s29 + $0x2a0] sm:$0xff] }
 0x3ef   : > { %v2882_v53 = vpop.xlane.xlu1 %2881  ;;  %v2952_v57 = vpop.xlane.xlu0 %2951 }
 0x3f0   : > { %v3095_v34 = vmax.f32 %v2711_v24, %v2882_v53  ;;  %v3130_v22 = vmax.f32 %v2746_v10, %v2952_v57  ;;  %v3022_v32 = vpop.xlane.xlu2 %3021  ;;  %v2788_v24 = vld [vmem:[%s4936_s29 + $0x3b8] sm:$0xff]  ;;  %v2718_v57 = vld [vmem:[%s4936_s29 + $0x188] sm:$0xff] }
 0x3f1   : > { %v3165_v51 = vmax.f32 %v2781_v35, %v3022_v32 }
 0x3f2   : > { %3224 = vst.msk [vmem:[%s4936_s29 + $0x150] sm:$0xff] %vm321_vm1, %v3095_v34 }
 0x3f3   : > { %3259 = vst.msk [vmem:[%s4936_s29 + $0x268] sm:$0xff] %vm321_vm1, %v3130_v22 }
 0x3f4   : > { %3294 = vst.msk [vmem:[%s4936_s29 + $0x380] sm:$0xff] %vm321_vm1, %v3165_v51  ;;  %v2789_v51 = vld [vmem:[%s4936_s29 + $0x3c0] sm:$0xff] }
 0x3f7   : > { %v2954_v45 = vpop.xlane.xlu1 %2953  ;;  %v3024_v0 = vpop.xlane.xlu0 %3023 }
 0x3f8   : > { %v3131_v40 = vmax.f32 %v2747_v52, %v2954_v45  ;;  %v3166_v55 = vmax.f32 %v2782_v61, %v3024_v0  ;;  %v2884_v18 = vpop.xlane.xlu2 %2883  ;;  %v2719_v52 = vld [vmem:[%s4936_s29 + $0x190] sm:$0xff]  ;;  %v2754_v0 = vld [vmem:[%s4936_s29 + $0x2a8] sm:$0xff] }
 0x3f9   : > { %v3096_v4 = vmax.f32 %v2712_v46, %v2884_v18 }
 0x3fa   : > { %3260 = vst.msk [vmem:[%s4936_s29 + $0x270] sm:$0xff] %vm321_vm1, %v3131_v40 }
 0x3fb   : > { %3295 = vst.msk [vmem:[%s4936_s29 + $0x388] sm:$0xff] %vm321_vm1, %v3166_v55 }
 0x3fc   : > { %3225 = vst.msk [vmem:[%s4936_s29 + $0x158] sm:$0xff] %vm321_vm1, %v3096_v4  ;;  %v2720_v4 = vld [vmem:[%s4936_s29 + $0x198] sm:$0xff] }
 0x3ff   : > { %v3026_v1 = vpop.xlane.xlu1 %3025  ;;  %v2886_v17 = vpop.xlane.xlu0 %2885 }
 0x400   : > { %v3167_v6 = vmax.f32 %v2783_v11, %v3026_v1  ;;  %v3097_v9 = vmax.f32 %v2713_v47, %v2886_v17  ;;  %v2956_v14 = vpop.xlane.xlu2 %2955  ;;  %v2755_v11 = vld [vmem:[%s4936_s29 + $0x2b0] sm:$0xff]  ;;  %v2790_v17 = vld [vmem:[%s4936_s29 + $0x3c8] sm:$0xff] }
 0x401   : > { %v3132_v19 = vmax.f32 %v2748_v12, %v2956_v14 }
 0x402   : > { %3296 = vst.msk [vmem:[%s4936_s29 + $0x390] sm:$0xff] %vm321_vm1, %v3167_v6 }
 0x403   : > { %3226 = vst.msk [vmem:[%s4936_s29 + $0x160] sm:$0xff] %vm321_vm1, %v3097_v9 }
 0x404   : > { %3261 = vst.msk [vmem:[%s4936_s29 + $0x278] sm:$0xff] %vm321_vm1, %v3132_v19  ;;  %v2756_v19 = vld [vmem:[%s4936_s29 + $0x2b8] sm:$0xff] }
 0x407   : > { %v2888_v5 = vpop.xlane.xlu1 %2887  ;;  %v2958_v3 = vpop.xlane.xlu0 %2957 }
 0x408   : > { %v3098_v16 = vmax.f32 %v2714_v44, %v2888_v5  ;;  %v3133_v36 = vmax.f32 %v2749_v54, %v2958_v3  ;;  %v3028_v41 = vpop.xlane.xlu2 %3027  ;;  %v2791_v44 = vld [vmem:[%s4936_s29 + $0x3d0] sm:$0xff]  ;;  %v2721_v3 = vld [vmem:[%s4936_s29 + $0x1a0] sm:$0xff] }
 0x409   : > { %v3168_v23 = vmax.f32 %v2784_v33, %v3028_v41 }
 0x40a   : > { %3227 = vst.msk [vmem:[%s4936_s29 + $0x168] sm:$0xff] %vm321_vm1, %v3098_v16 }
 0x40b   : > { %3262 = vst.msk [vmem:[%s4936_s29 + $0x280] sm:$0xff] %vm321_vm1, %v3133_v36 }
 0x40c   : > { %3297 = vst.msk [vmem:[%s4936_s29 + $0x398] sm:$0xff] %vm321_vm1, %v3168_v23  ;;  %v2792_v23 = vld [vmem:[%s4936_s29 + $0x3d8] sm:$0xff] }
 0x40f   : > { %v2960_v56 = vpop.xlane.xlu1 %2959  ;;  %v3030_v49 = vpop.xlane.xlu0 %3029 }
 0x410   : > { %v3134_v7 = vmax.f32 %v2750_v28, %v2960_v56  ;;  %v3169_v21 = vmax.f32 %v2785_v29, %v3030_v49  ;;  %v2890_v62 = vpop.xlane.xlu2 %2889  ;;  %v2722_v28 = vld [vmem:[%s4936_s29 + $0x1a8] sm:$0xff]  ;;  %v2757_v49 = vld [vmem:[%s4936_s29 + $0x2c0] sm:$0xff] }
 0x411   : > { %v3099_v58 = vmax.f32 %v2715_v25, %v2890_v62 }
 0x412   : > { %3263 = vst.msk [vmem:[%s4936_s29 + $0x288] sm:$0xff] %vm321_vm1, %v3134_v7 }
 0x413   : > { %3298 = vst.msk [vmem:[%s4936_s29 + $0x3a0] sm:$0xff] %vm321_vm1, %v3169_v21 }
 0x414   : > { %3228 = vst.msk [vmem:[%s4936_s29 + $0x170] sm:$0xff] %vm321_vm1, %v3099_v58  ;;  %v2723_v58 = vld [vmem:[%s4936_s29 + $0x1b0] sm:$0xff] }
 0x417   : > { %v3032_v38 = vpop.xlane.xlu1 %3031  ;;  %v2892_v59 = vpop.xlane.xlu0 %2891 }
 0x418   : > { %v3170_v13 = vmax.f32 %v2786_v37, %v3032_v38  ;;  %v3100_v48 = vmax.f32 %v2716_v43, %v2892_v59  ;;  %v2962_v50 = vpop.xlane.xlu2 %2961  ;;  %v2758_v37 = vld [vmem:[%s4936_s29 + $0x2c8] sm:$0xff]  ;;  %v2793_v59 = vld [vmem:[%s4936_s29 + $0x3e0] sm:$0xff] }
 0x419   : > { %v3135_v20 = vmax.f32 %v2751_v30, %v2962_v50 }
 0x41a   : > { %3299 = vst.msk [vmem:[%s4936_s29 + $0x3a8] sm:$0xff] %vm321_vm1, %v3170_v13 }
 0x41b   : > { %3229 = vst.msk [vmem:[%s4936_s29 + $0x178] sm:$0xff] %vm321_vm1, %v3100_v48 }
 0x41c   : > { %3264 = vst.msk [vmem:[%s4936_s29 + $0x290] sm:$0xff] %vm321_vm1, %v3135_v20  ;;  %v2759_v20 = vld [vmem:[%s4936_s29 + $0x2d0] sm:$0xff] }
 0x41f   : > { %v2894_v15 = vpop.xlane.xlu1 %2893  ;;  %v2964_v31 = vpop.xlane.xlu0 %2963 }
 0x420   : > { %v3101_v39 = vmax.f32 %v2717_v2, %v2894_v15  ;;  %v3136_v63 = vmax.f32 %v2752_v8, %v2964_v31  ;;  %v3034_v42 = vpop.xlane.xlu2 %3033  ;;  %v2794_v2 = vld [vmem:[%s4936_s29 + $0x3e8] sm:$0xff]  ;;  %v2724_v31 = vld [vmem:[%s4936_s29 + $0x1b8] sm:$0xff] }
 0x421   : > { %v3171_v60 = vmax.f32 %v2787_v26, %v3034_v42 }
 0x422   : > { %3230 = vst.msk [vmem:[%s4936_s29 + $0x180] sm:$0xff] %vm321_vm1, %v3101_v39 }
 0x423   : > { %3265 = vst.msk [vmem:[%s4936_s29 + $0x298] sm:$0xff] %vm321_vm1, %v3136_v63 }
 0x424   : > { %3300 = vst.msk [vmem:[%s4936_s29 + $0x3b0] sm:$0xff] %vm321_vm1, %v3171_v60  ;;  %v2795_v60 = vld [vmem:[%s4936_s29 + $0x3f0] sm:$0xff] }
 0x427   : > { %v2966_v10 = vpop.xlane.xlu1 %2965  ;;  %v3036_v34 = vpop.xlane.xlu0 %3035 }
 0x428   : > { %v3137_v53 = vmax.f32 %v2753_v27, %v2966_v10  ;;  %v3172_v35 = vmax.f32 %v2788_v24, %v3036_v34  ;;  %v2896_v22 = vpop.xlane.xlu2 %2895  ;;  %v2760_v10 = vld [vmem:[%s4936_s29 + $0x2d8] sm:$0xff] }
 0x429   : > { %v3102_v32 = vmax.f32 %v2718_v57, %v2896_v22  ;;  %v2796_v57 = vld [vmem:[%s4936_s29 + $0x3f8] sm:$0xff] }
 0x42a   : > { %3266 = vst.msk [vmem:[%s4936_s29 + $0x2a0] sm:$0xff] %vm321_vm1, %v3137_v53 }
 0x42b   : > { %3301 = vst.msk [vmem:[%s4936_s29 + $0x3b8] sm:$0xff] %vm321_vm1, %v3172_v35 }
 0x42c   : > { %3231 = vst.msk [vmem:[%s4936_s29 + $0x188] sm:$0xff] %vm321_vm1, %v3102_v32 }
 0x42f   : > { %v3038_v61 = vpop.xlane.xlu1 %3037  ;;  %v2898_v40 = vpop.xlane.xlu0 %2897 }
 0x430   : > { %v3173_v45 = vmax.f32 %v2789_v51, %v3038_v61  ;;  %v3103_v46 = vmax.f32 %v2719_v52, %v2898_v40  ;;  %v2968_v55 = vpop.xlane.xlu2 %2967 }
 0x431   : > { %v3138_v18 = vmax.f32 %v2754_v0, %v2968_v55 }
 0x432   : > { %3302 = vst.msk [vmem:[%s4936_s29 + $0x3c0] sm:$0xff] %vm321_vm1, %v3173_v45 }
 0x433   : > { %3232 = vst.msk [vmem:[%s4936_s29 + $0x190] sm:$0xff] %vm321_vm1, %v3103_v46 }
 0x434   : > { %3267 = vst.msk [vmem:[%s4936_s29 + $0x2a8] sm:$0xff] %vm321_vm1, %v3138_v18 }
 0x437   : > { %v2900_v47 = vpop.xlane.xlu1 %2899  ;;  %v2970_v6 = vpop.xlane.xlu0 %2969 }
 0x438   : > { %v3104_v1 = vmax.f32 %v2720_v4, %v2900_v47  ;;  %v3139_v12 = vmax.f32 %v2755_v11, %v2970_v6  ;;  %v3040_v9 = vpop.xlane.xlu2 %3039 }
 0x439   : > { %v3174_v14 = vmax.f32 %v2790_v17, %v3040_v9 }
 0x43a   : > { %3233 = vst.msk [vmem:[%s4936_s29 + $0x198] sm:$0xff] %vm321_vm1, %v3104_v1 }
 0x43b   : > { %3268 = vst.msk [vmem:[%s4936_s29 + $0x2b0] sm:$0xff] %vm321_vm1, %v3139_v12 }
 0x43c   : > { %3303 = vst.msk [vmem:[%s4936_s29 + $0x3c8] sm:$0xff] %vm321_vm1, %v3174_v14 }
 0x43f   : > { %v2972_v54 = vpop.xlane.xlu1 %2971  ;;  %v3042_v16 = vpop.xlane.xlu0 %3041 }
 0x440   : > { %v3140_v5 = vmax.f32 %v2756_v19, %v2972_v54  ;;  %v3175_v33 = vmax.f32 %v2791_v44, %v3042_v16  ;;  %v2902_v36 = vpop.xlane.xlu2 %2901 }
 0x441   : > { %v3105_v41 = vmax.f32 %v2721_v3, %v2902_v36 }
 0x442   : > { %3269 = vst.msk [vmem:[%s4936_s29 + $0x2b8] sm:$0xff] %vm321_vm1, %v3140_v5 }
 0x443   : > { %3304 = vst.msk [vmem:[%s4936_s29 + $0x3d0] sm:$0xff] %vm321_vm1, %v3175_v33 }
 0x444   : > { %3234 = vst.msk [vmem:[%s4936_s29 + $0x1a0] sm:$0xff] %vm321_vm1, %v3105_v41 }
 0x447   : > { %v3044_v29 = vpop.xlane.xlu1 %3043  ;;  %v2904_v7 = vpop.xlane.xlu0 %2903 }
 0x448   : > { %v3176_v56 = vmax.f32 %v2792_v23, %v3044_v29  ;;  %v3106_v25 = vmax.f32 %v2722_v28, %v2904_v7  ;;  %v2974_v21 = vpop.xlane.xlu2 %2973 }
 0x449   : > { %v3141_v62 = vmax.f32 %v2757_v49, %v2974_v21 }
 0x44a   : > { %3305 = vst.msk [vmem:[%s4936_s29 + $0x3d8] sm:$0xff] %vm321_vm1, %v3176_v56 }
 0x44b   : > { %3235 = vst.msk [vmem:[%s4936_s29 + $0x1a8] sm:$0xff] %vm321_vm1, %v3106_v25 }
 0x44c   : > { %3270 = vst.msk [vmem:[%s4936_s29 + $0x2c0] sm:$0xff] %vm321_vm1, %v3141_v62 }
 0x44f   : > { %v2906_v43 = vpop.xlane.xlu1 %2905  ;;  %v2976_v13 = vpop.xlane.xlu0 %2975 }
 0x450   : > { %v3107_v38 = vmax.f32 %v2723_v58, %v2906_v43  ;;  %v3142_v30 = vmax.f32 %v2758_v37, %v2976_v13  ;;  %v3046_v48 = vpop.xlane.xlu2 %3045 }
 0x451   : > { %v3177_v50 = vmax.f32 %v2793_v59, %v3046_v48 }
 0x452   : > { %3236 = vst.msk [vmem:[%s4936_s29 + $0x1b0] sm:$0xff] %vm321_vm1, %v3107_v38 }
 0x453   : > { %3271 = vst.msk [vmem:[%s4936_s29 + $0x2c8] sm:$0xff] %vm321_vm1, %v3142_v30 }
 0x454   : > { %3306 = vst.msk [vmem:[%s4936_s29 + $0x3e0] sm:$0xff] %vm321_vm1, %v3177_v50 }
 0x457   : > { %v2978_v8 = vpop.xlane.xlu1 %2977  ;;  %v3048_v39 = vpop.xlane.xlu0 %3047 }
 0x458   : > { %v3143_v15 = vmax.f32 %v2759_v20, %v2978_v8  ;;  %v3178_v26 = vmax.f32 %v2794_v2, %v3048_v39  ;;  %v2908_v63 = vpop.xlane.xlu2 %2907 }
 0x459   : > { %v3108_v42 = vmax.f32 %v2724_v31, %v2908_v63 }
 0x45a   : > { %3272 = vst.msk [vmem:[%s4936_s29 + $0x2d0] sm:$0xff] %vm321_vm1, %v3143_v15 }
 0x45b   : > { %3307 = vst.msk [vmem:[%s4936_s29 + $0x3e8] sm:$0xff] %vm321_vm1, %v3178_v26 }
 0x45c   : > { %3237 = vst.msk [vmem:[%s4936_s29 + $0x1b8] sm:$0xff] %vm321_vm1, %v3108_v42 }
 0x45f   : > { %v3050_v27 = vpop.xlane.xlu1 %3049 }
 0x460   : > { %v3179_v24 = vmax.f32 %v2795_v60, %v3050_v27  ;;  %v2980_v53 = vpop.xlane.xlu2 %2979 }
 0x461   : > { %v3144_v34 = vmax.f32 %v2760_v10, %v2980_v53 }
 0x462   : > { %3308 = vst.msk [vmem:[%s4936_s29 + $0x3f0] sm:$0xff] %vm321_vm1, %v3179_v24 }
 0x463   : > { %3273 = vst.msk [vmem:[%s4936_s29 + $0x2d8] sm:$0xff] %vm321_vm1, %v3144_v34 }
 0x468   : > { %v3052_v35 = vpop.xlane.xlu2 %3051 }
 0x469   : > { %v3180_v22 = vmax.f32 %v2796_v57, %v3052_v35 }
 0x46b   : > { %3309 = vst.msk [vmem:[%s4936_s29 + $0x3f8] sm:$0xff] %vm321_vm1, %v3180_v22 }
 0x46c PF: > { %s18_s26 = sadd.s32 1, %s3980_s26   ;;  %s5999_s24 = smov %s3976_s25 }
 0x46d   : > { %p15_p8 = scmp.ge.s32.totalorder %s18_s26, 4   ;;  %s6000_s25 = smov %s6002_s28 }
 0x46f   :  { %17 = sbr.rel (!%p15_p8) target bundleno = 2 (0x2), region = 87 }
 0x474   :  { %3331 = vsyncpa [#allocation3], 1 }
 0x475   :  { %3333 = vsyncpa [#allocation3 + $0x1], 1 }

// kernel: pointnet_encoder_forward.4
= control target key start
LH: loop header
LB: loop body
LE: loop exit
PB: predicated region body
PF: predicated region fallthrough
CT: control target
= control target key end

     0   :  { %vm1939_vm0 = vcmask 66560   ;;  %s4463_s1 = inlined_call_operand.vmem [shape: bf16[1024,512], index: 1, kind: input, shape index: {}]   ;;  %s4464_s0 = inlined_call_operand.vmem [shape: f32[2,1024], index: 0, kind: input, shape index: {}]   ;;  %s4465_s2 = inlined_call_operand.vmem [shape: f32[1,512], index: 2, kind: input, shape index: {}]   ;;  %s4466_s3 = inlined_call_operand.vmem [shape: bf16[512,256], index: 3, kind: input, shape index: {}]   ;;  %s4467_s6 = inlined_call_operand.vmem [shape: f32[1,9], index: 6, kind: input, shape index: {}]   ;;  %s4468_s5 = inlined_call_operand.vmem [shape: bf16[256,9], index: 5, kind: input, shape index: {}]   ;;  %s4469_s4 = inlined_call_operand.vmem [shape: f32[1,256], index: 4, kind: input, shape index: {}]   ;;  %s4470_s7 = inlined_call_operand.vmem [shape: f32[2,9], index: 7, kind: output, shape index: {}]  }
   0x1   :  { %v2076_v0 = vld [vmem:[%s4463_s1 + $0xf0] sm:$0xff]  ;;  %v2093_v5 = vld [vmem:[%s4463_s1 + $0xe0] sm:$0xff] }
   0x2   :  { %v2081_v1 = vld [vmem:[%s4463_s1 + $0x1f0] sm:$0xff]  ;;  %v344_v3 = vunpack.c.l.bf16 %v2076_v0  ;;  %v2098_v6 = vld [vmem:[%s4463_s1 + $0x1e0] sm:$0xff]  ;;  %v340_v9 = vunpack.c.l.bf16 %v2093_v5 }
   0x3   :  { %v2086_v2 = vld [vmem:[%s4463_s1 + $0x2f0] sm:$0xff]  ;;  %v408_v4 = vunpack.c.l.bf16 %v2081_v1  ;;  %v2103_v7 = vld [vmem:[%s4463_s1 + $0x2e0] sm:$0xff]  ;;  %v404_v13 = vunpack.c.l.bf16 %v2098_v6 }
   0x4   :  { %v472_v8 = vunpack.c.l.bf16 %v2086_v2  ;;  %v2110_v10 = vld [vmem:[%s4463_s1 + $0x3f0] sm:$0xff]  ;;  %827 = vmatpush.msra.mxu0 %v344_v3  ;;  %v468_v14 = vunpack.c.l.bf16 %v2103_v7  ;;  %v2132_v16 = vld [vmem:[%s4463_s1 + $0x3e0] sm:$0xff] }
   0x5   :  { %v2115_v11 = vld [vmem:[%s4463_s1 + $0xd0] sm:$0xff]  ;;  %847 = vmatpush.msra.mxu1 %v408_v4  ;;  %v2137_v17 = vld [vmem:[%s4463_s1 + $0xc0] sm:$0xff]  ;;  %v536_v18 = vunpack.c.l.bf16 %v2110_v10  ;;  %v532_v26 = vunpack.c.l.bf16 %v2132_v16 }
   0x6   :  { %v2120_v12 = vld [vmem:[%s4463_s1 + $0x1d0] sm:$0xff]  ;;  %867 = vmatpush.msra.mxu2 %v472_v8  ;;  %v336_v19 = vunpack.c.l.bf16 %v2115_v11  ;;  %v2144_v20 = vld [vmem:[%s4463_s1 + $0x1c0] sm:$0xff]  ;;  %828 = vmatpush.msra.mxu0 %v340_v9  ;;  %v332_v27 = vunpack.c.l.bf16 %v2137_v17 }
   0x7   :  { %v2127_v15 = vld [vmem:[%s4463_s1 + $0x2d0] sm:$0xff]  ;;  %v2149_v21 = vld [vmem:[%s4463_s1 + $0x2c0] sm:$0xff]  ;;  %848 = vmatpush.msra.mxu1 %v404_v13  ;;  %v400_v22 = vunpack.c.l.bf16 %v2120_v12  ;;  %887 = vmatpush.msra.mxu3 %v536_v18  ;;  %v396_v30 = vunpack.c.l.bf16 %v2144_v20 }
   0x8   :  { %v464_v23 = vunpack.c.l.bf16 %v2127_v15  ;;  %v2156_v24 = vld [vmem:[%s4463_s1 + $0x3d0] sm:$0xff]  ;;  %868 = vmatpush.msra.mxu2 %v468_v14  ;;  %829 = vmatpush.msra.mxu0 %v336_v19  ;;  %v460_v31 = vunpack.c.l.bf16 %v2149_v21  ;;  %v2180_v32 = vld [vmem:[%s4463_s1 + $0x3c0] sm:$0xff] }
   0x9   :  { %v2161_v25 = vld [vmem:[%s4463_s1 + $0xb0] sm:$0xff]  ;;  %849 = vmatpush.msra.mxu1 %v400_v22  ;;  %v2185_v33 = vld [vmem:[%s4463_s1 + $0xa0] sm:$0xff]  ;;  %888 = vmatpush.msra.mxu3 %v532_v26  ;;  %v528_v34 = vunpack.c.l.bf16 %v2156_v24  ;;  %v524_v42 = vunpack.c.l.bf16 %v2180_v32 }
   0xa   :  { %v2168_v28 = vld [vmem:[%s4463_s1 + $0x1b0] sm:$0xff]  ;;  %869 = vmatpush.msra.mxu2 %v464_v23  ;;  %v328_v35 = vunpack.c.l.bf16 %v2161_v25  ;;  %v2192_v36 = vld [vmem:[%s4463_s1 + $0x1a0] sm:$0xff]  ;;  %830 = vmatpush.msra.mxu0 %v332_v27  ;;  %v324_v43 = vunpack.c.l.bf16 %v2185_v33 }
   0xb   :  { %v2173_v29 = vld [vmem:[%s4463_s1 + $0x2b0] sm:$0xff]  ;;  %v2197_v37 = vld [vmem:[%s4463_s1 + $0x2a0] sm:$0xff]  ;;  %850 = vmatpush.msra.mxu1 %v396_v30  ;;  %v392_v38 = vunpack.c.l.bf16 %v2168_v28  ;;  %889 = vmatpush.msra.mxu3 %v528_v34  ;;  %v388_v46 = vunpack.c.l.bf16 %v2192_v36 }
   0xc   :  { %v456_v39 = vunpack.c.l.bf16 %v2173_v29  ;;  %v2204_v40 = vld [vmem:[%s4463_s1 + $0x3b0] sm:$0xff]  ;;  %870 = vmatpush.msra.mxu2 %v460_v31  ;;  %831 = vmatpush.msra.mxu0 %v328_v35  ;;  %v452_v47 = vunpack.c.l.bf16 %v2197_v37  ;;  %v2228_v48 = vld [vmem:[%s4463_s1 + $0x3a0] sm:$0xff] }
   0xd   :  { %v2209_v41 = vld [vmem:[%s4463_s1 + $0x90] sm:$0xff]  ;;  %851 = vmatpush.msra.mxu1 %v392_v38  ;;  %v2233_v49 = vld [vmem:[%s4463_s1 + $0x80] sm:$0xff]  ;;  %890 = vmatpush.msra.mxu3 %v524_v42  ;;  %v520_v50 = vunpack.c.l.bf16 %v2204_v40  ;;  %v516_v58 = vunpack.c.l.bf16 %v2228_v48 }
   0xe   :  { %v2216_v44 = vld [vmem:[%s4463_s1 + $0x190] sm:$0xff]  ;;  %871 = vmatpush.msra.mxu2 %v456_v39  ;;  %v320_v51 = vunpack.c.l.bf16 %v2209_v41  ;;  %v2240_v52 = vld [vmem:[%s4463_s1 + $0x180] sm:$0xff]  ;;  %832 = vmatpush.msra.mxu0 %v324_v43  ;;  %v316_v59 = vunpack.c.l.bf16 %v2233_v49 }
   0xf   :  { %v2221_v45 = vld [vmem:[%s4463_s1 + $0x290] sm:$0xff]  ;;  %v2245_v53 = vld [vmem:[%s4463_s1 + $0x280] sm:$0xff]  ;;  %852 = vmatpush.msra.mxu1 %v388_v46  ;;  %v384_v54 = vunpack.c.l.bf16 %v2216_v44  ;;  %891 = vmatpush.msra.mxu3 %v520_v50  ;;  %v380_v62 = vunpack.c.l.bf16 %v2240_v52 }
  0x10   :  { %v448_v55 = vunpack.c.l.bf16 %v2221_v45  ;;  %v2252_v56 = vld [vmem:[%s4463_s1 + $0x390] sm:$0xff]  ;;  %872 = vmatpush.msra.mxu2 %v452_v47  ;;  %833 = vmatpush.msra.mxu0 %v320_v51  ;;  %v444_v63 = vunpack.c.l.bf16 %v2245_v53  ;;  %v2276_v3 = vld [vmem:[%s4463_s1 + $0x380] sm:$0xff] }
  0x11   :  { %v2257_v57 = vld [vmem:[%s4463_s1 + $0x70] sm:$0xff]  ;;  %853 = vmatpush.msra.mxu1 %v384_v54  ;;  %v2281_v4 = vld [vmem:[%s4463_s1 + $0x60] sm:$0xff]  ;;  %892 = vmatpush.msra.mxu3 %v516_v58  ;;  %v512_v8 = vunpack.c.l.bf16 %v2252_v56  ;;  %v508_v26 = vunpack.c.l.bf16 %v2276_v3 }
  0x12   :  { %v2264_v60 = vld [vmem:[%s4463_s1 + $0x170] sm:$0xff]  ;;  %873 = vmatpush.msra.mxu2 %v448_v55  ;;  %v312_v9 = vunpack.c.l.bf16 %v2257_v57  ;;  %v2288_v13 = vld [vmem:[%s4463_s1 + $0x160] sm:$0xff]  ;;  %834 = vmatpush.msra.mxu0 %v316_v59  ;;  %v308_v27 = vunpack.c.l.bf16 %v2281_v4 }
  0x13   :  { %v2269_v61 = vld [vmem:[%s4463_s1 + $0x270] sm:$0xff]  ;;  %v2293_v14 = vld [vmem:[%s4463_s1 + $0x260] sm:$0xff]  ;;  %854 = vmatpush.msra.mxu1 %v380_v62  ;;  %v376_v18 = vunpack.c.l.bf16 %v2264_v60  ;;  %893 = vmatpush.msra.mxu3 %v512_v8  ;;  %v372_v34 = vunpack.c.l.bf16 %v2288_v13 }
  0x14   :  { %v440_v19 = vunpack.c.l.bf16 %v2269_v61  ;;  %v2300_v22 = vld [vmem:[%s4463_s1 + $0x370] sm:$0xff]  ;;  %874 = vmatpush.msra.mxu2 %v444_v63  ;;  %835 = vmatpush.msra.mxu0 %v312_v9  ;;  %v436_v35 = vunpack.c.l.bf16 %v2293_v14  ;;  %v2324_v38 = vld [vmem:[%s4463_s1 + $0x360] sm:$0xff] }
  0x15   :  { %v2305_v23 = vld [vmem:[%s4463_s1 + $0x50] sm:$0xff]  ;;  %855 = vmatpush.msra.mxu1 %v376_v18  ;;  %v2329_v39 = vld [vmem:[%s4463_s1 + $0x40] sm:$0xff]  ;;  %894 = vmatpush.msra.mxu3 %v508_v26  ;;  %v504_v42 = vunpack.c.l.bf16 %v2300_v22  ;;  %v500_v58 = vunpack.c.l.bf16 %v2324_v38 }
  0x16   :  { %v2312_v30 = vld [vmem:[%s4463_s1 + $0x150] sm:$0xff]  ;;  %875 = vmatpush.msra.mxu2 %v440_v19  ;;  %v304_v43 = vunpack.c.l.bf16 %v2305_v23  ;;  %v2336_v46 = vld [vmem:[%s4463_s1 + $0x140] sm:$0xff]  ;;  %836 = vmatpush.msra.mxu0 %v308_v27  ;;  %v300_v59 = vunpack.c.l.bf16 %v2329_v39 }
  0x17   :  { %v2317_v31 = vld [vmem:[%s4463_s1 + $0x250] sm:$0xff]  ;;  %v2341_v47 = vld [vmem:[%s4463_s1 + $0x240] sm:$0xff]  ;;  %856 = vmatpush.msra.mxu1 %v372_v34  ;;  %v368_v50 = vunpack.c.l.bf16 %v2312_v30  ;;  %895 = vmatpush.msra.mxu3 %v504_v42  ;;  %v364_v8 = vunpack.c.l.bf16 %v2336_v46 }
  0x18   :  { %v432_v51 = vunpack.c.l.bf16 %v2317_v31  ;;  %v2348_v54 = vld [vmem:[%s4463_s1 + $0x350] sm:$0xff]  ;;  %876 = vmatpush.msra.mxu2 %v436_v35  ;;  %837 = vmatpush.msra.mxu0 %v304_v43  ;;  %v428_v9 = vunpack.c.l.bf16 %v2341_v47  ;;  %v2372_v18 = vld [vmem:[%s4463_s1 + $0x340] sm:$0xff] }
  0x19   :  { %v2353_v55 = vld [vmem:[%s4463_s1 + $0x30] sm:$0xff]  ;;  %857 = vmatpush.msra.mxu1 %v368_v50  ;;  %4633 = vst [vmem:[#allocation5_spill] sm:$0xff] %v2372_v18  ;;  %v2377_v19 = vld [vmem:[%s4463_s1 + $0x20] sm:$0xff]  ;;  %896 = vmatpush.msra.mxu3 %v500_v58  ;;  %v496_v26 = vunpack.c.l.bf16 %v2348_v54  ;;  %v492_v58 = vunpack.c.l.bf16 %v2372_v18 }
  0x1a   :  { %4630 = vst [vmem:[#allocation2_spill] sm:$0xff] %v2353_v55  ;;  %v2360_v62 = vld [vmem:[%s4463_s1 + $0x130] sm:$0xff]  ;;  %877 = vmatpush.msra.mxu2 %v432_v51  ;;  %v296_v27 = vunpack.c.l.bf16 %v2353_v55  ;;  %v2384_v34 = vld [vmem:[%s4463_s1 + $0x120] sm:$0xff]  ;;  %838 = vmatpush.msra.mxu0 %v300_v59  ;;  %v292_v59 = vunpack.c.l.bf16 %v2377_v19 }
  0x1b   :  { %4631 = vst [vmem:[#allocation3_spill] sm:$0xff] %v2360_v62  ;;  %v2365_v63 = vld [vmem:[%s4463_s1 + $0x230] sm:$0xff]  ;;  %v2389_v35 = vld [vmem:[%s4463_s1 + $0x220] sm:$0xff]  ;;  %858 = vmatpush.msra.mxu1 %v364_v8  ;;  %v360_v42 = vunpack.c.l.bf16 %v2360_v62  ;;  %897 = vmatpush.msra.mxu3 %v496_v26  ;;  %v356_v62 = vunpack.c.l.bf16 %v2384_v34 }
  0x1c   :  { %4632 = vst [vmem:[#allocation4_spill] sm:$0xff] %v2365_v63  ;;  %v424_v43 = vunpack.c.l.bf16 %v2365_v63  ;;  %v2396_v50 = vld [vmem:[%s4463_s1 + $0x330] sm:$0xff]  ;;  %878 = vmatpush.msra.mxu2 %v428_v9  ;;  %839 = vmatpush.msra.mxu0 %v296_v27  ;;  %v420_v9 = vunpack.c.l.bf16 %v2389_v35  ;;  %v2420_v26 = vld [vmem:[%s4463_s1 + $0x320] sm:$0xff] }
  0x1d   :  { %4634 = vst [vmem:[#allocation6_spill] sm:$0xff] %v2377_v19  ;;  %v2401_v51 = vld [vmem:[%s4463_s1 + $0x10] sm:$0xff]  ;;  %859 = vmatpush.msra.mxu1 %v360_v42  ;;  %v2425_v19 = vld [vmem:[%s4463_s1] sm:$0xff]  ;;  %898 = vmatpush.msra.mxu3 %v492_v58  ;;  %v488_v18 = vunpack.c.l.bf16 %v2396_v50 }
  0x1e   :  { %4635 = vst [vmem:[#allocation7_spill] sm:$0xff] %v2384_v34  ;;  %v2408_v8 = vld [vmem:[%s4463_s1 + $0x110] sm:$0xff]  ;;  %879 = vmatpush.msra.mxu2 %v424_v43  ;;  %v288_v27 = vunpack.c.l.bf16 %v2401_v51  ;;  %v2432_v42 = vld [vmem:[%s4463_s1 + $0x100] sm:$0xff]  ;;  %840 = vmatpush.msra.mxu0 %v292_v59 }
  0x1f   :  { %4636 = vst [vmem:[#allocation8_spill] sm:$0xff] %v2389_v35  ;;  %v2413_v63 = vld [vmem:[%s4463_s1 + $0x210] sm:$0xff]  ;;  %v2437_v35 = vld [vmem:[%s4463_s1 + $0x200] sm:$0xff]  ;;  %860 = vmatpush.msra.mxu1 %v356_v62  ;;  %v352_v34 = vunpack.c.l.bf16 %v2408_v8  ;;  %899 = vmatpush.msra.mxu3 %v488_v18  ;;  %v284_v62 = vunpack.c.l.bf16 %v2425_v19 }
  0x20   :  { %4637 = vst [vmem:[#allocation9_spill] sm:$0xff] %v2396_v50  ;;  %v416_v43 = vunpack.c.l.bf16 %v2413_v63  ;;  %v2444_v58 = vld [vmem:[%s4463_s1 + $0x310] sm:$0xff]  ;;  %880 = vmatpush.msra.mxu2 %v420_v9  ;;  %v484_v50 = vunpack.c.l.bf16 %v2420_v26  ;;  %841 = vmatpush.msra.mxu0 %v288_v27  ;;  %v412_v18 = vunpack.c.l.bf16 %v2437_v35  ;;  %v2468_v9 = vld [vmem:[%s4463_s1 + $0x300] sm:$0xff] }
  0x21   :  { %4638 = vst [vmem:[#allocation10_spill] sm:$0xff] %v2401_v51  ;;  %v2449_v51 = vld [vmem:[%s4463_s1 + $0x4f0] sm:$0xff]  ;;  %861 = vmatpush.msra.mxu1 %v352_v34  ;;  %v2480_v27 = vld [vmem:[%s4463_s1 + $0x5e0] sm:$0xff] }
  0x22   :  { %4639 = vst [vmem:[#allocation11_spill] sm:$0xff] %v2408_v8  ;;  %v2456_v59 = vld [vmem:[%s4463_s1 + $0x5f0] sm:$0xff]  ;;  %v348_v8 = vunpack.c.l.bf16 %v2432_v42  ;;  %881 = vmatpush.msra.mxu2 %v416_v43  ;;  %900 = vmatpush.msra.mxu3 %v484_v50  ;;  %v600_v34 = vunpack.c.l.bf16 %v2449_v51  ;;  %v2635_v55 = vld [vmem:[%s4463_s1 + $0x680] sm:$0xff] }
  0x23   :  { %4640 = vst [vmem:[#allocation12_spill] sm:$0xff] %v2413_v63  ;;  %v2461_v63 = vld [vmem:[%s4463_s1 + $0x6f0] sm:$0xff]  ;;  %842 = vmatpush.msra.mxu0 %v284_v62 }
  0x24   :  { %4641 = vst [vmem:[#allocation13_spill] sm:$0xff] %v2420_v26  ;;  %v480_v26 = vunpack.c.l.bf16 %v2444_v58  ;;  %862 = vmatpush.msra.mxu1 %v348_v8  ;;  %v728_v50 = vunpack.c.l.bf16 %v2461_v63  ;;  %v2492_v43 = vld [vmem:[%s4463_s1 + $0x7f0] sm:$0xff]  ;;  %882 = vmatpush.msra.mxu2 %v412_v18  ;;  %v2516_v18 = vld [vmem:[%s4463_s1 + $0x7e0] sm:$0xff] }
  0x25   :  { %4642 = vst [vmem:[#allocation14_spill] sm:$0xff] %v2425_v19  ;;  %v2473_v19 = vld [vmem:[%s4463_s1 + $0x4e0] sm:$0xff]  ;;  %v2504_v62 = vld [vmem:[%s4463_s1 + $0x5d0] sm:$0xff]  ;;  %907 = vmatpush.msrb.mxu0 %v600_v34 }
  0x26   :  { %4643 = vst [vmem:[#allocation15_spill] sm:$0xff] %v2432_v42  ;;  %v664_v42 = vunpack.c.l.bf16 %v2456_v59  ;;  %901 = vmatpush.msra.mxu3 %v480_v26  ;;  %v596_v8 = vunpack.c.l.bf16 %v2473_v19  ;;  %947 = vmatpush.msrb.mxu2 %v728_v50  ;;  %v2528_v34 = vld [vmem:[%s4463_s1 + $0x5c0] sm:$0xff]  ;;  %v2540_v50 = vld [vmem:[%s4463_s1 + $0x7d0] sm:$0xff] }
  0x27   :  { %4644 = vst [vmem:[#allocation16_spill] sm:$0xff] %v2437_v35  ;;  %v2485_v35 = vld [vmem:[%s4463_s1 + $0x6e0] sm:$0xff] }
  0x28   :  { %4645 = vst [vmem:[#allocation17_spill] sm:$0xff] %v2444_v58  ;;  %v476_v58 = vunpack.c.l.bf16 %v2468_v9  ;;  %927 = vmatpush.msrb.mxu1 %v664_v42  ;;  %v724_v26 = vunpack.c.l.bf16 %v2485_v35  ;;  %908 = vmatpush.msrb.mxu0 %v596_v8  ;;  %v2552_v8 = vld [vmem:[%s4463_s1 + $0x5b0] sm:$0xff] }
  0x29   :  { %4646 = vst [vmem:[#allocation18_spill] sm:$0xff] %v2449_v51  ;;  %v2497_v51 = vld [vmem:[%s4463_s1 + $0x4d0] sm:$0xff] }
  0x2a   :  { %4647 = vst [vmem:[#allocation19_spill] sm:$0xff] %v2456_v59  ;;  %v660_v59 = vunpack.c.l.bf16 %v2480_v27  ;;  %902 = vmatpush.msra.mxu3 %v476_v58  ;;  %v592_v42 = vunpack.c.l.bf16 %v2497_v51  ;;  %948 = vmatpush.msrb.mxu2 %v724_v26  ;;  %v2564_v26 = vld [vmem:[%s4463_s1 + $0x7c0] sm:$0xff] }
  0x2b   :  { %4648 = vst [vmem:[#allocation20_spill] sm:$0xff] %v2461_v63  ;;  %v2509_v63 = vld [vmem:[%s4463_s1 + $0x6d0] sm:$0xff] }
  0x2c   :  { %4649 = vst [vmem:[#allocation21_spill] sm:$0xff] %v2468_v9  ;;  %v792_v9 = vunpack.c.l.bf16 %v2492_v43  ;;  %928 = vmatpush.msrb.mxu1 %v660_v59  ;;  %v720_v58 = vunpack.c.l.bf16 %v2509_v63  ;;  %909 = vmatpush.msrb.mxu0 %v592_v42  ;;  %v2576_v42 = vld [vmem:[%s4463_s1 + $0x5a0] sm:$0xff] }
  0x2d   :  { %4650 = vst [vmem:[#allocation22_spill] sm:$0xff] %v2473_v19  ;;  %v2521_v19 = vld [vmem:[%s4463_s1 + $0x4c0] sm:$0xff] }
  0x2e   :  { %4651 = vst [vmem:[#allocation23_spill] sm:$0xff] %v2480_v27  ;;  %v656_v27 = vunpack.c.l.bf16 %v2504_v62  ;;  %967 = vmatpush.msrb.mxu3 %v792_v9  ;;  %v588_v59 = vunpack.c.l.bf16 %v2521_v19  ;;  %949 = vmatpush.msrb.mxu2 %v720_v58  ;;  %v2588_v58 = vld [vmem:[%s4463_s1 + $0x7b0] sm:$0xff] }
  0x2f   :  { %4652 = vst [vmem:[#allocation24_spill] sm:$0xff] %v2485_v35  ;;  %v2533_v35 = vld [vmem:[%s4463_s1 + $0x6c0] sm:$0xff] }
  0x30   :  { %4653 = vst [vmem:[#allocation25_spill] sm:$0xff] %v2492_v43  ;;  %v788_v43 = vunpack.c.l.bf16 %v2516_v18  ;;  %929 = vmatpush.msrb.mxu1 %v656_v27  ;;  %v716_v9 = vunpack.c.l.bf16 %v2533_v35  ;;  %910 = vmatpush.msrb.mxu0 %v588_v59  ;;  %v2600_v59 = vld [vmem:[%s4463_s1 + $0x590] sm:$0xff] }
  0x31   :  { %4654 = vst [vmem:[#allocation26_spill] sm:$0xff] %v2497_v51  ;;  %v2545_v51 = vld [vmem:[%s4463_s1 + $0x4b0] sm:$0xff] }
  0x32   :  { %4655 = vst [vmem:[#allocation27_spill] sm:$0xff] %v2504_v62  ;;  %v652_v62 = vunpack.c.l.bf16 %v2528_v34  ;;  %968 = vmatpush.msrb.mxu3 %v788_v43  ;;  %v584_v27 = vunpack.c.l.bf16 %v2545_v51  ;;  %950 = vmatpush.msrb.mxu2 %v716_v9 }
  0x33   :  { %4656 = vst [vmem:[#allocation28_spill] sm:$0xff] %v2509_v63  ;;  %v2557_v63 = vld [vmem:[%s4463_s1 + $0x6b0] sm:$0xff] }
  0x34   :  { %4657 = vst [vmem:[#allocation29_spill] sm:$0xff] %v2516_v18  ;;  %v784_v18 = vunpack.c.l.bf16 %v2540_v50  ;;  %930 = vmatpush.msrb.mxu1 %v652_v62  ;;  %v712_v43 = vunpack.c.l.bf16 %v2557_v63  ;;  %911 = vmatpush.msrb.mxu0 %v584_v27  ;;  %v27_v27 = vld [vmem:[%s4464_s0 + $0x8] sm:$0xff] }
  0x35   :  { %4658 = vst [vmem:[#allocation30_spill] sm:$0xff] %v2521_v19  ;;  %v2569_v19 = vld [vmem:[%s4463_s1 + $0x4a0] sm:$0xff] }
  0x36   :  { %4659 = vst [vmem:[#allocation31_spill] sm:$0xff] %v2528_v34  ;;  %v648_v34 = vunpack.c.l.bf16 %v2552_v8  ;;  %969 = vmatpush.msrb.mxu3 %v784_v18  ;;  %v580_v62 = vunpack.c.l.bf16 %v2569_v19  ;;  %v644_v18 = vunpack.c.l.bf16 %v2576_v42  ;;  %951 = vmatpush.msrb.mxu2 %v712_v43  ;;  %v2642_v43 = vld [vmem:[%s4463_s1 + $0x790] sm:$0xff] }
  0x37   :  { %4660 = vst [vmem:[#allocation32_spill] sm:$0xff] %v2533_v35  ;;  %v2581_v35 = vld [vmem:[%s4463_s1 + $0x6a0] sm:$0xff] }
  0x38   :  { %4661 = vst [vmem:[#allocation33_spill] sm:$0xff] %v2540_v50  ;;  %v780_v50 = vunpack.c.l.bf16 %v2564_v26  ;;  %931 = vmatpush.msrb.mxu1 %v648_v34  ;;  %v708_v9 = vunpack.c.l.bf16 %v2581_v35  ;;  %v776_v34 = vunpack.c.l.bf16 %v2588_v58  ;;  %912 = vmatpush.msrb.mxu0 %v580_v62 }
  0x39   :  { %4662 = vst [vmem:[#allocation34_spill] sm:$0xff] %v2545_v51  ;;  %v2593_v51 = vld [vmem:[%s4463_s1 + $0x490] sm:$0xff] }
  0x3a   :  { %4663 = vst [vmem:[#allocation35_spill] sm:$0xff] %v2552_v8  ;;  %v26_v8 = vld [vmem:[%s4464_s0] sm:$0xff]  ;;  %970 = vmatpush.msrb.mxu3 %v780_v50  ;;  %932 = vmatpush.msrb.mxu1 %v644_v18  ;;  %v2654_v18 = vld [vmem:[%s4463_s1 + $0x570] sm:$0xff] }
  0x3b   :  { %4664 = vst [vmem:[#allocation36_spill] sm:$0xff] %v2557_v63  ;;  %v2605_v63 = vld [vmem:[%s4463_s1 + $0x690] sm:$0xff]  ;;  %952 = vmatpush.msrb.mxu2 %v708_v9  ;;  %v700_v9 = vunpack.c.l.bf16 %v2635_v55 }
  0x3c   :  { %4665 = vst [vmem:[#allocation37_spill] sm:$0xff] %v2564_v26  ;;  %v2620_v26 = vld [vmem:[%s4463_s1 + $0x480] sm:$0xff]  ;;  %v704_v50 = vunpack.c.l.bf16 %v2605_v63  ;;  %971 = vmatpush.msrb.mxu3 %v776_v34 }
  0x3d   :  { %4666 = vst [vmem:[#allocation38_spill] sm:$0xff] %v2569_v19  ;;  %v2615_v19 = vld [vmem:[%s4463_s1 + $0x7a0] sm:$0xff]  ;;  %v572_v62 = vunpack.c.l.bf16 %v2620_v26 }
  0x3e   :  { %4667 = vst [vmem:[#allocation39_spill] sm:$0xff] %v2576_v42  ;;  %v2630_v42 = vld [vmem:[%s4463_s1 + $0x580] sm:$0xff]  ;;  %953 = vmatpush.msrb.mxu2 %v704_v50 }
  0x3f   :  { %4668 = vst [vmem:[#allocation40_spill] sm:$0xff] %v2581_v35  ;;  %v576_v35 = vunpack.c.l.bf16 %v2593_v51  ;;  %v2666_v34 = vld [vmem:[%s4463_s1 + $0x780] sm:$0xff] }
  0x40   :  { %4669 = vst [vmem:[#allocation41_spill] sm:$0xff] %v2593_v51  ;;  %v2647_v51 = vld [vmem:[%s4463_s1 + $0x470] sm:$0xff]  ;;  %954 = vmatpush.msrb.mxu2 %v700_v9  ;;  %v2714_v9 = vld [vmem:[%s4463_s1 + $0x760] sm:$0xff] }
  0x41   :  { %4670 = vst [vmem:[#allocation42_spill] sm:$0xff] %v2600_v59  ;;  %913 = vmatpush.msrb.mxu0 %v576_v35  ;;  %v568_v35 = vunpack.c.l.bf16 %v2647_v51 }
  0x42   :  { %4671 = vst [vmem:[#allocation43_spill] sm:$0xff] %v2605_v63  ;;  %v2659_v63 = vld [vmem:[%s4463_s1 + $0x670] sm:$0xff] }
  0x43   :  { %4672 = vst [vmem:[#allocation44_spill] sm:$0xff] %v2615_v19  ;;  %914 = vmatpush.msrb.mxu0 %v572_v62  ;;  %v696_v50 = vunpack.c.l.bf16 %v2659_v63  ;;  %v2702_v62 = vld [vmem:[%s4463_s1 + $0x550] sm:$0xff] }
  0x44   :  { %4673 = vst [vmem:[#allocation45_spill] sm:$0xff] %v2620_v26  ;;  %v2671_v26 = vld [vmem:[%s4463_s1 + $0x460] sm:$0xff] }
  0x45   :  { %808 = vst [vmem:[#allocation1] ss:$4 sm:$0xff] %v26_v8  ;;  %v640_v8 = vunpack.c.l.bf16 %v2600_v59  ;;  %v636_v59 = vunpack.c.l.bf16 %v2630_v42  ;;  %915 = vmatpush.msrb.mxu0 %v568_v35  ;;  %955 = vmatpush.msrb.mxu2 %v696_v50  ;;  %v2726_v35 = vld [vmem:[%s4463_s1 + $0x540] sm:$0xff]  ;;  %v2738_v50 = vld [vmem:[%s4463_s1 + $0x750] sm:$0xff] }
  0x46   :  { %4674 = vst [vmem:[#allocation46_spill] sm:$0xff] %v2630_v42  ;;  %v632_v42 = vunpack.c.l.bf16 %v2654_v18 }
  0x47   :  { %4675 = vst [vmem:[#allocation47_spill] sm:$0xff] %v2635_v55  ;;  %933 = vmatpush.msrb.mxu1 %v640_v8  ;;  %v2678_v8 = vld [vmem:[%s4463_s1 + $0x560] sm:$0xff] }
  0x48   :  { %810 = vst [vmem:[#allocation1 + $0x20] ss:$4 sm:$0xff] %v27_v27  ;;  %v772_v27 = vunpack.c.l.bf16 %v2615_v19  ;;  %v768_v19 = vunpack.c.l.bf16 %v2642_v43  ;;  %v2683_v55 = vld [vmem:[%s4463_s1 + $0x660] sm:$0xff] }
  0x49   :  { %4676 = vst [vmem:[#allocation48_spill] sm:$0xff] %v2642_v43  ;;  %934 = vmatpush.msrb.mxu1 %v636_v59  ;;  %v764_v43 = vunpack.c.l.bf16 %v2666_v34  ;;  %v564_v59 = vunpack.c.l.bf16 %v2671_v26 }
  0x4a   :  { %4677 = vst [vmem:[#allocation49_spill] sm:$0xff] %v2647_v51  ;;  %972 = vmatpush.msrb.mxu3 %v772_v27  ;;  %v2690_v27 = vld [vmem:[%s4463_s1 + $0x770] sm:$0xff] }
  0x4b   :  { %4678 = vst [vmem:[#allocation50_spill] sm:$0xff] %v2654_v18  ;;  %v2695_v51 = vld [vmem:[%s4463_s1 + $0x450] sm:$0xff]  ;;  %935 = vmatpush.msrb.mxu1 %v632_v42  ;;  %v628_v18 = vunpack.c.l.bf16 %v2678_v8  ;;  %916 = vmatpush.msrb.mxu0 %v564_v59 }
  0x4c   :  { %4679 = vst [vmem:[#allocation51_spill] sm:$0xff] %v2659_v63  ;;  %973 = vmatpush.msrb.mxu3 %v768_v19  ;;  %v2707_v63 = vld [vmem:[%s4463_s1 + $0x650] sm:$0xff]  ;;  %v692_v19 = vunpack.c.l.bf16 %v2683_v55  ;;  %v560_v42 = vunpack.c.l.bf16 %v2695_v51 }
  0x4d   :  { %4680 = vst [vmem:[#allocation52_spill] sm:$0xff] %v2666_v34  ;;  %v760_v34 = vunpack.c.l.bf16 %v2690_v27  ;;  %936 = vmatpush.msrb.mxu1 %v628_v18  ;;  %v2750_v59 = vld [vmem:[%s4463_s1 + $0x530] sm:$0xff] }
  0x4e   :  { %4681 = vst [vmem:[#allocation53_spill] sm:$0xff] %v2671_v26  ;;  %v2719_v26 = vld [vmem:[%s4463_s1 + $0x440] sm:$0xff]  ;;  %974 = vmatpush.msrb.mxu3 %v764_v43  ;;  %v688_v43 = vunpack.c.l.bf16 %v2707_v63  ;;  %956 = vmatpush.msrb.mxu2 %v692_v19 }
  0x4f   :  { %4682 = vst [vmem:[#allocation54_spill] sm:$0xff] %v2678_v8  ;;  %v624_v8 = vunpack.c.l.bf16 %v2702_v62  ;;  %v556_v18 = vunpack.c.l.bf16 %v2719_v26  ;;  %917 = vmatpush.msrb.mxu0 %v560_v42  ;;  %v2762_v19 = vld [vmem:[%s4463_s1 + $0x740] sm:$0xff] }
  0x50   :  { %4683 = vst [vmem:[#allocation55_spill] sm:$0xff] %v2683_v55  ;;  %v2731_v55 = vld [vmem:[%s4463_s1 + $0x640] sm:$0xff]  ;;  %975 = vmatpush.msrb.mxu3 %v760_v34  ;;  %957 = vmatpush.msrb.mxu2 %v688_v43  ;;  %v2786_v43 = vld [vmem:[%s4463_s1 + $0x730] sm:$0xff] }
  0x51   :  { %4684 = vst [vmem:[#allocation56_spill] sm:$0xff] %v2690_v27  ;;  %v756_v27 = vunpack.c.l.bf16 %v2714_v9  ;;  %937 = vmatpush.msrb.mxu1 %v624_v8  ;;  %v684_v34 = vunpack.c.l.bf16 %v2731_v55  ;;  %v2774_v42 = vld [vmem:[%s4463_s1 + $0x520] sm:$0xff]  ;;  %918 = vmatpush.msrb.mxu0 %v556_v18  ;;  %v2798_v18 = vld [vmem:[%s4463_s1 + $0x510] sm:$0xff] }
  0x52   :  { %4685 = vst [vmem:[#allocation57_spill] sm:$0xff] %v2695_v51  ;;  %v2743_v51 = vld [vmem:[%s4463_s1 + $0x430] sm:$0xff] }
  0x53   :  { %4686 = vst [vmem:[#allocation58_spill] sm:$0xff] %v2702_v62  ;;  %v620_v62 = vunpack.c.l.bf16 %v2726_v35  ;;  %976 = vmatpush.msrb.mxu3 %v756_v27  ;;  %v552_v8 = vunpack.c.l.bf16 %v2743_v51  ;;  %958 = vmatpush.msrb.mxu2 %v684_v34  ;;  %v2810_v34 = vld [vmem:[%s4463_s1 + $0x720] sm:$0xff] }
  0x54   :  { %4687 = vst [vmem:[#allocation59_spill] sm:$0xff] %v2707_v63  ;;  %v2755_v63 = vld [vmem:[%s4463_s1 + $0x630] sm:$0xff] }
  0x55   :  { %4688 = vst [vmem:[#allocation60_spill] sm:$0xff] %v2714_v9  ;;  %v752_v9 = vunpack.c.l.bf16 %v2738_v50  ;;  %938 = vmatpush.msrb.mxu1 %v620_v62  ;;  %v680_v27 = vunpack.c.l.bf16 %v2755_v63  ;;  %919 = vmatpush.msrb.mxu0 %v552_v8  ;;  %v2822_v8 = vld [vmem:[%s4463_s1 + $0x500] sm:$0xff] }
  0x56   :  { %4689 = vst [vmem:[#allocation61_spill] sm:$0xff] %v2719_v26  ;;  %v2767_v26 = vld [vmem:[%s4463_s1 + $0x420] sm:$0xff] }
  0x57   :  { %4690 = vst [vmem:[#allocation62_spill] sm:$0xff] %v2726_v35  ;;  %v616_v35 = vunpack.c.l.bf16 %v2750_v59  ;;  %977 = vmatpush.msrb.mxu3 %v752_v9  ;;  %v548_v62 = vunpack.c.l.bf16 %v2767_v26  ;;  %959 = vmatpush.msrb.mxu2 %v680_v27  ;;  %v2834_v27 = vld [vmem:[%s4463_s1 + $0x710] sm:$0xff] }
  0x58   :  { %4691 = vst [vmem:[#allocation63_spill] sm:$0xff] %v2731_v55  ;;  %v2779_v55 = vld [vmem:[%s4463_s1 + $0x620] sm:$0xff] }
  0x59   :  { %4692 = vst [vmem:[#allocation64_spill] sm:$0xff] %v2738_v50  ;;  %v748_v50 = vunpack.c.l.bf16 %v2762_v19  ;;  %939 = vmatpush.msrb.mxu1 %v616_v35  ;;  %v676_v9 = vunpack.c.l.bf16 %v2779_v55  ;;  %920 = vmatpush.msrb.mxu0 %v548_v62  ;;  %v604_v62 = vunpack.c.l.bf16 %v2822_v8 }
  0x5a   :  { %4693 = vst [vmem:[#allocation65_spill] sm:$0xff] %v2743_v51  ;;  %v2791_v51 = vld [vmem:[%s4463_s1 + $0x410] sm:$0xff] }
  0x5b   :  { %4694 = vst [vmem:[#allocation66_spill] sm:$0xff] %v2750_v59  ;;  %v612_v59 = vunpack.c.l.bf16 %v2774_v42  ;;  %978 = vmatpush.msrb.mxu3 %v748_v50  ;;  %v544_v35 = vunpack.c.l.bf16 %v2791_v51  ;;  %960 = vmatpush.msrb.mxu2 %v676_v9  ;;  %v2847_v9 = vld.sshfl [vmem:[#allocation1] sm:$0xff pattern:$0x73625140] }
  0x5c   :  { %4695 = vst [vmem:[#allocation67_spill] sm:$0xff] %v2755_v63  ;;  %v2803_v63 = vld [vmem:[%s4463_s1 + $0x610] sm:$0xff]  ;;  %843 = vmatmul.f32.vlgmr.msra.gmra.mxu0 %v2847_v9 }
  0x5d   :  { %4696 = vst [vmem:[#allocation68_spill] sm:$0xff] %v2762_v19  ;;  %v744_v19 = vunpack.c.l.bf16 %v2786_v43  ;;  %940 = vmatpush.msrb.mxu1 %v612_v59  ;;  %v672_v50 = vunpack.c.l.bf16 %v2803_v63  ;;  %921 = vmatpush.msrb.mxu0 %v544_v35  ;;  %v473_v35 = vunpack.c.h.bf16 %v2086_v2  ;;  %v537_v2 = vunpack.c.h.bf16 %v2110_v10 }
  0x5e   :  { %4697 = vst [vmem:[#allocation69_spill] sm:$0xff] %v2767_v26  ;;  %v2815_v26 = vld [vmem:[%s4463_s1 + $0x400] sm:$0xff]  ;;  %v397_v10 = vunpack.c.h.bf16 %v2144_v20  ;;  %v525_v20 = vunpack.c.h.bf16 %v2180_v32  ;;  %v321_v32 = vunpack.c.h.bf16 %v2209_v41  ;;  %v445_v41 = vunpack.c.h.bf16 %v2245_v53 }
  0x5f   :  { %4698 = vst [vmem:[#allocation70_spill] sm:$0xff] %v2774_v42  ;;  %v608_v42 = vunpack.c.l.bf16 %v2798_v18  ;;  %979 = vmatpush.msrb.mxu3 %v744_v19  ;;  %961 = vmatpush.msrb.mxu2 %v672_v50  ;;  %v736_v19 = vunpack.c.l.bf16 %v2834_v27  ;;  %v401_v50 = vunpack.c.h.bf16 %v2120_v12  ;;  %v329_v12 = vunpack.c.h.bf16 %v2161_v25 }
  0x60   :  { %4699 = vst [vmem:[#allocation71_spill] sm:$0xff] %v2779_v55  ;;  %v2827_v55 = vld [vmem:[%s4463_s1 + $0x600] sm:$0xff]  ;;  %v389_v25 = vunpack.c.h.bf16 %v2192_v36  ;;  %v449_v36 = vunpack.c.h.bf16 %v2221_v45  ;;  %v313_v45 = vunpack.c.h.bf16 %v2257_v57  ;;  %v373_v53 = vunpack.c.h.bf16 %v2288_v13 }
  0x61   :  { %4700 = vst [vmem:[#allocation72_spill] sm:$0xff] %v2786_v43  ;;  %v540_v43 = vunpack.c.l.bf16 %v2815_v26  ;;  %941 = vmatpush.msrb.mxu1 %v608_v42  ;;  %v668_v59 = vunpack.c.l.bf16 %v2827_v55  ;;  %v409_v42 = vunpack.c.h.bf16 %v2081_v1  ;;  %v469_v1 = vunpack.c.h.bf16 %v2103_v7 }
  0x62   :  { %4701 = vst [vmem:[#allocation73_spill] sm:$0xff] %v2791_v51  ;;  %v740_v51 = vunpack.c.l.bf16 %v2810_v34  ;;  %v333_v7 = vunpack.c.h.bf16 %v2137_v17  ;;  %v2877_v17 = vld.sshfl [vmem:[#allocation1 + $0x30] sm:$0xff pattern:$0x73625140]  ;;  %v505_v57 = vunpack.c.h.bf16 %v2300_v22  ;;  %v301_v13 = vunpack.c.h.bf16 %v2329_v39 }
  0x63   :  { %4702 = vst [vmem:[#allocation74_spill] sm:$0xff] %v2798_v18  ;;  %v345_v18 = vunpack.c.h.bf16 %v2076_v0  ;;  %922 = vmatpush.msrb.mxu0 %v540_v43  ;;  %942 = vmatpush.msrb.mxu1 %v604_v62  ;;  %v2863_v43 = vld.sshfl [vmem:[#allocation1 + $0x18] sm:$0xff pattern:$0x73625140]  ;;  %v533_v62 = vunpack.c.h.bf16 %v2132_v16  ;;  %v457_v16 = vunpack.c.h.bf16 %v2173_v29  ;;  %v429_v22 = vunpack.c.h.bf16 %v2341_v47 }
  0x64   :  { %4703 = vst [vmem:[#allocation75_spill] sm:$0xff] %v2803_v63  ;;  %v2843_v63 = vld [vmem:[%s4463_s1 + $0x700] sm:$0xff]  ;;  %980 = vmatpush.msrb.mxu3 %v740_v51  ;;  %962 = vmatpush.msrb.mxu2 %v668_v59  ;;  %v405_v51 = vunpack.c.h.bf16 %v2098_v6  ;;  %v465_v6 = vunpack.c.h.bf16 %v2127_v15  ;;  %v393_v15 = vunpack.c.h.bf16 %v2168_v28  ;;  %v453_v28 = vunpack.c.h.bf16 %v2197_v37  ;;  %v2886_v29 = vld.sshfl [vmem:[#allocation1 + $0x38] sm:$0xff pattern:$0x73625140] }
  0x65   :  { %4704 = vst [vmem:[#allocation76_spill] sm:$0xff] %v2815_v26  ;;  %v2849_v26 = vld.sshfl [vmem:[#allocation1 + $0x8] sm:$0xff pattern:$0x73625140]  ;;  %v732_v0 = vunpack.c.l.bf16 %v2843_v63  ;;  %987 = vmatpush.msra.mxu0 %v345_v18  ;;  %903 = vmatmul.f32.vlgmr.msra.gmra.mxu3 %v2863_v43  ;;  %v461_v18 = vunpack.c.h.bf16 %v2149_v21  ;;  %v325_v21 = vunpack.c.h.bf16 %v2185_v33  ;;  %v385_v33 = vunpack.c.h.bf16 %v2216_v44 }
  0x66   :  { %4705 = vst [vmem:[#allocation77_spill] sm:$0xff] %v2822_v8  ;;  %v341_v8 = vunpack.c.h.bf16 %v2093_v5  ;;  %981 = vmatpush.msrb.mxu3 %v736_v19  ;;  %863 = vmatmul.f32.vlgmr.msra.gmra.mxu1 %v2849_v26  ;;  %v337_v5 = vunpack.c.h.bf16 %v2115_v11  ;;  %v529_v11 = vunpack.c.h.bf16 %v2156_v24  ;;  %v2881_v24 = vld.sshfl [vmem:[#allocation1 + $0x20] sm:$0xff pattern:$0x73625140]  ;;  %v517_v37 = vunpack.c.h.bf16 %v2228_v48 }
  0x67   :  { %4706 = vst [vmem:[#allocation78_spill] sm:$0xff] %v2827_v55  ;;  %v2853_v55 = vld.sshfl [vmem:[#allocation1 + $0x10] sm:$0xff pattern:$0x73625140]  ;;  %1007 = vmatpush.msra.mxu1 %v409_v42  ;;  %923 = vmatmul.f32.vlgmr.msrb.gmra.mxu0 %v2881_v24  ;;  %v381_v19 = vunpack.c.h.bf16 %v2240_v52  ;;  %v513_v44 = vunpack.c.h.bf16 %v2252_v56  ;;  %v377_v48 = vunpack.c.h.bf16 %v2264_v60  ;;  %v441_v42 = vunpack.c.h.bf16 %v2269_v61 }
  0x68   :  { %883 = vmatmul.f32.vlgmr.msra.gmra.mxu2 %v2853_v55  ;;  %982 = vmatpush.msrb.mxu3 %v732_v0  ;;  %v2892_v59 = vld.sshfl [vmem:[#allocation1 + $0x28] sm:$0xff pattern:$0x73625140]  ;;  %v309_v52 = vunpack.c.h.bf16 %v2281_v4  ;;  %v437_v56 = vunpack.c.h.bf16 %v2293_v14  ;;  %v305_v60 = vunpack.c.h.bf16 %v2305_v23  ;;  %v369_v61 = vunpack.c.h.bf16 %v2312_v30  ;;  %v4708_v0 = vld [vmem:[#allocation3_spill] sm:$0xff] }
  0x69   :  { %1027 = vmatpush.msra.mxu2 %v473_v35  ;;  %988 = vmatpush.msra.mxu0 %v341_v8  ;;  %v521_v8 = vunpack.c.h.bf16 %v2204_v40  ;;  %v317_v40 = vunpack.c.h.bf16 %v2233_v49  ;;  %v509_v49 = vunpack.c.h.bf16 %v2276_v3  ;;  %v433_v3 = vunpack.c.h.bf16 %v2317_v31  ;;  %v4707_v30 = vld [vmem:[#allocation2_spill] sm:$0xff] }
  0x6a   :  { %1008 = vmatpush.msra.mxu1 %v405_v51  ;;  %1047 = vmatpush.msra.mxu3 %v537_v2  ;;  %v501_v4 = vunpack.c.h.bf16 %v2324_v38  ;;  %v365_v14 = vunpack.c.h.bf16 %v2336_v46  ;;  %v497_v23 = vunpack.c.h.bf16 %v2348_v54  ;;  %v297_v35 = vunpack.c.h.bf16 %v4707_v30  ;;  %v4709_v38 = vld [vmem:[#allocation4_spill] sm:$0xff]  ;;  %v4711_v46 = vld [vmem:[#allocation6_spill] sm:$0xff] }
  0x6b   :  { %1028 = vmatpush.msra.mxu2 %v469_v1  ;;  %989 = vmatpush.msra.mxu0 %v337_v5  ;;  %v361_v31 = vunpack.c.h.bf16 %v4708_v0  ;;  %v425_v51 = vunpack.c.h.bf16 %v4709_v38  ;;  %v4710_v1 = vld [vmem:[#allocation5_spill] sm:$0xff]  ;;  %v293_v2 = vunpack.c.h.bf16 %v4711_v46  ;;  %v4712_v5 = vld [vmem:[#allocation7_spill] sm:$0xff]  ;;  %v4713_v54 = vld [vmem:[#allocation8_spill] sm:$0xff] }
  0x6c   :  { %1009 = vmatpush.msra.mxu1 %v401_v50  ;;  %1048 = vmatpush.msra.mxu3 %v533_v62  ;;  %v493_v39 = vunpack.c.h.bf16 %v4710_v1  ;;  %v357_v47 = vunpack.c.h.bf16 %v4712_v5  ;;  %v421_v50 = vunpack.c.h.bf16 %v4713_v54  ;;  %v4733_v30 = vld [vmem:[#allocation28_spill] sm:$0xff]  ;;  %v4734_v0 = vld [vmem:[#allocation29_spill] sm:$0xff]  ;;  %v4735_v38 = vld [vmem:[#allocation30_spill] sm:$0xff] }
  0x6d   :  { %1029 = vmatpush.msra.mxu2 %v465_v6  ;;  %990 = vmatpush.msra.mxu0 %v333_v7  ;;  %v4714_v6 = vld [vmem:[#allocation9_spill] sm:$0xff]  ;;  %v4715_v7 = vld [vmem:[#allocation10_spill] sm:$0xff]  ;;  %v4736_v1 = vld [vmem:[#allocation31_spill] sm:$0xff] }
  0x6e   :  { %1010 = vmatpush.msra.mxu1 %v397_v10  ;;  %1049 = vmatpush.msra.mxu3 %v529_v11  ;;  %v489_v62 = vunpack.c.h.bf16 %v4714_v6  ;;  %v289_v10 = vunpack.c.h.bf16 %v4715_v7  ;;  %v4737_v46 = vld [vmem:[#allocation32_spill] sm:$0xff]  ;;  %v4738_v5 = vld [vmem:[#allocation33_spill] sm:$0xff]  ;;  %v4739_v54 = vld [vmem:[#allocation34_spill] sm:$0xff] }
  0x6f   :  { %1030 = vmatpush.msra.mxu2 %v461_v18  ;;  %991 = vmatpush.msra.mxu0 %v329_v12  ;;  %v4716_v18 = vld [vmem:[#allocation11_spill] sm:$0xff]  ;;  %v4717_v12 = vld [vmem:[#allocation12_spill] sm:$0xff] }
  0x70   :  { %963 = vmatmul.f32.vlgmr.msrb.gmra.mxu2 %v2877_v17  ;;  %1011 = vmatpush.msra.mxu1 %v393_v15  ;;  %v353_v11 = vunpack.c.h.bf16 %v4716_v18  ;;  %v417_v15 = vunpack.c.h.bf16 %v4717_v12  ;;  %v4740_v6 = vld [vmem:[#allocation35_spill] sm:$0xff]  ;;  %v4741_v7 = vld [vmem:[#allocation36_spill] sm:$0xff]  ;;  %v4742_v18 = vld [vmem:[#allocation37_spill] sm:$0xff] }
  0x71   :  { %1031 = vmatpush.msra.mxu2 %v457_v16  ;;  %1050 = vmatpush.msra.mxu3 %v525_v20  ;;  %v4718_v16 = vld [vmem:[#allocation13_spill] sm:$0xff]  ;;  %v4743_v12 = vld [vmem:[#allocation38_spill] sm:$0xff] }
  0x72   :  { %983 = vmatmul.f32.vlgmr.msrb.gmra.mxu3 %v2886_v29  ;;  %992 = vmatpush.msra.mxu0 %v325_v21  ;;  %v485_v20 = vunpack.c.h.bf16 %v4718_v16  ;;  %v4719_v21 = vld [vmem:[#allocation14_spill] sm:$0xff]  ;;  %v4744_v16 = vld [vmem:[#allocation39_spill] sm:$0xff] }
  0x73   :  { %1012 = vmatpush.msra.mxu1 %v389_v25  ;;  %1032 = vmatpush.msra.mxu2 %v453_v28  ;;  %v285_v25 = vunpack.c.h.bf16 %v4719_v21  ;;  %v4720_v28 = vld [vmem:[#allocation15_spill] sm:$0xff]  ;;  %v4745_v21 = vld [vmem:[#allocation40_spill] sm:$0xff] }
  0x74   :  { %1051 = vmatpush.msra.mxu3 %v521_v8  ;;  %943 = vmatmul.f32.vlgmr.msrb.gmra.mxu1 %v2892_v59  ;;  %v349_v8 = vunpack.c.h.bf16 %v4720_v28  ;;  %v777_v28 = vunpack.c.h.bf16 %v2588_v58  ;;  %v4752_v58 = vld [vmem:[#allocation47_spill] sm:$0xff] }
  0x75   :  { %993 = vmatpush.msra.mxu0 %v321_v32  ;;  %1013 = vmatpush.msra.mxu1 %v385_v33  ;;  %v4721_v32 = vld [vmem:[#allocation16_spill] sm:$0xff] }
  0x76   :  { %1033 = vmatpush.msra.mxu2 %v449_v36  ;;  %1052 = vmatpush.msra.mxu3 %v517_v37  ;;  %v413_v33 = vunpack.c.h.bf16 %v4721_v32  ;;  %v4722_v36 = vld [vmem:[#allocation17_spill] sm:$0xff] }
  0x77   :  { %994 = vmatpush.msra.mxu0 %v317_v40  ;;  %1014 = vmatpush.msra.mxu1 %v381_v19  ;;  %v481_v37 = vunpack.c.h.bf16 %v4722_v36  ;;  %v4723_v40 = vld [vmem:[#allocation18_spill] sm:$0xff] }
  0x78   :  { %1034 = vmatpush.msra.mxu2 %v445_v41  ;;  %1053 = vmatpush.msra.mxu3 %v513_v44  ;;  %v601_v19 = vunpack.c.h.bf16 %v4723_v40  ;;  %v4724_v41 = vld [vmem:[#allocation19_spill] sm:$0xff] }
  0x79   :  { %995 = vmatpush.msra.mxu0 %v313_v45  ;;  %1015 = vmatpush.msra.mxu1 %v377_v48  ;;  %v665_v44 = vunpack.c.h.bf16 %v4724_v41  ;;  %v4725_v45 = vld [vmem:[#allocation20_spill] sm:$0xff] }
  0x7a   :  { %1035 = vmatpush.msra.mxu2 %v441_v42  ;;  %1054 = vmatpush.msra.mxu3 %v509_v49  ;;  %v729_v48 = vunpack.c.h.bf16 %v4725_v45  ;;  %v4726_v42 = vld [vmem:[#allocation21_spill] sm:$0xff] }
  0x7b   :  { %996 = vmatpush.msra.mxu0 %v309_v52  ;;  %1016 = vmatpush.msra.mxu1 %v373_v53  ;;  %v477_v49 = vunpack.c.h.bf16 %v4726_v42  ;;  %v4727_v52 = vld [vmem:[#allocation22_spill] sm:$0xff] }
  0x7c   :  { %1036 = vmatpush.msra.mxu2 %v437_v56  ;;  %1055 = vmatpush.msra.mxu3 %v505_v57  ;;  %v597_v53 = vunpack.c.h.bf16 %v4727_v52  ;;  %v4728_v56 = vld [vmem:[#allocation23_spill] sm:$0xff]  ;;  %v4753_v52 = vld [vmem:[#allocation48_spill] sm:$0xff] }
  0x7d   :  { %997 = vmatpush.msra.mxu0 %v305_v60  ;;  %1017 = vmatpush.msra.mxu1 %v369_v61  ;;  %v661_v57 = vunpack.c.h.bf16 %v4728_v56  ;;  %v4729_v60 = vld [vmem:[#allocation24_spill] sm:$0xff]  ;;  %v4754_v56 = vld [vmem:[#allocation49_spill] sm:$0xff] }
  0x7e   :  { %1037 = vmatpush.msra.mxu2 %v433_v3  ;;  %1056 = vmatpush.msra.mxu3 %v501_v4  ;;  %v725_v61 = vunpack.c.h.bf16 %v4729_v60  ;;  %v4730_v3 = vld [vmem:[#allocation25_spill] sm:$0xff]  ;;  %v4755_v60 = vld [vmem:[#allocation50_spill] sm:$0xff] }
  0x7f   :  { %998 = vmatpush.msra.mxu0 %v301_v13  ;;  %1018 = vmatpush.msra.mxu1 %v365_v14  ;;  %v793_v4 = vunpack.c.h.bf16 %v4730_v3  ;;  %v4731_v13 = vld [vmem:[#allocation26_spill] sm:$0xff]  ;;  %v4756_v3 = vld [vmem:[#allocation51_spill] sm:$0xff] }
  0x80   :  { %1038 = vmatpush.msra.mxu2 %v429_v22  ;;  %1057 = vmatpush.msra.mxu3 %v497_v23  ;;  %v593_v14 = vunpack.c.h.bf16 %v4731_v13  ;;  %v4732_v22 = vld [vmem:[#allocation27_spill] sm:$0xff]  ;;  %v4757_v13 = vld [vmem:[#allocation52_spill] sm:$0xff] }
  0x81   :  { %999 = vmatpush.msra.mxu0 %v297_v35  ;;  %1019 = vmatpush.msra.mxu1 %v361_v31  ;;  %v657_v23 = vunpack.c.h.bf16 %v4732_v22  ;;  %v721_v35 = vunpack.c.h.bf16 %v4733_v30  ;;  %v789_v31 = vunpack.c.h.bf16 %v4734_v0  ;;  %v4758_v22 = vld [vmem:[#allocation53_spill] sm:$0xff]  ;;  %v4759_v30 = vld [vmem:[#allocation54_spill] sm:$0xff]  ;;  %v4760_v0 = vld [vmem:[#allocation55_spill] sm:$0xff] }
  0x82   :  { %1039 = vmatpush.msra.mxu2 %v425_v51  ;;  %1058 = vmatpush.msra.mxu3 %v493_v39  ;;  %v589_v51 = vunpack.c.h.bf16 %v4735_v38  ;;  %v653_v39 = vunpack.c.h.bf16 %v4736_v1  ;;  %v4761_v38 = vld [vmem:[#allocation56_spill] sm:$0xff]  ;;  %v4762_v1 = vld [vmem:[#allocation57_spill] sm:$0xff] }
  0x83   :  { %1000 = vmatpush.msra.mxu0 %v293_v2  ;;  %1020 = vmatpush.msra.mxu1 %v357_v47  ;;  %v717_v2 = vunpack.c.h.bf16 %v4737_v46  ;;  %v785_v47 = vunpack.c.h.bf16 %v4738_v5  ;;  %v4763_v46 = vld [vmem:[#allocation58_spill] sm:$0xff]  ;;  %v4764_v5 = vld [vmem:[#allocation59_spill] sm:$0xff] }
  0x84   :  { %1040 = vmatpush.msra.mxu2 %v421_v50  ;;  %1059 = vmatpush.msra.mxu3 %v489_v62  ;;  %v585_v50 = vunpack.c.h.bf16 %v4739_v54  ;;  %v649_v62 = vunpack.c.h.bf16 %v4740_v6  ;;  %v4765_v54 = vld [vmem:[#allocation60_spill] sm:$0xff]  ;;  %v4766_v6 = vld [vmem:[#allocation61_spill] sm:$0xff] }
  0x85   :  { %1001 = vmatpush.msra.mxu0 %v289_v10  ;;  %1021 = vmatpush.msra.mxu1 %v353_v11  ;;  %v713_v10 = vunpack.c.h.bf16 %v4741_v7  ;;  %v781_v11 = vunpack.c.h.bf16 %v4742_v18  ;;  %v4767_v7 = vld [vmem:[#allocation62_spill] sm:$0xff]  ;;  %v4768_v18 = vld [vmem:[#allocation63_spill] sm:$0xff] }
  0x86   :  { %1041 = vmatpush.msra.mxu2 %v417_v15  ;;  %1060 = vmatpush.msra.mxu3 %v485_v20  ;;  %v581_v15 = vunpack.c.h.bf16 %v4743_v12  ;;  %v645_v20 = vunpack.c.h.bf16 %v4744_v16  ;;  %v4769_v12 = vld [vmem:[#allocation64_spill] sm:$0xff]  ;;  %v4770_v16 = vld [vmem:[#allocation65_spill] sm:$0xff] }
  0x87   :  { %1002 = vmatpush.msra.mxu0 %v285_v25  ;;  %1022 = vmatpush.msra.mxu1 %v349_v8  ;;  %v709_v25 = vunpack.c.h.bf16 %v4745_v21  ;;  %v4746_v8 = vld [vmem:[#allocation41_spill] sm:$0xff]  ;;  %v4771_v21 = vld [vmem:[#allocation66_spill] sm:$0xff] }
  0x88   :  { %1042 = vmatpush.msra.mxu2 %v413_v33  ;;  %1061 = vmatpush.msra.mxu3 %v481_v37  ;;  %v577_v32 = vunpack.c.h.bf16 %v4746_v8  ;;  %v4747_v33 = vld [vmem:[#allocation42_spill] sm:$0xff]  ;;  %v4748_v37 = vld [vmem:[#allocation43_spill] sm:$0xff] }
  0x89   :  { %1067 = vmatpush.msrb.mxu0 %v601_v19  ;;  %1087 = vmatpush.msrb.mxu1 %v665_v44  ;;  %v641_v36 = vunpack.c.h.bf16 %v4747_v33  ;;  %v705_v40 = vunpack.c.h.bf16 %v4748_v37  ;;  %v4749_v19 = vld [vmem:[#allocation44_spill] sm:$0xff]  ;;  %v4750_v44 = vld [vmem:[#allocation45_spill] sm:$0xff] }
  0x8a   :  { %1107 = vmatpush.msrb.mxu2 %v729_v48  ;;  %1062 = vmatpush.msra.mxu3 %v477_v49  ;;  %v773_v41 = vunpack.c.h.bf16 %v4749_v19  ;;  %v573_v45 = vunpack.c.h.bf16 %v4750_v44  ;;  %v4751_v48 = vld [vmem:[#allocation46_spill] sm:$0xff]  ;;  %v701_v49 = vunpack.c.h.bf16 %v4752_v58 }
  0x8b   :  { %1068 = vmatpush.msrb.mxu0 %v597_v53  ;;  %1088 = vmatpush.msrb.mxu1 %v661_v57  ;;  %v637_v42 = vunpack.c.h.bf16 %v4751_v48  ;;  %v769_v53 = vunpack.c.h.bf16 %v4753_v52  ;;  %v569_v57 = vunpack.c.h.bf16 %v4754_v56 }
  0x8c   :  { %1108 = vmatpush.msrb.mxu2 %v725_v61  ;;  %1127 = vmatpush.msrb.mxu3 %v793_v4  ;;  %v633_v61 = vunpack.c.h.bf16 %v4755_v60  ;;  %v697_v4 = vunpack.c.h.bf16 %v4756_v3  ;;  %v4781_v60 = vld [vmem:[#allocation76_spill] sm:$0xff]  ;;  %v4782_v3 = vld [vmem:[#allocation77_spill] sm:$0xff] }
  0x8d   :  { %1069 = vmatpush.msrb.mxu0 %v593_v14  ;;  %1089 = vmatpush.msrb.mxu1 %v657_v23  ;;  %v765_v14 = vunpack.c.h.bf16 %v4757_v13  ;;  %v565_v23 = vunpack.c.h.bf16 %v4758_v22  ;;  %v2999_v13 = vld [vmem:[%s4463_s1 + $0xf8] sm:$0xff] }
  0x8e   :  { %1109 = vmatpush.msrb.mxu2 %v721_v35  ;;  %1128 = vmatpush.msrb.mxu3 %v789_v31  ;;  %v629_v35 = vunpack.c.h.bf16 %v4759_v30  ;;  %v693_v31 = vunpack.c.h.bf16 %v4760_v0  ;;  %v3011_v30 = vld [vmem:[%s4463_s1 + $0x2f8] sm:$0xff]  ;;  %v3022_v0 = vld [vmem:[%s4463_s1 + $0x1e8] sm:$0xff] }
  0x8f   :  { %1070 = vmatpush.msrb.mxu0 %v589_v51  ;;  %1090 = vmatpush.msrb.mxu1 %v653_v39  ;;  %v761_v51 = vunpack.c.h.bf16 %v4761_v38  ;;  %v561_v39 = vunpack.c.h.bf16 %v4762_v1  ;;  %v474_v38 = vunpack.c.l.bf16 %v3011_v30  ;;  %v3034_v1 = vld [vmem:[%s4463_s1 + $0x3f8] sm:$0xff] }
  0x90   :  { %1110 = vmatpush.msrb.mxu2 %v717_v2  ;;  %1129 = vmatpush.msrb.mxu3 %v785_v47  ;;  %v625_v2 = vunpack.c.h.bf16 %v4763_v46  ;;  %v689_v47 = vunpack.c.h.bf16 %v4764_v5  ;;  %v3046_v5 = vld [vmem:[%s4463_s1 + $0x1d8] sm:$0xff] }
  0x91   :  { %1071 = vmatpush.msrb.mxu0 %v585_v50  ;;  %1091 = vmatpush.msrb.mxu1 %v649_v62  ;;  %v757_v50 = vunpack.c.h.bf16 %v4765_v54  ;;  %v557_v62 = vunpack.c.h.bf16 %v4766_v6  ;;  %v3059_v54 = vld [vmem:[%s4463_s1 + $0x3e8] sm:$0xff] }
  0x92   :  { %1111 = vmatpush.msrb.mxu2 %v713_v10  ;;  %1130 = vmatpush.msrb.mxu3 %v781_v11  ;;  %v621_v10 = vunpack.c.h.bf16 %v4767_v7  ;;  %v685_v11 = vunpack.c.h.bf16 %v4768_v18  ;;  %v3072_v6 = vld [vmem:[%s4463_s1 + $0x1c8] sm:$0xff] }
  0x93   :  { %1072 = vmatpush.msrb.mxu0 %v581_v15  ;;  %1092 = vmatpush.msrb.mxu1 %v645_v20  ;;  %v753_v15 = vunpack.c.h.bf16 %v4769_v12  ;;  %v553_v20 = vunpack.c.h.bf16 %v4770_v16  ;;  %v3079_v7 = vld [vmem:[%s4463_s1 + $0x2c8] sm:$0xff]  ;;  %v3091_v12 = vld [vmem:[%s4463_s1 + $0xb8] sm:$0xff]  ;;  %v398_v16 = vunpack.c.l.bf16 %v3072_v6 }
  0x94   :  { %1112 = vmatpush.msrb.mxu2 %v709_v25  ;;  %1131 = vmatpush.msrb.mxu3 %v777_v28  ;;  %v617_v25 = vunpack.c.h.bf16 %v4771_v21  ;;  %v4772_v28 = vld [vmem:[#allocation67_spill] sm:$0xff]  ;;  %v3104_v21 = vld [vmem:[%s4463_s1 + $0x2b8] sm:$0xff] }
  0x95   :  { %1073 = vmatpush.msrb.mxu0 %v577_v32  ;;  %1093 = vmatpush.msrb.mxu1 %v641_v36  ;;  %v681_v8 = vunpack.c.h.bf16 %v4772_v28  ;;  %v4773_v32 = vld [vmem:[#allocation68_spill] sm:$0xff]  ;;  %v4774_v36 = vld [vmem:[#allocation69_spill] sm:$0xff]  ;;  %v3111_v28 = vld [vmem:[%s4463_s1 + $0x3c8] sm:$0xff] }
  0x96   :  { %1113 = vmatpush.msrb.mxu2 %v705_v40  ;;  %1132 = vmatpush.msrb.mxu3 %v773_v41  ;;  %v749_v33 = vunpack.c.h.bf16 %v4773_v32  ;;  %v549_v37 = vunpack.c.h.bf16 %v4774_v36  ;;  %v4775_v40 = vld [vmem:[#allocation70_spill] sm:$0xff]  ;;  %v4776_v41 = vld [vmem:[#allocation71_spill] sm:$0xff]  ;;  %v458_v36 = vunpack.c.l.bf16 %v3104_v21 }
  0x97   :  { %1074 = vmatpush.msrb.mxu0 %v573_v45  ;;  %1094 = vmatpush.msrb.mxu1 %v637_v42  ;;  %v613_v19 = vunpack.c.h.bf16 %v4775_v40  ;;  %v677_v44 = vunpack.c.h.bf16 %v4776_v41  ;;  %v4777_v45 = vld [vmem:[#allocation72_spill] sm:$0xff]  ;;  %v4778_v42 = vld [vmem:[#allocation73_spill] sm:$0xff]  ;;  %v3117_v32 = vld [vmem:[%s4463_s1 + $0xa8] sm:$0xff] }
  0x98   :  { %1114 = vmatpush.msrb.mxu2 %v701_v49  ;;  %1133 = vmatpush.msrb.mxu3 %v769_v53  ;;  %v745_v48 = vunpack.c.h.bf16 %v4777_v45  ;;  %v545_v58 = vunpack.c.h.bf16 %v4778_v42  ;;  %v4779_v49 = vld [vmem:[#allocation74_spill] sm:$0xff]  ;;  %v4780_v53 = vld [vmem:[#allocation75_spill] sm:$0xff]  ;;  %v3135_v41 = vld [vmem:[%s4463_s1 + $0x3b8] sm:$0xff] }
  0x99   :  { %1075 = vmatpush.msrb.mxu0 %v569_v57  ;;  %1095 = vmatpush.msrb.mxu1 %v633_v61  ;;  %v609_v52 = vunpack.c.h.bf16 %v4779_v49  ;;  %v673_v56 = vunpack.c.h.bf16 %v4780_v53  ;;  %v741_v57 = vunpack.c.h.bf16 %v2810_v34  ;;  %v541_v61 = vunpack.c.h.bf16 %v4781_v60  ;;  %v3006_v34 = vld [vmem:[%s4463_s1 + $0x1f8] sm:$0xff]  ;;  %v3129_v40 = vld [vmem:[%s4463_s1 + $0x2a8] sm:$0xff] }
  0x9a   :  { %1115 = vmatpush.msrb.mxu2 %v697_v4  ;;  %1134 = vmatpush.msrb.mxu3 %v765_v14  ;;  %v605_v4 = vunpack.c.h.bf16 %v4782_v3  ;;  %v4783_v14 = vld [vmem:[#allocation78_spill] sm:$0xff]  ;;  %v3141_v45 = vld [vmem:[%s4463_s1 + $0x98] sm:$0xff]  ;;  %v522_v53 = vunpack.c.l.bf16 %v3135_v41 }
  0x9b   :  { %1076 = vmatpush.msrb.mxu0 %v565_v23  ;;  %1096 = vmatpush.msrb.mxu1 %v629_v35  ;;  %v669_v22 = vunpack.c.h.bf16 %v4783_v14  ;;  %v737_v23 = vunpack.c.h.bf16 %v2834_v27  ;;  %v3016_v35 = vld [vmem:[%s4463_s1 + $0xe8] sm:$0xff]  ;;  %v346_v27 = vunpack.c.l.bf16 %v2999_v13  ;;  %v3154_v49 = vld [vmem:[%s4463_s1 + $0x298] sm:$0xff] }
  0x9c   :  { %1116 = vmatpush.msrb.mxu2 %v693_v31  ;;  %1135 = vmatpush.msrb.mxu3 %v761_v51  ;;  %v410_v31 = vunpack.c.l.bf16 %v3006_v34  ;;  %v3029_v51 = vld [vmem:[%s4463_s1 + $0x2e8] sm:$0xff]  ;;  %v342_v46 = vunpack.c.l.bf16 %v3016_v35  ;;  %v3183_v3 = vld [vmem:[%s4463_s1 + $0x398] sm:$0xff] }
  0x9d   :  { %1077 = vmatpush.msrb.mxu0 %v561_v39  ;;  %1097 = vmatpush.msrb.mxu1 %v625_v2  ;;  %v733_v39 = vunpack.c.h.bf16 %v2843_v63  ;;  %v3041_v2 = vld [vmem:[%s4463_s1 + $0xd8] sm:$0xff]  ;;  %v406_v63 = vunpack.c.l.bf16 %v3022_v0 }
  0x9e   :  { %1117 = vmatpush.msrb.mxu2 %v689_v47  ;;  %1136 = vmatpush.msrb.mxu3 %v757_v50  ;;  %v3054_v47 = vld [vmem:[%s4463_s1 + $0x2d8] sm:$0xff]  ;;  %v470_v50 = vunpack.c.l.bf16 %v3029_v51 }
  0x9f   :  { %1078 = vmatpush.msrb.mxu0 %v557_v62  ;;  %1098 = vmatpush.msrb.mxu1 %v621_v10  ;;  %v338_v62 = vunpack.c.l.bf16 %v3041_v2  ;;  %v3084_v10 = vld [vmem:[%s4463_s1 + $0x3d8] sm:$0xff]  ;;  %v466_v18 = vunpack.c.l.bf16 %v3054_v47 }
  0xa0   :  { %1118 = vmatpush.msrb.mxu2 %v685_v11  ;;  %1137 = vmatpush.msrb.mxu3 %v753_v15  ;;  %v534_v11 = vunpack.c.l.bf16 %v3059_v54  ;;  %v3191_v14 = vld [vmem:[%s4463_s1 + $0x78] sm:$0xff] }
  0xa1   :  { %1079 = vmatpush.msrb.mxu0 %v553_v20  ;;  %1099 = vmatpush.msrb.mxu1 %v617_v25  ;;  %v3099_v20 = vld [vmem:[%s4463_s1 + $0x1b8] sm:$0xff]  ;;  %v462_v25 = vunpack.c.l.bf16 %v3079_v7 }
  0xa2   :  { %1119 = vmatpush.msrb.mxu2 %v681_v8  ;;  %1138 = vmatpush.msrb.mxu3 %v749_v33  ;;  %v330_v8 = vunpack.c.l.bf16 %v3091_v12  ;;  %v394_v33 = vunpack.c.l.bf16 %v3099_v20 }
  0xa3   :  { %1080 = vmatpush.msrb.mxu0 %v549_v37  ;;  %1100 = vmatpush.msrb.mxu1 %v613_v19  ;;  %v3124_v37 = vld [vmem:[%s4463_s1 + $0x1a8] sm:$0xff]  ;;  %v526_v19 = vunpack.c.l.bf16 %v3111_v28 }
  0xa4   :  { %1120 = vmatpush.msrb.mxu2 %v677_v44  ;;  %1139 = vmatpush.msrb.mxu3 %v745_v48  ;;  %v326_v44 = vunpack.c.l.bf16 %v3117_v32  ;;  %v3146_v48 = vld [vmem:[%s4463_s1 + $0x198] sm:$0xff]  ;;  %v390_v42 = vunpack.c.l.bf16 %v3124_v37 }
  0xa5   :  { %1081 = vmatpush.msrb.mxu0 %v545_v58  ;;  %1101 = vmatpush.msrb.mxu1 %v609_v52  ;;  %v454_v58 = vunpack.c.l.bf16 %v3129_v40  ;;  %v3159_v52 = vld [vmem:[%s4463_s1 + $0x3a8] sm:$0xff]  ;;  %v386_v60 = vunpack.c.l.bf16 %v3146_v48 }
  0xa6   :  { %1121 = vmatpush.msrb.mxu2 %v673_v56  ;;  %1140 = vmatpush.msrb.mxu3 %v741_v57  ;;  %v3170_v56 = vld [vmem:[%s4463_s1 + $0x188] sm:$0xff]  ;;  %v322_v57 = vunpack.c.l.bf16 %v3141_v45 }
  0xa7   :  { %1082 = vmatpush.msrb.mxu0 %v541_v61  ;;  %1102 = vmatpush.msrb.mxu1 %v605_v4  ;;  %v3178_v61 = vld [vmem:[%s4463_s1 + $0x288] sm:$0xff]  ;;  %v450_v4 = vunpack.c.l.bf16 %v3154_v49 }
  0xa8   :  { %1122 = vmatpush.msrb.mxu2 %v669_v22  ;;  %1141 = vmatpush.msrb.mxu3 %v737_v23  ;;  %v3196_v22 = vld [vmem:[%s4463_s1 + $0x178] sm:$0xff] }
  0xa9   :  { %1003 = vmatmul.f32.vlgmr.msra.gmra.mxu0 %v2847_v9  ;;  %1023 = vmatmul.f32.vlgmr.msra.gmra.mxu1 %v2849_v26  ;;  %v538_v9 = vunpack.c.l.bf16 %v3034_v1  ;;  %v3067_v26 = vld [vmem:[%s4463_s1 + $0xc8] sm:$0xff] }
  0xaa   :  { %1043 = vmatmul.f32.vlgmr.msra.gmra.mxu2 %v2853_v55  ;;  %1147 = vmatpush.msra.mxu0 %v346_v27  ;;  %v402_v55 = vunpack.c.l.bf16 %v3046_v5  ;;  %v334_v15 = vunpack.c.l.bf16 %v3067_v26  ;;  %v3203_v27 = vld [vmem:[%s4463_s1 + $0x278] sm:$0xff] }
  0xab   :  { %1167 = vmatpush.msra.mxu1 %v410_v31  ;;  %1187 = vmatpush.msra.mxu2 %v474_v38  ;;  %v3208_v31 = vld [vmem:[%s4463_s1 + $0x388] sm:$0xff]  ;;  %v446_v38 = vunpack.c.l.bf16 %v3178_v61 }
  0xac   :  { %1142 = vmatpush.msrb.mxu3 %v733_v39  ;;  %1148 = vmatpush.msra.mxu0 %v342_v46  ;;  %v514_v39 = vunpack.c.l.bf16 %v3183_v3  ;;  %v3216_v46 = vld [vmem:[%s4463_s1 + $0x68] sm:$0xff] }
  0xad   :  { %1063 = vmatmul.f32.vlgmr.msra.gmra.mxu3 %v2863_v43  ;;  %1168 = vmatpush.msra.mxu1 %v406_v63  ;;  %v530_v43 = vunpack.c.l.bf16 %v3084_v10  ;;  %v3221_v63 = vld [vmem:[%s4463_s1 + $0x168] sm:$0xff] }
  0xae   :  { %1188 = vmatpush.msra.mxu2 %v470_v50  ;;  %1207 = vmatpush.msra.mxu3 %v538_v9  ;;  %v314_v50 = vunpack.c.l.bf16 %v3191_v14  ;;  %v3228_v9 = vld [vmem:[%s4463_s1 + $0x268] sm:$0xff] }
  0xaf   :  { %1149 = vmatpush.msra.mxu0 %v338_v62  ;;  %1169 = vmatpush.msra.mxu1 %v402_v55  ;;  %v3233_v62 = vld [vmem:[%s4463_s1 + $0x378] sm:$0xff]  ;;  %v442_v55 = vunpack.c.l.bf16 %v3203_v27 }
  0xb0   :  { %1189 = vmatpush.msra.mxu2 %v466_v18  ;;  %1208 = vmatpush.msra.mxu3 %v534_v11  ;;  %v510_v18 = vunpack.c.l.bf16 %v3208_v31  ;;  %v3240_v11 = vld [vmem:[%s4463_s1 + $0x58] sm:$0xff] }
  0xb1   :  { %1150 = vmatpush.msra.mxu0 %v334_v15  ;;  %1170 = vmatpush.msra.mxu1 %v398_v16  ;;  %v3245_v15 = vld [vmem:[%s4463_s1 + $0x158] sm:$0xff]  ;;  %v310_v16 = vunpack.c.l.bf16 %v3216_v46 }
  0xb2   :  { %1190 = vmatpush.msra.mxu2 %v462_v25  ;;  %1209 = vmatpush.msra.mxu3 %v530_v43  ;;  %v374_v25 = vunpack.c.l.bf16 %v3221_v63  ;;  %v3252_v43 = vld [vmem:[%s4463_s1 + $0x258] sm:$0xff] }
  0xb3   :  { %1123 = vmatmul.f32.vlgmr.msrb.gmra.mxu2 %v2877_v17  ;;  %1151 = vmatpush.msra.mxu0 %v330_v8  ;;  %v3165_v17 = vld [vmem:[%s4463_s1 + $0x88] sm:$0xff] }
  0xb4   :  { %1171 = vmatpush.msra.mxu1 %v394_v33  ;;  %1191 = vmatpush.msra.mxu2 %v458_v36  ;;  %v318_v23 = vunpack.c.l.bf16 %v3165_v17  ;;  %v3257_v8 = vld [vmem:[%s4463_s1 + $0x368] sm:$0xff]  ;;  %v438_v33 = vunpack.c.l.bf16 %v3228_v9  ;;  %v506_v36 = vunpack.c.l.bf16 %v3233_v62 }
  0xb5   :  { %1210 = vmatpush.msra.mxu3 %v526_v19  ;;  %1083 = vmatmul.f32.vlgmr.msrb.gmra.mxu0 %v2881_v24  ;;  %v518_v24 = vunpack.c.l.bf16 %v3159_v52  ;;  %v3264_v19 = vld [vmem:[%s4463_s1 + $0x48] sm:$0xff] }
  0xb6   :  { %1143 = vmatmul.f32.vlgmr.msrb.gmra.mxu3 %v2886_v29  ;;  %1152 = vmatpush.msra.mxu0 %v326_v44  ;;  %v382_v29 = vunpack.c.l.bf16 %v3170_v56  ;;  %v3269_v44 = vld [vmem:[%s4463_s1 + $0x148] sm:$0xff] }
  0xb7   :  { %1172 = vmatpush.msra.mxu1 %v390_v42  ;;  %1192 = vmatpush.msra.mxu2 %v454_v58  ;;  %v306_v42 = vunpack.c.l.bf16 %v3240_v11  ;;  %v370_v58 = vunpack.c.l.bf16 %v3245_v15 }
  0xb8   :  { %1211 = vmatpush.msra.mxu3 %v522_v53  ;;  %1103 = vmatmul.f32.vlgmr.msrb.gmra.mxu1 %v2892_v59  ;;  %v378_v59 = vunpack.c.l.bf16 %v3196_v22  ;;  %v3276_v53 = vld [vmem:[%s4463_s1 + $0x248] sm:$0xff] }
  0xb9   :  { %1153 = vmatpush.msra.mxu0 %v322_v57  ;;  %1173 = vmatpush.msra.mxu1 %v386_v60  ;;  %4784 = vst [vmem:[#allocation2_spill] sm:$0xff] %v3276_v53  ;;  %v3281_v57 = vld [vmem:[%s4463_s1 + $0x358] sm:$0xff]  ;;  %v434_v60 = vunpack.c.l.bf16 %v3252_v43 }
  0xba   :  { %1193 = vmatpush.msra.mxu2 %v450_v4  ;;  %1212 = vmatpush.msra.mxu3 %v518_v24  ;;  %4785 = vst [vmem:[#allocation3_spill] sm:$0xff] %v3281_v57  ;;  %v502_v4 = vunpack.c.l.bf16 %v3257_v8  ;;  %v3288_v24 = vld [vmem:[%s4463_s1 + $0x38] sm:$0xff] }
  0xbb   :  { %1154 = vmatpush.msra.mxu0 %v318_v23  ;;  %1174 = vmatpush.msra.mxu1 %v382_v29  ;;  %4786 = vst [vmem:[#allocation4_spill] sm:$0xff] %v3288_v24  ;;  %v3293_v23 = vld [vmem:[%s4463_s1 + $0x138] sm:$0xff]  ;;  %v302_v29 = vunpack.c.l.bf16 %v3264_v19 }
  0xbc   :  { %1194 = vmatpush.msra.mxu2 %v446_v38  ;;  %1213 = vmatpush.msra.mxu3 %v514_v39  ;;  %4787 = vst [vmem:[#allocation5_spill] sm:$0xff] %v3293_v23  ;;  %v366_v38 = vunpack.c.l.bf16 %v3269_v44  ;;  %v3300_v39 = vld [vmem:[%s4463_s1 + $0x238] sm:$0xff] }
  0xbd   :  { %1155 = vmatpush.msra.mxu0 %v314_v50  ;;  %1175 = vmatpush.msra.mxu1 %v378_v59  ;;  %4788 = vst [vmem:[#allocation6_spill] sm:$0xff] %v3300_v39  ;;  %v3305_v50 = vld [vmem:[%s4463_s1 + $0x348] sm:$0xff]  ;;  %v430_v59 = vunpack.c.l.bf16 %v3276_v53  ;;  %v426_v53 = vunpack.c.l.bf16 %v3300_v39 }
  0xbe   :  { %1195 = vmatpush.msra.mxu2 %v442_v55  ;;  %1214 = vmatpush.msra.mxu3 %v510_v18  ;;  %4789 = vst [vmem:[#allocation7_spill] sm:$0xff] %v3305_v50  ;;  %v498_v55 = vunpack.c.l.bf16 %v3281_v57  ;;  %v3312_v18 = vld [vmem:[%s4463_s1 + $0x28] sm:$0xff]  ;;  %v3329_v57 = vld [vmem:[%s4463_s1 + $0x338] sm:$0xff] }
  0xbf   :  { %1156 = vmatpush.msra.mxu0 %v310_v16  ;;  %1176 = vmatpush.msra.mxu1 %v374_v25  ;;  %4790 = vst [vmem:[#allocation8_spill] sm:$0xff] %v3312_v18  ;;  %v3317_v16 = vld [vmem:[%s4463_s1 + $0x128] sm:$0xff]  ;;  %v298_v25 = vunpack.c.l.bf16 %v3288_v24  ;;  %v294_v24 = vunpack.c.l.bf16 %v3312_v18 }
  0xc0   :  { %1196 = vmatpush.msra.mxu2 %v438_v33  ;;  %1215 = vmatpush.msra.mxu3 %v506_v36  ;;  %4791 = vst [vmem:[#allocation9_spill] sm:$0xff] %v3317_v16  ;;  %v362_v33 = vunpack.c.l.bf16 %v3293_v23  ;;  %v3324_v36 = vld [vmem:[%s4463_s1 + $0x228] sm:$0xff]  ;;  %v3341_v23 = vld [vmem:[%s4463_s1 + $0x118] sm:$0xff] }
  0xc1   :  { %1157 = vmatpush.msra.mxu0 %v306_v42  ;;  %1177 = vmatpush.msra.mxu1 %v370_v58  ;;  %4792 = vst [vmem:[#allocation10_spill] sm:$0xff] %v3324_v36  ;;  %v494_v42 = vunpack.c.l.bf16 %v3305_v50  ;;  %v3336_v58 = vld [vmem:[%s4463_s1 + $0x18] sm:$0xff]  ;;  %v3353_v50 = vld [vmem:[%s4463_s1 + $0x328] sm:$0xff]  ;;  %v422_v39 = vunpack.c.l.bf16 %v3324_v36 }
  0xc2   :  { %4793 = vst [vmem:[#allocation11_spill] sm:$0xff] %v3329_v57  ;;  %1197 = vmatpush.msra.mxu2 %v434_v60  ;;  %1216 = vmatpush.msra.mxu3 %v502_v4  ;;  %v358_v60 = vunpack.c.l.bf16 %v3317_v16  ;;  %v3348_v4 = vld [vmem:[%s4463_s1 + $0x218] sm:$0xff]  ;;  %v3365_v16 = vld [vmem:[%s4463_s1 + $0x108] sm:$0xff]  ;;  %v290_v18 = vunpack.c.l.bf16 %v3336_v58 }
  0xc3   :  { %4794 = vst [vmem:[#allocation12_spill] sm:$0xff] %v3336_v58  ;;  %1158 = vmatpush.msra.mxu0 %v302_v29  ;;  %1178 = vmatpush.msra.mxu1 %v366_v38  ;;  %v490_v29 = vunpack.c.l.bf16 %v3329_v57  ;;  %v3360_v38 = vld [vmem:[%s4463_s1 + $0x8] sm:$0xff]  ;;  %v3377_v57 = vld [vmem:[%s4463_s1 + $0x318] sm:$0xff]  ;;  %v418_v36 = vunpack.c.l.bf16 %v3348_v4 }
  0xc4   :  { %4795 = vst [vmem:[#allocation13_spill] sm:$0xff] %v3341_v23  ;;  %1198 = vmatpush.msra.mxu2 %v430_v59  ;;  %1217 = vmatpush.msra.mxu3 %v498_v55  ;;  %v354_v59 = vunpack.c.l.bf16 %v3341_v23  ;;  %v3372_v55 = vld [vmem:[%s4463_s1 + $0x208] sm:$0xff]  ;;  %v3389_v23 = vld [vmem:[%s4463_s1 + $0x5f8] sm:$0xff]  ;;  %v286_v58 = vunpack.c.l.bf16 %v3360_v38 }
  0xc5   :  { %4796 = vst [vmem:[#allocation14_spill] sm:$0xff] %v3348_v4  ;;  %1159 = vmatpush.msra.mxu0 %v298_v25  ;;  %1179 = vmatpush.msra.mxu1 %v362_v33  ;;  %v486_v25 = vunpack.c.l.bf16 %v3353_v50  ;;  %v3384_v33 = vld [vmem:[%s4463_s1 + $0x4f8] sm:$0xff]  ;;  %v414_v4 = vunpack.c.l.bf16 %v3372_v55 }
  0xc6   :  { %4797 = vst [vmem:[#allocation15_spill] sm:$0xff] %v3353_v50  ;;  %1199 = vmatpush.msra.mxu2 %v426_v53  ;;  %1218 = vmatpush.msra.mxu3 %v494_v42  ;;  %v350_v53 = vunpack.c.l.bf16 %v3365_v16  ;;  %v3396_v42 = vld [vmem:[%s4463_s1 + $0x6f8] sm:$0xff]  ;;  %v3401_v50 = vld [vmem:[%s4463_s1 + $0x308] sm:$0xff] }
  0xc7   :  { %4798 = vst [vmem:[#allocation16_spill] sm:$0xff] %v3360_v38  ;;  %1160 = vmatpush.msra.mxu0 %v294_v24  ;;  %1180 = vmatpush.msra.mxu1 %v358_v60  ;;  %v482_v24 = vunpack.c.l.bf16 %v3377_v57  ;;  %v3408_v60 = vld [vmem:[%s4463_s1 + $0x4e8] sm:$0xff]  ;;  %v602_v38 = vunpack.c.l.bf16 %v3384_v33 }
  0xc8   :  { %4799 = vst [vmem:[#allocation17_spill] sm:$0xff] %v3365_v16  ;;  %1200 = vmatpush.msra.mxu2 %v422_v39  ;;  %1219 = vmatpush.msra.mxu3 %v490_v29  ;;  %v3413_v16 = vld [vmem:[%s4463_s1 + $0x5e8] sm:$0xff]  ;;  %v666_v39 = vunpack.c.l.bf16 %v3389_v23 }
  0xc9   :  { %4800 = vst [vmem:[#allocation18_spill] sm:$0xff] %v3372_v55  ;;  %1161 = vmatpush.msra.mxu0 %v290_v18  ;;  %1181 = vmatpush.msra.mxu1 %v354_v59  ;;  %v3420_v29 = vld [vmem:[%s4463_s1 + $0x6e8] sm:$0xff]  ;;  %v730_v55 = vunpack.c.l.bf16 %v3396_v42  ;;  %v478_v18 = vunpack.c.l.bf16 %v3401_v50  ;;  %v3432_v59 = vld [vmem:[%s4463_s1 + $0x4d8] sm:$0xff] }
  0xca   :  { %4801 = vst [vmem:[#allocation19_spill] sm:$0xff] %v3377_v57  ;;  %v3425_v57 = vld [vmem:[%s4463_s1 + $0x7f8] sm:$0xff]  ;;  %1201 = vmatpush.msra.mxu2 %v418_v36  ;;  %1220 = vmatpush.msra.mxu3 %v486_v25  ;;  %v662_v36 = vunpack.c.l.bf16 %v3413_v16 }
  0xcb   :  { %4802 = vst [vmem:[#allocation20_spill] sm:$0xff] %v3384_v33  ;;  %1162 = vmatpush.msra.mxu0 %v286_v58  ;;  %1182 = vmatpush.msra.mxu1 %v350_v53  ;;  %v598_v33 = vunpack.c.l.bf16 %v3408_v60  ;;  %v3444_v25 = vld [vmem:[%s4463_s1 + $0x6d8] sm:$0xff]  ;;  %v794_v58 = vunpack.c.l.bf16 %v3425_v57  ;;  %v3456_v53 = vld [vmem:[%s4463_s1 + $0x4c8] sm:$0xff] }
  0xcc   :  { %4803 = vst [vmem:[#allocation21_spill] sm:$0xff] %v3389_v23  ;;  %v3437_v23 = vld [vmem:[%s4463_s1 + $0x5d8] sm:$0xff]  ;;  %1202 = vmatpush.msra.mxu2 %v414_v4  ;;  %1221 = vmatpush.msra.mxu3 %v482_v24  ;;  %v3468_v24 = vld [vmem:[%s4463_s1 + $0x6c8] sm:$0xff] }
  0xcd   :  { %4804 = vst [vmem:[#allocation22_spill] sm:$0xff] %v3396_v42  ;;  %v726_v42 = vunpack.c.l.bf16 %v3420_v29  ;;  %1227 = vmatpush.msrb.mxu0 %v602_v38  ;;  %1247 = vmatpush.msrb.mxu1 %v666_v39  ;;  %v658_v4 = vunpack.c.l.bf16 %v3437_v23  ;;  %v3480_v39 = vld [vmem:[%s4463_s1 + $0x4b8] sm:$0xff] }
  0xce   :  { %4805 = vst [vmem:[#allocation23_spill] sm:$0xff] %v3401_v50  ;;  %v3449_v50 = vld [vmem:[%s4463_s1 + $0x7e8] sm:$0xff]  ;;  %1267 = vmatpush.msrb.mxu2 %v730_v55  ;;  %1222 = vmatpush.msra.mxu3 %v478_v18  ;;  %v3492_v18 = vld [vmem:[%s4463_s1 + $0x6b8] sm:$0xff] }
  0xcf   :  { %4806 = vst [vmem:[#allocation24_spill] sm:$0xff] %v3408_v60  ;;  %v594_v60 = vunpack.c.l.bf16 %v3432_v59  ;;  %v790_v38 = vunpack.c.l.bf16 %v3449_v50  ;;  %1228 = vmatpush.msrb.mxu0 %v598_v33  ;;  %1248 = vmatpush.msrb.mxu1 %v662_v36  ;;  %v3504_v36 = vld [vmem:[%s4463_s1 + $0x4a8] sm:$0xff] }
  0xd0   :  { %4807 = vst [vmem:[#allocation25_spill] sm:$0xff] %v3413_v16  ;;  %v3461_v16 = vld [vmem:[%s4463_s1 + $0x5c8] sm:$0xff]  ;;  %1268 = vmatpush.msrb.mxu2 %v726_v42  ;;  %1287 = vmatpush.msrb.mxu3 %v794_v58 }
  0xd1   :  { %4808 = vst [vmem:[#allocation26_spill] sm:$0xff] %v3420_v29  ;;  %v722_v29 = vunpack.c.l.bf16 %v3444_v25  ;;  %v654_v55 = vunpack.c.l.bf16 %v3461_v16  ;;  %1229 = vmatpush.msrb.mxu0 %v594_v60  ;;  %1249 = vmatpush.msrb.mxu1 %v658_v4  ;;  %v3516_v58 = vld [vmem:[%s4463_s1 + $0x6a8] sm:$0xff]  ;;  %v3528_v4 = vld [vmem:[%s4463_s1 + $0x498] sm:$0xff] }
  0xd2   :  { %4809 = vst [vmem:[#allocation27_spill] sm:$0xff] %v3425_v57  ;;  %v3473_v57 = vld [vmem:[%s4463_s1 + $0x7d8] sm:$0xff]  ;;  %1288 = vmatpush.msrb.mxu3 %v790_v38 }
  0xd3   :  { %4810 = vst [vmem:[#allocation28_spill] sm:$0xff] %v3432_v59  ;;  %v590_v59 = vunpack.c.l.bf16 %v3456_v53  ;;  %v786_v33 = vunpack.c.l.bf16 %v3473_v57  ;;  %1269 = vmatpush.msrb.mxu2 %v722_v29  ;;  %1250 = vmatpush.msrb.mxu1 %v654_v55  ;;  %v3540_v38 = vld [vmem:[%s4463_s1 + $0x698] sm:$0xff]  ;;  %v3552_v55 = vld [vmem:[%s4463_s1 + $0x488] sm:$0xff] }
  0xd4   :  { %4811 = vst [vmem:[#allocation29_spill] sm:$0xff] %v3437_v23  ;;  %v3485_v23 = vld [vmem:[%s4463_s1 + $0x5b8] sm:$0xff] }
  0xd5   :  { %4812 = vst [vmem:[#allocation30_spill] sm:$0xff] %v3444_v25  ;;  %v718_v25 = vunpack.c.l.bf16 %v3468_v24  ;;  %v650_v42 = vunpack.c.l.bf16 %v3485_v23  ;;  %1230 = vmatpush.msrb.mxu0 %v590_v59  ;;  %1289 = vmatpush.msrb.mxu3 %v786_v33  ;;  %v3564_v33 = vld [vmem:[%s4463_s1 + $0x688] sm:$0xff] }
  0xd6   :  { %4813 = vst [vmem:[#allocation31_spill] sm:$0xff] %v3449_v50  ;;  %v3497_v50 = vld [vmem:[%s4463_s1 + $0x7c8] sm:$0xff] }
  0xd7   :  { %4814 = vst [vmem:[#allocation32_spill] sm:$0xff] %v3456_v53  ;;  %v586_v53 = vunpack.c.l.bf16 %v3480_v39  ;;  %v782_v60 = vunpack.c.l.bf16 %v3497_v50  ;;  %1270 = vmatpush.msrb.mxu2 %v718_v25  ;;  %1251 = vmatpush.msrb.mxu1 %v650_v42  ;;  %v3576_v42 = vld [vmem:[%s4463_s1 + $0x478] sm:$0xff] }
  0xd8   :  { %4815 = vst [vmem:[#allocation33_spill] sm:$0xff] %v3461_v16  ;;  %v3509_v16 = vld [vmem:[%s4463_s1 + $0x5a8] sm:$0xff] }
  0xd9   :  { %4816 = vst [vmem:[#allocation34_spill] sm:$0xff] %v3468_v24  ;;  %v714_v24 = vunpack.c.l.bf16 %v3492_v18  ;;  %v646_v29 = vunpack.c.l.bf16 %v3509_v16  ;;  %1231 = vmatpush.msrb.mxu0 %v586_v53  ;;  %1290 = vmatpush.msrb.mxu3 %v782_v60  ;;  %v3588_v60 = vld [vmem:[%s4463_s1 + $0x678] sm:$0xff] }
  0xda   :  { %4817 = vst [vmem:[#allocation35_spill] sm:$0xff] %v3473_v57  ;;  %v3521_v57 = vld [vmem:[%s4463_s1 + $0x7b8] sm:$0xff] }
  0xdb   :  { %4818 = vst [vmem:[#allocation36_spill] sm:$0xff] %v3480_v39  ;;  %v582_v39 = vunpack.c.l.bf16 %v3504_v36  ;;  %v778_v59 = vunpack.c.l.bf16 %v3521_v57  ;;  %1271 = vmatpush.msrb.mxu2 %v714_v24  ;;  %1252 = vmatpush.msrb.mxu1 %v646_v29  ;;  %v3600_v29 = vld [vmem:[%s4463_s1 + $0x468] sm:$0xff] }
  0xdc   :  { %4819 = vst [vmem:[#allocation37_spill] sm:$0xff] %v3485_v23  ;;  %v3533_v23 = vld [vmem:[%s4463_s1 + $0x598] sm:$0xff] }
  0xdd   :  { %4820 = vst [vmem:[#allocation38_spill] sm:$0xff] %v3492_v18  ;;  %v710_v18 = vunpack.c.l.bf16 %v3516_v58  ;;  %v642_v25 = vunpack.c.l.bf16 %v3533_v23  ;;  %1232 = vmatpush.msrb.mxu0 %v582_v39  ;;  %1291 = vmatpush.msrb.mxu3 %v778_v59  ;;  %v3612_v59 = vld [vmem:[%s4463_s1 + $0x668] sm:$0xff] }
  0xde   :  { %4821 = vst [vmem:[#allocation39_spill] sm:$0xff] %v3497_v50  ;;  %v3545_v50 = vld [vmem:[%s4463_s1 + $0x7a8] sm:$0xff] }
  0xdf   :  { %4822 = vst [vmem:[#allocation40_spill] sm:$0xff] %v3504_v36  ;;  %v578_v36 = vunpack.c.l.bf16 %v3528_v4  ;;  %v774_v53 = vunpack.c.l.bf16 %v3545_v50  ;;  %1272 = vmatpush.msrb.mxu2 %v710_v18  ;;  %1253 = vmatpush.msrb.mxu1 %v642_v25  ;;  %v3624_v25 = vld [vmem:[%s4463_s1 + $0x458] sm:$0xff] }
  0xe0   :  { %4823 = vst [vmem:[#allocation41_spill] sm:$0xff] %v3509_v16  ;;  %v3557_v16 = vld [vmem:[%s4463_s1 + $0x588] sm:$0xff] }
  0xe1   :  { %4824 = vst [vmem:[#allocation42_spill] sm:$0xff] %v3516_v58  ;;  %v706_v58 = vunpack.c.l.bf16 %v3540_v38  ;;  %v638_v24 = vunpack.c.l.bf16 %v3557_v16  ;;  %1233 = vmatpush.msrb.mxu0 %v578_v36  ;;  %1292 = vmatpush.msrb.mxu3 %v774_v53  ;;  %v3636_v53 = vld [vmem:[%s4463_s1 + $0x658] sm:$0xff] }
  0xe2   :  { %4825 = vst [vmem:[#allocation43_spill] sm:$0xff] %v3521_v57  ;;  %v3569_v57 = vld [vmem:[%s4463_s1 + $0x798] sm:$0xff] }
  0xe3   :  { %4826 = vst [vmem:[#allocation44_spill] sm:$0xff] %v3528_v4  ;;  %v574_v4 = vunpack.c.l.bf16 %v3552_v55  ;;  %v770_v39 = vunpack.c.l.bf16 %v3569_v57  ;;  %1273 = vmatpush.msrb.mxu2 %v706_v58  ;;  %1254 = vmatpush.msrb.mxu1 %v638_v24  ;;  %v3648_v24 = vld [vmem:[%s4463_s1 + $0x448] sm:$0xff] }
  0xe4   :  { %4827 = vst [vmem:[#allocation45_spill] sm:$0xff] %v3533_v23  ;;  %v3581_v23 = vld [vmem:[%s4463_s1 + $0x578] sm:$0xff] }
  0xe5   :  { %4828 = vst [vmem:[#allocation46_spill] sm:$0xff] %v3540_v38  ;;  %v702_v38 = vunpack.c.l.bf16 %v3564_v33  ;;  %v634_v18 = vunpack.c.l.bf16 %v3581_v23  ;;  %1234 = vmatpush.msrb.mxu0 %v574_v4  ;;  %1293 = vmatpush.msrb.mxu3 %v770_v39  ;;  %v3660_v39 = vld [vmem:[%s4463_s1 + $0x648] sm:$0xff] }
  0xe6   :  { %4829 = vst [vmem:[#allocation47_spill] sm:$0xff] %v3545_v50  ;;  %v3593_v50 = vld [vmem:[%s4463_s1 + $0x788] sm:$0xff] }
  0xe7   :  { %4830 = vst [vmem:[#allocation48_spill] sm:$0xff] %v3552_v55  ;;  %v570_v55 = vunpack.c.l.bf16 %v3576_v42  ;;  %v766_v36 = vunpack.c.l.bf16 %v3593_v50  ;;  %1274 = vmatpush.msrb.mxu2 %v702_v38  ;;  %1255 = vmatpush.msrb.mxu1 %v634_v18  ;;  %v3672_v18 = vld [vmem:[%s4463_s1 + $0x438] sm:$0xff] }
  0xe8   :  { %4831 = vst [vmem:[#allocation49_spill] sm:$0xff] %v3557_v16  ;;  %v3605_v16 = vld [vmem:[%s4463_s1 + $0x568] sm:$0xff] }
  0xe9   :  { %4832 = vst [vmem:[#allocation50_spill] sm:$0xff] %v3564_v33  ;;  %v698_v33 = vunpack.c.l.bf16 %v3588_v60  ;;  %v630_v58 = vunpack.c.l.bf16 %v3605_v16  ;;  %1235 = vmatpush.msrb.mxu0 %v570_v55  ;;  %1294 = vmatpush.msrb.mxu3 %v766_v36  ;;  %v3684_v36 = vld [vmem:[%s4463_s1 + $0x638] sm:$0xff] }
  0xea   :  { %4833 = vst [vmem:[#allocation51_spill] sm:$0xff] %v3569_v57  ;;  %v3617_v57 = vld [vmem:[%s4463_s1 + $0x778] sm:$0xff] }
  0xeb   :  { %4834 = vst [vmem:[#allocation52_spill] sm:$0xff] %v3576_v42  ;;  %v566_v42 = vunpack.c.l.bf16 %v3600_v29  ;;  %v762_v4 = vunpack.c.l.bf16 %v3617_v57  ;;  %1275 = vmatpush.msrb.mxu2 %v698_v33  ;;  %1256 = vmatpush.msrb.mxu1 %v630_v58  ;;  %v3679_v33 = vld [vmem:[%s4463_s1 + $0x538] sm:$0xff]  ;;  %v3691_v58 = vld [vmem:[%s4463_s1 + $0x748] sm:$0xff] }
  0xec   :  { %4835 = vst [vmem:[#allocation53_spill] sm:$0xff] %v3581_v23  ;;  %v3629_v23 = vld [vmem:[%s4463_s1 + $0x558] sm:$0xff] }
  0xed   :  { %4836 = vst [vmem:[#allocation54_spill] sm:$0xff] %v3588_v60  ;;  %v694_v60 = vunpack.c.l.bf16 %v3612_v59  ;;  %v626_v38 = vunpack.c.l.bf16 %v3629_v23  ;;  %1236 = vmatpush.msrb.mxu0 %v566_v42  ;;  %1295 = vmatpush.msrb.mxu3 %v762_v4  ;;  %v682_v4 = vunpack.c.l.bf16 %v3684_v36 }
  0xee   :  { %4837 = vst [vmem:[#allocation55_spill] sm:$0xff] %v3593_v50  ;;  %v3641_v50 = vld [vmem:[%s4463_s1 + $0x768] sm:$0xff] }
  0xef   :  { %4838 = vst [vmem:[#allocation56_spill] sm:$0xff] %v3600_v29  ;;  %v562_v29 = vunpack.c.l.bf16 %v3624_v25  ;;  %v758_v55 = vunpack.c.l.bf16 %v3641_v50  ;;  %1276 = vmatpush.msrb.mxu2 %v694_v60  ;;  %1257 = vmatpush.msrb.mxu1 %v626_v38  ;;  %v618_v60 = vunpack.c.l.bf16 %v3679_v33  ;;  %v750_v38 = vunpack.c.l.bf16 %v3691_v58 }
  0xf0   :  { %4839 = vst [vmem:[#allocation57_spill] sm:$0xff] %v3605_v16  ;;  %v3653_v16 = vld [vmem:[%s4463_s1 + $0x548] sm:$0xff] }
  0xf1   :  { %4840 = vst [vmem:[#allocation58_spill] sm:$0xff] %v3612_v59  ;;  %v690_v59 = vunpack.c.l.bf16 %v3636_v53  ;;  %1237 = vmatpush.msrb.mxu0 %v562_v29  ;;  %1296 = vmatpush.msrb.mxu3 %v758_v55  ;;  %v3709_v29 = vld [vmem:[%s4463_s1 + $0x628] sm:$0xff] }
  0xf2   :  { %4841 = vst [vmem:[#allocation59_spill] sm:$0xff] %v3617_v57  ;;  %v3665_v57 = vld [vmem:[%s4463_s1 + $0x758] sm:$0xff] }
  0xf3   :  { %4842 = vst [vmem:[#allocation60_spill] sm:$0xff] %v3624_v25  ;;  %v622_v25 = vunpack.c.l.bf16 %v3653_v16  ;;  %v754_v42 = vunpack.c.l.bf16 %v3665_v57  ;;  %1277 = vmatpush.msrb.mxu2 %v690_v59  ;;  %v3715_v59 = vld [vmem:[%s4463_s1 + $0x738] sm:$0xff] }
  0xf4   :  { %4843 = vst [vmem:[#allocation61_spill] sm:$0xff] %v3629_v23  ;;  %v558_v23 = vunpack.c.l.bf16 %v3648_v24 }
  0xf5   :  { %4844 = vst [vmem:[#allocation62_spill] sm:$0xff] %v3636_v53  ;;  %1258 = vmatpush.msrb.mxu1 %v622_v25  ;;  %1297 = vmatpush.msrb.mxu3 %v754_v42  ;;  %v3728_v25 = vld.sshfl [vmem:[#allocation1 + $0x10] sm:$0xff pattern:$0x73625140]  ;;  %v678_v42 = vunpack.c.l.bf16 %v3709_v29 }
  0xf6   :  { %4845 = vst [vmem:[#allocation63_spill] sm:$0xff] %v3641_v50  ;;  %v686_v50 = vunpack.c.l.bf16 %v3660_v39  ;;  %1238 = vmatpush.msrb.mxu0 %v558_v23  ;;  %v3726_v23 = vld [vmem:[%s4463_s1 + $0x518] sm:$0xff]  ;;  %1203 = vmatmul.f32.vlgmr.msra.gmra.mxu2 %v3728_v25 }
  0xf7   :  { %4846 = vst [vmem:[#allocation64_spill] sm:$0xff] %v3648_v24  ;;  %v3697_v24 = vld [vmem:[%s4463_s1 + $0x428] sm:$0xff]  ;;  %1259 = vmatpush.msrb.mxu1 %v618_v60  ;;  %1298 = vmatpush.msrb.mxu3 %v750_v38 }
  0xf8   :  { %4847 = vst [vmem:[#allocation65_spill] sm:$0xff] %v3653_v16  ;;  %v554_v16 = vunpack.c.l.bf16 %v3672_v18  ;;  %1278 = vmatpush.msrb.mxu2 %v686_v50  ;;  %v550_v55 = vunpack.c.l.bf16 %v3697_v24 }
  0xf9   :  { %4848 = vst [vmem:[#allocation66_spill] sm:$0xff] %v3660_v39  ;;  %v3776_v39 = vld.sshfl [vmem:[#allocation1 + $0x8] sm:$0xff pattern:$0x73625140] }
  0xfa   :  { %4849 = vst [vmem:[#allocation67_spill] sm:$0xff] %v3665_v57  ;;  %v3704_v57 = vld [vmem:[%s4463_s1 + $0x528] sm:$0xff]  ;;  %1239 = vmatpush.msrb.mxu0 %v554_v16  ;;  %1279 = vmatpush.msrb.mxu2 %v682_v4  ;;  %v610_v4 = vunpack.c.l.bf16 %v3726_v23 }
  0xfb   :  { %4850 = vst [vmem:[#allocation68_spill] sm:$0xff] %v3672_v18  ;;  %v614_v50 = vunpack.c.l.bf16 %v3704_v57  ;;  %v3747_v16 = vld [vmem:[%s4463_s1 + $0x408] sm:$0xff]  ;;  %v3769_v18 = vld.sshfl [vmem:[#allocation1 + $0x18] sm:$0xff pattern:$0x73625140]  ;;  %1183 = vmatmul.f32.vlgmr.msra.gmra.mxu1 %v3776_v39 }
  0xfc   :  { %4851 = vst [vmem:[#allocation69_spill] sm:$0xff] %v3679_v33  ;;  %v746_v33 = vunpack.c.l.bf16 %v3715_v59  ;;  %1223 = vmatmul.f32.vlgmr.msra.gmra.mxu3 %v3769_v18  ;;  %1240 = vmatpush.msrb.mxu0 %v550_v55  ;;  %v3784_v55 = vld [vmem:[%s4463_s1 + $0x708] sm:$0xff] }
  0xfd   :  { %4852 = vst [vmem:[#allocation70_spill] sm:$0xff] %v3684_v36  ;;  %v3721_v36 = vld [vmem:[%s4463_s1 + $0x418] sm:$0xff]  ;;  %1260 = vmatpush.msrb.mxu1 %v614_v50  ;;  %1280 = vmatpush.msrb.mxu2 %v678_v42  ;;  %v347_v50 = vunpack.c.h.bf16 %v2999_v13  ;;  %v475_v42 = vunpack.c.h.bf16 %v3011_v30  ;;  %v407_v13 = vunpack.c.h.bf16 %v3022_v0  ;;  %v3797_v30 = vld.sshfl [vmem:[#allocation1 + $0x20] sm:$0xff pattern:$0x73625140]  ;;  %v467_v0 = vunpack.c.h.bf16 %v3054_v47 }
  0xfe   :  { %4853 = vst [vmem:[#allocation71_spill] sm:$0xff] %v3691_v58  ;;  %v3741_v58 = vld [vmem:[%s4463_s1 + $0x728] sm:$0xff]  ;;  %v546_v60 = vunpack.c.l.bf16 %v3721_v36  ;;  %1299 = vmatpush.msrb.mxu3 %v746_v33  ;;  %v411_v33 = vunpack.c.h.bf16 %v3006_v34  ;;  %v539_v34 = vunpack.c.h.bf16 %v3034_v1  ;;  %v335_v1 = vunpack.c.h.bf16 %v3067_v26 }
  0xff   :  { %4854 = vst [vmem:[#allocation72_spill] sm:$0xff] %v3697_v24  ;;  %v3736_v24 = vld [vmem:[%s4463_s1 + $0x618] sm:$0xff]  ;;  %1261 = vmatpush.msrb.mxu1 %v610_v4  ;;  %v331_v47 = vunpack.c.h.bf16 %v3091_v12  ;;  %v459_v26 = vunpack.c.h.bf16 %v3104_v21  ;;  %v523_v12 = vunpack.c.h.bf16 %v3135_v41  ;;  %v387_v21 = vunpack.c.h.bf16 %v3146_v48 }
 0x100   :  { %4855 = vst [vmem:[#allocation73_spill] sm:$0xff] %v3704_v57  ;;  %v3754_v57 = vld.sshfl [vmem:[#allocation1] sm:$0xff pattern:$0x73625140]  ;;  %v674_v38 = vunpack.c.l.bf16 %v3736_v24  ;;  %1241 = vmatpush.msrb.mxu0 %v546_v60  ;;  %v447_v41 = vunpack.c.h.bf16 %v3178_v61  ;;  %v315_v48 = vunpack.c.h.bf16 %v3191_v14  ;;  %v375_v61 = vunpack.c.h.bf16 %v3221_v63  ;;  %v4867_v60 = vld [vmem:[#allocation3_spill] sm:$0xff] }
 0x101   :  { %4856 = vst [vmem:[#allocation74_spill] sm:$0xff] %v3709_v29  ;;  %v3752_v29 = vld [vmem:[%s4463_s1 + $0x508] sm:$0xff]  ;;  %1163 = vmatmul.f32.vlgmr.msra.gmra.mxu0 %v3754_v57  ;;  %v507_v14 = vunpack.c.h.bf16 %v3233_v62  ;;  %v303_v63 = vunpack.c.h.bf16 %v3264_v19 }
 0x102   :  { %4857 = vst [vmem:[#allocation75_spill] sm:$0xff] %v3715_v59  ;;  %v3762_v59 = vld [vmem:[%s4463_s1 + $0x608] sm:$0xff]  ;;  %1281 = vmatpush.msrb.mxu2 %v674_v38  ;;  %v4869_v38 = vld [vmem:[#allocation5_spill] sm:$0xff] }
 0x103   :  { %4858 = vst [vmem:[#allocation76_spill] sm:$0xff] %v3721_v36  ;;  %v742_v36 = vunpack.c.l.bf16 %v3741_v58  ;;  %v670_v53 = vunpack.c.l.bf16 %v3762_v59  ;;  %v4866_v62 = vld [vmem:[#allocation2_spill] sm:$0xff] }
 0x104   :  { %4859 = vst [vmem:[#allocation77_spill] sm:$0xff] %v3726_v23  ;;  %v542_v23 = vunpack.c.l.bf16 %v3747_v16 }
 0x105   :  { %4860 = vst [vmem:[#allocation78_spill] sm:$0xff] %v3728_v25  ;;  %v3767_v25 = vld [vmem:[%s4463_s1 + $0x718] sm:$0xff]  ;;  %1300 = vmatpush.msrb.mxu3 %v742_v36  ;;  %1282 = vmatpush.msrb.mxu2 %v670_v53  ;;  %v471_v36 = vunpack.c.h.bf16 %v3029_v51  ;;  %v535_v51 = vunpack.c.h.bf16 %v3059_v54  ;;  %v395_v54 = vunpack.c.h.bf16 %v3099_v20  ;;  %v323_v20 = vunpack.c.h.bf16 %v3141_v45 }
 0x106   :  { %4861 = vst [vmem:[#allocation79_spill] sm:$0xff] %v3754_v57  ;;  %v606_v57 = vunpack.c.l.bf16 %v3752_v29  ;;  %1242 = vmatpush.msrb.mxu0 %v542_v23  ;;  %v3802_v53 = vld.sshfl [vmem:[#allocation1 + $0x38] sm:$0xff pattern:$0x73625140]  ;;  %v327_v23 = vunpack.c.h.bf16 %v3117_v32  ;;  %v519_v32 = vunpack.c.h.bf16 %v3159_v52  ;;  %v515_v45 = vunpack.c.h.bf16 %v3183_v3 }
 0x107   :  { %4862 = vst [vmem:[#allocation80_spill] sm:$0xff] %v3762_v59  ;;  %v734_v59 = vunpack.c.l.bf16 %v3784_v55  ;;  %1347 = vmatpush.msra.mxu2 %v475_v42  ;;  %v443_v52 = vunpack.c.h.bf16 %v3203_v27  ;;  %v439_v3 = vunpack.c.h.bf16 %v3228_v9  ;;  %v371_v27 = vunpack.c.h.bf16 %v3245_v15  ;;  %v4868_v15 = vld [vmem:[#allocation4_spill] sm:$0xff] }
 0x108   :  { %4863 = vst [vmem:[#allocation81_spill] sm:$0xff] %v3767_v25  ;;  %1262 = vmatpush.msrb.mxu1 %v606_v57  ;;  %1307 = vmatpush.msra.mxu0 %v347_v50  ;;  %v403_v57 = vunpack.c.h.bf16 %v3046_v5  ;;  %v531_v5 = vunpack.c.h.bf16 %v3084_v10  ;;  %v455_v10 = vunpack.c.h.bf16 %v3129_v40  ;;  %v383_v40 = vunpack.c.h.bf16 %v3170_v56 }
 0x109   :  { %4864 = vst [vmem:[#allocation82_spill] sm:$0xff] %v3769_v18  ;;  %v738_v18 = vunpack.c.l.bf16 %v3767_v25  ;;  %v343_v25 = vunpack.c.h.bf16 %v3016_v35  ;;  %1243 = vmatmul.f32.vlgmr.msrb.gmra.mxu0 %v3797_v30  ;;  %v339_v35 = vunpack.c.h.bf16 %v3041_v2  ;;  %1348 = vmatpush.msra.mxu2 %v471_v36  ;;  %v463_v2 = vunpack.c.h.bf16 %v3079_v7 }
 0x10a   :  { %4865 = vst [vmem:[#allocation83_spill] sm:$0xff] %v3776_v39  ;;  %v3791_v39 = vld.sshfl [vmem:[#allocation1 + $0x30] sm:$0xff pattern:$0x73625140]  ;;  %1327 = vmatpush.msra.mxu1 %v411_v33  ;;  %v391_v7 = vunpack.c.h.bf16 %v3124_v37  ;;  %v319_v37 = vunpack.c.h.bf16 %v3165_v17  ;;  %v511_v17 = vunpack.c.h.bf16 %v3208_v31  ;;  %v311_v56 = vunpack.c.h.bf16 %v3216_v46 }
 0x10b   :  { %1301 = vmatpush.msrb.mxu3 %v738_v18  ;;  %1283 = vmatmul.f32.vlgmr.msrb.gmra.mxu2 %v3791_v39  ;;  %v399_v18 = vunpack.c.h.bf16 %v3072_v6  ;;  %v527_v6 = vunpack.c.h.bf16 %v3111_v28  ;;  %v451_v28 = vunpack.c.h.bf16 %v3154_v49  ;;  %v379_v49 = vunpack.c.h.bf16 %v3196_v22  ;;  %v4871_v33 = vld [vmem:[#allocation7_spill] sm:$0xff] }
 0x10c   :  { %1308 = vmatpush.msra.mxu0 %v343_v25  ;;  %1328 = vmatpush.msra.mxu1 %v407_v13  ;;  %v307_v22 = vunpack.c.h.bf16 %v3240_v11  ;;  %v435_v31 = vunpack.c.h.bf16 %v3252_v43  ;;  %v503_v46 = vunpack.c.h.bf16 %v3257_v8  ;;  %v367_v9 = vunpack.c.h.bf16 %v3269_v44  ;;  %v4870_v8 = vld [vmem:[#allocation6_spill] sm:$0xff]  ;;  %v4872_v44 = vld [vmem:[#allocation8_spill] sm:$0xff]  ;;  %v4873_v13 = vld [vmem:[#allocation9_spill] sm:$0xff] }
 0x10d   :  { %1302 = vmatpush.msrb.mxu3 %v734_v59  ;;  %v3809_v59 = vld.sshfl [vmem:[#allocation1 + $0x28] sm:$0xff pattern:$0x73625140]  ;;  %1349 = vmatpush.msra.mxu2 %v467_v0  ;;  %v431_v25 = vunpack.c.h.bf16 %v4866_v62  ;;  %v499_v11 = vunpack.c.h.bf16 %v4867_v60  ;;  %v299_v4 = vunpack.c.h.bf16 %v4868_v15  ;;  %v363_v43 = vunpack.c.h.bf16 %v4869_v38 }
 0x10e   :  { %1303 = vmatmul.f32.vlgmr.msrb.gmra.mxu3 %v3802_v53  ;;  %1263 = vmatmul.f32.vlgmr.msrb.gmra.mxu1 %v3809_v59  ;;  %v427_v50 = vunpack.c.h.bf16 %v4870_v8  ;;  %v495_v19 = vunpack.c.h.bf16 %v4871_v33  ;;  %v295_v42 = vunpack.c.h.bf16 %v4872_v44  ;;  %v359_v36 = vunpack.c.h.bf16 %v4873_v13 }
 0x10f   :  { %1367 = vmatpush.msra.mxu3 %v539_v34  ;;  %1309 = vmatpush.msra.mxu0 %v339_v35  ;;  %v4874_v34 = vld [vmem:[#allocation10_spill] sm:$0xff] }
 0x110   :  { %1329 = vmatpush.msra.mxu1 %v403_v57  ;;  %1350 = vmatpush.msra.mxu2 %v463_v2  ;;  %v423_v35 = vunpack.c.h.bf16 %v4874_v34  ;;  %v4875_v57 = vld [vmem:[#allocation11_spill] sm:$0xff] }
 0x111   :  { %1368 = vmatpush.msra.mxu3 %v535_v51  ;;  %1310 = vmatpush.msra.mxu0 %v335_v1  ;;  %v491_v0 = vunpack.c.h.bf16 %v4875_v57  ;;  %v4876_v51 = vld [vmem:[#allocation12_spill] sm:$0xff] }
 0x112   :  { %1330 = vmatpush.msra.mxu1 %v399_v18  ;;  %1351 = vmatpush.msra.mxu2 %v459_v26  ;;  %v291_v1 = vunpack.c.h.bf16 %v4876_v51  ;;  %v4877_v18 = vld [vmem:[#allocation13_spill] sm:$0xff] }
 0x113   :  { %1369 = vmatpush.msra.mxu3 %v531_v5  ;;  %1311 = vmatpush.msra.mxu0 %v331_v47  ;;  %v355_v2 = vunpack.c.h.bf16 %v4877_v18  ;;  %v4878_v5 = vld [vmem:[#allocation14_spill] sm:$0xff] }
 0x114   :  { %1331 = vmatpush.msra.mxu1 %v395_v54  ;;  %1352 = vmatpush.msra.mxu2 %v455_v10  ;;  %v419_v47 = vunpack.c.h.bf16 %v4878_v5  ;;  %v4879_v54 = vld [vmem:[#allocation15_spill] sm:$0xff] }
 0x115   :  { %1370 = vmatpush.msra.mxu3 %v527_v6  ;;  %1312 = vmatpush.msra.mxu0 %v327_v23  ;;  %v487_v26 = vunpack.c.h.bf16 %v4879_v54  ;;  %v4880_v6 = vld [vmem:[#allocation16_spill] sm:$0xff] }
 0x116   :  { %1332 = vmatpush.msra.mxu1 %v391_v7  ;;  %1353 = vmatpush.msra.mxu2 %v451_v28  ;;  %v287_v23 = vunpack.c.h.bf16 %v4880_v6  ;;  %v4881_v7 = vld [vmem:[#allocation17_spill] sm:$0xff] }
 0x117   :  { %1371 = vmatpush.msra.mxu3 %v523_v12  ;;  %1313 = vmatpush.msra.mxu0 %v323_v20  ;;  %v351_v10 = vunpack.c.h.bf16 %v4881_v7  ;;  %v4882_v12 = vld [vmem:[#allocation18_spill] sm:$0xff] }
 0x118   :  { %1333 = vmatpush.msra.mxu1 %v387_v21  ;;  %1354 = vmatpush.msra.mxu2 %v447_v41  ;;  %v415_v20 = vunpack.c.h.bf16 %v4882_v12  ;;  %v4883_v21 = vld [vmem:[#allocation19_spill] sm:$0xff] }
 0x119   :  { %1372 = vmatpush.msra.mxu3 %v519_v32  ;;  %1314 = vmatpush.msra.mxu0 %v319_v37  ;;  %v483_v28 = vunpack.c.h.bf16 %v4883_v21  ;;  %v4884_v32 = vld [vmem:[#allocation20_spill] sm:$0xff] }
 0x11a   :  { %1334 = vmatpush.msra.mxu1 %v383_v40  ;;  %1355 = vmatpush.msra.mxu2 %v443_v52  ;;  %v603_v37 = vunpack.c.h.bf16 %v4884_v32  ;;  %v4885_v40 = vld [vmem:[#allocation21_spill] sm:$0xff] }
 0x11b   :  { %1373 = vmatpush.msra.mxu3 %v515_v45  ;;  %1315 = vmatpush.msra.mxu0 %v315_v48  ;;  %v667_v41 = vunpack.c.h.bf16 %v4885_v40  ;;  %v4886_v45 = vld [vmem:[#allocation22_spill] sm:$0xff] }
 0x11c   :  { %1335 = vmatpush.msra.mxu1 %v379_v49  ;;  %1356 = vmatpush.msra.mxu2 %v439_v3  ;;  %v731_v48 = vunpack.c.h.bf16 %v4886_v45  ;;  %v4887_v49 = vld [vmem:[#allocation23_spill] sm:$0xff] }
 0x11d   :  { %1374 = vmatpush.msra.mxu3 %v511_v17  ;;  %1316 = vmatpush.msra.mxu0 %v311_v56  ;;  %v479_v52 = vunpack.c.h.bf16 %v4887_v49  ;;  %v4888_v17 = vld [vmem:[#allocation24_spill] sm:$0xff]  ;;  %v4914_v49 = vld [vmem:[#allocation50_spill] sm:$0xff] }
 0x11e   :  { %1336 = vmatpush.msra.mxu1 %v375_v61  ;;  %1357 = vmatpush.msra.mxu2 %v435_v31  ;;  %v599_v56 = vunpack.c.h.bf16 %v4888_v17  ;;  %v4889_v61 = vld [vmem:[#allocation25_spill] sm:$0xff]  ;;  %v4915_v17 = vld [vmem:[#allocation51_spill] sm:$0xff] }
 0x11f   :  { %1375 = vmatpush.msra.mxu3 %v507_v14  ;;  %1317 = vmatpush.msra.mxu0 %v307_v22  ;;  %v663_v3 = vunpack.c.h.bf16 %v4889_v61  ;;  %v4890_v14 = vld [vmem:[#allocation26_spill] sm:$0xff]  ;;  %v4916_v61 = vld [vmem:[#allocation52_spill] sm:$0xff] }
 0x120   :  { %1337 = vmatpush.msra.mxu1 %v371_v27  ;;  %1358 = vmatpush.msra.mxu2 %v431_v25  ;;  %v727_v22 = vunpack.c.h.bf16 %v4890_v14  ;;  %v4891_v27 = vld [vmem:[#allocation27_spill] sm:$0xff]  ;;  %v4894_v25 = vld [vmem:[#allocation30_spill] sm:$0xff]  ;;  %v4917_v14 = vld [vmem:[#allocation53_spill] sm:$0xff] }
 0x121   :  { %1376 = vmatpush.msra.mxu3 %v503_v46  ;;  %1318 = vmatpush.msra.mxu0 %v303_v63  ;;  %v795_v31 = vunpack.c.h.bf16 %v4891_v27  ;;  %v4892_v46 = vld [vmem:[#allocation28_spill] sm:$0xff]  ;;  %v723_v60 = vunpack.c.h.bf16 %v4894_v25  ;;  %v4918_v27 = vld [vmem:[#allocation54_spill] sm:$0xff]  ;;  %v4921_v25 = vld [vmem:[#allocation57_spill] sm:$0xff] }
 0x122   :  { %1338 = vmatpush.msra.mxu1 %v367_v9  ;;  %1359 = vmatpush.msra.mxu2 %v427_v50  ;;  %v595_v63 = vunpack.c.h.bf16 %v4892_v46  ;;  %v4893_v9 = vld [vmem:[#allocation29_spill] sm:$0xff]  ;;  %v4898_v50 = vld [vmem:[#allocation34_spill] sm:$0xff]  ;;  %v4919_v46 = vld [vmem:[#allocation55_spill] sm:$0xff] }
 0x123   :  { %1377 = vmatpush.msra.mxu3 %v499_v11  ;;  %1319 = vmatpush.msra.mxu0 %v299_v4  ;;  %v659_v62 = vunpack.c.h.bf16 %v4893_v9  ;;  %v4895_v11 = vld [vmem:[#allocation31_spill] sm:$0xff]  ;;  %v4896_v4 = vld [vmem:[#allocation32_spill] sm:$0xff]  ;;  %v719_v33 = vunpack.c.h.bf16 %v4898_v50 }
 0x124   :  { %1339 = vmatpush.msra.mxu1 %v363_v43  ;;  %1360 = vmatpush.msra.mxu2 %v423_v35  ;;  %v791_v15 = vunpack.c.h.bf16 %v4895_v11  ;;  %v591_v38 = vunpack.c.h.bf16 %v4896_v4  ;;  %v4897_v43 = vld [vmem:[#allocation33_spill] sm:$0xff]  ;;  %v4902_v35 = vld [vmem:[#allocation38_spill] sm:$0xff]  ;;  %v4920_v9 = vld [vmem:[#allocation56_spill] sm:$0xff]  ;;  %v3902_v11 = vpop.f32.mrf.mxu1 }
 0x125   :  { %1378 = vmatpush.msra.mxu3 %v495_v19  ;;  %1320 = vmatpush.msra.mxu0 %v295_v42  ;;  %v655_v8 = vunpack.c.h.bf16 %v4897_v43  ;;  %v4899_v19 = vld [vmem:[#allocation35_spill] sm:$0xff]  ;;  %v4900_v42 = vld [vmem:[#allocation36_spill] sm:$0xff]  ;;  %v715_v57 = vunpack.c.h.bf16 %v4902_v35 }
 0x126   :  { %1340 = vmatpush.msra.mxu1 %v359_v36  ;;  %1361 = vmatpush.msra.mxu2 %v419_v47  ;;  %v787_v44 = vunpack.c.h.bf16 %v4899_v19  ;;  %v587_v13 = vunpack.c.h.bf16 %v4900_v42  ;;  %v4901_v36 = vld [vmem:[#allocation37_spill] sm:$0xff]  ;;  %v4906_v47 = vld [vmem:[#allocation42_spill] sm:$0xff] }
 0x127   :  { %1379 = vmatpush.msra.mxu3 %v491_v0  ;;  %1321 = vmatpush.msra.mxu0 %v291_v1  ;;  %v651_v34 = vunpack.c.h.bf16 %v4901_v36  ;;  %v4903_v0 = vld [vmem:[#allocation39_spill] sm:$0xff]  ;;  %v4904_v1 = vld [vmem:[#allocation40_spill] sm:$0xff]  ;;  %v711_v54 = vunpack.c.h.bf16 %v4906_v47 }
 0x128   :  { %1341 = vmatpush.msra.mxu1 %v355_v2  ;;  %1362 = vmatpush.msra.mxu2 %v415_v20  ;;  %v783_v51 = vunpack.c.h.bf16 %v4903_v0  ;;  %v583_v18 = vunpack.c.h.bf16 %v4904_v1  ;;  %v4905_v2 = vld [vmem:[#allocation41_spill] sm:$0xff]  ;;  %v4910_v20 = vld [vmem:[#allocation46_spill] sm:$0xff]  ;;  %v4932_v47 = vld [vmem:[#allocation68_spill] sm:$0xff] }
 0x129   :  { %1380 = vmatpush.msra.mxu3 %v487_v26  ;;  %1322 = vmatpush.msra.mxu0 %v287_v23  ;;  %v647_v5 = vunpack.c.h.bf16 %v4905_v2  ;;  %v4907_v26 = vld [vmem:[#allocation43_spill] sm:$0xff]  ;;  %v4908_v23 = vld [vmem:[#allocation44_spill] sm:$0xff]  ;;  %v707_v21 = vunpack.c.h.bf16 %v4910_v20  ;;  %v4930_v1 = vld [vmem:[#allocation66_spill] sm:$0xff] }
 0x12a   :  { %1342 = vmatpush.msra.mxu1 %v351_v10  ;;  %1427 = vmatpush.msrb.mxu2 %v731_v48  ;;  %v779_v6 = vunpack.c.h.bf16 %v4907_v26  ;;  %v579_v7 = vunpack.c.h.bf16 %v4908_v23  ;;  %v4909_v10 = vld [vmem:[#allocation45_spill] sm:$0xff]  ;;  %v3892_v48 = vpop.f32.mrf.mxu0  ;;  %v4931_v2 = vld [vmem:[#allocation67_spill] sm:$0xff] }
 0x12b   :  { %1381 = vmatpush.msra.mxu3 %v483_v28  ;;  %1387 = vmatpush.msrb.mxu0 %v603_v37  ;;  %v643_v12 = vunpack.c.h.bf16 %v4909_v10  ;;  %v4911_v28 = vld [vmem:[#allocation47_spill] sm:$0xff]  ;;  %v4912_v37 = vld [vmem:[#allocation48_spill] sm:$0xff] }
 0x12c   :  { %1407 = vmatpush.msrb.mxu1 %v667_v41  ;;  %1428 = vmatpush.msrb.mxu2 %v727_v22  ;;  %v775_v32 = vunpack.c.h.bf16 %v4911_v28  ;;  %v575_v40 = vunpack.c.h.bf16 %v4912_v37  ;;  %v4913_v41 = vld [vmem:[#allocation49_spill] sm:$0xff]  ;;  %v635_v22 = vunpack.c.h.bf16 %v4917_v14  ;;  %v4936_v28 = vld [vmem:[#allocation72_spill] sm:$0xff]  ;;  %v4937_v37 = vld [vmem:[#allocation78_spill] sm:$0xff] }
 0x12d   :  { %1382 = vmatpush.msra.mxu3 %v479_v52  ;;  %1388 = vmatpush.msrb.mxu0 %v599_v56  ;;  %v639_v45 = vunpack.c.h.bf16 %v4913_v41  ;;  %v703_v52 = vunpack.c.h.bf16 %v4914_v49  ;;  %v771_v56 = vunpack.c.h.bf16 %v4915_v17  ;;  %v3933_v17 = vpop.f32.mrf.mxu1  ;;  %v4942_v14 = vld [vmem:[#allocation76_spill] sm:$0xff] }
 0x12e   :  { %1408 = vmatpush.msrb.mxu1 %v663_v3  ;;  %1429 = vmatpush.msrb.mxu2 %v723_v60  ;;  %v571_v3 = vunpack.c.h.bf16 %v4916_v61  ;;  %v631_v60 = vunpack.c.h.bf16 %v4921_v25 }
 0x12f   :  { %1447 = vmatpush.msrb.mxu3 %v795_v31  ;;  %1389 = vmatpush.msrb.mxu0 %v595_v63  ;;  %v699_v31 = vunpack.c.h.bf16 %v4918_v27  ;;  %v767_v63 = vunpack.c.h.bf16 %v4919_v46  ;;  %v4943_v27 = vld [vmem:[#allocation77_spill] sm:$0xff]  ;;  %v4944_v46 = vld [vmem:[#allocation82_spill] sm:$0xff] }
 0x130   :  { %1409 = vmatpush.msrb.mxu1 %v659_v62  ;;  %1430 = vmatpush.msrb.mxu2 %v719_v33  ;;  %v567_v62 = vunpack.c.h.bf16 %v4920_v9  ;;  %v4925_v33 = vld [vmem:[#allocation61_spill] sm:$0xff]  ;;  %v743_v9 = vunpack.c.h.bf16 %v3741_v58 }
 0x131   :  { %1448 = vmatpush.msrb.mxu3 %v791_v15  ;;  %1390 = vmatpush.msrb.mxu0 %v591_v38  ;;  %v4922_v15 = vld [vmem:[#allocation58_spill] sm:$0xff]  ;;  %v4923_v38 = vld [vmem:[#allocation59_spill] sm:$0xff]  ;;  %v627_v19 = vunpack.c.h.bf16 %v4925_v33 }
 0x132   :  { %1410 = vmatpush.msrb.mxu1 %v655_v8  ;;  %1431 = vmatpush.msrb.mxu2 %v715_v57  ;;  %v695_v4 = vunpack.c.h.bf16 %v4922_v15  ;;  %v763_v43 = vunpack.c.h.bf16 %v4923_v38  ;;  %v4924_v8 = vld [vmem:[#allocation60_spill] sm:$0xff]  ;;  %v4929_v57 = vld [vmem:[#allocation65_spill] sm:$0xff]  ;;  %v3917_v26 = vpop.f32.mrf.mxu0  ;;  %v607_v15 = vunpack.c.h.bf16 %v3752_v29  ;;  %v4945_v38 = vld [vmem:[#allocation83_spill] sm:$0xff] }
 0x133   :  { %1449 = vmatpush.msrb.mxu3 %v787_v44  ;;  %1391 = vmatpush.msrb.mxu0 %v587_v13  ;;  %v563_v50 = vunpack.c.h.bf16 %v4924_v8  ;;  %v4926_v44 = vld [vmem:[#allocation62_spill] sm:$0xff]  ;;  %v4927_v13 = vld [vmem:[#allocation63_spill] sm:$0xff]  ;;  %v623_v0 = vunpack.c.h.bf16 %v4929_v57 }
 0x134   :  { %1411 = vmatpush.msrb.mxu1 %v651_v34  ;;  %1432 = vmatpush.msrb.mxu2 %v711_v54  ;;  %v691_v42 = vunpack.c.h.bf16 %v4926_v44  ;;  %v759_v36 = vunpack.c.h.bf16 %v4927_v13  ;;  %v4928_v34 = vld [vmem:[#allocation64_spill] sm:$0xff]  ;;  %v555_v54 = vunpack.c.h.bf16 %v4932_v47  ;;  %v3970_v44 = vld [vmem:[%s4466_s3 + $0xf0] sm:$0xff]  ;;  %v735_v13 = vunpack.c.h.bf16 %v3784_v55  ;;  %v3983_v57 = vld [vmem:[%s4466_s3 + $0x68] sm:$0xff] }
 0x135   :  { %1450 = vmatpush.msrb.mxu3 %v783_v51  ;;  %1392 = vmatpush.msrb.mxu0 %v583_v18  ;;  %v559_v35 = vunpack.c.h.bf16 %v4928_v34  ;;  %v3912_v51 = vpop.f32.mrf.mxu2  ;;  %v687_v18 = vunpack.c.h.bf16 %v4930_v1  ;;  %v4008_v47 = vld [vmem:[%s4466_s3 + $0xe0] sm:$0xff] }
 0x136   :  { %1412 = vmatpush.msrb.mxu1 %v647_v5  ;;  %1433 = vmatpush.msrb.mxu2 %v707_v21  ;;  %v755_v5 = vunpack.c.h.bf16 %v4931_v2  ;;  %v3922_v21 = vpop.f32.mrf.mxu3  ;;  %v3997_v2 = vld [vmem:[%s4466_s3 + $0x170] sm:$0xff] }
 0x137   :  { %1451 = vmatpush.msrb.mxu3 %v779_v6  ;;  %1393 = vmatpush.msrb.mxu0 %v579_v7  ;;  %v4933_v6 = vld [vmem:[#allocation69_spill] sm:$0xff]  ;;  %v4934_v7 = vld [vmem:[#allocation70_spill] sm:$0xff] }
 0x138   :  { %1413 = vmatpush.msrb.mxu1 %v643_v12  ;;  %1434 = vmatpush.msrb.mxu2 %v703_v52  ;;  %v619_v23 = vunpack.c.h.bf16 %v4933_v6  ;;  %v683_v10 = vunpack.c.h.bf16 %v4934_v7  ;;  %v4935_v12 = vld [vmem:[#allocation71_spill] sm:$0xff]  ;;  %v3931_v52 = vld [vmem:[%s4465_s2] sm:$0xf]  ;;  %v1561_v6 = vunpack.c.l.bf16 %v3983_v57 }
 0x139   :  { %1452 = vmatpush.msrb.mxu3 %v775_v32  ;;  %1394 = vmatpush.msrb.mxu0 %v575_v40  ;;  %v751_v20 = vunpack.c.h.bf16 %v4935_v12  ;;  %v551_v32 = vunpack.c.h.bf16 %v4936_v28  ;;  %v4938_v40 = vld [vmem:[#allocation73_spill] sm:$0xff]  ;;  %v798_v25 = vperm.slane %v3931_v52, 0  ;;  %v4024_v12 = vld [vmem:[%s4466_s3 + $0x58] sm:$0xff]  ;;  %v1627_v28 = vunpack.c.l.bf16 %v3997_v2 }
 0x13a   :  { %1414 = vmatpush.msrb.mxu1 %v639_v45  ;;  %1435 = vmatpush.msrb.mxu2 %v699_v31  ;;  %v615_v41 = vunpack.c.h.bf16 %v4938_v40  ;;  %v4939_v45 = vld [vmem:[#allocation74_spill] sm:$0xff]  ;;  %v611_v31 = vunpack.c.h.bf16 %v4943_v27  ;;  %v4048_v40 = vld [vmem:[%s4466_s3 + $0xd0] sm:$0xff] }
 0x13b   :  { %1453 = vmatpush.msrb.mxu3 %v771_v56  ;;  %1395 = vmatpush.msrb.mxu0 %v571_v3  ;;  %v679_v49 = vunpack.c.h.bf16 %v4939_v45  ;;  %v4940_v56 = vld [vmem:[#allocation75_spill] sm:$0xff]  ;;  %v845_v34 = vadd.f32 %v3892_v48, %v798_v25  ;;  %v1595_v48 = vunpack.c.l.bf16 %v3970_v44  ;;  %v1557_v45 = vunpack.c.l.bf16 %v4024_v12 }
 0x13c   :  { %1415 = vmatpush.msrb.mxu1 %v635_v22  ;;  %1436 = vmatpush.msrb.mxu2 %v695_v4  ;;  %v747_v61 = vunpack.c.h.bf16 %v4940_v56  ;;  %v4941_v3 = vld [vmem:[#allocation79_spill] sm:$0xff]  ;;  %v547_v22 = vunpack.c.h.bf16 %v4942_v14  ;;  %v3953_v4 = vld [vmem:[%s4466_s3 + $0xf8] sm:$0xff]  ;;  %v4067_v14 = vld [vmem:[%s4466_s3 + $0xc8] sm:$0xff] }
 0x13d   :  { %1454 = vmatpush.msrb.mxu3 %v767_v63  ;;  %1396 = vmatpush.msrb.mxu0 %v567_v62  ;;  %v675_v63 = vunpack.c.h.bf16 %v3736_v24  ;;  %v3945_v62 = vld [vmem:[%s4466_s3 + $0x78] sm:$0xff]  ;;  %v799_v24 = vperm.slane %v3931_v52, 1  ;;  %v3956_v58 = vpop.f32.mrf.mxu2  ;;  %v865_v7 = vadd.f32 %v3902_v11, %v845_v34  ;;  %v4122_v34 = vld [vmem:[%s4466_s3 + $0xb0] sm:$0xff] }
 0x13e   :  { %1416 = vmatpush.msrb.mxu1 %v631_v60  ;;  %1437 = vmatpush.msrb.mxu2 %v691_v42  ;;  %v543_v60 = vunpack.c.h.bf16 %v3747_v16  ;;  %v1565_v29 = vunpack.c.l.bf16 %v3945_v62  ;;  %v3965_v16 = vld [vmem:[%s4466_s3 + $0x70] sm:$0xff]  ;;  %v1597_v42 = vunpack.c.l.bf16 %v3953_v4  ;;  %v3990_v55 = vpop.f32.mrf.mxu3 }
 0x13f   :  { %1455 = vmatpush.msrb.mxu3 %v763_v43  ;;  %1397 = vmatpush.msrb.mxu0 %v563_v50  ;;  %v4946_v43 = vld [vmem:[#allocation80_spill] sm:$0xff]  ;;  %v4947_v50 = vld [vmem:[#allocation81_spill] sm:$0xff]  ;;  %v1563_v1 = vunpack.c.l.bf16 %v3965_v16  ;;  %v885_v56 = vadd.f32 %v3912_v51, %v865_v7  ;;  %v1587_v51 = vunpack.c.l.bf16 %v4048_v40  ;;  %v4141_v7 = vld [vmem:[%s4466_s3 + $0xa8] sm:$0xff] }
 0x140   :  { %1417 = vmatpush.msrb.mxu1 %v627_v19  ;;  %1438 = vmatpush.msrb.mxu2 %v687_v18  ;;  %v671_v8 = vunpack.c.h.bf16 %v4946_v43  ;;  %v739_v33 = vunpack.c.h.bf16 %v4947_v50  ;;  %v1004_v19 = vpop.f32.mrf.mxu0  ;;  %v1024_v18 = vpop.f32.mrf.mxu1  ;;  %v4104_v50 = vld [vmem:[%s4466_s3 + $0xb8] sm:$0xff] }
 0x141   :  { %1456 = vmatpush.msrb.mxu3 %v759_v36  ;;  %1398 = vmatpush.msrb.mxu0 %v559_v35  ;;  %v3977_v36 = vld [vmem:[%s4466_s3 + $0x178] sm:$0xff]  ;;  %v1005_v35 = vadd.f32 %v1004_v19, %v799_v24  ;;  %v4093_v24 = vld [vmem:[%s4466_s3 + $0x148] sm:$0xff] }
 0x142   :  { %1418 = vmatpush.msrb.mxu1 %v623_v0  ;;  %1363 = vmatmul.f32.vlgmr.msra.gmra.mxu2 %v4937_v37  ;;  %v3988_v0 = vld [vmem:[%s4466_s3 + $0xe8] sm:$0xff]  ;;  %v4043_v37 = vld [vmem:[%s4466_s3 + $0x50] sm:$0xff] }
 0x143   :  { %1457 = vmatpush.msrb.mxu3 %v755_v5  ;;  %1399 = vmatpush.msrb.mxu0 %v555_v54  ;;  %v4003_v5 = vld [vmem:[%s4466_s3 + $0x60] sm:$0xff]  ;;  %v1629_v54 = vunpack.c.l.bf16 %v3977_v36 }
 0x144   :  { %1419 = vmatpush.msrb.mxu1 %v619_v23  ;;  %1439 = vmatpush.msrb.mxu2 %v683_v10  ;;  %v1593_v23 = vunpack.c.l.bf16 %v3988_v0  ;;  %v1025_v10 = vadd.f32 %v1024_v18, %v1005_v35  ;;  %v1559_v11 = vunpack.c.l.bf16 %v4003_v5  ;;  %v1617_v35 = vunpack.c.l.bf16 %v4093_v24  ;;  %v4130_v18 = vld [vmem:[%s4466_s3 + $0x138] sm:$0xff] }
 0x145   :  { %1458 = vmatpush.msrb.mxu3 %v751_v20  ;;  %1323 = vmatmul.f32.vlgmr.msra.gmra.mxu0 %v4941_v3  ;;  %v4029_v20 = vld [vmem:[%s4466_s3 + $0xd8] sm:$0xff]  ;;  %v4062_v3 = vld [vmem:[%s4466_s3 + $0x48] sm:$0xff] }
 0x146   :  { %1383 = vmatmul.f32.vlgmr.msra.gmra.mxu3 %v4944_v46  ;;  %1400 = vmatpush.msrb.mxu0 %v551_v32  ;;  %v4037_v32 = vld [vmem:[%s4466_s3 + $0x160] sm:$0xff]  ;;  %v1064_v27 = vpop.f32.mrf.mxu3  ;;  %v4075_v46 = vld [vmem:[%s4466_s3 + $0x150] sm:$0xff] }
 0x147   :  { %1420 = vmatpush.msrb.mxu1 %v615_v41  ;;  %1440 = vmatpush.msrb.mxu2 %v679_v49  ;;  %v1589_v49 = vunpack.c.l.bf16 %v4029_v20 }
 0x148   :  { %1459 = vmatpush.msrb.mxu3 %v747_v61  ;;  %1343 = vmatmul.f32.vlgmr.msra.gmra.mxu1 %v4945_v38  ;;  %v905_v38 = vadd.f32 %v3922_v21, %v885_v56  ;;  %v1084_v19 = vpop.f32.mrf.mxu0  ;;  %v1577_v56 = vunpack.c.l.bf16 %v4141_v7 }
 0x149   :  { %1401 = vmatpush.msrb.mxu0 %v547_v22  ;;  %1421 = vmatpush.msrb.mxu1 %v611_v31  ;;  %v1623_v22 = vunpack.c.l.bf16 %v4037_v32  ;;  %v1555_v31 = vunpack.c.l.bf16 %v4043_v37 }
 0x14a   :  { %1441 = vmatpush.msrb.mxu2 %v675_v63  ;;  %1460 = vmatpush.msrb.mxu3 %v743_v9  ;;  %v4080_v63 = vld [vmem:[%s4466_s3 + $0x40] sm:$0xff] }
 0x14b   :  { %1402 = vmatpush.msrb.mxu0 %v543_v60  ;;  %1422 = vmatpush.msrb.mxu1 %v607_v15  ;;  %v4085_v9 = vld [vmem:[%s4466_s3 + $0xc0] sm:$0xff]  ;;  %v1553_v60 = vunpack.c.l.bf16 %v4062_v3  ;;  %v1585_v15 = vunpack.c.l.bf16 %v4067_v14 }
 0x14c   :  { %1442 = vmatpush.msrb.mxu2 %v671_v8  ;;  %1461 = vmatpush.msrb.mxu3 %v739_v33  ;;  %v4099_v8 = vld [vmem:[%s4466_s3 + $0x38] sm:$0xff]  ;;  %v1619_v33 = vunpack.c.l.bf16 %v4075_v46  ;;  %v1583_v21 = vunpack.c.l.bf16 %v4085_v9 }
 0x14d   :  { %1443 = vmatmul.f32.vlgmr.msrb.gmra.mxu2 %v3791_v39  ;;  %1669 = vmatpush.msra.mxu0 %v1565_v29  ;;  %v4016_v39 = vld [vmem:[%s4466_s3 + $0x168] sm:$0xff]  ;;  %v1551_v29 = vunpack.c.l.bf16 %v4080_v63 }
 0x14e   :  { %1689 = vmatpush.msra.mxu1 %v1597_v42  ;;  %1462 = vmatpush.msrb.mxu3 %v735_v13  ;;  %v1625_v41 = vunpack.c.l.bf16 %v4016_v39  ;;  %v4112_v42 = vld [vmem:[%s4466_s3 + $0x140] sm:$0xff]  ;;  %v4117_v13 = vld [vmem:[%s4466_s3 + $0x30] sm:$0xff] }
 0x14f   :  { %1403 = vmatmul.f32.vlgmr.msrb.gmra.mxu0 %v3797_v30  ;;  %1463 = vmatmul.f32.vlgmr.msrb.gmra.mxu3 %v3802_v53  ;;  %v1591_v30 = vunpack.c.l.bf16 %v4008_v47  ;;  %v1044_v53 = vpop.f32.mrf.mxu2 }
 0x150   :  { %1670 = vmatpush.msra.mxu0 %v1563_v1  ;;  %1690 = vmatpush.msra.mxu1 %v1595_v48  ;;  %v1045_v61 = vadd.f32 %v1044_v53, %v1025_v10  ;;  %v1549_v1 = vunpack.c.l.bf16 %v4099_v8  ;;  %v1581_v48 = vunpack.c.l.bf16 %v4104_v50  ;;  %v1615_v10 = vunpack.c.l.bf16 %v4112_v42  ;;  %v4154_v53 = vld [vmem:[%s4466_s3 + $0x20] sm:$0xff] }
 0x151   :  { %1423 = vmatmul.f32.vlgmr.msrb.gmra.mxu1 %v3809_v59  ;;  %1709 = vmatpush.msra.mxu2 %v1629_v54  ;;  %v4056_v59 = vld [vmem:[%s4466_s3 + $0x158] sm:$0xff]  ;;  %v925_v54 = vadd.f32 %v3917_v26, %v905_v38  ;;  %v1579_v26 = vunpack.c.l.bf16 %v4122_v34  ;;  %v4186_v38 = vld [vmem:[%s4466_s3 + $0x120] sm:$0xff] }
 0x152   :  { %1671 = vmatpush.msra.mxu0 %v1561_v6  ;;  %1691 = vmatpush.msra.mxu1 %v1593_v23  ;;  %v1621_v25 = vunpack.c.l.bf16 %v4056_v59  ;;  %v1065_v43 = vadd.f32 %v1064_v27, %v1045_v61  ;;  %v4136_v23 = vld [vmem:[%s4466_s3 + $0x28] sm:$0xff] }
 0x153   :  { %1710 = vmatpush.msra.mxu2 %v1627_v28  ;;  %v1104_v28 = vpop.f32.mrf.mxu1  ;;  %v4167_v61 = vld [vmem:[%s4466_s3 + $0x128] sm:$0xff] }
 0x154   :  { %1672 = vmatpush.msra.mxu0 %v1559_v11  ;;  %1692 = vmatpush.msra.mxu1 %v1591_v30  ;;  %v1085_v6 = vadd.f32 %v1084_v19, %v1065_v43  ;;  %v1547_v11 = vunpack.c.l.bf16 %v4117_v13  ;;  %v4149_v30 = vld [vmem:[%s4466_s3 + $0x130] sm:$0xff]  ;;  %v1609_v19 = vunpack.c.l.bf16 %v4167_v61 }
 0x155   :  { %1711 = vmatpush.msra.mxu2 %v1625_v41  ;;  %v4159_v41 = vld [vmem:[%s4466_s3 + $0xa0] sm:$0xff]  ;;  %v4191_v43 = vld [vmem:[%s4466_s3 + $0x10] sm:$0xff] }
 0x156   :  { %1673 = vmatpush.msra.mxu0 %v1557_v45  ;;  %1693 = vmatpush.msra.mxu1 %v1589_v49  ;;  %v1613_v45 = vunpack.c.l.bf16 %v4130_v18  ;;  %v1545_v49 = vunpack.c.l.bf16 %v4136_v23  ;;  %v1105_v27 = vadd.f32 %v1104_v28, %v1085_v6  ;;  %v4215_v6 = vld [vmem:[%s4466_s3 + $0x88] sm:$0xff]  ;;  %v1144_v28 = vpop.f32.mrf.mxu3 }
 0x157   :  { %1712 = vmatpush.msra.mxu2 %v1623_v22  ;;  %v945_v22 = vadd.f32 %v3933_v17, %v925_v54  ;;  %v1575_v17 = vunpack.c.l.bf16 %v4159_v41  ;;  %v4210_v54 = vld [vmem:[%s4466_s3 + $0x8] sm:$0xff] }
 0x158   :  { %1674 = vmatpush.msra.mxu0 %v1555_v31  ;;  %1694 = vmatpush.msra.mxu1 %v1587_v51  ;;  %v4173_v31 = vld [vmem:[%s4466_s3 + $0x18] sm:$0xff] }
 0x159   :  { %1713 = vmatpush.msra.mxu2 %v1621_v25  ;;  %v4178_v51 = vld [vmem:[%s4466_s3 + $0x98] sm:$0xff]  ;;  %v1611_v25 = vunpack.c.l.bf16 %v4149_v30 }
 0x15a   :  { %1675 = vmatpush.msra.mxu0 %v1553_v60  ;;  %1695 = vmatpush.msra.mxu1 %v1585_v15  ;;  %v1124_v60 = vpop.f32.mrf.mxu2  ;;  %v1543_v15 = vunpack.c.l.bf16 %v4154_v53 }
 0x15b   :  { %1714 = vmatpush.msra.mxu2 %v1619_v33  ;;  %v4196_v33 = vld [vmem:[%s4466_s3 + $0x90] sm:$0xff] }
 0x15c   :  { %1676 = vmatpush.msra.mxu0 %v1551_v29  ;;  %1696 = vmatpush.msra.mxu1 %v1583_v21  ;;  %v1541_v29 = vunpack.c.l.bf16 %v4173_v31  ;;  %v1573_v21 = vunpack.c.l.bf16 %v4178_v51 }
 0x15d   :  { %1715 = vmatpush.msra.mxu2 %v1617_v35  ;;  %v4204_v35 = vld [vmem:[%s4466_s3 + $0x118] sm:$0xff] }
 0x15e   :  { %1677 = vmatpush.msra.mxu0 %v1549_v1  ;;  %1697 = vmatpush.msra.mxu1 %v1581_v48  ;;  %v965_v1 = vadd.f32 %v3956_v58, %v945_v22  ;;  %v1125_v48 = vadd.f32 %v1124_v60, %v1105_v27  ;;  %v1571_v58 = vunpack.c.l.bf16 %v4196_v33  ;;  %v1537_v22 = vunpack.c.l.bf16 %v4210_v54 }
 0x15f   :  { %1716 = vmatpush.msra.mxu2 %v1615_v10  ;;  %v1607_v10 = vunpack.c.l.bf16 %v4186_v38  ;;  %v1569_v27 = vunpack.c.l.bf16 %v4215_v6 }
 0x160   :  { %1678 = vmatpush.msra.mxu0 %v1547_v11  ;;  %1698 = vmatpush.msra.mxu1 %v1579_v26  ;;  %v1539_v11 = vunpack.c.l.bf16 %v4191_v43  ;;  %v4223_v26 = vld [vmem:[%s4466_s3 + $0x110] sm:$0xff]  ;;  %v4241_v60 = vadd.f32 %v1144_v28, %v1125_v48 }
 0x161   :  { %1717 = vmatpush.msra.mxu2 %v1613_v45  ;;  %v4228_v45 = vld [vmem:[%s4466_s3] sm:$0xff] }
 0x162   :  { %1679 = vmatpush.msra.mxu0 %v1545_v49  ;;  %1699 = vmatpush.msra.mxu1 %v1577_v56  ;;  %v4233_v49 = vld [vmem:[%s4466_s3 + $0x80] sm:$0xff]  ;;  %v1605_v56 = vunpack.c.l.bf16 %v4204_v35 }
 0x163   :  { %1718 = vmatpush.msra.mxu2 %v1611_v25  ;;  %v4239_v25 = vadd.f32 %v3990_v55, %v965_v1  ;;  %v1566_v55 = vunpack.c.h.bf16 %v3945_v62  ;;  %v4256_v1 = vld [vmem:[%s4466_s3 + $0x100] sm:$0xff]  ;;  %v1596_v62 = vunpack.c.h.bf16 %v3970_v44  ;;  %v1592_v44 = vunpack.c.h.bf16 %v4008_v47  ;;  %v4282_v47 = vld [vmem:[%s4466_s3 + $0x1f8] sm:$0xff] }
 0x164   :  { %1680 = vmatpush.msra.mxu0 %v1543_v15  ;;  %1700 = vmatpush.msra.mxu1 %v1575_v17  ;;  %v1603_v15 = vunpack.c.l.bf16 %v4223_v26  ;;  %v1535_v17 = vunpack.c.l.bf16 %v4228_v45 }
 0x165   :  { %1719 = vmatpush.msra.mxu2 %v1609_v19  ;;  %v1567_v19 = vunpack.c.l.bf16 %v4233_v49  ;;  %v1467_v48 = vmax.f32 %v4239_v25, 0.0 }
 0x166   :  { %1681 = vmatpush.msra.mxu0 %v1541_v29  ;;  %1701 = vmatpush.msra.mxu1 %v1573_v21  ;;  %v4249_v29 = vld [vmem:[%s4466_s3 + $0x108] sm:$0xff]  ;;  %v1598_v21 = vunpack.c.h.bf16 %v3953_v4  ;;  %v1599_v4 = vunpack.c.l.bf16 %v4256_v1 }
 0x167   :  { %1720 = vmatpush.msra.mxu2 %v1607_v10  ;;  %v1468_v10 = vmax.f32 %v4241_v60, 0.0  ;;  %v1601_v28 = vunpack.c.l.bf16 %v4249_v29 }
 0x168   :  { %1682 = vmatpush.msra.mxu0 %v1539_v11  ;;  %1702 = vmatpush.msra.mxu1 %v1571_v58  ;;  %v1564_v11 = vunpack.c.h.bf16 %v3965_v16  ;;  %v1562_v58 = vunpack.c.h.bf16 %v3983_v57  ;;  %v1560_v16 = vunpack.c.h.bf16 %v4003_v5  ;;  %v1590_v57 = vunpack.c.h.bf16 %v4029_v20 }
 0x169   :  { %1721 = vmatpush.msra.mxu2 %v1605_v56  ;;  %v1594_v56 = vunpack.c.h.bf16 %v3988_v0  ;;  %v1626_v0 = vunpack.c.h.bf16 %v4016_v39  ;;  %v1588_v5 = vunpack.c.h.bf16 %v4048_v40  ;;  %v1554_v39 = vunpack.c.h.bf16 %v4062_v3 }
 0x16a   :  { %1683 = vmatpush.msra.mxu0 %v1537_v22  ;;  %1703 = vmatpush.msra.mxu1 %v1569_v27  ;;  %v1630_v22 = vunpack.c.h.bf16 %v3977_v36  ;;  %v1628_v27 = vunpack.c.h.bf16 %v3997_v2  ;;  %v1556_v36 = vunpack.c.h.bf16 %v4043_v37  ;;  %v1624_v2 = vunpack.c.h.bf16 %v4037_v32 }
 0x16b   :  { %1722 = vmatpush.msra.mxu2 %v1603_v15  ;;  %v1558_v15 = vunpack.c.h.bf16 %v4024_v12  ;;  %v1661_v12 = vunpack.c.l.bf16 %v4282_v47  ;;  %v1586_v20 = vunpack.c.h.bf16 %v4067_v14  ;;  %v1622_v37 = vunpack.c.h.bf16 %v4056_v59 }
 0x16c   :  { %1684 = vmatpush.msra.mxu0 %v1535_v17  ;;  %1704 = vmatpush.msra.mxu1 %v1567_v19  ;;  %v1552_v40 = vunpack.c.h.bf16 %v4080_v63  ;;  %v1584_v17 = vunpack.c.h.bf16 %v4085_v9  ;;  %v1620_v32 = vunpack.c.h.bf16 %v4075_v46  ;;  %v1550_v19 = vunpack.c.h.bf16 %v4099_v8  ;;  %v4301_v46 = vld [vmem:[%s4466_s3 + $0x1f0] sm:$0xff]  ;;  %v4306_v8 = vld [vmem:[%s4466_s3 + $0x1e8] sm:$0xff] }
 0x16d   :  { %1685 = vmatmul.f32.vlgmr.msra.gmra.mxu0 %v1467_v48  ;;  %1705 = vmatmul.f32.vlgmr.msra.gmra.mxu1 %v1468_v10  ;;  %v1582_v3 = vunpack.c.h.bf16 %v4104_v50  ;;  %v800_v14 = vperm.slane %v3931_v52, 2  ;;  %v1618_v59 = vunpack.c.h.bf16 %v4093_v24  ;;  %v1548_v63 = vunpack.c.h.bf16 %v4117_v13  ;;  %v4311_v24 = vld [vmem:[%s4466_s3 + $0x1e0] sm:$0xff] }
 0x16e   :  { %1749 = vmatpush.msrb.mxu0 %v1566_v55  ;;  %1769 = vmatpush.msrb.mxu1 %v1598_v21  ;;  %v1580_v9 = vunpack.c.h.bf16 %v4122_v34  ;;  %v1616_v50 = vunpack.c.h.bf16 %v4112_v42  ;;  %v1659_v13 = vunpack.c.l.bf16 %v4301_v46  ;;  %v1657_v34 = vunpack.c.l.bf16 %v4306_v8 }
 0x16f   :  { %1723 = vmatpush.msra.mxu2 %v1601_v28  ;;  %1729 = vmatpush.msra.mxu3 %v1661_v12  ;;  %v1546_v55 = vunpack.c.h.bf16 %v4136_v23  ;;  %v1578_v21 = vunpack.c.h.bf16 %v4141_v7  ;;  %v1614_v42 = vunpack.c.h.bf16 %v4130_v18  ;;  %v1576_v23 = vunpack.c.h.bf16 %v4159_v41  ;;  %v4330_v7 = vld [vmem:[%s4466_s3 + $0x1d0] sm:$0xff] }
 0x170   :  { %1750 = vmatpush.msrb.mxu0 %v1564_v11  ;;  %1770 = vmatpush.msrb.mxu1 %v1596_v62  ;;  %v4321_v11 = vld [vmem:[%s4466_s3 + $0x1d8] sm:$0xff]  ;;  %v1606_v12 = vunpack.c.h.bf16 %v4204_v35  ;;  %v4366_v35 = vld [vmem:[%s4466_s3 + $0x1b0] sm:$0xff] }
 0x171   :  { %1724 = vmatpush.msra.mxu2 %v1599_v4  ;;  %1730 = vmatpush.msra.mxu3 %v1659_v13  ;;  %v1655_v4 = vunpack.c.l.bf16 %v4311_v24  ;;  %v1653_v18 = vunpack.c.l.bf16 %v4321_v11 }
 0x172   :  { %1751 = vmatpush.msrb.mxu0 %v1562_v58  ;;  %1771 = vmatpush.msrb.mxu1 %v1594_v56  ;;  %v1544_v58 = vunpack.c.h.bf16 %v4154_v53  ;;  %v1574_v53 = vunpack.c.h.bf16 %v4178_v51 }
 0x173   :  { %1789 = vmatpush.msrb.mxu2 %v1630_v22  ;;  %v1612_v22 = vunpack.c.h.bf16 %v4149_v30  ;;  %1731 = vmatpush.msra.mxu3 %v1657_v34  ;;  %v1651_v30 = vunpack.c.l.bf16 %v4330_v7 }
 0x174   :  { %1752 = vmatpush.msrb.mxu0 %v1560_v16  ;;  %1772 = vmatpush.msrb.mxu1 %v1592_v44  ;;  %v1542_v16 = vunpack.c.h.bf16 %v4173_v31  ;;  %v1572_v31 = vunpack.c.h.bf16 %v4196_v33 }
 0x175   :  { %1790 = vmatpush.msrb.mxu2 %v1628_v27  ;;  %v4339_v27 = vld [vmem:[%s4466_s3 + $0x1c8] sm:$0xff]  ;;  %1732 = vmatpush.msra.mxu3 %v1655_v4  ;;  %v1658_v4 = vunpack.c.h.bf16 %v4306_v8  ;;  %v1644_v8 = vunpack.c.h.bf16 %v4366_v35 }
 0x176   :  { %1753 = vmatpush.msrb.mxu0 %v1558_v15  ;;  %1773 = vmatpush.msrb.mxu1 %v1590_v57  ;;  %v1610_v15 = vunpack.c.h.bf16 %v4167_v61  ;;  %v1540_v57 = vunpack.c.h.bf16 %v4191_v43  ;;  %v1649_v61 = vunpack.c.l.bf16 %v4339_v27  ;;  %v1570_v43 = vunpack.c.h.bf16 %v4215_v6 }
 0x177   :  { %1791 = vmatpush.msrb.mxu2 %v1626_v0  ;;  %v4348_v0 = vld [vmem:[%s4466_s3 + $0x1c0] sm:$0xff]  ;;  %1733 = vmatpush.msra.mxu3 %v1653_v18 }
 0x178   :  { %1754 = vmatpush.msrb.mxu0 %v1556_v36  ;;  %1774 = vmatpush.msrb.mxu1 %v1588_v5  ;;  %v1184_v56 = vpop.f32.mrf.mxu1  ;;  %v1608_v5 = vunpack.c.h.bf16 %v4186_v38  ;;  %v4359_v38 = vld [vmem:[%s4466_s3 + $0x1b8] sm:$0xff] }
 0x179   :  { %1792 = vmatpush.msrb.mxu2 %v1624_v2  ;;  %v1204_v41 = vpop.f32.mrf.mxu2  ;;  %v1538_v2 = vunpack.c.h.bf16 %v4210_v54  ;;  %1734 = vmatpush.msra.mxu3 %v1651_v30  ;;  %v1568_v54 = vunpack.c.h.bf16 %v4233_v49 }
 0x17a   :  { %1755 = vmatpush.msrb.mxu0 %v1554_v39  ;;  %1775 = vmatpush.msrb.mxu1 %v1586_v20  ;;  %v1647_v39 = vunpack.c.l.bf16 %v4348_v0  ;;  %v1536_v20 = vunpack.c.h.bf16 %v4228_v45  ;;  %v1524_v45 = vld [vmem:[%s4466_s3 + $0x1a8] sm:$0xff] }
 0x17b   :  { %1793 = vmatpush.msrb.mxu2 %v1622_v37  ;;  %1735 = vmatpush.msra.mxu3 %v1649_v61 }
 0x17c   :  { %1756 = vmatpush.msrb.mxu0 %v1552_v40  ;;  %1776 = vmatpush.msrb.mxu1 %v1584_v17  ;;  %v1604_v40 = vunpack.c.h.bf16 %v4223_v26  ;;  %v1645_v17 = vunpack.c.l.bf16 %v4359_v38  ;;  %v1523_v26 = vld [vmem:[%s4466_s3 + $0x1a0] sm:$0xff] }
 0x17d   :  { %1794 = vmatpush.msrb.mxu2 %v1620_v32  ;;  %1736 = vmatpush.msra.mxu3 %v1647_v39  ;;  %v1639_v60 = vunpack.c.l.bf16 %v1523_v26  ;;  %v1640_v18 = vunpack.c.h.bf16 %v1523_v26 }
 0x17e   :  { %1757 = vmatpush.msrb.mxu0 %v1550_v19  ;;  %1777 = vmatpush.msrb.mxu1 %v1582_v3  ;;  %v1164_v28 = vpop.f32.mrf.mxu0  ;;  %v1602_v3 = vunpack.c.h.bf16 %v4249_v29  ;;  %v1522_v29 = vld [vmem:[%s4466_s3 + $0x198] sm:$0xff] }
 0x17f   :  { %v1165_v62 = vadd.f32 %v1164_v28, %v800_v14  ;;  %1795 = vmatpush.msrb.mxu2 %v1618_v59  ;;  %v1224_v36 = vpop.f32.mrf.mxu3  ;;  %v1643_v14 = vunpack.c.l.bf16 %v4366_v35  ;;  %1737 = vmatpush.msra.mxu3 %v1645_v17  ;;  %v1637_v13 = vunpack.c.l.bf16 %v1522_v29  ;;  %v2022_v35 = vld [vmem:[%s4468_s5 + $0x70] sm:$0xff]  }
 0x180   :  { %1758 = vmatpush.msrb.mxu0 %v1548_v63  ;;  %1778 = vmatpush.msrb.mxu1 %v1580_v9  ;;  %v1600_v63 = vunpack.c.h.bf16 %v4256_v1  ;;  %v1641_v9 = vunpack.c.l.bf16 %v1524_v45  ;;  %v1520_v1 = vld [vmem:[%s4466_s3 + $0x188] sm:$0xff] }
 0x181   :  { %1796 = vmatpush.msrb.mxu2 %v1616_v50  ;;  %v1185_v44 = vadd.f32 %v1184_v56, %v1165_v62  ;;  %1738 = vmatpush.msra.mxu3 %v1643_v14  ;;  %v1662_v62 = vunpack.c.h.bf16 %v4282_v47  ;;  %v1652_v56 = vunpack.c.h.bf16 %v4330_v7  ;;  %v1650_v47 = vunpack.c.h.bf16 %v4339_v27 }
 0x182   :  { %1759 = vmatpush.msrb.mxu0 %v1546_v55  ;;  %1779 = vmatpush.msrb.mxu1 %v1578_v21  ;;  %v1519_v55 = vld [vmem:[%s4466_s3 + $0x180] sm:$0xff]  ;;  %v1633_v21 = vunpack.c.l.bf16 %v1520_v1  ;;  %v1634_v7 = vunpack.c.h.bf16 %v1520_v1  ;;  %v2003_v14 = vunpack.c.l.bf16 %v2022_v35 }
 0x183   :  { %1797 = vmatpush.msrb.mxu2 %v1614_v42  ;;  %v1205_v51 = vadd.f32 %v1204_v41, %v1185_v44  ;;  %1739 = vmatpush.msra.mxu3 %v1641_v9  ;;  %v1631_v28 = vunpack.c.l.bf16 %v1519_v55  ;;  %v1660_v42 = vunpack.c.h.bf16 %v4301_v46  ;;  %v1648_v46 = vunpack.c.h.bf16 %v4348_v0 }
 0x184   :  { %1760 = vmatpush.msrb.mxu0 %v1544_v58  ;;  %1780 = vmatpush.msrb.mxu1 %v1576_v23  ;;  %v1656_v58 = vunpack.c.h.bf16 %v4311_v24  ;;  %v1654_v23 = vunpack.c.h.bf16 %v4321_v11  ;;  %v1642_v24 = vunpack.c.h.bf16 %v1524_v45  ;;  %v1638_v11 = vunpack.c.h.bf16 %v1522_v29  ;;  %v2013_v45 = vld [vmem:[%s4468_s5 + $0x28] sm:$0xff]  }
 0x185   :  { %1798 = vmatpush.msrb.mxu2 %v1612_v22  ;;  %v1225_v33 = vadd.f32 %v1224_v36, %v1205_v51  ;;  %1740 = vmatpush.msra.mxu3 %v1639_v60  ;;  %v1646_v22 = vunpack.c.h.bf16 %v4359_v38  ;;  %v801_v44 = vperm.slane %v3931_v52, 3  ;;  %v2015_v52 = vld [vmem:[%s4468_s5 + $0x38] sm:$0xff]   ;;  %v1968_v26 = vunpack.c.h.bf16 %v2013_v45 }
 0x186   :  { %1761 = vmatpush.msrb.mxu0 %v1542_v16  ;;  %1781 = vmatpush.msrb.mxu1 %v1574_v53  ;;  %v1244_v37 = vpop.f32.mrf.mxu0  ;;  %v1632_v53 = vunpack.c.h.bf16 %v1519_v55  ;;  %v1967_v9 = vunpack.c.l.bf16 %v2013_v45  ;;  %v2011_v60 = vld [vmem:[%s4468_s5 + $0x18] sm:$0xff]   ;;  %v2010_v55 = vld [vmem:[%s4468_s5 + $0x10] sm:$0xff]  }
 0x187   :  { %1799 = vmatpush.msrb.mxu2 %v1610_v15  ;;  %v1245_v6 = vadd.f32 %v1244_v37, %v1225_v33  ;;  %1741 = vmatpush.msra.mxu3 %v1637_v13  ;;  %v1975_v37 = vunpack.c.l.bf16 %v2015_v52  ;;  %v2019_v13 = vld [vmem:[%s4468_s5 + $0x58] sm:$0xff]  }
 0x188   :  { %1762 = vmatpush.msrb.mxu0 %v1540_v57  ;;  %1782 = vmatpush.msrb.mxu1 %v1572_v31 }
 0x189   :  { %1800 = vmatpush.msrb.mxu2 %v1608_v5 }
 0x18a   :  { %1763 = vmatpush.msrb.mxu0 %v1538_v2  ;;  %1783 = vmatpush.msrb.mxu1 %v1570_v43 }
 0x18b   :  { %v1264_v32 = vpop.f32.mrf.mxu1  ;;  %1801 = vmatpush.msrb.mxu2 %v1606_v12 }
 0x18c   :  { %1764 = vmatpush.msrb.mxu0 %v1536_v20  ;;  %1784 = vmatpush.msrb.mxu1 %v1568_v54  ;;  %v1265_v49 = vadd.f32 %v1264_v32, %v1245_v6  ;;  %v2014_v20 = vld [vmem:[%s4468_s5 + $0x30] sm:$0xff]   ;;  %v1976_v54 = vunpack.c.h.bf16 %v2015_v52  ;;  %v2023_v6 = vld [vmem:[%s4468_s5 + $0x78] sm:$0xff]  }
 0x18d   :  { %1765 = vmatmul.f32.vlgmr.msrb.gmra.mxu0 %v1467_v48  ;;  %1785 = vmatmul.f32.vlgmr.msrb.gmra.mxu1 %v1468_v10  ;;  %v1521_v48 = vld [vmem:[%s4466_s3 + $0x190] sm:$0xff]  ;;  %v2007_v17 = vunpack.c.l.bf16 %v2023_v6  ;;  %v1972_v32 = vunpack.c.h.bf16 %v2014_v20 }
 0x18e   :  { %v1284_v19 = vpop.f32.mrf.mxu2  ;;  %1802 = vmatpush.msrb.mxu2 %v1604_v40  ;;  %v1635_v34 = vunpack.c.l.bf16 %v1521_v48  ;;  %v1636_v16 = vunpack.c.h.bf16 %v1521_v48  ;;  %v2008_v40 = vunpack.c.h.bf16 %v2023_v6  ;;  %1899 = vmatpush.msra.mxu0 %v1976_v54 }
 0x18f   :  { %v1285_v59 = vadd.f32 %v1284_v19, %v1265_v49  ;;  %v2004_v49 = vunpack.c.h.bf16 %v2022_v35  ;;  %v1971_v19 = vunpack.c.l.bf16 %v2014_v20  ;;  %v2024_v35 = vld [vmem:[%s4467_s6] ss:$0 sm:$0xff] }
 0x190   :  { %1803 = vmatpush.msrb.mxu2 %v1602_v3  ;;  %1742 = vmatpush.msra.mxu3 %v1635_v34  ;;  %v2021_v3 = vld [vmem:[%s4468_s5 + $0x68] sm:$0xff]   ;;  %v1960_v34 = vunpack.c.h.bf16 %v2011_v60 }
 0x191   :  { %v1304_v50 = vpop.f32.mrf.mxu3  ;;  %1919 = vmatpush.msra.mxu1 %v2008_v40  ;;  %1900 = vmatpush.msra.mxu0 %v1975_v37  ;;  %v1999_v29 = vunpack.c.l.bf16 %v2021_v3 }
 0x192   :  { %v1305_v25 = vadd.f32 %v1304_v50, %v1285_v59  ;;  %1804 = vmatpush.msrb.mxu2 %v1600_v63  ;;  %1743 = vmatpush.msra.mxu3 %v1633_v21  ;;  %v2012_v59 = vld [vmem:[%s4468_s5 + $0x20] sm:$0xff]   ;;  %v2000_v63 = vunpack.c.h.bf16 %v2021_v3  ;;  %v1992_v21 = vunpack.c.h.bf16 %v2019_v13 }
 0x193   :  { %1920 = vmatpush.msra.mxu1 %v2007_v17  ;;  %1901 = vmatpush.msra.mxu0 %v1972_v32  ;;  %v2020_v50 = vld [vmem:[%s4468_s5 + $0x60] sm:$0xff]  }
 0x194   :  { %v1469_v10 = vmax.f32 %v1305_v25, 0.0  ;;  %1744 = vmatpush.msra.mxu3 %v1631_v28  ;;  %v1964_v25 = vunpack.c.h.bf16 %v2012_v59  ;;  %v1996_v48 = vunpack.c.h.bf16 %v2020_v50  ;;  %v1995_v1 = vunpack.c.l.bf16 %v2020_v50 }
 0x195   :  { %1921 = vmatpush.msra.mxu1 %v2004_v49  ;;  %1902 = vmatpush.msra.mxu0 %v1971_v19  ;;  %v1959_v28 = vunpack.c.l.bf16 %v2011_v60 }
 0x196   :  { %1725 = vmatmul.f32.vlgmr.msra.gmra.mxu2 %v1469_v10  ;;  %1809 = vmatpush.msrb.mxu3 %v1662_v62  ;;  %v1956_v62 = vunpack.c.h.bf16 %v2010_v55 }
 0x197   :  { %1922 = vmatpush.msra.mxu1 %v2003_v14  ;;  %1903 = vmatpush.msra.mxu0 %v1968_v26 }
 0x198   :  { %1810 = vmatpush.msrb.mxu3 %v1660_v42  ;;  %v2009_v42 = vld [vmem:[%s4468_s5 + $0x8] sm:$0xff]  }
 0x199   :  { %1923 = vmatpush.msra.mxu1 %v2000_v63  ;;  %1904 = vmatpush.msra.mxu0 %v1967_v9 }
 0x19a   :  { %1811 = vmatpush.msrb.mxu3 %v1658_v4  ;;  %v1955_v4 = vunpack.c.l.bf16 %v2010_v55 }
 0x19b   :  { %1924 = vmatpush.msra.mxu1 %v1999_v29  ;;  %1905 = vmatpush.msra.mxu0 %v1964_v25 }
 0x19c   :  { %1812 = vmatpush.msrb.mxu3 %v1656_v58  ;;  %v1952_v58 = vunpack.c.h.bf16 %v2009_v42 }
 0x19d   :  { %1925 = vmatpush.msra.mxu1 %v1996_v48 }
 0x19e   :  { %1805 = vmatmul.f32.vlgmr.msrb.gmra.mxu2 %v1469_v10  ;;  %1813 = vmatpush.msrb.mxu3 %v1654_v23  ;;  %v1963_v10 = vunpack.c.l.bf16 %v2012_v59  ;;  %v1951_v23 = vunpack.c.l.bf16 %v2009_v42 }
 0x19f   :  { %1926 = vmatpush.msra.mxu1 %v1995_v1 }
 0x1a0   :  { %1814 = vmatpush.msrb.mxu3 %v1652_v56  ;;  %1906 = vmatpush.msra.mxu0 %v1963_v10  ;;  %v1991_v56 = vunpack.c.l.bf16 %v2019_v13 }
 0x1a1   :  { %1927 = vmatpush.msra.mxu1 %v1992_v21 }
 0x1a2   :  { %1815 = vmatpush.msrb.mxu3 %v1650_v47  ;;  %1907 = vmatpush.msra.mxu0 %v1960_v34  ;;  %v1946_v47 = vld [vmem:[%s4468_s5] sm:$0xff]  }
 0x1a3   :  { %1928 = vmatpush.msra.mxu1 %v1991_v56 }
 0x1a4   :  { %1816 = vmatpush.msrb.mxu3 %v1648_v46  ;;  %1908 = vmatpush.msra.mxu0 %v1959_v28  ;;  %v2018_v46 = vld [vmem:[%s4468_s5 + $0x50] sm:$0xff]  }
 0x1a6   :  { %1817 = vmatpush.msrb.mxu3 %v1646_v22  ;;  %1909 = vmatpush.msra.mxu0 %v1956_v62  ;;  %v1948_v22 = vunpack.c.h.bf16 %v1946_v47 }
 0x1a8   :  { %1818 = vmatpush.msrb.mxu3 %v1644_v8  ;;  %1910 = vmatpush.msra.mxu0 %v1955_v4  ;;  %v1988_v8 = vunpack.c.h.bf16 %v2018_v46 }
 0x1aa   :  { %1819 = vmatpush.msrb.mxu3 %v1642_v24  ;;  %1911 = vmatpush.msra.mxu0 %v1952_v58  ;;  %v1947_v24 = vunpack.c.l.bf16 %v1946_v47 }
 0x1ab   :  { %1929 = vmatpush.msra.mxu1 %v1988_v8 }
 0x1ac   :  { %1820 = vmatpush.msrb.mxu3 %v1640_v18  ;;  %1912 = vmatpush.msra.mxu0 %v1951_v23  ;;  %v1987_v18 = vunpack.c.l.bf16 %v2018_v46 }
 0x1ae   :  { %1821 = vmatpush.msrb.mxu3 %v1638_v11  ;;  %1913 = vmatpush.msra.mxu0 %v1948_v22  ;;  %v2017_v11 = vld [vmem:[%s4468_s5 + $0x48] sm:$0xff]  }
 0x1af   :  { %1930 = vmatpush.msra.mxu1 %v1987_v18 }
 0x1b0   :  { %1822 = vmatpush.msrb.mxu3 %v1636_v16  ;;  %1914 = vmatpush.msra.mxu0 %v1947_v24  ;;  %v1984_v16 = vunpack.c.h.bf16 %v2017_v11 }
 0x1b2   :  { %1823 = vmatpush.msrb.mxu3 %v1634_v7  ;;  %1931 = vmatpush.msra.mxu1 %v1984_v16  ;;  %v1983_v7 = vunpack.c.l.bf16 %v2017_v11 }
 0x1b4   :  { %1824 = vmatpush.msrb.mxu3 %v1632_v53  ;;  %v2016_v53 = vld [vmem:[%s4468_s5 + $0x40] sm:$0xff]   ;;  %1932 = vmatpush.msra.mxu1 %v1983_v7 }
 0x1c2   :  { %v1324_v41 = vpop.f32.mrf.mxu0 }
 0x1c3   :  { %v1325_v27 = vadd.f32 %v1324_v41, %v801_v44  ;;  %v1980_v44 = vunpack.c.h.bf16 %v2016_v53  ;;  %v1979_v41 = vunpack.c.l.bf16 %v2016_v53 }
 0x1c5   :  { %v1344_v15 = vpop.f32.mrf.mxu1  ;;  %v1364_v57 = vpop.f32.mrf.mxu2  ;;  %1933 = vmatpush.msra.mxu1 %v1980_v44 }
 0x1c6   :  { %v1345_v30 = vadd.f32 %v1344_v15, %v1325_v27  ;;  %v1663_v27 = vld [vmem:[%s4469_s4] sm:$0x3] }
 0x1c7   :  { %1934 = vmatpush.msra.mxu1 %v1979_v41  ;;  %v1665_v15 = vperm.slane %v1663_v27, 0 }
 0x1c8   :  { %v1365_v31 = vadd.f32 %v1364_v57, %v1345_v30 }
 0x1c9   :  { %v1384_v51 = vpop.f32.mrf.mxu3 }
 0x1ca   :  { %v1385_v0 = vadd.f32 %v1384_v51, %v1365_v31 }
 0x1cc   :  { %v1404_v36 = vpop.f32.mrf.mxu0 }
 0x1cd   :  { %v1405_v5 = vadd.f32 %v1404_v36, %v1385_v0  ;;  %v1666_v36 = vperm.slane %v1663_v27, 1 }
 0x1ce   :  { %v1424_v61 = vpop.f32.mrf.mxu1 }
 0x1cf   :  { %v1425_v2 = vadd.f32 %v1424_v61, %v1405_v5 }
 0x1d0   :  { %v1444_v43 = vpop.f32.mrf.mxu2 }
 0x1d1   :  { %v1445_v33 = vadd.f32 %v1444_v43, %v1425_v2 }
 0x1d2   :  { %v1464_v12 = vpop.f32.mrf.mxu3 }
 0x1d3   :  { %v1465_v39 = vadd.f32 %v1464_v12, %v1445_v33 }
 0x1d5   :  { %v1470_v38 = vmax.f32 %v1465_v39, 0.0 }
 0x1d7   :  { %1745 = vmatmul.f32.vlgmr.msra.gmra.mxu3 %v1470_v38 }
 0x1df   :  { %1825 = vmatmul.f32.vlgmr.msrb.gmra.mxu3 %v1470_v38 }
 0x1ea   :  { %v1686_v30 = vpop.f32.mrf.mxu0  ;;  %v1706_v51 = vpop.f32.mrf.mxu1 }
 0x1eb   :  { %v1687_v57 = vadd.f32 %v1686_v30, %v1665_v15 }
 0x1ed   :  { %v1707_v0 = vadd.f32 %v1706_v51, %v1687_v57 }
 0x20a   :  { %v1766_v5 = vpop.f32.mrf.mxu0  ;;  %v1786_v39 = vpop.f32.mrf.mxu1 }
 0x20b   :  { %v1767_v43 = vadd.f32 %v1766_v5, %v1666_v36 }
 0x20d   :  { %v1787_v52 = vadd.f32 %v1786_v39, %v1767_v43 }
 0x219   :  { %v1726_v31 = vpop.f32.mrf.mxu2 }
 0x21a   :  { %v1727_v61 = vadd.f32 %v1726_v31, %v1707_v0 }
 0x221   :  { %v1806_v38 = vpop.f32.mrf.mxu2 }
 0x222   :  { %v1807_v20 = vadd.f32 %v1806_v38, %v1787_v52 }
 0x25a   :  { %v1746_v2 = vpop.f32.mrf.mxu3 }
 0x25b   :  { %v1747_v33 = vadd.f32 %v1746_v2, %v1727_v61 }
 0x25d   :  { %v1829_v12 = vmax.f32 %v1747_v33, 0.0 }
 0x25f   :  { %1915 = vmatmul.f32.vlgmr.msra.gmra.mxu0 %v1829_v12 }
 0x262   :  { %v1826_v54 = vpop.f32.mrf.mxu3 }
 0x263   :  { %v1827_v37 = vadd.f32 %v1826_v54, %v1807_v20 }
 0x265   :  { %v1830_v6 = vmax.f32 %v1827_v37, 0.0 }
 0x267   :  { %1935 = vmatmul.f32.vlgmr.msra.gmra.mxu1 %v1830_v6 }
 0x2dc   :  { %v1916_v40 = vpop.f32.mrf.mxu0 }
 0x2dd   :  { %v1917_v17 = vadd.f32 %v2024_v35, %v1916_v40 }
 0x2e4   :  { %v1936_v32 = vpop.f32.mrf.mxu1 }
 0x2e5   :  { %v1937_v45 = vadd.f32 %v1936_v32, %v1917_v17 }
 0x2e7   :  { %1940 = vst.msk [vmem:[%s4470_s7] sm:$0x3] %vm1939_vm0, %v1937_v45 }

// kernel: pointnet_encoder_forward.5
= control target key start
LH: loop header
LB: loop body
LE: loop exit
PB: predicated region body
PF: predicated region fallthrough
CT: control target
= control target key end

     0   :  { %14 = vsyncpa [#allocation3], 0  ;;  %s7975_s0 = inlined_call_operand.vmem [shape: f32[2,3,128], index: 0, kind: input, shape index: {}]   ;;  %s7976_s1 = inlined_call_operand.vmem [shape: f32[2,64,3], index: 1, kind: input, shape index: {}]   ;;  %s7977_s2 = inlined_call_operand.vmem [shape: f32[64,1], index: 2, kind: input, shape index: {}]   ;;  %s7978_s3 = inlined_call_operand.vmem [shape: bf16[128,64], index: 3, kind: input, shape index: {}]   ;;  %s7979_s4 = inlined_call_operand.vmem [shape: f32[128,1], index: 4, kind: input, shape index: {}]   ;;  %s7980_s5 = inlined_call_operand.vmem [shape: bf16[1024,128], index: 5, kind: input, shape index: {}]   ;;  %s7981_s6 = inlined_call_operand.vmem [shape: f32[1024,1], index: 6, kind: input, shape index: {}]   ;;  %s7982_s7 = inlined_call_operand.vmem [shape: f32[2,1024,1], index: 7, kind: output, shape index: {0}]   ;;  %s7983_s8 = inlined_call_operand.hbm [shape: f32[2,2048,128], index: 8, kind: output, shape index: {1}]  }
   0x1   :  { %16 = vsyncpa [#allocation3 + $0x1], 0  ;;  %s5080_s27 = smov 0   ;;  %s5082_s28 = smov 0  }
   0x2   :  { %s5084_s29 = smov 0   ;;  %s5086_s30 = smov 0  }
   0x3   :  { %s5088_s9 = smov 0   ;;  %s5090_s10 = smov 0  }
   0x4   :  { %s5092_s11 = smov 0   ;;  %s5094_s12 = smov 0  }
   0x5 LB: > { %7990 = sst [smem:[#allocation5_spill]] %s5006_s29  ;;  %s4425_s13 = sadd.s32 4294967295, %s5026_s12   ;;  %s5026_s12 = sphi %s5094_s12, %s22_s12   ;;  %s5022_s11 = sphi %s5092_s11, %s8094_s11   ;;  %s5018_s10 = sphi %s5090_s10, %s8093_s10   ;;  %s5014_s9 = sphi %s5088_s9, %s8092_s9   ;;  %s5010_s30 = sphi %s5086_s30, %s8091_s30   ;;  %s5006_s29 = sphi %s5084_s29, %s8090_s29   ;;  %s5002_s28 = sphi %s5082_s28, %s8096_s28   ;;  %s4998_s27 = sphi %s5080_s27, %s8095_s27  }
   0x6   : > { %7991 = sst [smem:[#allocation6_spill]] %s5018_s10  ;;  %s4426_s14 = sadd.s32 4294967294, %s5026_s12  }
   0x7   : > { %7992 = sst [smem:[#allocation7_spill]] %s5022_s11  ;;  %s37_s15 = sadd.s32 1, %s5018_s10 }
   0x8   : > { %s41_s16 = sadd.s32 1, %s5022_s11  ;;  %p39_p0 = scmp.ge.s32.totalorder %s37_s15, 2 }
   0x9   : > { %s234_s17 = ssub.s32 1, %s5018_s10  ;;  %s243_s18 = sadd.s32 1, %s5006_s29 }
   0xa   : > { %p253_p1 = scmp.ne.s32.totalorder %s5006_s29, %s5002_s28  ;;  %s8098_s15 = smov (%p39_p0, %s37_s15), 0 }
   0xb   : > { %7993 = sst [smem:[#allocation8_spill]] %s8098_s15  ;;  %s8100_s16 = smov (!%p39_p0, %s41_s16), %s5022_s11 }
   0xc   : > { %s235_s19 = ssub.s32 1, %s8098_s15  ;;  %p254_p2 = scmp.eq.s32.totalorder %s4425_s13, 3 }
   0xd   : > { %p43_p3 = scmp.ge.s32.totalorder %s8100_s16, 2  ;;  %s237_s20 = ssub.s32 %s234_s17, %s235_s19 }
   0xe   : > { %p5132_p4 = por %p254_p2, %p253_p1  ;;  %p259_p5 = scmp.ne.s32.totalorder %s5002_s28, %s4998_s27 }
   0xf   : > { %s8102_s16 = smov (%p43_p3, %s8100_s16), 0  ;;  %p260_p6 = scmp.eq.s32.totalorder %s4426_s14, 3 }
  0x10   : > { %7995 = sst [smem:[#allocation9_spill]] %s8102_s16  ;;  %p4429_p7 = scmp.ge.s32.totalorder %s5026_s12, 1 }
  0x11   : > { %s236_s22 = ssub.s32 %s5022_s11, %s8102_s16  ;;  %p315_p8 = scmp.lt.s32.totalorder %s5026_s12, 5 }
  0x12   : > { %s238_s23 = sor.u32 %s237_s20, %s236_s22  ;;  %p5144_p9 = por %p260_p6, %p259_p5 }
  0x13   : > { %p241_p10 = scmp.eq.s32.totalorder %s238_s23, 0  ;;  %p316_p11 = pnand %p4429_p7, %p315_p8 }
  0x14   : > { %s7989_s26 = sand.u32 (!%p316_p11), 1, %s5002_s28   ;;  %p365_p12 = scmp.lt.s32.totalorder (!%p316_p11), %s5014_s9, 1 }
  0x15   : > { %s5149_s25 = scalar_select %p241_p10, %s5006_s29, %s243_s18  }
  0x16   : > { %319 = sbr.rel (%p316_p11) target bundleno = 1765 (0x6e5), region = 48  ;;  %s4430_s13 = sshll.u32 (!%p316_p11), %s7989_s26, 10 }
  0x17   : > { %7997 = sst [smem:[#allocation10_spill]] %s5149_s25  ;;  %p387_p13 = scmp.eq.s32.totalorder (!%p316_p11), %s5010_s30, 0 }
  0x18   : > { %s5172_s26 = scalar_lea.vmem (!%p316_p11), [#allocation2], %s4430_s13 }
  0x1b   : > { %s366_s14 = scalar_select %p365_p12, %s5014_s9, 1  ;;  %vm393_vm0 = vcmask (%p387_p13), 7168   ;;  %v5028_v0 = vmov (%p387_p13), -inf  }
  0x1c   : > { %392 = sbr.rel (!%p387_p13) target bundleno = 161 (0xa1), region = 52 }
  0x1d   : > { %s4431_s17 = sshll.u32 %s366_s14, 2  ;;  %s4741_s19 = sshll.u32 %s366_s14, 6 }
  0x1e   : > { %s5160_s23 = scalar_lea.vmem %s7975_s0, %s4431_s17  ;;  %s5165_s15 = scalar_lea.vmem %s7976_s1, %s4741_s19 }
  0x1f   : > { %s4742_s11 = sshll.u32 %s366_s14, 10 }
  0x20   : > { %s5170_s29 = scalar_lea.vmem %s7982_s7, %s4742_s11 }
  0x21   : > { %394 = vst.msk [vmem:[%s5170_s29] sm:$0xff] %vm393_vm0, %v5028_v0 }
  0x22   : > { %395 = vst.msk [vmem:[%s5170_s29 + $0x8] sm:$0xff] %vm393_vm0, %v5028_v0 }
  0x23   : > { %396 = vst.msk [vmem:[%s5170_s29 + $0x10] sm:$0xff] %vm393_vm0, %v5028_v0 }
  0x24   : > { %397 = vst.msk [vmem:[%s5170_s29 + $0x18] sm:$0xff] %vm393_vm0, %v5028_v0 }
  0x25   : > { %398 = vst.msk [vmem:[%s5170_s29 + $0x20] sm:$0xff] %vm393_vm0, %v5028_v0 }
  0x26   : > { %399 = vst.msk [vmem:[%s5170_s29 + $0x28] sm:$0xff] %vm393_vm0, %v5028_v0 }
  0x27   : > { %400 = vst.msk [vmem:[%s5170_s29 + $0x30] sm:$0xff] %vm393_vm0, %v5028_v0 }
  0x28   : > { %401 = vst.msk [vmem:[%s5170_s29 + $0x38] sm:$0xff] %vm393_vm0, %v5028_v0 }
  0x29   : > { %402 = vst.msk [vmem:[%s5170_s29 + $0x40] sm:$0xff] %vm393_vm0, %v5028_v0 }
  0x2a   : > { %403 = vst.msk [vmem:[%s5170_s29 + $0x48] sm:$0xff] %vm393_vm0, %v5028_v0 }
  0x2b   : > { %404 = vst.msk [vmem:[%s5170_s29 + $0x50] sm:$0xff] %vm393_vm0, %v5028_v0 }
  0x2c   : > { %405 = vst.msk [vmem:[%s5170_s29 + $0x58] sm:$0xff] %vm393_vm0, %v5028_v0 }
  0x2d   : > { %406 = vst.msk [vmem:[%s5170_s29 + $0x60] sm:$0xff] %vm393_vm0, %v5028_v0 }
  0x2e   : > { %407 = vst.msk [vmem:[%s5170_s29 + $0x68] sm:$0xff] %vm393_vm0, %v5028_v0 }
  0x2f   : > { %408 = vst.msk [vmem:[%s5170_s29 + $0x70] sm:$0xff] %vm393_vm0, %v5028_v0 }
  0x30   : > { %409 = vst.msk [vmem:[%s5170_s29 + $0x78] sm:$0xff] %vm393_vm0, %v5028_v0 }
  0x31   : > { %410 = vst.msk [vmem:[%s5170_s29 + $0x80] sm:$0xff] %vm393_vm0, %v5028_v0 }
  0x32   : > { %411 = vst.msk [vmem:[%s5170_s29 + $0x88] sm:$0xff] %vm393_vm0, %v5028_v0 }
  0x33   : > { %412 = vst.msk [vmem:[%s5170_s29 + $0x90] sm:$0xff] %vm393_vm0, %v5028_v0 }
  0x34   : > { %413 = vst.msk [vmem:[%s5170_s29 + $0x98] sm:$0xff] %vm393_vm0, %v5028_v0 }
  0x35   : > { %414 = vst.msk [vmem:[%s5170_s29 + $0xa0] sm:$0xff] %vm393_vm0, %v5028_v0 }
  0x36   : > { %415 = vst.msk [vmem:[%s5170_s29 + $0xa8] sm:$0xff] %vm393_vm0, %v5028_v0 }
  0x37   : > { %416 = vst.msk [vmem:[%s5170_s29 + $0xb0] sm:$0xff] %vm393_vm0, %v5028_v0 }
  0x38   : > { %417 = vst.msk [vmem:[%s5170_s29 + $0xb8] sm:$0xff] %vm393_vm0, %v5028_v0 }
  0x39   : > { %418 = vst.msk [vmem:[%s5170_s29 + $0xc0] sm:$0xff] %vm393_vm0, %v5028_v0 }
  0x3a   : > { %419 = vst.msk [vmem:[%s5170_s29 + $0xc8] sm:$0xff] %vm393_vm0, %v5028_v0 }
  0x3b   : > { %420 = vst.msk [vmem:[%s5170_s29 + $0xd0] sm:$0xff] %vm393_vm0, %v5028_v0 }
  0x3c   : > { %421 = vst.msk [vmem:[%s5170_s29 + $0xd8] sm:$0xff] %vm393_vm0, %v5028_v0 }
  0x3d   : > { %422 = vst.msk [vmem:[%s5170_s29 + $0xe0] sm:$0xff] %vm393_vm0, %v5028_v0 }
  0x3e   : > { %423 = vst.msk [vmem:[%s5170_s29 + $0xe8] sm:$0xff] %vm393_vm0, %v5028_v0 }
  0x3f   : > { %424 = vst.msk [vmem:[%s5170_s29 + $0xf0] sm:$0xff] %vm393_vm0, %v5028_v0 }
  0x40   : > { %425 = vst.msk [vmem:[%s5170_s29 + $0xf8] sm:$0xff] %vm393_vm0, %v5028_v0 }
  0x41   : > { %426 = vst.msk [vmem:[%s5170_s29 + $0x100] sm:$0xff] %vm393_vm0, %v5028_v0 }
  0x42   : > { %427 = vst.msk [vmem:[%s5170_s29 + $0x108] sm:$0xff] %vm393_vm0, %v5028_v0 }
  0x43   : > { %428 = vst.msk [vmem:[%s5170_s29 + $0x110] sm:$0xff] %vm393_vm0, %v5028_v0 }
  0x44   : > { %429 = vst.msk [vmem:[%s5170_s29 + $0x118] sm:$0xff] %vm393_vm0, %v5028_v0 }
  0x45   : > { %430 = vst.msk [vmem:[%s5170_s29 + $0x120] sm:$0xff] %vm393_vm0, %v5028_v0 }
  0x46   : > { %431 = vst.msk [vmem:[%s5170_s29 + $0x128] sm:$0xff] %vm393_vm0, %v5028_v0 }
  0x47   : > { %432 = vst.msk [vmem:[%s5170_s29 + $0x130] sm:$0xff] %vm393_vm0, %v5028_v0 }
  0x48   : > { %433 = vst.msk [vmem:[%s5170_s29 + $0x138] sm:$0xff] %vm393_vm0, %v5028_v0 }
  0x49   : > { %434 = vst.msk [vmem:[%s5170_s29 + $0x140] sm:$0xff] %vm393_vm0, %v5028_v0 }
  0x4a   : > { %435 = vst.msk [vmem:[%s5170_s29 + $0x148] sm:$0xff] %vm393_vm0, %v5028_v0 }
  0x4b   : > { %436 = vst.msk [vmem:[%s5170_s29 + $0x150] sm:$0xff] %vm393_vm0, %v5028_v0 }
  0x4c   : > { %437 = vst.msk [vmem:[%s5170_s29 + $0x158] sm:$0xff] %vm393_vm0, %v5028_v0 }
  0x4d   : > { %438 = vst.msk [vmem:[%s5170_s29 + $0x160] sm:$0xff] %vm393_vm0, %v5028_v0 }
  0x4e   : > { %439 = vst.msk [vmem:[%s5170_s29 + $0x168] sm:$0xff] %vm393_vm0, %v5028_v0 }
  0x4f   : > { %440 = vst.msk [vmem:[%s5170_s29 + $0x170] sm:$0xff] %vm393_vm0, %v5028_v0 }
  0x50   : > { %441 = vst.msk [vmem:[%s5170_s29 + $0x178] sm:$0xff] %vm393_vm0, %v5028_v0 }
  0x51   : > { %442 = vst.msk [vmem:[%s5170_s29 + $0x180] sm:$0xff] %vm393_vm0, %v5028_v0 }
  0x52   : > { %443 = vst.msk [vmem:[%s5170_s29 + $0x188] sm:$0xff] %vm393_vm0, %v5028_v0 }
  0x53   : > { %444 = vst.msk [vmem:[%s5170_s29 + $0x190] sm:$0xff] %vm393_vm0, %v5028_v0 }
  0x54   : > { %445 = vst.msk [vmem:[%s5170_s29 + $0x198] sm:$0xff] %vm393_vm0, %v5028_v0 }
  0x55   : > { %446 = vst.msk [vmem:[%s5170_s29 + $0x1a0] sm:$0xff] %vm393_vm0, %v5028_v0 }
  0x56   : > { %447 = vst.msk [vmem:[%s5170_s29 + $0x1a8] sm:$0xff] %vm393_vm0, %v5028_v0 }
  0x57   : > { %448 = vst.msk [vmem:[%s5170_s29 + $0x1b0] sm:$0xff] %vm393_vm0, %v5028_v0 }
  0x58   : > { %449 = vst.msk [vmem:[%s5170_s29 + $0x1b8] sm:$0xff] %vm393_vm0, %v5028_v0 }
  0x59   : > { %450 = vst.msk [vmem:[%s5170_s29 + $0x1c0] sm:$0xff] %vm393_vm0, %v5028_v0 }
  0x5a   : > { %451 = vst.msk [vmem:[%s5170_s29 + $0x1c8] sm:$0xff] %vm393_vm0, %v5028_v0 }
  0x5b   : > { %452 = vst.msk [vmem:[%s5170_s29 + $0x1d0] sm:$0xff] %vm393_vm0, %v5028_v0 }
  0x5c   : > { %453 = vst.msk [vmem:[%s5170_s29 + $0x1d8] sm:$0xff] %vm393_vm0, %v5028_v0 }
  0x5d   : > { %454 = vst.msk [vmem:[%s5170_s29 + $0x1e0] sm:$0xff] %vm393_vm0, %v5028_v0 }
  0x5e   : > { %455 = vst.msk [vmem:[%s5170_s29 + $0x1e8] sm:$0xff] %vm393_vm0, %v5028_v0 }
  0x5f   : > { %456 = vst.msk [vmem:[%s5170_s29 + $0x1f0] sm:$0xff] %vm393_vm0, %v5028_v0 }
  0x60   : > { %457 = vst.msk [vmem:[%s5170_s29 + $0x1f8] sm:$0xff] %vm393_vm0, %v5028_v0 }
  0x61   : > { %458 = vst.msk [vmem:[%s5170_s29 + $0x200] sm:$0xff] %vm393_vm0, %v5028_v0 }
  0x62   : > { %459 = vst.msk [vmem:[%s5170_s29 + $0x208] sm:$0xff] %vm393_vm0, %v5028_v0 }
  0x63   : > { %460 = vst.msk [vmem:[%s5170_s29 + $0x210] sm:$0xff] %vm393_vm0, %v5028_v0 }
  0x64   : > { %461 = vst.msk [vmem:[%s5170_s29 + $0x218] sm:$0xff] %vm393_vm0, %v5028_v0 }
  0x65   : > { %462 = vst.msk [vmem:[%s5170_s29 + $0x220] sm:$0xff] %vm393_vm0, %v5028_v0 }
  0x66   : > { %463 = vst.msk [vmem:[%s5170_s29 + $0x228] sm:$0xff] %vm393_vm0, %v5028_v0 }
  0x67   : > { %464 = vst.msk [vmem:[%s5170_s29 + $0x230] sm:$0xff] %vm393_vm0, %v5028_v0 }
  0x68   : > { %465 = vst.msk [vmem:[%s5170_s29 + $0x238] sm:$0xff] %vm393_vm0, %v5028_v0 }
  0x69   : > { %466 = vst.msk [vmem:[%s5170_s29 + $0x240] sm:$0xff] %vm393_vm0, %v5028_v0 }
  0x6a   : > { %467 = vst.msk [vmem:[%s5170_s29 + $0x248] sm:$0xff] %vm393_vm0, %v5028_v0 }
  0x6b   : > { %468 = vst.msk [vmem:[%s5170_s29 + $0x250] sm:$0xff] %vm393_vm0, %v5028_v0 }
  0x6c   : > { %469 = vst.msk [vmem:[%s5170_s29 + $0x258] sm:$0xff] %vm393_vm0, %v5028_v0 }
  0x6d   : > { %470 = vst.msk [vmem:[%s5170_s29 + $0x260] sm:$0xff] %vm393_vm0, %v5028_v0 }
  0x6e   : > { %471 = vst.msk [vmem:[%s5170_s29 + $0x268] sm:$0xff] %vm393_vm0, %v5028_v0 }
  0x6f   : > { %472 = vst.msk [vmem:[%s5170_s29 + $0x270] sm:$0xff] %vm393_vm0, %v5028_v0 }
  0x70   : > { %473 = vst.msk [vmem:[%s5170_s29 + $0x278] sm:$0xff] %vm393_vm0, %v5028_v0 }
  0x71   : > { %474 = vst.msk [vmem:[%s5170_s29 + $0x280] sm:$0xff] %vm393_vm0, %v5028_v0 }
  0x72   : > { %475 = vst.msk [vmem:[%s5170_s29 + $0x288] sm:$0xff] %vm393_vm0, %v5028_v0 }
  0x73   : > { %476 = vst.msk [vmem:[%s5170_s29 + $0x290] sm:$0xff] %vm393_vm0, %v5028_v0 }
  0x74   : > { %477 = vst.msk [vmem:[%s5170_s29 + $0x298] sm:$0xff] %vm393_vm0, %v5028_v0 }
  0x75   : > { %478 = vst.msk [vmem:[%s5170_s29 + $0x2a0] sm:$0xff] %vm393_vm0, %v5028_v0 }
  0x76   : > { %479 = vst.msk [vmem:[%s5170_s29 + $0x2a8] sm:$0xff] %vm393_vm0, %v5028_v0 }
  0x77   : > { %480 = vst.msk [vmem:[%s5170_s29 + $0x2b0] sm:$0xff] %vm393_vm0, %v5028_v0 }
  0x78   : > { %481 = vst.msk [vmem:[%s5170_s29 + $0x2b8] sm:$0xff] %vm393_vm0, %v5028_v0 }
  0x79   : > { %482 = vst.msk [vmem:[%s5170_s29 + $0x2c0] sm:$0xff] %vm393_vm0, %v5028_v0 }
  0x7a   : > { %483 = vst.msk [vmem:[%s5170_s29 + $0x2c8] sm:$0xff] %vm393_vm0, %v5028_v0 }
  0x7b   : > { %484 = vst.msk [vmem:[%s5170_s29 + $0x2d0] sm:$0xff] %vm393_vm0, %v5028_v0 }
  0x7c   : > { %485 = vst.msk [vmem:[%s5170_s29 + $0x2d8] sm:$0xff] %vm393_vm0, %v5028_v0 }
  0x7d   : > { %486 = vst.msk [vmem:[%s5170_s29 + $0x2e0] sm:$0xff] %vm393_vm0, %v5028_v0 }
  0x7e   : > { %487 = vst.msk [vmem:[%s5170_s29 + $0x2e8] sm:$0xff] %vm393_vm0, %v5028_v0 }
  0x7f   : > { %488 = vst.msk [vmem:[%s5170_s29 + $0x2f0] sm:$0xff] %vm393_vm0, %v5028_v0 }
  0x80   : > { %489 = vst.msk [vmem:[%s5170_s29 + $0x2f8] sm:$0xff] %vm393_vm0, %v5028_v0 }
  0x81   : > { %490 = vst.msk [vmem:[%s5170_s29 + $0x300] sm:$0xff] %vm393_vm0, %v5028_v0 }
  0x82   : > { %491 = vst.msk [vmem:[%s5170_s29 + $0x308] sm:$0xff] %vm393_vm0, %v5028_v0 }
  0x83   : > { %492 = vst.msk [vmem:[%s5170_s29 + $0x310] sm:$0xff] %vm393_vm0, %v5028_v0 }
  0x84   : > { %493 = vst.msk [vmem:[%s5170_s29 + $0x318] sm:$0xff] %vm393_vm0, %v5028_v0 }
  0x85   : > { %494 = vst.msk [vmem:[%s5170_s29 + $0x320] sm:$0xff] %vm393_vm0, %v5028_v0 }
  0x86   : > { %495 = vst.msk [vmem:[%s5170_s29 + $0x328] sm:$0xff] %vm393_vm0, %v5028_v0 }
  0x87   : > { %496 = vst.msk [vmem:[%s5170_s29 + $0x330] sm:$0xff] %vm393_vm0, %v5028_v0 }
  0x88   : > { %497 = vst.msk [vmem:[%s5170_s29 + $0x338] sm:$0xff] %vm393_vm0, %v5028_v0 }
  0x89   : > { %498 = vst.msk [vmem:[%s5170_s29 + $0x340] sm:$0xff] %vm393_vm0, %v5028_v0 }
  0x8a   : > { %499 = vst.msk [vmem:[%s5170_s29 + $0x348] sm:$0xff] %vm393_vm0, %v5028_v0 }
  0x8b   : > { %500 = vst.msk [vmem:[%s5170_s29 + $0x350] sm:$0xff] %vm393_vm0, %v5028_v0 }
  0x8c   : > { %501 = vst.msk [vmem:[%s5170_s29 + $0x358] sm:$0xff] %vm393_vm0, %v5028_v0 }
  0x8d   : > { %502 = vst.msk [vmem:[%s5170_s29 + $0x360] sm:$0xff] %vm393_vm0, %v5028_v0 }
  0x8e   : > { %503 = vst.msk [vmem:[%s5170_s29 + $0x368] sm:$0xff] %vm393_vm0, %v5028_v0 }
  0x8f   : > { %504 = vst.msk [vmem:[%s5170_s29 + $0x370] sm:$0xff] %vm393_vm0, %v5028_v0 }
  0x90   : > { %505 = vst.msk [vmem:[%s5170_s29 + $0x378] sm:$0xff] %vm393_vm0, %v5028_v0 }
  0x91   : > { %506 = vst.msk [vmem:[%s5170_s29 + $0x380] sm:$0xff] %vm393_vm0, %v5028_v0 }
  0x92   : > { %507 = vst.msk [vmem:[%s5170_s29 + $0x388] sm:$0xff] %vm393_vm0, %v5028_v0 }
  0x93   : > { %508 = vst.msk [vmem:[%s5170_s29 + $0x390] sm:$0xff] %vm393_vm0, %v5028_v0 }
  0x94   : > { %509 = vst.msk [vmem:[%s5170_s29 + $0x398] sm:$0xff] %vm393_vm0, %v5028_v0 }
  0x95   : > { %510 = vst.msk [vmem:[%s5170_s29 + $0x3a0] sm:$0xff] %vm393_vm0, %v5028_v0 }
  0x96   : > { %511 = vst.msk [vmem:[%s5170_s29 + $0x3a8] sm:$0xff] %vm393_vm0, %v5028_v0 }
  0x97   : > { %512 = vst.msk [vmem:[%s5170_s29 + $0x3b0] sm:$0xff] %vm393_vm0, %v5028_v0 }
  0x98   : > { %513 = vst.msk [vmem:[%s5170_s29 + $0x3b8] sm:$0xff] %vm393_vm0, %v5028_v0 }
  0x99   : > { %514 = vst.msk [vmem:[%s5170_s29 + $0x3c0] sm:$0xff] %vm393_vm0, %v5028_v0 }
  0x9a   : > { %515 = vst.msk [vmem:[%s5170_s29 + $0x3c8] sm:$0xff] %vm393_vm0, %v5028_v0 }
  0x9b   : > { %516 = vst.msk [vmem:[%s5170_s29 + $0x3d0] sm:$0xff] %vm393_vm0, %v5028_v0 }
  0x9c   : > { %517 = vst.msk [vmem:[%s5170_s29 + $0x3d8] sm:$0xff] %vm393_vm0, %v5028_v0 }
  0x9d   : > { %518 = vst.msk [vmem:[%s5170_s29 + $0x3e0] sm:$0xff] %vm393_vm0, %v5028_v0 }
  0x9e   : > { %519 = vst.msk [vmem:[%s5170_s29 + $0x3e8] sm:$0xff] %vm393_vm0, %v5028_v0 }
  0x9f   : > { %520 = vst.msk [vmem:[%s5170_s29 + $0x3f0] sm:$0xff] %vm393_vm0, %v5028_v0 }
  0xa0   : > { %521 = vst.msk [vmem:[%s5170_s29 + $0x3f8] sm:$0xff] %vm393_vm0, %v5028_v0 }
  0xa1 PF: > { %p4437_p0 = scmp.ne.s32.totalorder %s5010_s30, 0 }
  0xa3   : > { %524 = sbr.rel (%p4437_p0) target bundleno = 1283 (0x503), region = 56 }
  0xa8   : > { %v530_v1 = vld [vmem:[%s5165_s15 + $0x20] sm:$0xff]  ;;  %v528_v2 = vld [vmem:[%s5165_s15 + $0x10] sm:$0xff]  ;;  %v527_v3 = vld [vmem:[%s5165_s15 + $0x8] sm:$0xff]  ;;  %v5029_v4 = vmov 1   ;;  %v5030_v5 = vmov 0   ;;  %v5031_v11 = vmov 2  }
  0xa9   : > { %4921 = vset.pattern.permute.xlu0 %v5029_v4  ;;  %4919 = vset.pattern.permute.xlu2 %v5030_v5  ;;  %v531_v6 = vld [vmem:[%s5165_s15 + $0x28] sm:$0xff]  ;;  %v529_v7 = vld [vmem:[%s5165_s15 + $0x18] sm:$0xff]  ;;  %v532_v8 = vld [vmem:[%s5165_s15 + $0x30] sm:$0xff]  ;;  %vm901_vm1 = vcmask 523264   ;;  %vm3120_vm2 = vcmask 7168  }
  0xaa   : > { %4918 = vset.pattern.permute.xlu1 %v5030_v5  ;;  %556 = vperm.xlu2 %4919, %v530_v1   ;;  %v533_v9 = vld [vmem:[%s5165_s15 + $0x38] sm:$0xff]  ;;  %v526_v10 = vld [vmem:[%s5165_s15] sm:$0xff]  ;;  %v682_v12 = vld [vmem:[%s7977_s2 + $0x8] sm:$0xff] }
  0xab   : > { %546 = vperm.xlu1 %4918, %v528_v2   ;;  %588 = vperm.xlu0 %4921, %v527_v3   ;;  %v687_v13 = vld [vmem:[%s7977_s2 + $0x30] sm:$0xff]  ;;  %v681_v14 = vld [vmem:[%s7977_s2] sm:$0xff]  ;;  %v766_v15 = vld [vmem:[%s7979_s4 + $0x8] sm:$0xff] }
  0xac   : > { %v683_v16 = vld [vmem:[%s7977_s2 + $0x10] sm:$0xff]  ;;  %v684_v17 = vld [vmem:[%s7977_s2 + $0x18] sm:$0xff]  ;;  %v769_v18 = vld [vmem:[%s7979_s4 + $0x20] sm:$0xff] }
  0xad   : > { %v685_v19 = vld [vmem:[%s7977_s2 + $0x20] sm:$0xff]  ;;  %v686_v20 = vld [vmem:[%s7977_s2 + $0x28] sm:$0xff]  ;;  %v772_v21 = vld [vmem:[%s7979_s4 + $0x38] sm:$0xff] }
  0xae   : > { %v688_v22 = vld [vmem:[%s7977_s2 + $0x38] sm:$0xff]  ;;  %v765_v23 = vld [vmem:[%s7979_s4] sm:$0xff]  ;;  %v775_v24 = vld [vmem:[%s7979_s4 + $0x50] sm:$0xff] }
  0xaf   : > { %v767_v25 = vld [vmem:[%s7979_s4 + $0x10] sm:$0xff]  ;;  %v768_v26 = vld [vmem:[%s7979_s4 + $0x18] sm:$0xff]  ;;  %v778_v27 = vld [vmem:[%s7979_s4 + $0x68] sm:$0xff] }
  0xb0   : > { %v770_v28 = vld [vmem:[%s7979_s4 + $0x28] sm:$0xff]  ;;  %v771_v30 = vld [vmem:[%s7979_s4 + $0x30] sm:$0xff]  ;;  %v1127_v31 = vld [vmem:[%s7981_s6] sm:$0xff] }
  0xb1   : > { %v773_v32 = vld [vmem:[%s7979_s4 + $0x40] sm:$0xff]  ;;  %v774_v33 = vld [vmem:[%s7979_s4 + $0x48] sm:$0xff]  ;;  %v1130_v36 = vld [vmem:[%s7981_s6 + $0x18] sm:$0xff] }
  0xb2   : > { %561 = vperm.xlu2 %4919, %v531_v6   ;;  %v776_v37 = vld [vmem:[%s7979_s4 + $0x58] sm:$0xff]  ;;  %v777_v39 = vld [vmem:[%s7979_s4 + $0x60] sm:$0xff]  ;;  %v1133_v42 = vld [vmem:[%s7981_s6 + $0x30] sm:$0xff] }
  0xb3   : > { %551 = vperm.xlu1 %4918, %v529_v7   ;;  %608 = vperm.xlu0 %4921, %v532_v8   ;;  %v779_v43 = vld [vmem:[%s7979_s4 + $0x70] sm:$0xff]  ;;  %v780_v44 = vld [vmem:[%s7979_s4 + $0x78] sm:$0xff]  ;;  %v1136_v48 = vld [vmem:[%s7981_s6 + $0x48] sm:$0xff] }
  0xb4   : > { %v1128_v49 = vld [vmem:[%s7981_s6 + $0x8] sm:$0xff]  ;;  %v1129_v50 = vld [vmem:[%s7981_s6 + $0x10] sm:$0xff]  ;;  %v1139_v53 = vld [vmem:[%s7981_s6 + $0x60] sm:$0xff] }
  0xb5   : > { %v1131_v54 = vld [vmem:[%s7981_s6 + $0x20] sm:$0xff]  ;;  %v1132_v56 = vld [vmem:[%s7981_s6 + $0x28] sm:$0xff]  ;;  %v1142_v59 = vld [vmem:[%s7981_s6 + $0x78] sm:$0xff] }
  0xb6   : > { %v1134_v60 = vld [vmem:[%s7981_s6 + $0x38] sm:$0xff]  ;;  %v1135_v61 = vld [vmem:[%s7981_s6 + $0x40] sm:$0xff]  ;;  %v1145_v0 = vld [vmem:[%s7981_s6 + $0x90] sm:$0xff] }
  0xba   : > { %4920 = vset.pattern.permute.xlu2 %v5029_v4 }
  0xbb   : > { %571 = vperm.xlu1 %4918, %v533_v9   ;;  %4924 = vset.pattern.permute.xlu0 %v5031_v11 }
  0xbc   : > { %637 = vperm.xlu0 %4924, %v527_v3   ;;  %584 = vperm.xlu2 %4920, %v526_v10  }
  0xc3   : > { %4922 = vset.pattern.permute.xlu1 %v5029_v4 }
  0xc4   : > { %592 = vperm.xlu1 %4922, %v528_v2   ;;  %657 = vperm.xlu0 %4924, %v532_v8  }
  0xc5   : > { %596 = vperm.xlu2 %4920, %v529_v7  }
  0xcc   : > { %600 = vperm.xlu1 %4922, %v530_v1   ;;  %4926 = vset.pattern.permute.xlu0 %v5030_v5 }
  0xcd   : > { %604 = vperm.xlu2 %4920, %v531_v6   ;;  %536 = vperm.xlu0 %4926, %v526_v10  }
  0xd4   : > { %612 = vperm.xlu1 %4922, %v533_v9  }
  0xd5   : > { %4923 = vset.pattern.permute.xlu2 %v5031_v11  ;;  %541 = vperm.xlu0 %4926, %v527_v3   ;;  %v1138_v3 = vld [vmem:[%s7981_s6 + $0x58] sm:$0xff] }
  0xd6   : > { %633 = vperm.xlu2 %4923, %v526_v10  }
  0xdc   : > { %4925 = vset.pattern.permute.xlu1 %v5031_v11 }
  0xdd   : > { %641 = vperm.xlu1 %4925, %v528_v2   ;;  %566 = vperm.xlu0 %4926, %v532_v8   ;;  %v1141_v8 = vld [vmem:[%s7981_s6 + $0x70] sm:$0xff] }
  0xde   : > { %645 = vperm.xlu2 %4923, %v529_v7   ;;  %v1140_v7 = vld [vmem:[%s7981_s6 + $0x68] sm:$0xff] }
  0xe5   : > { %649 = vperm.xlu1 %4925, %v530_v1   ;;  %696 = vperm.xlu0 %4926, %v682_v12   ;;  %v1137_v1 = vld [vmem:[%s7981_s6 + $0x50] sm:$0xff]  ;;  %v1151_v12 = vld [vmem:[%s7981_s6 + $0xc0] sm:$0xff] }
  0xe6   : > { %653 = vperm.xlu2 %4923, %v531_v6   ;;  %v1148_v6 = vld [vmem:[%s7981_s6 + $0xa8] sm:$0xff] }
  0xed   : > { %661 = vperm.xlu1 %4925, %v533_v9   ;;  %721 = vperm.xlu0 %4926, %v687_v13   ;;  %v1143_v13 = vld [vmem:[%s7981_s6 + $0x80] sm:$0xff] }
  0xee   : > { %4927 = vset.pattern.permute.xlu2 %v5030_v5 }
  0xef   : > { %691 = vperm.xlu2 %4927, %v681_v14   ;;  %v1144_v14 = vld [vmem:[%s7981_s6 + $0x88] sm:$0xff] }
  0xf5   : > { %4928 = vset.pattern.permute.xlu1 %v5030_v5  ;;  %788 = vperm.xlu0 %4926, %v766_v15  }
  0xf6   : > { %701 = vperm.xlu1 %4928, %v683_v16  }
  0xf7   : > { %706 = vperm.xlu2 %4927, %v684_v17   ;;  %v1154_v17 = vld [vmem:[%s7981_s6 + $0xd8] sm:$0xff] }
  0xfd   : > { %803 = vperm.xlu0 %4926, %v769_v18   ;;  %v1146_v18 = vld [vmem:[%s7981_s6 + $0x98] sm:$0xff] }
  0xfe   : > { %711 = vperm.xlu1 %4928, %v685_v19  }
  0xff   : > { %716 = vperm.xlu2 %4927, %v686_v20   ;;  %v1147_v20 = vld [vmem:[%s7981_s6 + $0xa0] sm:$0xff] }
 0x104   : > { %v5618_v29 = vpop.permute.xlu2 %556 }
 0x105   : > { %818 = vperm.xlu0 %4926, %v772_v21   ;;  %v525_v21 = vld [vmem:[%s5160_s23] sm:$0x7] }
 0x106   : > { %726 = vperm.xlu1 %4928, %v688_v22  }
 0x107   : > { %783 = vperm.xlu2 %4927, %v765_v23  }
 0x10c   : > { %v5634_v35 = vpop.permute.xlu2 %561 }
 0x10d   : > { %833 = vperm.xlu0 %4926, %v775_v24   ;;  %v1157_v24 = vld [vmem:[%s7981_s6 + $0xf0] sm:$0xff] }
 0x10e   : > { %793 = vperm.xlu1 %4928, %v767_v25   ;;  %v574_v25 = vperm.slane %v525_v21, 0 }
 0x10f   : > { %798 = vperm.xlu2 %4927, %v768_v26   ;;  %v1149_v26 = vld [vmem:[%s7981_s6 + $0xb0] sm:$0xff] }
 0x115   : > { %848 = vperm.xlu0 %4926, %v778_v27   ;;  %v1150_v27 = vld [vmem:[%s7981_s6 + $0xb8] sm:$0xff] }
 0x116   : > { %808 = vperm.xlu1 %4928, %v770_v28   ;;  %v5649_v41 = vpop.permute.xlu2 %584  ;;  %v615_v28 = vperm.slane %v525_v21, 1 }
 0x117   : > { %813 = vperm.xlu2 %4927, %v771_v30  }
 0x11d   : > { %v5632_v34 = vpop.permute.xlu1 %546  ;;  %1257 = vperm.xlu0 %4926, %v1127_v31   ;;  %v5642_v38 = vpop.permute.xlu0 %588 }
 0x11e   : > { %823 = vperm.xlu1 %4928, %v773_v32  }
 0x11f   : > { %828 = vperm.xlu2 %4927, %v774_v33   ;;  %v5664_v47 = vpop.permute.xlu2 %596 }
 0x125   : > { %v5647_v40 = vpop.permute.xlu1 %551  ;;  %1272 = vperm.xlu0 %4926, %v1130_v36   ;;  %v5662_v46 = vpop.permute.xlu0 %608  ;;  %v664_v36 = vperm.slane %v525_v21, 2 }
 0x126   : > { %838 = vperm.xlu1 %4928, %v776_v37   ;;  %v622_v32 = vmul.f32 %v615_v28, %v5662_v46 }
 0x127   : > { %843 = vperm.xlu2 %4927, %v777_v39   ;;  %v5685_v55 = vpop.permute.xlu2 %604 }
 0x12d   : > { %v5660_v45 = vpop.permute.xlu1 %571  ;;  %1287 = vperm.xlu0 %4926, %v1133_v42  }
 0x12e   : > { %853 = vperm.xlu1 %4928, %v779_v43   ;;  %v5677_v52 = vpop.permute.xlu0 %637  ;;  %v579_v43 = vmul.f32 %v574_v25, %v5618_v29  ;;  %v577_v29 = vmul.f32 %v574_v25, %v5632_v34 }
 0x12f   : > { %858 = vperm.xlu2 %4927, %v780_v44   ;;  %v580_v44 = vmul.f32 %v574_v25, %v5634_v35 }
 0x130   : > { %v5701_v62 = vpop.permute.xlu2 %633 }
 0x131   : > { %v665_v21 = vmul.f32 %v664_v36, %v5701_v62 }
 0x135   : > { %1302 = vperm.xlu0 %4926, %v1136_v48   ;;  %v621_v48 = vmul.f32 %v615_v28, %v5685_v55  ;;  %v1153_v55 = vld [vmem:[%s7981_s6 + $0xd0] sm:$0xff] }
 0x136   : > { %1262 = vperm.xlu1 %4928, %v1128_v49   ;;  %v5675_v51 = vpop.permute.xlu1 %592  ;;  %v5690_v58 = vpop.permute.xlu0 %657  ;;  %v1160_v49 = vld [vmem:[%s7981_s6 + $0x108] sm:$0xff] }
 0x137   : > { %1267 = vperm.xlu2 %4927, %v1129_v50   ;;  %v582_v50 = vmul.f32 %v574_v25, %v5660_v45  ;;  %v671_v46 = vmul.f32 %v664_v36, %v5690_v58  ;;  %v618_v35 = vmul.f32 %v615_v28, %v5675_v51  ;;  %v619_v58 = vmul.f32 %v615_v28, %v5664_v47 }
 0x138   : > { %v5716_v5 = vpop.permute.xlu2 %645 }
 0x13d   : > { %1317 = vperm.xlu0 %4926, %v1139_v53  }
 0x13e   : > { %1277 = vperm.xlu1 %4928, %v1131_v54   ;;  %v601_v57 = vpop.permute.xlu1 %600 }
 0x13f   : > { %1282 = vperm.xlu2 %4927, %v1132_v56   ;;  %v5709_v2 = vpop.permute.xlu0 %536  ;;  %v620_v37 = vmul.f32 %v615_v28, %v601_v57  ;;  %v1152_v56 = vld [vmem:[%s7981_s6 + $0xc8] sm:$0xff] }
 0x140   : > { %v654_v11 = vpop.permute.xlu2 %653  ;;  %v575_v47 = vmul.f32 %v574_v25, %v5709_v2  ;;  %v666_v2 = vmul.f32 %v664_v36, %v5677_v52 }
 0x145   : > { %1332 = vperm.xlu0 %4926, %v1142_v59   ;;  %v628_v59 = vadd.f32 %v620_v37, %v579_v43  ;;  %v1159_v43 = vld [vmem:[%s7981_s6 + $0x100] sm:$0xff] }
 0x146   : > { %1292 = vperm.xlu1 %4928, %v1134_v60   ;;  %v613_v63 = vpop.permute.xlu1 %612  ;;  %v670_v60 = vmul.f32 %v664_v36, %v654_v11 }
 0x147   : > { %1297 = vperm.xlu2 %4927, %v1135_v61   ;;  %v542_v9 = vpop.permute.xlu0 %541  ;;  %v623_v39 = vmul.f32 %v615_v28, %v613_v63  ;;  %v578_v63 = vmul.f32 %v574_v25, %v5647_v40 }
 0x149   : > { %v5742_v19 = vpop.permute.xlu2 %691  ;;  %v631_v45 = vadd.f32 %v623_v39, %v582_v50  ;;  %v1166_v39 = vld [vmem:[%s7981_s6 + $0x138] sm:$0xff]  ;;  %v4744_v50 = vld [vmem:[%s7978_s3] sm:$0xff] }
 0x14d   : > { %1347 = vperm.xlu0 %4926, %v1145_v0   ;;  %v629_v0 = vadd.f32 %v621_v48, %v580_v44 }
 0x14e   : > { %1307 = vperm.xlu1 %4928, %v1137_v1   ;;  %v576_v1 = vmul.f32 %v574_v25, %v542_v9  ;;  %v616_v9 = vmul.f32 %v615_v28, %v5649_v41  ;;  %v1156_v41 = vld [vmem:[%s7981_s6 + $0xe8] sm:$0xff] }
 0x14f   : > { %1312 = vperm.xlu2 %4927, %v1138_v3   ;;  %v5714_v4 = vpop.permute.xlu1 %641  ;;  %v567_v16 = vpop.permute.xlu0 %566 }
 0x150   : > { %v581_v30 = vmul.f32 %v574_v25, %v567_v16  ;;  %v667_v34 = vmul.f32 %v664_v36, %v5714_v4  ;;  %v1163_v16 = vld [vmem:[%s7981_s6 + $0x120] sm:$0xff]  ;;  %v624_v25 = vadd.f32 %v616_v9, %v575_v47  ;;  %v1182_v9 = vld [vmem:[%s7981_s6 + $0x1b8] sm:$0xff] }
 0x151   : > { %v5761_v31 = vpop.permute.xlu2 %706 }
 0x152   : > { %v630_v42 = vadd.f32 %v622_v32, %v581_v30  ;;  %v673_v52 = vadd.f32 %v665_v21, %v624_v25  ;;  %v1188_v21 = vld [vmem:[%s7981_s6 + $0x1e8] sm:$0xff] }
 0x154   : > { %v679_v61 = vadd.f32 %v671_v46, %v630_v42  ;;  %v1161_v46 = vld [vmem:[%s7981_s6 + $0x110] sm:$0xff] }
 0x155   : > { %1362 = vperm.xlu0 %4926, %v1148_v6  }
 0x156   : > { %1322 = vperm.xlu1 %4928, %v1140_v7   ;;  %v617_v7 = vmul.f32 %v615_v28, %v5642_v38 }
 0x157   : > { %1327 = vperm.xlu2 %4927, %v1141_v8   ;;  %v650_v10 = vpop.permute.xlu1 %649  ;;  %v5750_v23 = vpop.permute.xlu0 %696  ;;  %v626_v8 = vadd.f32 %v618_v35, %v577_v29  ;;  %v1165_v29 = vld [vmem:[%s7981_s6 + $0x130] sm:$0xff]  ;;  %v1175_v35 = vld [vmem:[%s7981_s6 + $0x180] sm:$0xff] }
 0x158   : > { %v669_v53 = vmul.f32 %v664_v36, %v650_v10  ;;  %v668_v10 = vmul.f32 %v664_v36, %v5716_v5  ;;  %v625_v4 = vadd.f32 %v617_v7, %v576_v1  ;;  %v1155_v5 = vld [vmem:[%s7981_s6 + $0xe0] sm:$0xff]  ;;  %v1174_v1 = vld [vmem:[%s7981_s6 + $0x178] sm:$0xff] }
 0x159   : > { %v717_v11 = vpop.permute.xlu2 %716  ;;  %v675_v38 = vadd.f32 %v667_v34, %v626_v8  ;;  %v1184_v34 = vld [vmem:[%s7981_s6 + $0x1c8] sm:$0xff]  ;;  %v1187_v8 = vld [vmem:[%s7981_s6 + $0x1e0] sm:$0xff] }
 0x15a   : > { %v677_v3 = vadd.f32 %v669_v53, %v628_v59  ;;  %v674_v32 = vadd.f32 %v666_v2, %v625_v4  ;;  %v1162_v53 = vld [vmem:[%s7981_s6 + $0x118] sm:$0xff]  ;;  %v1168_v59 = vld [vmem:[%s7981_s6 + $0x148] sm:$0xff] }
 0x15b   : > { %v1196_v2 = vld [vmem:[%s7981_s6 + $0x228] sm:$0xff] }
 0x15c   : > { %v730_v62 = vadd.f32 %v5750_v23, %v674_v32  ;;  %v1192_v32 = vld [vmem:[%s7981_s6 + $0x208] sm:$0xff] }
 0x15d   : > { %1377 = vperm.xlu0 %4926, %v1151_v12  }
 0x15e   : > { %1337 = vperm.xlu1 %4928, %v1143_v13   ;;  %v678_v13 = vadd.f32 %v670_v60, %v629_v0  ;;  %v738_v44 = vmax.f32 %v730_v62, 0.0  ;;  %v1178_v60 = vld [vmem:[%s7981_s6 + $0x198] sm:$0xff]  ;;  %v1173_v0 = vld [vmem:[%s7981_s6 + $0x170] sm:$0xff] }
 0x15f   : > { %1342 = vperm.xlu2 %4927, %v1144_v14   ;;  %v662_v15 = vpop.permute.xlu1 %661  ;;  %v722_v57 = vpop.permute.xlu0 %721 }
 0x160   : > { %v672_v54 = vmul.f32 %v664_v36, %v662_v15  ;;  %v735_v51 = vadd.f32 %v722_v57, %v679_v61  ;;  %v627_v15 = vadd.f32 %v619_v58, %v578_v63  ;;  %v4745_v57 = vld [vmem:[%s7978_s3 + $0x8] sm:$0xff]  ;;  %v1171_v61 = vld [vmem:[%s7981_s6 + $0x160] sm:$0xff]  ;;  %v1181_v58 = vld [vmem:[%s7981_s6 + $0x1b0] sm:$0xff] }
 0x161   : > { %v4746_v63 = vld [vmem:[%s7978_s3 + $0x10] sm:$0xff] }
 0x162   : > { %v680_v6 = vadd.f32 %v672_v54, %v631_v45  ;;  %v1172_v54 = vld [vmem:[%s7981_s6 + $0x168] sm:$0xff]  ;;  %v1170_v45 = vld [vmem:[%s7981_s6 + $0x158] sm:$0xff] }
 0x165   : > { %1392 = vperm.xlu0 %4926, %v1154_v17   ;;  %v734_v17 = vadd.f32 %v717_v11, %v678_v13  ;;  %v1179_v11 = vld [vmem:[%s7981_s6 + $0x1a0] sm:$0xff] }
 0x166   : > { %1352 = vperm.xlu1 %4928, %v1146_v18   ;;  %v743_v18 = vmax.f32 %v735_v51, 0.0  ;;  %v1176_v51 = vld [vmem:[%s7981_s6 + $0x188] sm:$0xff] }
 0x167   : > { %1357 = vperm.xlu2 %4927, %v1147_v20   ;;  %v5879_v7 = vpop.permute.xlu0 %788 }
 0x168   : > { %v5748_v22 = vpop.permute.xlu1 %701 }
 0x16d   : > { %1407 = vperm.xlu0 %4926, %v1157_v24   ;;  %v676_v24 = vadd.f32 %v668_v10, %v627_v15  ;;  %v4747_v10 = vld [vmem:[%s7978_s3 + $0x18] sm:$0xff]  ;;  %v1183_v15 = vld [vmem:[%s7981_s6 + $0x1c0] sm:$0xff] }
 0x16e   : > { %1367 = vperm.xlu1 %4928, %v1149_v26   ;;  %v731_v26 = vadd.f32 %v5748_v22, %v675_v38  ;;  %v729_v22 = vadd.f32 %v5742_v19, %v673_v52  ;;  %v1169_v19 = vld [vmem:[%s7981_s6 + $0x150] sm:$0xff] }
 0x16f   : > { %1372 = vperm.xlu2 %4927, %v1150_v27   ;;  %v732_v30 = vadd.f32 %v5761_v31, %v676_v24  ;;  %v1158_v31 = vld [vmem:[%s7981_s6 + $0xf8] sm:$0xff]  ;;  %v1185_v38 = vld [vmem:[%s7981_s6 + $0x1d0] sm:$0xff] }
 0x170   : > { %v712_v33 = vpop.permute.xlu1 %711  ;;  %v739_v36 = vmax.f32 %v731_v26, 0.0  ;;  %v737_v48 = vmax.f32 %v729_v22, 0.0 }
 0x171   : > { %v733_v40 = vadd.f32 %v712_v33, %v677_v3  ;;  %v742_v33 = vmax.f32 %v734_v17, 0.0  ;;  %v740_v42 = vmax.f32 %v732_v30, 0.0  ;;  %v1177_v3 = vld [vmem:[%s7981_s6 + $0x190] sm:$0xff]  ;;  %v4748_v17 = vld [vmem:[%s7978_s3 + $0x20] sm:$0xff] }
 0x172   : > { %v1191_v30 = vld [vmem:[%s7981_s6 + $0x200] sm:$0xff] }
 0x173   : > { %v741_v27 = vmax.f32 %v733_v40, 0.0  ;;  %v762_v23 = vpack.c.bf16 %v740_v42, %v739_v36  ;;  %v5898_v40 = vpop.permute.xlu0 %803  ;;  %v1202_v36 = vld [vmem:[%s7981_s6 + $0x258] sm:$0xff] }
 0x175   : > { %1422 = vperm.xlu0 %4926, %v1160_v49   ;;  %v763_v37 = vpack.c.bf16 %v742_v33, %v741_v27  ;;  %v761_v49 = vpack.c.bf16 %v738_v44, %v737_v48  ;;  %v1199_v27 = vld [vmem:[%s7981_s6 + $0x240] sm:$0xff]  ;;  %v4750_v44 = vld [vmem:[%s7978_s3 + $0x30] sm:$0xff]  ;;  %v1198_v48 = vld [vmem:[%s7981_s6 + $0x238] sm:$0xff] }
 0x176   : > { %1382 = vperm.xlu1 %4928, %v1152_v56   ;;  %v1164_v56 = vld [vmem:[%s7981_s6 + $0x128] sm:$0xff] }
 0x177   : > { %1387 = vperm.xlu2 %4927, %v1153_v55   ;;  %v1167_v55 = vld [vmem:[%s7981_s6 + $0x140] sm:$0xff] }
 0x178   : > { %v727_v12 = vpop.permute.xlu1 %726 }
 0x179   : > { %v736_v14 = vadd.f32 %v727_v12, %v680_v6  ;;  %v5877_v6 = vpop.permute.xlu2 %783  ;;  %v1180_v12 = vld [vmem:[%s7981_s6 + $0x1a8] sm:$0xff] }
 0x17b   : > { %v744_v20 = vmax.f32 %v736_v14, 0.0  ;;  %v1190_v14 = vld [vmem:[%s7981_s6 + $0x1f8] sm:$0xff] }
 0x17d   : > { %1437 = vperm.xlu0 %4926, %v1163_v16   ;;  %v764_v28 = vpack.c.bf16 %v744_v20, %v743_v18  ;;  %v1193_v16 = vld [vmem:[%s7981_s6 + $0x210] sm:$0xff]  ;;  %v5922_v18 = vpop.permute.xlu0 %818  ;;  %v1186_v20 = vld [vmem:[%s7981_s6 + $0x1d8] sm:$0xff] }
 0x17e   : > { %1397 = vperm.xlu1 %4928, %v1155_v5  }
 0x17f   : > { %1402 = vperm.xlu2 %4927, %v1156_v41   ;;  %930 = vmatpush.bf16.msra.mxu0 %v764_v28  ;;  %v1189_v41 = vld [vmem:[%s7981_s6 + $0x1f0] sm:$0xff]  ;;  %v4749_v28 = vld [vmem:[%s7978_s3 + $0x28] sm:$0xff] }
 0x180   : > { %v5894_v47 = vpop.permute.xlu1 %793 }
 0x181   : > { %v5896_v13 = vpop.permute.xlu2 %798 }
 0x183   : > { %931 = vmatpush.bf16.msra.mxu0 %v763_v37  ;;  %v1194_v37 = vld [vmem:[%s7981_s6 + $0x218] sm:$0xff] }
 0x185   : > { %1452 = vperm.xlu0 %4926, %v1166_v39   ;;  %v5941_v26 = vpop.permute.xlu0 %833  ;;  %v1195_v39 = vld [vmem:[%s7981_s6 + $0x220] sm:$0xff] }
 0x186   : > { %1412 = vperm.xlu1 %4928, %v1158_v31  }
 0x187   : > { %1417 = vperm.xlu2 %4927, %v1159_v43   ;;  %932 = vmatpush.bf16.msra.mxu0 %v762_v23  ;;  %v1205_v43 = vld [vmem:[%s7981_s6 + $0x270] sm:$0xff] }
 0x188   : > { %v5909_v4 = vpop.permute.xlu1 %808  ;;  %v1197_v23 = vld [vmem:[%s7981_s6 + $0x230] sm:$0xff] }
 0x189   : > { %v5920_v5 = vpop.permute.xlu2 %813 }
 0x18b   : > { %933 = vmatpush.bf16.msra.mxu0 %v761_v49 }
 0x18d   : > { %1467 = vperm.xlu0 %4926, %v1169_v19   ;;  %v5960_v62 = vpop.permute.xlu0 %848  ;;  %v1208_v19 = vld [vmem:[%s7981_s6 + $0x288] sm:$0xff] }
 0x18e   : > { %1427 = vperm.xlu1 %4928, %v1161_v46   ;;  %4470 = vmatmul.msk.bf16.vlgmr.msra.gmra.mxu0 %vm901_vm1, %v4744_v50  ;;  %v1200_v50 = vld [vmem:[%s7981_s6 + $0x248] sm:$0xff] }
 0x18f   : > { %1432 = vperm.xlu2 %4927, %v1162_v53  }
 0x190   : > { %v5934_v24 = vpop.permute.xlu1 %823 }
 0x191   : > { %v5939_v25 = vpop.permute.xlu2 %828 }
 0x195   : > { %1482 = vperm.xlu0 %4926, %v1172_v54   ;;  %v5975_v31 = vpop.permute.xlu0 %1257  ;;  %v1201_v54 = vld [vmem:[%s7981_s6 + $0x250] sm:$0xff] }
 0x196   : > { %1442 = vperm.xlu1 %4928, %v1164_v56   ;;  %v1211_v56 = vld [vmem:[%s7981_s6 + $0x2a0] sm:$0xff] }
 0x197   : > { %1447 = vperm.xlu2 %4927, %v1165_v29   ;;  %v4751_v29 = vld [vmem:[%s7978_s3 + $0x38] sm:$0xff] }
 0x198   : > { %v5955_v33 = vpop.permute.xlu1 %838 }
 0x199   : > { %v5958_v52 = vpop.permute.xlu2 %843 }
 0x19d   : > { %1497 = vperm.xlu0 %4926, %v1175_v35   ;;  %v6000_v53 = vpop.permute.xlu0 %1272  ;;  %v1203_v35 = vld [vmem:[%s7981_s6 + $0x260] sm:$0xff] }
 0x19e   : > { %1457 = vperm.xlu1 %4928, %v1167_v55   ;;  %4471 = vmatmul.msk.bf16.gmra.mxu0 %vm901_vm1, %v4745_v57  ;;  %v1204_v55 = vld [vmem:[%s7981_s6 + $0x268] sm:$0xff] }
 0x19f   : > { %1462 = vperm.xlu2 %4927, %v1168_v59  }
 0x1a0   : > { %v5971_v22 = vpop.permute.xlu1 %853 }
 0x1a1   : > { %v5973_v42 = vpop.permute.xlu2 %858 }
 0x1a5   : > { %1512 = vperm.xlu0 %4926, %v1178_v60   ;;  %v6021_v60 = vpop.permute.xlu0 %1287 }
 0x1a6   : > { %1472 = vperm.xlu1 %4928, %v1170_v45   ;;  %v1214_v45 = vld [vmem:[%s7981_s6 + $0x2b8] sm:$0xff] }
 0x1a7   : > { %1477 = vperm.xlu2 %4927, %v1171_v61   ;;  %v1206_v61 = vld [vmem:[%s7981_s6 + $0x278] sm:$0xff] }
 0x1a8   : > { %v5990_v49 = vpop.permute.xlu1 %1262 }
 0x1a9   : > { %v5998_v46 = vpop.permute.xlu2 %1267 }
 0x1ad   : > { %1527 = vperm.xlu0 %4926, %v1181_v58   ;;  %v1207_v58 = vld [vmem:[%s7981_s6 + $0x280] sm:$0xff] }
 0x1ae   : > { %1487 = vperm.xlu1 %4928, %v1173_v0   ;;  %4472 = vmatmul.msk.bf16.gmra.mxu0 %vm901_vm1, %v4746_v63 }
 0x1af   : > { %1492 = vperm.xlu2 %4927, %v1174_v1   ;;  %v6037_v1 = vpop.permute.xlu0 %1302 }
 0x1b0   : > { %v6014_v57 = vpop.permute.xlu1 %1277 }
 0x1b1   : > { %v6019_v59 = vpop.permute.xlu2 %1282 }
 0x1b5   : > { %1542 = vperm.xlu0 %4926, %v1184_v34   ;;  %v1217_v34 = vld [vmem:[%s7981_s6 + $0x2d0] sm:$0xff] }
 0x1b6   : > { %1502 = vperm.xlu1 %4928, %v1176_v51  }
 0x1b7   : > { %1507 = vperm.xlu2 %4927, %v1177_v3   ;;  %v1209_v3 = vld [vmem:[%s7981_s6 + $0x290] sm:$0xff] }
 0x1b8   : > { %v6033_v63 = vpop.permute.xlu1 %1292 }
 0x1b9   : > { %v6035_v0 = vpop.permute.xlu2 %1297 }
 0x1bd   : > { %1557 = vperm.xlu0 %4926, %v1187_v8   ;;  %v1210_v8 = vld [vmem:[%s7981_s6 + $0x298] sm:$0xff] }
 0x1be   : > { %1517 = vperm.xlu1 %4928, %v1179_v11   ;;  %4473 = vmatmul.msk.bf16.gmra.mxu0 %vm901_vm1, %v4747_v10 }
 0x1bf   : > { %1522 = vperm.xlu2 %4927, %v1180_v12   ;;  %v6054_v12 = vpop.permute.xlu0 %1317 }
 0x1c0   : > { %v6050_v10 = vpop.permute.xlu1 %1307  ;;  %8000 = vst [vmem:[#allocation13_spill] sm:$0xff] %v6054_v12 }
 0x1c1   : > { %7998 = vst [vmem:[#allocation11_spill] sm:$0xff] %v6050_v10  ;;  %v6052_v11 = vpop.permute.xlu2 %1312 }
 0x1c2   : > { %7999 = vst [vmem:[#allocation12_spill] sm:$0xff] %v6052_v11 }
 0x1c5   : > { %1572 = vperm.xlu0 %4926, %v1190_v14   ;;  %v1220_v14 = vld [vmem:[%s7981_s6 + $0x2e8] sm:$0xff] }
 0x1c6   : > { %1532 = vperm.xlu1 %4928, %v1182_v9  }
 0x1c7   : > { %1537 = vperm.xlu2 %4927, %v1183_v15   ;;  %v1212_v15 = vld [vmem:[%s7981_s6 + $0x2a8] sm:$0xff] }
 0x1cd   : > { %1587 = vperm.xlu0 %4926, %v1193_v16   ;;  %v1213_v16 = vld [vmem:[%s7981_s6 + $0x2b0] sm:$0xff] }
 0x1ce   : > { %1547 = vperm.xlu1 %4928, %v1185_v38   ;;  %4474 = vmatmul.msk.bf16.gmra.mxu0 %vm901_vm1, %v4748_v17  ;;  %v6067_v17 = vpop.permute.xlu1 %1322  ;;  %v1223_v38 = vld [vmem:[%s7981_s6 + $0x300] sm:$0xff] }
 0x1cf   : > { %1552 = vperm.xlu2 %4927, %v1186_v20   ;;  %8001 = vst [vmem:[#allocation14_spill] sm:$0xff] %v6067_v17 }
 0x1d5   : > { %1602 = vperm.xlu0 %4926, %v1196_v2   ;;  %v1215_v2 = vld [vmem:[%s7981_s6 + $0x2c0] sm:$0xff] }
 0x1d6   : > { %1562 = vperm.xlu1 %4928, %v1188_v21   ;;  %v6077_v21 = vpop.permute.xlu2 %1327 }
 0x1d7   : > { %1567 = vperm.xlu2 %4927, %v1189_v41   ;;  %8002 = vst [vmem:[#allocation15_spill] sm:$0xff] %v6077_v21  ;;  %v6079_v41 = vpop.permute.xlu0 %1332  ;;  %v1242_v21 = vld [vmem:[%s7981_s6 + $0x398] sm:$0xff] }
 0x1d8   : > { %8003 = vst [vmem:[#allocation16_spill] sm:$0xff] %v6079_v41 }
 0x1dd   : > { %1617 = vperm.xlu0 %4926, %v1199_v27   ;;  %v1216_v27 = vld [vmem:[%s7981_s6 + $0x2c8] sm:$0xff] }
 0x1de   : > { %1577 = vperm.xlu1 %4928, %v1191_v30   ;;  %4475 = vmatmul.msk.bf16.gmra.mxu0 %vm901_vm1, %v4749_v28  ;;  %v1226_v28 = vld [vmem:[%s7981_s6 + $0x318] sm:$0xff] }
 0x1df   : > { %1582 = vperm.xlu2 %4927, %v1192_v32   ;;  %v1218_v32 = vld [vmem:[%s7981_s6 + $0x2d8] sm:$0xff] }
 0x1e5   : > { %1632 = vperm.xlu0 %4926, %v1202_v36   ;;  %v6092_v36 = vpop.permute.xlu1 %1337 }
 0x1e6   : > { %1592 = vperm.xlu1 %4928, %v1194_v37   ;;  %8004 = vst [vmem:[#allocation17_spill] sm:$0xff] %v6092_v36  ;;  %v1219_v37 = vld [vmem:[%s7981_s6 + $0x2e0] sm:$0xff]  ;;  %v1250_v36 = vld [vmem:[%s7981_s6 + $0x3d8] sm:$0xff] }
 0x1e7   : > { %1597 = vperm.xlu2 %4927, %v1195_v39   ;;  %v6097_v39 = vpop.permute.xlu2 %1342 }
 0x1e8   : > { %8005 = vst [vmem:[#allocation18_spill] sm:$0xff] %v6097_v39 }
 0x1ed   : > { %1647 = vperm.xlu0 %4926, %v1205_v43   ;;  %v6099_v43 = vpop.permute.xlu0 %1347 }
 0x1ee   : > { %1607 = vperm.xlu1 %4928, %v1197_v23   ;;  %4476 = vmatmul.msk.bf16.gmra.mxu0 %vm901_vm1, %v4750_v44  ;;  %8006 = vst [vmem:[#allocation19_spill] sm:$0xff] %v6099_v43  ;;  %v1229_v44 = vld [vmem:[%s7981_s6 + $0x330] sm:$0xff]  ;;  %v1239_v43 = vld [vmem:[%s7981_s6 + $0x380] sm:$0xff] }
 0x1ef   : > { %1612 = vperm.xlu2 %4927, %v1198_v48   ;;  %v1221_v48 = vld [vmem:[%s7981_s6 + $0x2f0] sm:$0xff] }
 0x1f5   : > { %1662 = vperm.xlu0 %4926, %v1208_v19   ;;  %v1222_v19 = vld [vmem:[%s7981_s6 + $0x2f8] sm:$0xff] }
 0x1f6   : > { %1622 = vperm.xlu1 %4928, %v1200_v50   ;;  %v6112_v50 = vpop.permute.xlu1 %1352 }
 0x1f7   : > { %1627 = vperm.xlu2 %4927, %v1201_v54   ;;  %8007 = vst [vmem:[#allocation20_spill] sm:$0xff] %v6112_v50  ;;  %v6114_v54 = vpop.permute.xlu2 %1357 }
 0x1fd   : > { %1677 = vperm.xlu0 %4926, %v1211_v56   ;;  %v6116_v56 = vpop.permute.xlu0 %1362 }
 0x1fe   : > { %1637 = vperm.xlu1 %4928, %v1203_v35   ;;  %4477 = vmatmul.msk.bf16.gmra.mxu0 %vm901_vm1, %v4751_v29  ;;  %v1232_v29 = vld [vmem:[%s7981_s6 + $0x348] sm:$0xff] }
 0x1ff   : > { %1642 = vperm.xlu2 %4927, %v1204_v55   ;;  %v1224_v55 = vld [vmem:[%s7981_s6 + $0x308] sm:$0xff] }
 0x205   : > { %1692 = vperm.xlu0 %4926, %v1214_v45   ;;  %v1225_v45 = vld [vmem:[%s7981_s6 + $0x310] sm:$0xff] }
 0x206   : > { %1652 = vperm.xlu1 %4928, %v1206_v61   ;;  %v6129_v61 = vpop.permute.xlu1 %1367 }
 0x207   : > { %1657 = vperm.xlu2 %4927, %v1207_v58   ;;  %v6131_v58 = vpop.permute.xlu2 %1372 }
 0x20b   : > { %v6042_v51 = vpop.f32.mrf.mxu0 }
 0x20d   : > { %1707 = vperm.xlu0 %4926, %v1217_v34   ;;  %v6133_v34 = vpop.permute.xlu0 %1377 }
 0x20e   : > { %1667 = vperm.xlu1 %4928, %v1209_v3   ;;  %v1235_v3 = vld [vmem:[%s7981_s6 + $0x360] sm:$0xff] }
 0x20f   : > { %1672 = vperm.xlu2 %4927, %v1210_v8  }
 0x213   : > { %v6059_v9 = vpop.f32.mrf.mxu0 }
 0x215   : > { %1722 = vperm.xlu0 %4926, %v1220_v14   ;;  %v1227_v14 = vld [vmem:[%s7981_s6 + $0x320] sm:$0xff] }
 0x216   : > { %1682 = vperm.xlu1 %4928, %v1212_v15   ;;  %v1228_v15 = vld [vmem:[%s7981_s6 + $0x328] sm:$0xff] }
 0x217   : > { %1687 = vperm.xlu2 %4927, %v1213_v16   ;;  %v6146_v16 = vpop.permute.xlu1 %1382 }
 0x21b   : > { %v6072_v20 = vpop.f32.mrf.mxu0 }
 0x21d   : > { %1737 = vperm.xlu0 %4926, %v1223_v38   ;;  %v1238_v38 = vld [vmem:[%s7981_s6 + $0x378] sm:$0xff] }
 0x21e   : > { %1697 = vperm.xlu1 %4928, %v1215_v2  }
 0x21f   : > { %1702 = vperm.xlu2 %4927, %v1216_v27   ;;  %v1230_v27 = vld [vmem:[%s7981_s6 + $0x338] sm:$0xff] }
 0x223   : > { %v6087_v30 = vpop.f32.mrf.mxu0 }
 0x225   : > { %1752 = vperm.xlu0 %4926, %v1226_v28   ;;  %v6156_v28 = vpop.permute.xlu2 %1387 }
 0x226   : > { %1712 = vperm.xlu1 %4928, %v1218_v32   ;;  %v6158_v32 = vpop.permute.xlu0 %1392 }
 0x227   : > { %1717 = vperm.xlu2 %4927, %v1219_v37   ;;  %v1231_v37 = vld [vmem:[%s7981_s6 + $0x340] sm:$0xff] }
 0x22b   : > { %v6104_v23 = vpop.f32.mrf.mxu0 }
 0x22d   : > { %1767 = vperm.xlu0 %4926, %v1229_v44   ;;  %v1241_v44 = vld [vmem:[%s7981_s6 + $0x390] sm:$0xff] }
 0x22e   : > { %1727 = vperm.xlu1 %4928, %v1221_v48  }
 0x22f   : > { %1732 = vperm.xlu2 %4927, %v1222_v19   ;;  %v1233_v19 = vld [vmem:[%s7981_s6 + $0x350] sm:$0xff] }
 0x233   : > { %v6121_v35 = vpop.f32.mrf.mxu0 }
 0x235   : > { %1782 = vperm.xlu0 %4926, %v1232_v29   ;;  %v6171_v29 = vpop.permute.xlu1 %1397 }
 0x236   : > { %1742 = vperm.xlu1 %4928, %v1224_v55   ;;  %v1234_v55 = vld [vmem:[%s7981_s6 + $0x358] sm:$0xff] }
 0x237   : > { %1747 = vperm.xlu2 %4927, %v1225_v45   ;;  %v6176_v45 = vpop.permute.xlu2 %1402 }
 0x23b   : > { %v6138_v8 = vpop.f32.mrf.mxu0 }
 0x23d   : > { %1797 = vperm.xlu0 %4926, %v1235_v3   ;;  %v6178_v3 = vpop.permute.xlu0 %1407 }
 0x23e   : > { %1757 = vperm.xlu1 %4928, %v1227_v14   ;;  %8008 = vst [vmem:[#allocation21_spill] sm:$0xff] %v6178_v3  ;;  %v1244_v14 = vld [vmem:[%s7981_s6 + $0x3a8] sm:$0xff] }
 0x23f   : > { %1762 = vperm.xlu2 %4927, %v1228_v15  }
 0x243   : > { %v6151_v2 = vpop.f32.mrf.mxu0 }
 0x245   : > { %1812 = vperm.xlu0 %4926, %v1238_v38   ;;  %v1236_v38 = vld [vmem:[%s7981_s6 + $0x368] sm:$0xff] }
 0x246   : > { %1772 = vperm.xlu1 %4928, %v1230_v27   ;;  %v1237_v27 = vld [vmem:[%s7981_s6 + $0x370] sm:$0xff] }
 0x247   : > { %1777 = vperm.xlu2 %4927, %v1231_v37   ;;  %v6191_v37 = vpop.permute.xlu1 %1412 }
 0x248   : > { %8009 = vst [vmem:[#allocation22_spill] sm:$0xff] %v6191_v37 }
 0x24b   : > { %v6166_v48 = vpop.f32.mrf.mxu0 }
 0x24d   : > { %1827 = vperm.xlu0 %4926, %v1241_v44   ;;  %v6193_v44 = vpop.permute.xlu2 %1417 }
 0x24e   : > { %1787 = vperm.xlu1 %4928, %v1233_v19   ;;  %8010 = vst [vmem:[#allocation23_spill] sm:$0xff] %v6193_v44  ;;  %v6195_v19 = vpop.permute.xlu0 %1422 }
 0x24f   : > { %1792 = vperm.xlu2 %4927, %v1234_v55   ;;  %8011 = vst [vmem:[#allocation24_spill] sm:$0xff] %v6195_v19  ;;  %v1247_v55 = vld [vmem:[%s7981_s6 + $0x3c0] sm:$0xff] }
 0x253   : > { %v6183_v15 = vpop.f32.mrf.mxu0 }
 0x255   : > { %1842 = vperm.xlu0 %4926, %v1244_v14   ;;  %v1240_v14 = vld [vmem:[%s7981_s6 + $0x388] sm:$0xff] }
 0x256   : > { %1802 = vperm.xlu1 %4928, %v1236_v38   ;;  %v6206_v38 = vpop.permute.xlu1 %1427  ;;  %v6210_v39 = vpop.permute.xlu0 %1437 }
 0x257   : > { %1807 = vperm.xlu2 %4927, %v1237_v27   ;;  %8012 = vst [vmem:[#allocation25_spill] sm:$0xff] %v6206_v38  ;;  %v6208_v27 = vpop.permute.xlu2 %1432 }
 0x258   : > { %8013 = vst [vmem:[#allocation26_spill] sm:$0xff] %v6208_v27  ;;  %v1245_v27 = vld [vmem:[%s7981_s6 + $0x3b0] sm:$0xff] }
 0x259   : > { %8014 = vst [vmem:[#allocation27_spill] sm:$0xff] %v6210_v39 }
 0x25b   : > { %v960_v50 = vpop.f32.mrf.mxu0 }
 0x25c   : > { %v961_v10 = vadd.f32 %v960_v50, %v5941_v26  ;;  %v953_v26 = vadd.f32 %v6151_v2, %v5922_v18 }
 0x25d   : > { %1857 = vperm.xlu0 %4926, %v1247_v55  }
 0x25e   : > { %1817 = vperm.xlu1 %4928, %v1239_v43   ;;  %v1243_v43 = vld [vmem:[%s7981_s6 + $0x3a0] sm:$0xff]  ;;  %v6221_v55 = vpop.permute.xlu1 %1442  ;;  %v6231_v19 = vpop.permute.xlu0 %1452  ;;  %v982_v18 = vmax.f32 %v953_v26, 0.0  ;;  %v4763_v26 = vld [vmem:[%s7980_s5 + $0x58] sm:$0xff] }
 0x25f   : > { %1822 = vperm.xlu2 %4927, %v1240_v14   ;;  %8015 = vst [vmem:[#allocation28_spill] sm:$0xff] %v6221_v55  ;;  %v1253_v14 = vld [vmem:[%s7981_s6 + $0x3f0] sm:$0xff]  ;;  %v6229_v38 = vpop.permute.xlu2 %1447 }
 0x260   : > { %8016 = vst [vmem:[#allocation29_spill] sm:$0xff] %v6229_v38  ;;  %v1249_v38 = vld [vmem:[%s7981_s6 + $0x3d0] sm:$0xff] }
 0x261   : > { %8017 = vst [vmem:[#allocation30_spill] sm:$0xff] %v6231_v19 }
 0x263   : > { %v962_v41 = vpop.f32.mrf.mxu0 }
 0x265   : > { %1872 = vperm.xlu0 %4926, %v1250_v36  }
 0x266   : > { %1832 = vperm.xlu1 %4928, %v1242_v21   ;;  %v1246_v21 = vld [vmem:[%s7981_s6 + $0x3b8] sm:$0xff]  ;;  %v6239_v55 = vpop.permute.xlu1 %1457  ;;  %v6246_v19 = vpop.permute.xlu0 %1467 }
 0x267   : > { %1837 = vperm.xlu2 %4927, %v1243_v43   ;;  %v1248_v43 = vld [vmem:[%s7981_s6 + $0x3c8] sm:$0xff]  ;;  %8018 = vst [vmem:[#allocation31_spill] sm:$0xff] %v6239_v55  ;;  %v6244_v17 = vpop.permute.xlu2 %1462 }
 0x268   : > { %8019 = vst [vmem:[#allocation32_spill] sm:$0xff] %v6244_v17 }
 0x269   : > { %8020 = vst [vmem:[#allocation33_spill] sm:$0xff] %v6246_v19  ;;  %v1254_v19 = vld [vmem:[%s7981_s6 + $0x3f8] sm:$0xff] }
 0x26b   : > { %v965_v39 = vpop.f32.mrf.mxu0 }
 0x26c   : > { %v966_v11 = vadd.f32 %v965_v39, %v5958_v52  ;;  %v958_v52 = vadd.f32 %v6183_v15, %v5939_v25  ;;  %v951_v25 = vadd.f32 %v6138_v8, %v5920_v5  ;;  %v946_v15 = vadd.f32 %v6104_v23, %v5898_v40 }
 0x26d   : > { %1887 = vperm.xlu0 %4926, %v1253_v14   ;;  %v943_v5 = vadd.f32 %v6087_v30, %v5896_v13  ;;  %v938_v40 = vadd.f32 %v6059_v9, %v5879_v7  ;;  %v936_v13 = vadd.f32 %v6042_v51, %v5877_v6  ;;  %v4752_v6 = vld [vmem:[%s7980_s5] sm:$0xff]  ;;  %v4762_v51 = vld [vmem:[%s7980_s5 + $0x50] sm:$0xff] }
 0x26e   : > { %1847 = vperm.xlu1 %4928, %v1245_v27   ;;  %v1251_v27 = vld [vmem:[%s7981_s6 + $0x3e0] sm:$0xff]  ;;  %v6254_v55 = vpop.permute.xlu1 %1472  ;;  %v6258_v17 = vpop.permute.xlu0 %1482 }
 0x26f   : > { %1852 = vperm.xlu2 %4927, %v1246_v21   ;;  %v1252_v21 = vld [vmem:[%s7981_s6 + $0x3e8] sm:$0xff]  ;;  %8021 = vst [vmem:[#allocation34_spill] sm:$0xff] %v6254_v55  ;;  %v6256_v44 = vpop.permute.xlu2 %1477 }
 0x270   : > { %8022 = vst [vmem:[#allocation35_spill] sm:$0xff] %v6256_v44 }
 0x271   : > { %8023 = vst [vmem:[#allocation36_spill] sm:$0xff] %v6258_v17  ;;  %v963_v17 = vadd.f32 %v962_v41, %v5955_v33  ;;  %v956_v33 = vadd.f32 %v6166_v48, %v5934_v24  ;;  %v948_v48 = vadd.f32 %v6121_v35, %v5909_v4  ;;  %v978_v4 = vmax.f32 %v943_v5, 0.0 }
 0x273   : > { %v967_v36 = vpop.f32.mrf.mxu0  ;;  %v980_v8 = vmax.f32 %v948_v48, 0.0 }
 0x274   : > { %v968_v12 = vadd.f32 %v967_v36, %v5960_v62  ;;  %v987_v62 = vmax.f32 %v966_v11, 0.0  ;;  %v984_v11 = vmax.f32 %v958_v52, 0.0 }
 0x276   : > { %1862 = vperm.xlu1 %4928, %v1248_v43   ;;  %v988_v44 = vmax.f32 %v968_v12, 0.0  ;;  %v6272_v3 = vpop.permute.xlu0 %1497  ;;  %v985_v12 = vmax.f32 %v961_v10, 0.0 }
 0x277   : > { %1867 = vperm.xlu2 %4927, %v1249_v38   ;;  %8025 = vst [vmem:[#allocation38_spill] sm:$0xff] %v6272_v3 }
 0x278   : > { %v1125_v39 = vpack.c.bf16 %v988_v44, %v987_v62 }
 0x27b   : > { %v970_v14 = vpop.f32.mrf.mxu0 }
 0x27c   : > { %v971_v43 = vadd.f32 %v970_v14, %v5971_v22  ;;  %v6270_v14 = vpop.permute.xlu2 %1492 }
 0x27d   : > { %8024 = vst [vmem:[#allocation37_spill] sm:$0xff] %v6270_v14 }
 0x27e   : > { %1877 = vperm.xlu1 %4928, %v1251_v27   ;;  %v989_v55 = vmax.f32 %v971_v43, 0.0  ;;  %v6287_v10 = vpop.permute.xlu0 %1512 }
 0x27f   : > { %1882 = vperm.xlu2 %4927, %v1252_v21   ;;  %v6267_v21 = vpop.permute.xlu1 %1487  ;;  %8028 = vst [vmem:[#allocation41_spill] sm:$0xff] %v6287_v10  ;;  %v4769_v10 = vld [vmem:[%s7980_s5 + $0x88] sm:$0xff] }
 0x283   : > { %v972_v38 = vpop.f32.mrf.mxu0 }
 0x284   : > { %v973_v37 = vadd.f32 %v972_v38, %v5973_v42  ;;  %v986_v42 = vmax.f32 %v963_v17, 0.0  ;;  %v983_v17 = vmax.f32 %v956_v33, 0.0  ;;  %v6285_v24 = vpop.permute.xlu2 %1507  ;;  %v975_v38 = vmax.f32 %v936_v13, 0.0  ;;  %v4783_v13 = vld [vmem:[%s7980_s5 + $0xf8] sm:$0xff] }
 0x285   : > { %8027 = vst [vmem:[#allocation40_spill] sm:$0xff] %v6285_v24 }
 0x286   : > { %v990_v27 = vmax.f32 %v973_v37, 0.0  ;;  %1892 = vperm.xlu1 %4928, %v1254_v19   ;;  %v1124_v41 = vpack.c.bf16 %v986_v42, %v985_v12  ;;  %v1123_v2 = vpack.c.bf16 %v984_v11, %v983_v17  ;;  %v981_v37 = vmax.f32 %v951_v25, 0.0  ;;  %v6305_v43 = vpop.permute.xlu0 %1527  ;;  %v4753_v12 = vld [vmem:[%s7980_s5 + $0x8] sm:$0xff] }
 0x287   : > { %v6281_v50 = vpop.permute.xlu1 %1502  ;;  %v941_v19 = vadd.f32 %v6072_v20, %v5894_v47  ;;  %8031 = vst [vmem:[#allocation44_spill] sm:$0xff] %v6305_v43  ;;  %v976_v47 = vmax.f32 %v938_v40, 0.0  ;;  %v4781_v11 = vld [vmem:[%s7980_s5 + $0xe8] sm:$0xff] }
 0x288   : > { %v1126_v22 = vpack.c.bf16 %v990_v27, %v989_v55  ;;  %8026 = vst [vmem:[#allocation39_spill] sm:$0xff] %v6281_v50  ;;  %v1122_v44 = vpack.c.bf16 %v982_v18, %v981_v37  ;;  %v979_v55 = vmax.f32 %v946_v15, 0.0  ;;  %v4780_v27 = vld [vmem:[%s7980_s5 + $0xe0] sm:$0xff] }
 0x289   : > { %v977_v36 = vmax.f32 %v941_v19, 0.0  ;;  %v1119_v7 = vpack.c.bf16 %v976_v47, %v975_v38  ;;  %v4764_v15 = vld [vmem:[%s7980_s5 + $0x60] sm:$0xff] }
 0x28a   : > { %2279 = vmatpush.bf16.msrb.mxu0 %v1126_v22  ;;  %4816 = vmatpush.bf16.msra.mxu1 %v1126_v22  ;;  %v1121_v35 = vpack.c.bf16 %v980_v8, %v979_v55  ;;  %v4782_v8 = vld [vmem:[%s7980_s5 + $0xf0] sm:$0xff] }
 0x28b   : > { %4817 = vmatpush.bf16.msra.mxu2 %v1126_v22  ;;  %4818 = vmatpush.bf16.msra.mxu3 %v1126_v22  ;;  %v1120_v20 = vpack.c.bf16 %v978_v4, %v977_v36  ;;  %v4798_v22 = vld [vmem:[%s7980_s5 + $0x170] sm:$0xff]  ;;  %v4755_v4 = vld [vmem:[%s7980_s5 + $0x18] sm:$0xff]  ;;  %v4801_v36 = vld [vmem:[%s7980_s5 + $0x188] sm:$0xff] }
 0x28c   : > { %v6303_v30 = vpop.permute.xlu2 %1522 }
 0x28d   : > { %8030 = vst [vmem:[#allocation43_spill] sm:$0xff] %v6303_v30 }
 0x28e   : > { %2280 = vmatpush.bf16.msrb.mxu0 %v1125_v39  ;;  %4819 = vmatpush.bf16.msra.mxu1 %v1125_v39  ;;  %v6323_v52 = vpop.permute.xlu0 %1542 }
 0x28f   : > { %4820 = vmatpush.bf16.msra.mxu2 %v1125_v39  ;;  %4821 = vmatpush.bf16.msra.mxu3 %v1125_v39  ;;  %v6299_v23 = vpop.permute.xlu1 %1517 }
 0x290   : > { %8029 = vst [vmem:[#allocation42_spill] sm:$0xff] %v6299_v23  ;;  %v4759_v23 = vld [vmem:[%s7980_s5 + $0x38] sm:$0xff] }
 0x292   : > { %2281 = vmatpush.bf16.msrb.mxu0 %v1124_v41  ;;  %4822 = vmatpush.bf16.msra.mxu1 %v1124_v41 }
 0x293   : > { %4823 = vmatpush.bf16.msra.mxu2 %v1124_v41  ;;  %4824 = vmatpush.bf16.msra.mxu3 %v1124_v41  ;;  %v4799_v41 = vld [vmem:[%s7980_s5 + $0x178] sm:$0xff] }
 0x294   : > { %v6321_v62 = vpop.permute.xlu2 %1537 }
 0x296   : > { %2282 = vmatpush.bf16.msrb.mxu0 %v1123_v2  ;;  %4825 = vmatpush.bf16.msra.mxu1 %v1123_v2  ;;  %v6329_v33 = vpop.permute.xlu0 %1557 }
 0x297   : > { %4826 = vmatpush.bf16.msra.mxu2 %v1123_v2  ;;  %4827 = vmatpush.bf16.msra.mxu3 %v1123_v2  ;;  %v6313_v9 = vpop.permute.xlu1 %1532  ;;  %v4754_v2 = vld [vmem:[%s7980_s5 + $0x10] sm:$0xff] }
 0x298   : > { %8032 = vst [vmem:[#allocation45_spill] sm:$0xff] %v6313_v9  ;;  %v4768_v9 = vld [vmem:[%s7980_s5 + $0x80] sm:$0xff] }
 0x29a   : > { %2283 = vmatpush.bf16.msrb.mxu0 %v1122_v44  ;;  %4828 = vmatpush.bf16.msra.mxu1 %v1122_v44 }
 0x29b   : > { %4829 = vmatpush.bf16.msra.mxu2 %v1122_v44  ;;  %4830 = vmatpush.bf16.msra.mxu3 %v1122_v44  ;;  %v4800_v44 = vld [vmem:[%s7980_s5 + $0x180] sm:$0xff] }
 0x29c   : > { %v6327_v39 = vpop.permute.xlu2 %1552 }
 0x29e   : > { %2284 = vmatpush.bf16.msrb.mxu0 %v1121_v35  ;;  %4831 = vmatpush.bf16.msra.mxu1 %v1121_v35  ;;  %v6347_v48 = vpop.permute.xlu0 %1572 }
 0x29f   : > { %4832 = vmatpush.bf16.msra.mxu2 %v1121_v35  ;;  %4833 = vmatpush.bf16.msra.mxu3 %v1121_v35  ;;  %v6325_v42 = vpop.permute.xlu1 %1547  ;;  %v4765_v35 = vld [vmem:[%s7980_s5 + $0x68] sm:$0xff] }
 0x2a2   : > { %2285 = vmatpush.bf16.msrb.mxu0 %v1120_v20  ;;  %4834 = vmatpush.bf16.msra.mxu1 %v1120_v20 }
 0x2a3   : > { %4835 = vmatpush.bf16.msra.mxu2 %v1120_v20  ;;  %4836 = vmatpush.bf16.msra.mxu3 %v1120_v20 }
 0x2a4   : > { %v6345_v17 = vpop.permute.xlu2 %1567 }
 0x2a6   : > { %2286 = vmatpush.bf16.msrb.mxu0 %v1119_v7  ;;  %4837 = vmatpush.bf16.msra.mxu1 %v1119_v7  ;;  %v6359_v5 = vpop.permute.xlu0 %1587 }
 0x2a7   : > { %4838 = vmatpush.bf16.msra.mxu2 %v1119_v7  ;;  %4839 = vmatpush.bf16.msra.mxu3 %v1119_v7  ;;  %v6343_v25 = vpop.permute.xlu1 %1562 }
 0x2a9   : > { %2287 = vmatmul.bf16.vlgmr.msrb.gmra.mxu0 %v4752_v6  ;;  %2337 = vmatmul.bf16.vlgmr.msra.gmra.mxu1 %v4762_v51 }
 0x2aa   : > { %2427 = vmatmul.bf16.vlgmr.msra.gmra.mxu2 %v4780_v27  ;;  %2517 = vmatmul.bf16.vlgmr.msra.gmra.mxu3 %v4798_v22  ;;  %v4756_v27 = vld [vmem:[%s7980_s5 + $0x20] sm:$0xff]  ;;  %v4766_v22 = vld [vmem:[%s7980_s5 + $0x70] sm:$0xff] }
 0x2ac   : > { %v6357_v37 = vpop.permute.xlu2 %1582 }
 0x2ae   : > { %v6371_v40 = vpop.permute.xlu0 %1602 }
 0x2af   : > { %v6349_v18 = vpop.permute.xlu1 %1577 }
 0x2b4   : > { %v6369_v55 = vpop.permute.xlu2 %1597 }
 0x2b6   : > { %v6389_v38 = vpop.permute.xlu0 %1617 }
 0x2b7   : > { %v6367_v19 = vpop.permute.xlu1 %1592 }
 0x2b9   : > { %2292 = vmatmul.bf16.gmra.mxu0 %v4753_v12  ;;  %2342 = vmatmul.bf16.gmra.mxu1 %v4763_v26  ;;  %v4784_v12 = vld [vmem:[%s7980_s5 + $0x100] sm:$0xff]  ;;  %v4802_v26 = vld [vmem:[%s7980_s5 + $0x190] sm:$0xff] }
 0x2ba   : > { %2432 = vmatmul.bf16.gmra.mxu2 %v4781_v11  ;;  %2522 = vmatmul.bf16.gmra.mxu3 %v4799_v41 }
 0x2bc   : > { %v6387_v20 = vpop.permute.xlu2 %1612 }
 0x2be   : > { %v6395_v51 = vpop.permute.xlu0 %1632 }
 0x2bf   : > { %v6385_v47 = vpop.permute.xlu1 %1607 }
 0x2c4   : > { %v6393_v6 = vpop.permute.xlu2 %1627 }
 0x2c7   : > { %v6391_v7 = vpop.permute.xlu1 %1622 }
 0x2c9   : > { %2297 = vmatmul.bf16.gmra.mxu0 %v4754_v2  ;;  %2347 = vmatmul.bf16.gmra.mxu1 %v4764_v15  ;;  %v6413_v2 = vpop.permute.xlu0 %1647  ;;  %v4757_v15 = vld [vmem:[%s7980_s5 + $0x28] sm:$0xff] }
 0x2ca   : > { %2437 = vmatmul.bf16.gmra.mxu2 %v4782_v8  ;;  %2527 = vmatmul.bf16.gmra.mxu3 %v4800_v44  ;;  %v4767_v8 = vld [vmem:[%s7980_s5 + $0x78] sm:$0xff] }
 0x2cc   : > { %v6411_v41 = vpop.permute.xlu2 %1642 }
 0x2cf   : > { %v6409_v11 = vpop.permute.xlu1 %1637 }
 0x2d7   : > { %v6421_v44 = vpop.permute.xlu1 %1652 }
 0x2d9   : > { %2302 = vmatmul.bf16.gmra.mxu0 %v4755_v4  ;;  %2352 = vmatmul.bf16.gmra.mxu1 %v4765_v35  ;;  %v4785_v4 = vld [vmem:[%s7980_s5 + $0x108] sm:$0xff]  ;;  %v4803_v35 = vld [vmem:[%s7980_s5 + $0x198] sm:$0xff] }
 0x2da   : > { %2442 = vmatmul.bf16.gmra.mxu2 %v4783_v13  ;;  %2532 = vmatmul.bf16.gmra.mxu3 %v4801_v36  ;;  %v6429_v13 = vpop.permute.xlu2 %1657  ;;  %v6431_v36 = vpop.permute.xlu0 %1662 }
 0x2e9   : > { %2307 = vmatmul.bf16.gmra.mxu0 %v4756_v27  ;;  %2357 = vmatmul.bf16.gmra.mxu1 %v4766_v22  ;;  %v6433_v27 = vpop.permute.xlu1 %1667  ;;  %v6435_v22 = vpop.permute.xlu2 %1672 }
 0x2ea   : > { %2447 = vmatmul.bf16.gmra.mxu2 %v4784_v12  ;;  %2537 = vmatmul.bf16.gmra.mxu3 %v4802_v26  ;;  %8033 = vst [vmem:[#allocation46_spill] sm:$0xff] %v6435_v22  ;;  %v6437_v12 = vpop.permute.xlu0 %1677  ;;  %v4758_v26 = vld [vmem:[%s7980_s5 + $0x30] sm:$0xff] }
 0x2eb   : > { %8034 = vst [vmem:[#allocation47_spill] sm:$0xff] %v6437_v12 }
 0x2f2   : > { %v6455_v43 = vpop.permute.xlu0 %1692 }
 0x2f3   : > { %8037 = vst [vmem:[#allocation50_spill] sm:$0xff] %v6455_v43 }
 0x2f9   : > { %2312 = vmatmul.bf16.gmra.mxu0 %v4757_v15  ;;  %2362 = vmatmul.bf16.gmra.mxu1 %v4767_v8  ;;  %v4786_v15 = vld [vmem:[%s7980_s5 + $0x110] sm:$0xff]  ;;  %v4804_v8 = vld [vmem:[%s7980_s5 + $0x1a0] sm:$0xff] }
 0x2fa   : > { %2452 = vmatmul.bf16.gmra.mxu2 %v4785_v4  ;;  %2542 = vmatmul.bf16.gmra.mxu3 %v4803_v35  ;;  %v6451_v4 = vpop.permute.xlu1 %1682  ;;  %v6453_v35 = vpop.permute.xlu2 %1687 }
 0x2fb   : > { %8035 = vst [vmem:[#allocation48_spill] sm:$0xff] %v6451_v4  ;;  %v4788_v4 = vld [vmem:[%s7980_s5 + $0x120] sm:$0xff] }
 0x2fc   : > { %8036 = vst [vmem:[#allocation49_spill] sm:$0xff] %v6453_v35 }
 0x302   : > { %v6457_v30 = vpop.permute.xlu1 %1697 }
 0x303   : > { %8038 = vst [vmem:[#allocation51_spill] sm:$0xff] %v6457_v30 }
 0x309   : > { %2317 = vmatmul.bf16.gmra.mxu0 %v4758_v26  ;;  %2367 = vmatmul.bf16.gmra.mxu1 %v4768_v9  ;;  %v6465_v26 = vpop.permute.xlu2 %1702  ;;  %v6467_v9 = vpop.permute.xlu0 %1707 }
 0x30a   : > { %2457 = vmatmul.bf16.gmra.mxu2 %v4786_v15  ;;  %2547 = vmatmul.bf16.gmra.mxu3 %v4804_v8  ;;  %8039 = vst [vmem:[#allocation52_spill] sm:$0xff] %v6465_v26  ;;  %v4787_v15 = vld [vmem:[%s7980_s5 + $0x118] sm:$0xff]  ;;  %v4805_v8 = vld [vmem:[%s7980_s5 + $0x1a8] sm:$0xff]  ;;  %v6475_v30 = vpop.permute.xlu1 %1712 }
 0x30b   : > { %8040 = vst [vmem:[#allocation53_spill] sm:$0xff] %v6467_v9  ;;  %v4770_v9 = vld [vmem:[%s7980_s5 + $0x90] sm:$0xff] }
 0x30c   : > { %8041 = vst [vmem:[#allocation54_spill] sm:$0xff] %v6475_v30 }
 0x311   : > { %v1718_v43 = vpop.permute.xlu2 %1717  ;;  %v1723_v26 = vpop.permute.xlu0 %1722 }
 0x312   : > { %v1728_v30 = vpop.permute.xlu1 %1727 }
 0x319   : > { %2322 = vmatmul.bf16.gmra.mxu0 %v4759_v23  ;;  %2372 = vmatmul.bf16.gmra.mxu1 %v4769_v10  ;;  %v4806_v10 = vld [vmem:[%s7980_s5 + $0x1b0] sm:$0xff]  ;;  %v6492_v50 = vpop.permute.xlu2 %1732  ;;  %v6494_v12 = vpop.permute.xlu0 %1737 }
 0x31a   : > { %2462 = vmatmul.bf16.gmra.mxu2 %v4787_v15  ;;  %2552 = vmatmul.bf16.gmra.mxu3 %v4805_v8  ;;  %v4760_v8 = vld [vmem:[%s7980_s5 + $0x40] sm:$0xff] }
 0x326   : > { %v2288_v35 = vpop.f32.mrf.mxu0  ;;  %v2338_v24 = vpop.f32.mrf.mxu1 }
 0x327   : > { %v2289_v23 = vadd.f32 %v2288_v35, %v5975_v31  ;;  %v2339_v15 = vadd.f32 %v2338_v24, %v6114_v54 }
 0x329   : > { %3249 = vst [vmem:[%s5172_s26] sm:$0xff] %v2289_v23  ;;  %2377 = vmatmul.bf16.gmra.mxu1 %v4770_v9  ;;  %2776 = vmax.xlane.f32.xlu0 %v2339_v15 }
 0x32a   : > { %3269 = vst [vmem:[%s5172_s26 + $0xa0] sm:$0xff] %v2339_v15  ;;  %2467 = vmatmul.bf16.gmra.mxu2 %v4788_v4  ;;  %2557 = vmatmul.bf16.gmra.mxu3 %v4806_v10  ;;  %v6502_v4 = vpop.permute.xlu1 %1742  ;;  %v6506_v10 = vpop.permute.xlu2 %1747 }
 0x32b   : > { %2327 = vmatmul.bf16.gmra.mxu0 %v4760_v8  ;;  %2736 = vmax.xlane.f32.xlu2 %v2289_v23 }
 0x32d   : > { %v2428_v31 = vpop.f32.mrf.mxu2  ;;  %v2518_v54 = vpop.f32.mrf.mxu3 }
 0x32e   : > { %v2429_v24 = vadd.f32 %v2428_v31, %v6321_v62  ;;  %v2519_v35 = vadd.f32 %v2518_v54, %v1718_v43  ;;  %v2290_v9 = vpop.f32.mrf.mxu0  ;;  %v2340_v3 = vpop.f32.mrf.mxu1  ;;  %v4807_v31 = vld [vmem:[%s7980_s5 + $0x1b8] sm:$0xff] }
 0x32f   : > { %v2291_v22 = vadd.f32 %v2290_v9, %v5990_v49  ;;  %v2341_v14 = vadd.f32 %v2340_v3, %v6116_v56  ;;  %v6508_v62 = vpop.permute.xlu0 %1752  ;;  %v4771_v49 = vld [vmem:[%s7980_s5 + $0x98] sm:$0xff] }
 0x330   : > { %3305 = vst [vmem:[%s5172_s26 + $0x1c0] sm:$0xff] %v2429_v24 }
 0x331   : > { %3341 = vst [vmem:[%s5172_s26 + $0x2e0] sm:$0xff] %v2519_v35  ;;  %2778 = vmax.xlane.f32.xlu1 %v2341_v14  ;;  %2848 = vmax.xlane.f32.xlu0 %v2429_v24 }
 0x332   : > { %3250 = vst [vmem:[%s5172_s26 + $0x8] sm:$0xff] %v2291_v22 }
 0x333   : > { %3270 = vst [vmem:[%s5172_s26 + $0xa8] sm:$0xff] %v2341_v14  ;;  %v4789_v14 = vld [vmem:[%s7980_s5 + $0x128] sm:$0xff] }
 0x335   : > { %v2430_v43 = vpop.f32.mrf.mxu2  ;;  %v2520_v23 = vpop.f32.mrf.mxu3 }
 0x336   : > { %v2431_v56 = vadd.f32 %v2430_v43, %v6323_v52  ;;  %v2521_v3 = vadd.f32 %v2520_v23, %v1723_v26  ;;  %v2293_v15 = vpop.f32.mrf.mxu0  ;;  %v2343_v8 = vpop.f32.mrf.mxu1  ;;  %v4761_v52 = vld [vmem:[%s7980_s5 + $0x48] sm:$0xff] }
 0x337   : > { %v2294_v54 = vadd.f32 %v2293_v15, %v5998_v46  ;;  %v2344_v24 = vadd.f32 %v2343_v8, %v6129_v61  ;;  %v6529_v46 = vpop.permute.xlu1 %1757  ;;  %v6534_v8 = vpop.permute.xlu2 %1762 }
 0x338   : > { %3306 = vst [vmem:[%s5172_s26 + $0x1c8] sm:$0xff] %v2431_v56 }
 0x339   : > { %3342 = vst [vmem:[%s5172_s26 + $0x2e8] sm:$0xff] %v2521_v3  ;;  %2382 = vmatmul.bf16.gmra.mxu1 %v4771_v49  ;;  %2850 = vmax.xlane.f32.xlu1 %v2431_v56 }
 0x33a   : > { %3251 = vst [vmem:[%s5172_s26 + $0x10] sm:$0xff] %v2294_v54  ;;  %2472 = vmatmul.bf16.gmra.mxu2 %v4789_v14  ;;  %2562 = vmatmul.bf16.gmra.mxu3 %v4807_v31 }
 0x33b   : > { %3271 = vst [vmem:[%s5172_s26 + $0xb0] sm:$0xff] %v2344_v24  ;;  %2920 = vmax.xlane.f32.xlu0 %v2519_v35  ;;  %2332 = vmatmul.bf16.gmra.mxu0 %v4761_v52  ;;  %v6536_v35 = vpop.permute.xlu0 %1767 }
 0x33c   : > { %2780 = vmax.xlane.f32.xlu2 %v2344_v24  ;;  %v4790_v24 = vld [vmem:[%s7980_s5 + $0x130] sm:$0xff] }
 0x33d   : > { %v2433_v61 = vpop.f32.mrf.mxu2  ;;  %v2523_v26 = vpop.f32.mrf.mxu3 }
 0x33e   : > { %v2434_v9 = vadd.f32 %v2433_v61, %v6325_v42  ;;  %v2524_v43 = vadd.f32 %v2523_v26, %v1728_v30  ;;  %v2295_v23 = vpop.f32.mrf.mxu0  ;;  %v2345_v49 = vpop.f32.mrf.mxu1 }
 0x33f   : > { %v2296_v56 = vadd.f32 %v2295_v23, %v6000_v53  ;;  %v2346_v15 = vadd.f32 %v2345_v49, %v6131_v58  ;;  %v4772_v53 = vld [vmem:[%s7980_s5 + $0xa0] sm:$0xff]  ;;  %v6555_v26 = vpop.permute.xlu1 %1772 }
 0x340   : > { %3307 = vst [vmem:[%s5172_s26 + $0x1d0] sm:$0xff] %v2434_v9 }
 0x341   : > { %3343 = vst [vmem:[%s5172_s26 + $0x2f0] sm:$0xff] %v2524_v43  ;;  %2922 = vmax.xlane.f32.xlu1 %v2521_v3 }
 0x342   : > { %3252 = vst [vmem:[%s5172_s26 + $0x18] sm:$0xff] %v2296_v56 }
 0x343   : > { %3272 = vst [vmem:[%s5172_s26 + $0xb8] sm:$0xff] %v2346_v15  ;;  %2738 = vmax.xlane.f32.xlu0 %v2291_v22  ;;  %v4808_v22 = vld [vmem:[%s7980_s5 + $0x1c0] sm:$0xff] }
 0x344   : > { %2852 = vmax.xlane.f32.xlu2 %v2434_v9 }
 0x345   : > { %v2435_v30 = vpop.f32.mrf.mxu2  ;;  %v2525_v42 = vpop.f32.mrf.mxu3 }
 0x346   : > { %v2436_v58 = vadd.f32 %v2435_v30, %v6327_v39  ;;  %v2526_v14 = vadd.f32 %v2525_v42, %v6492_v50  ;;  %v2298_v31 = vpop.f32.mrf.mxu0  ;;  %v2348_v3 = vpop.f32.mrf.mxu1 }
 0x347   : > { %v2299_v52 = vadd.f32 %v2298_v31, %v6014_v57  ;;  %v2349_v61 = vadd.f32 %v2348_v3, %v6133_v34  ;;  %v6559_v50 = vpop.permute.xlu2 %1777  ;;  %v6561_v39 = vpop.permute.xlu0 %1782 }
 0x348   : > { %3308 = vst [vmem:[%s5172_s26 + $0x1d8] sm:$0xff] %v2436_v58 }
 0x349   : > { %3344 = vst [vmem:[%s5172_s26 + $0x2f8] sm:$0xff] %v2526_v14  ;;  %2387 = vmatmul.bf16.gmra.mxu1 %v4772_v53  ;;  %2740 = vmax.xlane.f32.xlu1 %v2294_v54  ;;  %v6571_v53 = vpop.permute.xlu1 %1787 }
 0x34a   : > { %3253 = vst [vmem:[%s5172_s26 + $0x20] sm:$0xff] %v2299_v52  ;;  %2477 = vmatmul.bf16.gmra.mxu2 %v4790_v24  ;;  %2567 = vmatmul.bf16.gmra.mxu3 %v4808_v22  ;;  %v4791_v24 = vld [vmem:[%s7980_s5 + $0x138] sm:$0xff] }
 0x34b   : > { %3273 = vst [vmem:[%s5172_s26 + $0xc0] sm:$0xff] %v2349_v61  ;;  %2782 = vmax.xlane.f32.xlu0 %v2346_v15 }
 0x34c   : > { %2924 = vmax.xlane.f32.xlu2 %v2524_v43 }
 0x34d   : > { %v2438_v57 = vpop.f32.mrf.mxu2  ;;  %v2528_v34 = vpop.f32.mrf.mxu3 }
 0x34e   : > { %v2439_v9 = vadd.f32 %v2438_v57, %v6329_v33  ;;  %v2529_v54 = vadd.f32 %v2528_v34, %v6494_v12  ;;  %v2300_v23 = vpop.f32.mrf.mxu0  ;;  %v2350_v49 = vpop.f32.mrf.mxu1 }
 0x34f   : > { %v2301_v30 = vadd.f32 %v2300_v23, %v6019_v59  ;;  %v2351_v42 = vadd.f32 %v2350_v49, %v6146_v16  ;;  %v6575_v43 = vpop.permute.xlu2 %1792  ;;  %v6577_v33 = vpop.permute.xlu0 %1797  ;;  %v4773_v16 = vld [vmem:[%s7980_s5 + $0xa8] sm:$0xff] }
 0x350   : > { %3309 = vst [vmem:[%s5172_s26 + $0x1e0] sm:$0xff] %v2439_v9 }
 0x351   : > { %3345 = vst [vmem:[%s5172_s26 + $0x300] sm:$0xff] %v2529_v54  ;;  %2784 = vmax.xlane.f32.xlu1 %v2349_v61 }
 0x352   : > { %3254 = vst [vmem:[%s5172_s26 + $0x28] sm:$0xff] %v2301_v30 }
 0x353   : > { %3274 = vst [vmem:[%s5172_s26 + $0xc8] sm:$0xff] %v2351_v42  ;;  %2854 = vmax.xlane.f32.xlu0 %v2436_v58 }
 0x354   : > { %2742 = vmax.xlane.f32.xlu2 %v2296_v56  ;;  %v4809_v56 = vld [vmem:[%s7980_s5 + $0x1c8] sm:$0xff] }
 0x355   : > { %v2440_v12 = vpop.f32.mrf.mxu2  ;;  %v2530_v59 = vpop.f32.mrf.mxu3 }
 0x356   : > { %v2441_v15 = vadd.f32 %v2440_v12, %v6343_v25  ;;  %v6584_v31 = vadd.f32 %v2530_v59, %v6502_v4  ;;  %v2303_v58 = vpop.f32.mrf.mxu0  ;;  %v2353_v3 = vpop.f32.mrf.mxu1 }
 0x357   : > { %v2304_v22 = vadd.f32 %v2303_v58, %v6021_v60  ;;  %v2354_v61 = vadd.f32 %v2353_v3, %v6156_v28  ;;  %v6599_v25 = vpop.permute.xlu1 %1802  ;;  %v6611_v12 = vpop.permute.xlu0 %1812 }
 0x358   : > { %3310 = vst [vmem:[%s5172_s26 + $0x1e8] sm:$0xff] %v2441_v15 }
 0x359   : > { %3346 = vst [vmem:[%s5172_s26 + $0x308] sm:$0xff] %v6584_v31  ;;  %2392 = vmatmul.bf16.gmra.mxu1 %v4773_v16  ;;  %2856 = vmax.xlane.f32.xlu1 %v2439_v9 }
 0x35a   : > { %3255 = vst [vmem:[%s5172_s26 + $0x30] sm:$0xff] %v2304_v22  ;;  %2482 = vmatmul.bf16.gmra.mxu2 %v4791_v24  ;;  %2572 = vmatmul.bf16.gmra.mxu3 %v4809_v56 }
 0x35b   : > { %3275 = vst [vmem:[%s5172_s26 + $0xd0] sm:$0xff] %v2354_v61  ;;  %2926 = vmax.xlane.f32.xlu0 %v2526_v14  ;;  %v6609_v14 = vpop.permute.xlu2 %1807 }
 0x35c   : > { %2744 = vmax.xlane.f32.xlu2 %v2299_v52 }
 0x35d   : > { %v2443_v60 = vpop.f32.mrf.mxu2  ;;  %v2533_v4 = vpop.f32.mrf.mxu3 }
 0x35e   : > { %v2444_v28 = vadd.f32 %v2443_v60, %v6345_v17  ;;  %v6603_v57 = vadd.f32 %v2533_v4, %v6506_v10  ;;  %v2305_v34 = vpop.f32.mrf.mxu0  ;;  %v2355_v9 = vpop.f32.mrf.mxu1 }
 0x35f   : > { %v6606_v23 = vadd.f32 %v2305_v34, %v6033_v63  ;;  %v2356_v49 = vadd.f32 %v2355_v9, %v6158_v32  ;;  %v4774_v32 = vld [vmem:[%s7980_s5 + $0xb0] sm:$0xff]  ;;  %v6645_v3 = vpop.permute.xlu0 %1827 }
 0x360   : > { %3311 = vst [vmem:[%s5172_s26 + $0x1f0] sm:$0xff] %v2444_v28 }
 0x361   : > { %3347 = vst [vmem:[%s5172_s26 + $0x310] sm:$0xff] %v6603_v57  ;;  %2928 = vmax.xlane.f32.xlu1 %v2529_v54 }
 0x362   : > { %3256 = vst [vmem:[%s5172_s26 + $0x38] sm:$0xff] %v6606_v23 }
 0x363   : > { %3276 = vst [vmem:[%s5172_s26 + $0xd8] sm:$0xff] %v2356_v49  ;;  %2746 = vmax.xlane.f32.xlu0 %v2301_v30  ;;  %v4792_v30 = vld [vmem:[%s7980_s5 + $0x140] sm:$0xff] }
 0x364   : > { %2786 = vmax.xlane.f32.xlu2 %v2351_v42  ;;  %v4810_v42 = vld [vmem:[%s7980_s5 + $0x1d0] sm:$0xff] }
 0x365   : > { %v2445_v17 = vpop.f32.mrf.mxu2  ;;  %v2535_v63 = vpop.f32.mrf.mxu3 }
 0x366   : > { %v2446_v10 = vadd.f32 %v2445_v17, %v6347_v48  ;;  %v6624_v52 = vadd.f32 %v2535_v63, %v6508_v62  ;;  %v2308_v54 = vpop.f32.mrf.mxu0  ;;  %v2358_v59 = vpop.f32.mrf.mxu1  ;;  %v4811_v63 = vld [vmem:[%s7980_s5 + $0x1d8] sm:$0xff] }
 0x367   : > { %v6633_v16 = vadd.f32 %v2308_v54, %v6035_v0  ;;  %v6636_v58 = vadd.f32 %v2358_v59, %v6171_v29  ;;  %v6638_v48 = vpop.permute.xlu1 %1817  ;;  %v6643_v62 = vpop.permute.xlu2 %1822  ;;  %v8043_v59 = vld [vmem:[#allocation21_spill] sm:$0xff] }
 0x368   : > { %3312 = vst [vmem:[%s5172_s26 + $0x1f8] sm:$0xff] %v2446_v10 }
 0x369   : > { %3348 = vst [vmem:[%s5172_s26 + $0x318] sm:$0xff] %v6624_v52  ;;  %2397 = vmatmul.bf16.gmra.mxu1 %v4774_v32  ;;  %2748 = vmax.xlane.f32.xlu1 %v2304_v22  ;;  %v8042_v32 = vld [vmem:[#allocation11_spill] sm:$0xff] }
 0x36a   : > { %3257 = vst [vmem:[%s5172_s26 + $0x40] sm:$0xff] %v6633_v16  ;;  %2487 = vmatmul.bf16.gmra.mxu2 %v4792_v30  ;;  %2577 = vmatmul.bf16.gmra.mxu3 %v4810_v42 }
 0x36b   : > { %3277 = vst [vmem:[%s5172_s26 + $0xe0] sm:$0xff] %v6636_v58  ;;  %2788 = vmax.xlane.f32.xlu0 %v2354_v61  ;;  %v4775_v61 = vld [vmem:[%s7980_s5 + $0xb8] sm:$0xff] }
 0x36c   : > { %2858 = vmax.xlane.f32.xlu2 %v2441_v15 }
 0x36d   : > { %v2448_v0 = vpop.f32.mrf.mxu2  ;;  %v2538_v29 = vpop.f32.mrf.mxu3 }
 0x36e   : > { %v6652_v24 = vadd.f32 %v2448_v0, %v6349_v18  ;;  %v6655_v56 = vadd.f32 %v2538_v29, %v6529_v46  ;;  %v2310_v22 = vpop.f32.mrf.mxu0  ;;  %v2360_v60 = vpop.f32.mrf.mxu1 }
 0x36f   : > { %v6658_v4 = vadd.f32 %v2310_v22, %v6037_v1  ;;  %v6661_v34 = vadd.f32 %v2360_v60, %v6176_v45  ;;  %v6667_v15 = vpop.permute.xlu1 %1832  ;;  %v6673_v18 = vpop.permute.xlu2 %1837  ;;  %v8044_v60 = vld [vmem:[#allocation12_spill] sm:$0xff] }
 0x370   : > { %3313 = vst [vmem:[%s5172_s26 + $0x200] sm:$0xff] %v6652_v24  ;;  %v6675_v1 = vpop.permute.xlu0 %1842 }
 0x371   : > { %3349 = vst [vmem:[%s5172_s26 + $0x320] sm:$0xff] %v6655_v56  ;;  %2790 = vmax.xlane.f32.xlu1 %v2356_v49 }
 0x372   : > { %3258 = vst [vmem:[%s5172_s26 + $0x48] sm:$0xff] %v6658_v4 }
 0x373   : > { %3278 = vst [vmem:[%s5172_s26 + $0xe8] sm:$0xff] %v6661_v34  ;;  %2860 = vmax.xlane.f32.xlu0 %v2444_v28 }
 0x374   : > { %2930 = vmax.xlane.f32.xlu2 %v6584_v31  ;;  %v4793_v31 = vld [vmem:[%s7980_s5 + $0x148] sm:$0xff] }
 0x375   : > { %v2450_v45 = vpop.f32.mrf.mxu2  ;;  %v2540_v46 = vpop.f32.mrf.mxu3 }
 0x376   : > { %v6682_v9 = vadd.f32 %v2450_v45, %v6357_v37  ;;  %v6685_v28 = vadd.f32 %v2540_v46, %v6534_v8  ;;  %v2313_v49 = vpop.f32.mrf.mxu0  ;;  %v2363_v17 = vpop.f32.mrf.mxu1 }
 0x377   : > { %v6694_v54 = vadd.f32 %v2313_v49, %v8042_v32  ;;  %v2364_v30 = vadd.f32 %v2363_v17, %v8043_v59  ;;  %v6705_v37 = vpop.permute.xlu1 %1847  ;;  %v8046_v32 = vld [vmem:[#allocation13_spill] sm:$0xff] }
 0x378   : > { %3314 = vst [vmem:[%s5172_s26 + $0x208] sm:$0xff] %v6682_v9  ;;  %v6722_v49 = vpop.permute.xlu0 %1857 }
 0x379   : > { %3350 = vst [vmem:[%s5172_s26 + $0x328] sm:$0xff] %v6685_v28  ;;  %2402 = vmatmul.bf16.gmra.mxu1 %v4775_v61  ;;  %2862 = vmax.xlane.f32.xlu1 %v2446_v10  ;;  %v6720_v61 = vpop.permute.xlu2 %1852 }
 0x37a   : > { %3259 = vst [vmem:[%s5172_s26 + $0x50] sm:$0xff] %v6694_v54  ;;  %2492 = vmatmul.bf16.gmra.mxu2 %v4793_v31  ;;  %2582 = vmatmul.bf16.gmra.mxu3 %v4811_v63 }
 0x37b   : > { %3279 = vst [vmem:[%s5172_s26 + $0xf0] sm:$0xff] %v2364_v30  ;;  %2932 = vmax.xlane.f32.xlu0 %v6603_v57  ;;  %v8045_v57 = vld [vmem:[#allocation22_spill] sm:$0xff] }
 0x37c   : > { %2750 = vmax.xlane.f32.xlu2 %v6606_v23  ;;  %v4776_v23 = vld [vmem:[%s7980_s5 + $0xc0] sm:$0xff] }
 0x37d   : > { %v2453_v8 = vpop.f32.mrf.mxu2  ;;  %v2543_v42 = vpop.f32.mrf.mxu3 }
 0x37e   : > { %v6709_v0 = vadd.f32 %v2453_v8, %v6359_v5  ;;  %v6712_v10 = vadd.f32 %v2543_v42, %v6536_v35  ;;  %v2315_v29 = vpop.f32.mrf.mxu0  ;;  %v2365_v22 = vpop.f32.mrf.mxu1  ;;  %v8047_v8 = vld [vmem:[#allocation23_spill] sm:$0xff] }
 0x37f   : > { %v6715_v45 = vadd.f32 %v2315_v29, %v8044_v60  ;;  %v6718_v46 = vadd.f32 %v2365_v22, %v8045_v57  ;;  %v6756_v42 = vpop.permute.xlu1 %1862 }
 0x380   : > { %3315 = vst [vmem:[%s5172_s26 + $0x210] sm:$0xff] %v6709_v0  ;;  %v6765_v29 = vpop.permute.xlu0 %1872 }
 0x381   : > { %3351 = vst [vmem:[%s5172_s26 + $0x330] sm:$0xff] %v6712_v10  ;;  %2934 = vmax.xlane.f32.xlu1 %v6624_v52 }
 0x382   : > { %3260 = vst [vmem:[%s5172_s26 + $0x58] sm:$0xff] %v6715_v45 }
 0x383   : > { %3280 = vst [vmem:[%s5172_s26 + $0xf8] sm:$0xff] %v6718_v46  ;;  %2752 = vmax.xlane.f32.xlu0 %v6633_v16  ;;  %v4794_v16 = vld [vmem:[%s7980_s5 + $0x150] sm:$0xff] }
 0x384   : > { %2792 = vmax.xlane.f32.xlu2 %v6636_v58  ;;  %v4812_v58 = vld [vmem:[%s7980_s5 + $0x1e0] sm:$0xff] }
 0x385   : > { %v2455_v5 = vpop.f32.mrf.mxu2  ;;  %v2545_v35 = vpop.f32.mrf.mxu3 }
 0x386   : > { %v6739_v17 = vadd.f32 %v2455_v5, %v6367_v19  ;;  %v6742_v52 = vadd.f32 %v2545_v35, %v6555_v26  ;;  %v2318_v31 = vpop.f32.mrf.mxu0  ;;  %v2368_v63 = vpop.f32.mrf.mxu1 }
 0x387   : > { %v6751_v59 = vadd.f32 %v2318_v31, %v8046_v32  ;;  %v6754_v19 = vadd.f32 %v2368_v63, %v8047_v8  ;;  %v6763_v26 = vpop.permute.xlu2 %1867  ;;  %v8049_v63 = vld [vmem:[#allocation24_spill] sm:$0xff] }
 0x388   : > { %3316 = vst [vmem:[%s5172_s26 + $0x218] sm:$0xff] %v6739_v17 }
 0x389   : > { %3352 = vst [vmem:[%s5172_s26 + $0x338] sm:$0xff] %v6742_v52  ;;  %2407 = vmatmul.bf16.gmra.mxu1 %v4776_v23  ;;  %2754 = vmax.xlane.f32.xlu1 %v6658_v4  ;;  %v8048_v23 = vld [vmem:[#allocation14_spill] sm:$0xff] }
 0x38a   : > { %3261 = vst [vmem:[%s5172_s26 + $0x60] sm:$0xff] %v6751_v59  ;;  %2497 = vmatmul.bf16.gmra.mxu2 %v4794_v16  ;;  %2587 = vmatmul.bf16.gmra.mxu3 %v4812_v58 }
 0x38b   : > { %3281 = vst [vmem:[%s5172_s26 + $0x100] sm:$0xff] %v6754_v19  ;;  %2794 = vmax.xlane.f32.xlu0 %v6661_v34 }
 0x38c   : > { %2864 = vmax.xlane.f32.xlu2 %v6652_v24  ;;  %v6789_v24 = vpop.permute.xlu1 %1877 }
 0x38d   : > { %v2458_v22 = vpop.f32.mrf.mxu2  ;;  %v2548_v4 = vpop.f32.mrf.mxu3 }
 0x38e   : > { %v6774_v60 = vadd.f32 %v2458_v22, %v6369_v55  ;;  %v6777_v57 = vadd.f32 %v2548_v4, %v6559_v50  ;;  %v2320_v5 = vpop.f32.mrf.mxu0  ;;  %v2370_v35 = vpop.f32.mrf.mxu1  ;;  %v4813_v4 = vld [vmem:[%s7980_s5 + $0x1e8] sm:$0xff] }
 0x38f   : > { %v6780_v31 = vadd.f32 %v2320_v5, %v8048_v23  ;;  %v6783_v16 = vadd.f32 %v2370_v35, %v8049_v63  ;;  %v6796_v55 = vpop.permute.xlu2 %1882  ;;  %v6798_v50 = vpop.permute.xlu0 %1887  ;;  %v8050_v5 = vld [vmem:[#allocation15_spill] sm:$0xff]  ;;  %v8051_v23 = vld [vmem:[#allocation25_spill] sm:$0xff] }
 0x390   : > { %3317 = vst [vmem:[%s5172_s26 + $0x220] sm:$0xff] %v6774_v60 }
 0x391   : > { %3353 = vst [vmem:[%s5172_s26 + $0x340] sm:$0xff] %v6777_v57  ;;  %2796 = vmax.xlane.f32.xlu1 %v2364_v30  ;;  %v4777_v30 = vld [vmem:[%s7980_s5 + $0xc8] sm:$0xff] }
 0x392   : > { %3262 = vst [vmem:[%s5172_s26 + $0x68] sm:$0xff] %v6780_v31 }
 0x393   : > { %3282 = vst [vmem:[%s5172_s26 + $0x108] sm:$0xff] %v6783_v16  ;;  %2866 = vmax.xlane.f32.xlu0 %v6682_v9 }
 0x394   : > { %2936 = vmax.xlane.f32.xlu2 %v6655_v56  ;;  %v4795_v56 = vld [vmem:[%s7980_s5 + $0x158] sm:$0xff]  ;;  %v6833_v63 = vpop.permute.xlu1 %1892 }
 0x395   : > { %v2460_v34 = vpop.f32.mrf.mxu2  ;;  %v2550_v58 = vpop.f32.mrf.mxu3  ;;  %8052 = vst [vmem:[#allocation11_spill] sm:$0xff] %v6833_v63 }
 0x396   : > { %v6805_v32 = vadd.f32 %v2460_v34, %v6371_v40  ;;  %v6808_v9 = vadd.f32 %v2550_v58, %v6561_v39  ;;  %v2323_v8 = vpop.f32.mrf.mxu0  ;;  %v2373_v22 = vpop.f32.mrf.mxu1  ;;  %v2628_v39 = vld [vmem:[%s5170_s29 + $0xa0] sm:$0xff] }
 0x397   : > { %v6817_v35 = vadd.f32 %v2323_v8, %v8050_v5  ;;  %v6820_v40 = vadd.f32 %v2373_v22, %v8051_v23  ;;  %v2608_v58 = vld [vmem:[%s5170_s29] sm:$0xff]  ;;  %v8053_v5 = vld [vmem:[#allocation16_spill] sm:$0xff] }
 0x398   : > { %3318 = vst [vmem:[%s5172_s26 + $0x228] sm:$0xff] %v6805_v32 }
 0x399   : > { %3354 = vst [vmem:[%s5172_s26 + $0x348] sm:$0xff] %v6808_v9  ;;  %2412 = vmatmul.bf16.gmra.mxu1 %v4777_v30  ;;  %2868 = vmax.xlane.f32.xlu1 %v6709_v0 }
 0x39a   : > { %3263 = vst [vmem:[%s5172_s26 + $0x70] sm:$0xff] %v6817_v35  ;;  %2502 = vmatmul.bf16.gmra.mxu2 %v4795_v56  ;;  %2592 = vmatmul.bf16.gmra.mxu3 %v4813_v4 }
 0x39b   : > { %3283 = vst [vmem:[%s5172_s26 + $0x110] sm:$0xff] %v6820_v40  ;;  %2938 = vmax.xlane.f32.xlu0 %v6685_v28 }
 0x39c   : > { %2756 = vmax.xlane.f32.xlu2 %v6694_v54  ;;  %v2777_v34 = vpop.xlane.xlu0 %2776 }
 0x39d   : > { %v2463_v0 = vpop.f32.mrf.mxu2  ;;  %v2553_v30 = vpop.f32.mrf.mxu3  ;;  %v3012_v8 = vmax.f32 %v2628_v39, %v2777_v34  ;;  %v8054_v39 = vld [vmem:[#allocation26_spill] sm:$0xff] }
 0x39e   : > { %v6838_v22 = vadd.f32 %v2463_v0, %v6385_v47  ;;  %v6841_v28 = vadd.f32 %v2553_v30, %v6571_v53  ;;  %v2737_v56 = vpop.xlane.xlu2 %2736  ;;  %v2325_v54 = vpop.f32.mrf.mxu0  ;;  %v2629_v47 = vld [vmem:[%s5170_s29 + $0xa8] sm:$0xff]  ;;  %v2664_v53 = vld [vmem:[%s5170_s29 + $0x1c0] sm:$0xff] }
 0x39f   : > { %3141 = vst.msk [vmem:[%s5170_s29 + $0xa0] sm:$0xff] %vm3120_vm2, %v3012_v8  ;;  %v2992_v4 = vmax.f32 %v2608_v58, %v2737_v56  ;;  %v6846_v23 = vadd.f32 %v2325_v54, %v8053_v5  ;;  %v2375_v63 = vpop.f32.mrf.mxu1  ;;  %v4778_v8 = vld [vmem:[%s7980_s5 + $0xd0] sm:$0xff] }
 0x3a0   : > { %3319 = vst [vmem:[%s5172_s26 + $0x230] sm:$0xff] %v6838_v22  ;;  %v6851_v34 = vadd.f32 %v2375_v63, %v8054_v39 }
 0x3a1   : > { %3355 = vst [vmem:[%s5172_s26 + $0x350] sm:$0xff] %v6841_v28  ;;  %2940 = vmax.xlane.f32.xlu1 %v6712_v10 }
 0x3a2   : > { %3121 = vst.msk [vmem:[%s5170_s29] sm:$0xff] %vm3120_vm2, %v2992_v4  ;;  %v4814_v4 = vld [vmem:[%s7980_s5 + $0x1f0] sm:$0xff] }
 0x3a3   : > { %3264 = vst [vmem:[%s5172_s26 + $0x78] sm:$0xff] %v6846_v23  ;;  %2758 = vmax.xlane.f32.xlu0 %v6715_v45 }
 0x3a4   : > { %3284 = vst [vmem:[%s5172_s26 + $0x118] sm:$0xff] %v6851_v34  ;;  %2798 = vmax.xlane.f32.xlu2 %v6718_v46  ;;  %v2779_v63 = vpop.xlane.xlu1 %2778  ;;  %v2849_v58 = vpop.xlane.xlu0 %2848  ;;  %v4796_v46 = vld [vmem:[%s7980_s5 + $0x160] sm:$0xff] }
 0x3a5   : > { %v2465_v0 = vpop.f32.mrf.mxu2  ;;  %v2555_v30 = vpop.f32.mrf.mxu3  ;;  %v3013_v10 = vmax.f32 %v2629_v47, %v2779_v63  ;;  %v3048_v54 = vmax.f32 %v2664_v53, %v2849_v58  ;;  %v8056_v47 = vld [vmem:[#allocation17_spill] sm:$0xff]  ;;  %v2665_v63 = vld [vmem:[%s5170_s29 + $0x1c8] sm:$0xff] }
 0x3a6   : > { %v6870_v56 = vadd.f32 %v2465_v0, %v6387_v20  ;;  %v6873_v45 = vadd.f32 %v2555_v30, %v6575_v43  ;;  %v8055_v43 = vld [vmem:[#allocation27_spill] sm:$0xff] }
 0x3a7   : > { %3142 = vst.msk [vmem:[%s5170_s29 + $0xa8] sm:$0xff] %vm3120_vm2, %v3013_v10  ;;  %v2378_v5 = vpop.f32.mrf.mxu1  ;;  %v2700_v0 = vld [vmem:[%s5170_s29 + $0x2e0] sm:$0xff] }
 0x3a8   : > { %3320 = vst [vmem:[%s5172_s26 + $0x238] sm:$0xff] %v6870_v56  ;;  %v2328_v20 = vpop.f32.mrf.mxu0  ;;  %v6886_v39 = vadd.f32 %v2378_v5, %v8055_v43 }
 0x3a9   : > { %3356 = vst [vmem:[%s5172_s26 + $0x358] sm:$0xff] %v6873_v45  ;;  %v6891_v53 = vadd.f32 %v2328_v20, %v8056_v47  ;;  %2417 = vmatmul.bf16.gmra.mxu1 %v4778_v8  ;;  %2760 = vmax.xlane.f32.xlu1 %v6751_v59  ;;  %v2630_v8 = vld [vmem:[%s5170_s29 + $0xb0] sm:$0xff] }
 0x3aa   : > { %3177 = vst.msk [vmem:[%s5170_s29 + $0x1c0] sm:$0xff] %vm3120_vm2, %v3048_v54  ;;  %2507 = vmatmul.bf16.gmra.mxu2 %v4796_v46  ;;  %2597 = vmatmul.bf16.gmra.mxu3 %v4814_v4 }
 0x3ab   : > { %3265 = vst [vmem:[%s5172_s26 + $0x80] sm:$0xff] %v6891_v53  ;;  %2800 = vmax.xlane.f32.xlu0 %v6754_v19 }
 0x3ac   : > { %3285 = vst [vmem:[%s5172_s26 + $0x120] sm:$0xff] %v6886_v39  ;;  %2870 = vmax.xlane.f32.xlu2 %v6739_v17  ;;  %v2851_v58 = vpop.xlane.xlu1 %2850 }
 0x3ad   : > { %v2468_v30 = vpop.f32.mrf.mxu2  ;;  %v2558_v59 = vpop.f32.mrf.mxu3  ;;  %v3049_v10 = vmax.f32 %v2665_v63, %v2851_v58  ;;  %v2701_v58 = vld [vmem:[%s5170_s29 + $0x2e8] sm:$0xff] }
 0x3ae   : > { %v6906_v54 = vadd.f32 %v2468_v30, %v6389_v38  ;;  %v6909_v19 = vadd.f32 %v2558_v59, %v6577_v33  ;;  %v2921_v46 = vpop.xlane.xlu0 %2920  ;;  %v8057_v38 = vld [vmem:[#allocation18_spill] sm:$0xff]  ;;  %v8058_v33 = vld [vmem:[#allocation28_spill] sm:$0xff] }
 0x3af   : > { %3178 = vst.msk [vmem:[%s5170_s29 + $0x1c8] sm:$0xff] %vm3120_vm2, %v3049_v10  ;;  %v3084_v17 = vmax.f32 %v2700_v0, %v2921_v46  ;;  %v2781_v4 = vpop.xlane.xlu2 %2780  ;;  %v2380_v5 = vpop.f32.mrf.mxu1  ;;  %v2609_v30 = vld [vmem:[%s5170_s29 + $0x8] sm:$0xff]  ;;  %v4779_v46 = vld [vmem:[%s7980_s5 + $0xd8] sm:$0xff] }
 0x3b0   : > { %3321 = vst [vmem:[%s5172_s26 + $0x240] sm:$0xff] %v6906_v54  ;;  %v3014_v20 = vmax.f32 %v2630_v8, %v2781_v4  ;;  %v2330_v43 = vpop.f32.mrf.mxu0  ;;  %v6921_v63 = vadd.f32 %v2380_v5, %v8058_v33  ;;  %v2666_v8 = vld [vmem:[%s5170_s29 + $0x1d0] sm:$0xff]  ;;  %v4797_v4 = vld [vmem:[%s7980_s5 + $0x168] sm:$0xff]  ;;  %v4815_v5 = vld [vmem:[%s7980_s5 + $0x1f8] sm:$0xff] }
 0x3b1   : > { %3357 = vst [vmem:[%s5172_s26 + $0x360] sm:$0xff] %v6909_v19  ;;  %v6918_v47 = vadd.f32 %v2330_v43, %v8057_v38  ;;  %2802 = vmax.xlane.f32.xlu1 %v6783_v16  ;;  %v8059_v33 = vld [vmem:[#allocation19_spill] sm:$0xff] }
 0x3b2   : > { %3213 = vst.msk [vmem:[%s5170_s29 + $0x2e0] sm:$0xff] %vm3120_vm2, %v3084_v17 }
 0x3b3   : > { %3143 = vst.msk [vmem:[%s5170_s29 + $0xb0] sm:$0xff] %vm3120_vm2, %v3014_v20  ;;  %2872 = vmax.xlane.f32.xlu0 %v6774_v60 }
 0x3b4   : > { %3266 = vst [vmem:[%s5172_s26 + $0x88] sm:$0xff] %v6918_v47  ;;  %2942 = vmax.xlane.f32.xlu2 %v6742_v52  ;;  %v2923_v0 = vpop.xlane.xlu1 %2922 }
 0x3b5   : > { %3286 = vst [vmem:[%s5172_s26 + $0x128] sm:$0xff] %v6921_v63  ;;  %v2470_v59 = vpop.f32.mrf.mxu2  ;;  %v2560_v10 = vpop.f32.mrf.mxu3  ;;  %v3085_v16 = vmax.f32 %v2701_v58, %v2923_v0  ;;  %v8060_v0 = vld [vmem:[#allocation29_spill] sm:$0xff] }
 0x3b6   : > { %v6941_v60 = vadd.f32 %v2470_v59, %v6391_v7  ;;  %v6944_v17 = vadd.f32 %v2560_v10, %v6599_v25  ;;  %v2739_v52 = vpop.xlane.xlu0 %2738 }
 0x3b7   : > { %3214 = vst.msk [vmem:[%s5170_s29 + $0x2e8] sm:$0xff] %vm3120_vm2, %v3085_v16  ;;  %v2993_v20 = vmax.f32 %v2609_v30, %v2739_v52  ;;  %v2853_v7 = vpop.xlane.xlu2 %2852  ;;  %v2383_v43 = vpop.f32.mrf.mxu1  ;;  %v2610_v30 = vld [vmem:[%s5170_s29 + $0x10] sm:$0xff]  ;;  %v2631_v16 = vld [vmem:[%s5170_s29 + $0xb8] sm:$0xff] }
 0x3b8   : > { %3322 = vst [vmem:[%s5172_s26 + $0x248] sm:$0xff] %v6941_v60  ;;  %v3050_v25 = vmax.f32 %v2666_v8, %v2853_v7  ;;  %v2333_v38 = vpop.f32.mrf.mxu0  ;;  %v6962_v59 = vadd.f32 %v2383_v43, %v8060_v0  ;;  %v2702_v52 = vld [vmem:[%s5170_s29 + $0x2f0] sm:$0xff]  ;;  %v2632_v0 = vld [vmem:[%s5170_s29 + $0xc0] sm:$0xff] }
 0x3b9   : > { %3358 = vst [vmem:[%s5172_s26 + $0x368] sm:$0xff] %v6944_v17  ;;  %v6959_v58 = vadd.f32 %v2333_v38, %v8059_v33  ;;  %2422 = vmatmul.bf16.gmra.mxu1 %v4779_v46  ;;  %2874 = vmax.xlane.f32.xlu1 %v6805_v32 }
 0x3ba   : > { %3122 = vst.msk [vmem:[%s5170_s29 + $0x8] sm:$0xff] %vm3120_vm2, %v2993_v20  ;;  %2512 = vmatmul.bf16.gmra.mxu2 %v4797_v4  ;;  %2602 = vmatmul.bf16.gmra.mxu3 %v4815_v5 }
 0x3bb   : > { %3179 = vst.msk [vmem:[%s5170_s29 + $0x1d0] sm:$0xff] %vm3120_vm2, %v3050_v25  ;;  %2764 = vmax.xlane.f32.xlu0 %v6817_v35 }
 0x3bc   : > { %3267 = vst [vmem:[%s5172_s26 + $0x90] sm:$0xff] %v6959_v58  ;;  %2762 = vmax.xlane.f32.xlu2 %v6780_v31  ;;  %v2741_v10 = vpop.xlane.xlu1 %2740 }
 0x3bd   : > { %3287 = vst [vmem:[%s5172_s26 + $0x130] sm:$0xff] %v6962_v59  ;;  %v2473_v32 = vpop.f32.mrf.mxu2  ;;  %v2563_v8 = vpop.f32.mrf.mxu3  ;;  %v2994_v46 = vmax.f32 %v2610_v30, %v2741_v10  ;;  %v2667_v10 = vld [vmem:[%s5170_s29 + $0x1d8] sm:$0xff] }
 0x3be   : > { %v6979_v4 = vadd.f32 %v2473_v32, %v6393_v6  ;;  %v6982_v35 = vadd.f32 %v2563_v8, %v6609_v14  ;;  %v2783_v5 = vpop.xlane.xlu0 %2782  ;;  %v8061_v6 = vld [vmem:[#allocation20_spill] sm:$0xff]  ;;  %v8062_v14 = vld [vmem:[#allocation30_spill] sm:$0xff] }
 0x3bf   : > { %3123 = vst.msk [vmem:[%s5170_s29 + $0x10] sm:$0xff] %vm3120_vm2, %v2994_v46  ;;  %v3015_v31 = vmax.f32 %v2631_v16, %v2783_v5  ;;  %v2925_v20 = vpop.xlane.xlu2 %2924  ;;  %v2385_v7 = vpop.f32.mrf.mxu1  ;;  %v2611_v8 = vld [vmem:[%s5170_s29 + $0x18] sm:$0xff] }
 0x3c0   : > { %3323 = vst [vmem:[%s5172_s26 + $0x250] sm:$0xff] %v6979_v4  ;;  %v3086_v43 = vmax.f32 %v2702_v52, %v2925_v20  ;;  %v2335_v25 = vpop.f32.mrf.mxu0  ;;  %v6994_v33 = vadd.f32 %v2385_v7, %v8062_v14  ;;  %v8063_v7 = vld [vmem:[#allocation31_spill] sm:$0xff] }
 0x3c1   : > { %3359 = vst [vmem:[%s5172_s26 + $0x370] sm:$0xff] %v6982_v35  ;;  %v6991_v38 = vadd.f32 %v2335_v25, %v8061_v6  ;;  %2766 = vmax.xlane.f32.xlu1 %v6846_v23  ;;  %v2703_v25 = vld [vmem:[%s5170_s29 + $0x2f8] sm:$0xff] }
 0x3c2   : > { %3144 = vst.msk [vmem:[%s5170_s29 + $0xb8] sm:$0xff] %vm3120_vm2, %v3015_v31 }
 0x3c3   : > { %3215 = vst.msk [vmem:[%s5170_s29 + $0x2f0] sm:$0xff] %vm3120_vm2, %v3086_v43  ;;  %2806 = vmax.xlane.f32.xlu0 %v6851_v34 }
 0x3c4   : > { %3268 = vst [vmem:[%s5172_s26 + $0x98] sm:$0xff] %v6991_v38  ;;  %2804 = vmax.xlane.f32.xlu2 %v6820_v40  ;;  %v2785_v30 = vpop.xlane.xlu1 %2784 }
 0x3c5   : > { %3288 = vst [vmem:[%s5172_s26 + $0x138] sm:$0xff] %v6994_v33  ;;  %v2475_v16 = vpop.f32.mrf.mxu2  ;;  %v2565_v23 = vpop.f32.mrf.mxu3  ;;  %v3016_v32 = vmax.f32 %v2632_v0, %v2785_v30  ;;  %v2612_v0 = vld [vmem:[%s5170_s29 + $0x20] sm:$0xff] }
 0x3c6   : > { %v7011_v46 = vadd.f32 %v2475_v16, %v6395_v51  ;;  %v7014_v34 = vadd.f32 %v2565_v23, %v6611_v12  ;;  %v2855_v40 = vpop.xlane.xlu0 %2854  ;;  %v2668_v51 = vld [vmem:[%s5170_s29 + $0x1e0] sm:$0xff] }
 0x3c7   : > { %3145 = vst.msk [vmem:[%s5170_s29 + $0xc0] sm:$0xff] %vm3120_vm2, %v3016_v32  ;;  %v3051_v52 = vmax.f32 %v2667_v10, %v2855_v40  ;;  %v2743_v5 = vpop.xlane.xlu2 %2742  ;;  %v2388_v31 = vpop.f32.mrf.mxu1 }
 0x3c8   : > { %3324 = vst [vmem:[%s5172_s26 + $0x258] sm:$0xff] %v7011_v46  ;;  %v2995_v20 = vmax.f32 %v2611_v8, %v2743_v5  ;;  %v7021_v43 = vadd.f32 %v2388_v31, %v8063_v7  ;;  %v8064_v8 = vld [vmem:[#allocation32_spill] sm:$0xff] }
 0x3c9   : > { %3360 = vst [vmem:[%s5172_s26 + $0x378] sm:$0xff] %v7014_v34  ;;  %2808 = vmax.xlane.f32.xlu1 %v6886_v39 }
 0x3ca   : > { %3180 = vst.msk [vmem:[%s5170_s29 + $0x1d8] sm:$0xff] %vm3120_vm2, %v3051_v52  ;;  %v2613_v52 = vld [vmem:[%s5170_s29 + $0x28] sm:$0xff] }
 0x3cb   : > { %3124 = vst.msk [vmem:[%s5170_s29 + $0x18] sm:$0xff] %vm3120_vm2, %v2995_v20  ;;  %2878 = vmax.xlane.f32.xlu0 %v6870_v56  ;;  %v2633_v20 = vld [vmem:[%s5170_s29 + $0xc8] sm:$0xff] }
 0x3cc   : > { %3289 = vst [vmem:[%s5172_s26 + $0x140] sm:$0xff] %v7021_v43  ;;  %2876 = vmax.xlane.f32.xlu2 %v6838_v22  ;;  %v2857_v12 = vpop.xlane.xlu1 %2856 }
 0x3cd   : > { %v2478_v6 = vpop.f32.mrf.mxu2  ;;  %v2568_v14 = vpop.f32.mrf.mxu3  ;;  %v3052_v39 = vmax.f32 %v2668_v51, %v2857_v12 }
 0x3ce   : > { %v7038_v30 = vadd.f32 %v2478_v6, %v6409_v11  ;;  %v7041_v56 = vadd.f32 %v2568_v14, %v6638_v48  ;;  %v2927_v10 = vpop.xlane.xlu0 %2926  ;;  %v2704_v11 = vld [vmem:[%s5170_s29 + $0x300] sm:$0xff]  ;;  %v8065_v14 = vld [vmem:[#allocation33_spill] sm:$0xff] }
 0x3cf   : > { %3181 = vst.msk [vmem:[%s5170_s29 + $0x1e0] sm:$0xff] %vm3120_vm2, %v3052_v39  ;;  %v3087_v22 = vmax.f32 %v2703_v25, %v2927_v10  ;;  %v2745_v16 = vpop.xlane.xlu2 %2744  ;;  %v2390_v23 = vpop.f32.mrf.mxu1 }
 0x3d0   : > { %3325 = vst [vmem:[%s5172_s26 + $0x260] sm:$0xff] %v7038_v30  ;;  %v2996_v32 = vmax.f32 %v2612_v0, %v2745_v16  ;;  %v7048_v40 = vadd.f32 %v2390_v23, %v8064_v8  ;;  %v2634_v0 = vld [vmem:[%s5170_s29 + $0xd0] sm:$0xff]  ;;  %v2669_v16 = vld [vmem:[%s5170_s29 + $0x1e8] sm:$0xff] }
 0x3d1   : > { %3361 = vst [vmem:[%s5172_s26 + $0x380] sm:$0xff] %v7041_v56  ;;  %2880 = vmax.xlane.f32.xlu1 %v6906_v54 }
 0x3d2   : > { %3216 = vst.msk [vmem:[%s5170_s29 + $0x2f8] sm:$0xff] %vm3120_vm2, %v3087_v22 }
 0x3d3   : > { %3125 = vst.msk [vmem:[%s5170_s29 + $0x20] sm:$0xff] %vm3120_vm2, %v2996_v32  ;;  %2770 = vmax.xlane.f32.xlu0 %v6918_v47 }
 0x3d4   : > { %3290 = vst [vmem:[%s5172_s26 + $0x148] sm:$0xff] %v7048_v40  ;;  %2768 = vmax.xlane.f32.xlu2 %v6891_v53  ;;  %v2929_v48 = vpop.xlane.xlu1 %2928 }
 0x3d5   : > { %v2480_v5 = vpop.f32.mrf.mxu2  ;;  %v2570_v31 = vpop.f32.mrf.mxu3  ;;  %v3088_v54 = vmax.f32 %v2704_v11, %v2929_v48 }
 0x3d6   : > { %v7065_v7 = vadd.f32 %v2480_v5, %v6411_v41  ;;  %v7068_v47 = vadd.f32 %v2570_v31, %v6643_v62  ;;  %v2747_v51 = vpop.xlane.xlu0 %2746  ;;  %v2614_v41 = vld [vmem:[%s5170_s29 + $0x30] sm:$0xff] }
 0x3d7   : > { %3217 = vst.msk [vmem:[%s5170_s29 + $0x300] sm:$0xff] %vm3120_vm2, %v3088_v54  ;;  %v2997_v53 = vmax.f32 %v2613_v52, %v2747_v51  ;;  %v2787_v12 = vpop.xlane.xlu2 %2786  ;;  %v2393_v25 = vpop.f32.mrf.mxu1  ;;  %v8066_v52 = vld [vmem:[#allocation34_spill] sm:$0xff]  ;;  %v2670_v31 = vld [vmem:[%s5170_s29 + $0x1f0] sm:$0xff]  ;;  %v2705_v51 = vld [vmem:[%s5170_s29 + $0x308] sm:$0xff] }
 0x3d8   : > { %3326 = vst [vmem:[%s5172_s26 + $0x268] sm:$0xff] %v7065_v7  ;;  %v3017_v6 = vmax.f32 %v2633_v20, %v2787_v12  ;;  %v7075_v39 = vadd.f32 %v2393_v25, %v8065_v14 }
 0x3d9   : > { %3362 = vst [vmem:[%s5172_s26 + $0x388] sm:$0xff] %v7068_v47  ;;  %2772 = vmax.xlane.f32.xlu1 %v6959_v58 }
 0x3da   : > { %3126 = vst.msk [vmem:[%s5170_s29 + $0x28] sm:$0xff] %vm3120_vm2, %v2997_v53 }
 0x3db   : > { %3146 = vst.msk [vmem:[%s5170_s29 + $0xc8] sm:$0xff] %vm3120_vm2, %v3017_v6  ;;  %2812 = vmax.xlane.f32.xlu0 %v6962_v59 }
 0x3dc   : > { %3291 = vst [vmem:[%s5172_s26 + $0x150] sm:$0xff] %v7075_v39  ;;  %2810 = vmax.xlane.f32.xlu2 %v6921_v63  ;;  %v2749_v62 = vpop.xlane.xlu1 %2748 }
 0x3dd   : > { %v2483_v10 = vpop.f32.mrf.mxu2  ;;  %v2573_v22 = vpop.f32.mrf.mxu3  ;;  %v2998_v58 = vmax.f32 %v2614_v41, %v2749_v62  ;;  %v8067_v41 = vld [vmem:[#allocation35_spill] sm:$0xff] }
 0x3de   : > { %v7092_v23 = vadd.f32 %v2483_v10, %v6413_v2  ;;  %v7095_v59 = vadd.f32 %v2573_v22, %v6645_v3  ;;  %v2789_v32 = vpop.xlane.xlu0 %2788  ;;  %v2635_v2 = vld [vmem:[%s5170_s29 + $0xd8] sm:$0xff] }
 0x3df   : > { %3127 = vst.msk [vmem:[%s5170_s29 + $0x30] sm:$0xff] %vm3120_vm2, %v2998_v58  ;;  %v3018_v63 = vmax.f32 %v2634_v0, %v2789_v32  ;;  %v2859_v8 = vpop.xlane.xlu2 %2858  ;;  %v2395_v11 = vpop.f32.mrf.mxu1  ;;  %v2706_v0 = vld [vmem:[%s5170_s29 + $0x310] sm:$0xff]  ;;  %v2615_v58 = vld [vmem:[%s5170_s29 + $0x38] sm:$0xff] }
 0x3e0   : > { %3327 = vst [vmem:[%s5172_s26 + $0x270] sm:$0xff] %v7092_v23  ;;  %v3053_v48 = vmax.f32 %v2669_v16, %v2859_v8  ;;  %v7102_v5 = vadd.f32 %v2395_v11, %v8066_v52 }
 0x3e1   : > { %3363 = vst [vmem:[%s5172_s26 + $0x390] sm:$0xff] %v7095_v59  ;;  %2946 = vmax.xlane.f32.xlu1 %v6808_v9 }
 0x3e2   : > { %3147 = vst.msk [vmem:[%s5170_s29 + $0xd0] sm:$0xff] %vm3120_vm2, %v3018_v63 }
 0x3e3   : > { %3182 = vst.msk [vmem:[%s5170_s29 + $0x1e8] sm:$0xff] %vm3120_vm2, %v3053_v48  ;;  %2884 = vmax.xlane.f32.xlu0 %v6979_v4  ;;  %v8068_v48 = vld [vmem:[#allocation36_spill] sm:$0xff] }
 0x3e4   : > { %3292 = vst [vmem:[%s5172_s26 + $0x158] sm:$0xff] %v7102_v5  ;;  %2882 = vmax.xlane.f32.xlu2 %v6941_v60  ;;  %v2791_v3 = vpop.xlane.xlu1 %2790 }
 0x3e5   : > { %v2485_v54 = vpop.f32.mrf.mxu2  ;;  %v2575_v20 = vpop.f32.mrf.mxu3  ;;  %v3019_v9 = vmax.f32 %v2635_v2, %v2791_v3  ;;  %v2616_v2 = vld [vmem:[%s5170_s29 + $0x40] sm:$0xff] }
 0x3e6   : > { %v7119_v53 = vadd.f32 %v2485_v54, %v6421_v44  ;;  %v7122_v4 = vadd.f32 %v2575_v20, %v6667_v15  ;;  %v2861_v12 = vpop.xlane.xlu0 %2860  ;;  %v2671_v44 = vld [vmem:[%s5170_s29 + $0x1f8] sm:$0xff]  ;;  %v2636_v54 = vld [vmem:[%s5170_s29 + $0xe0] sm:$0xff] }
 0x3e7   : > { %3148 = vst.msk [vmem:[%s5170_s29 + $0xd8] sm:$0xff] %vm3120_vm2, %v3019_v9  ;;  %v3054_v60 = vmax.f32 %v2670_v31, %v2861_v12  ;;  %v2931_v25 = vpop.xlane.xlu2 %2930  ;;  %v2398_v6 = vpop.f32.mrf.mxu1 }
 0x3e8   : > { %3328 = vst [vmem:[%s5172_s26 + $0x278] sm:$0xff] %v7119_v53  ;;  %v3089_v14 = vmax.f32 %v2705_v51, %v2931_v25  ;;  %v7129_v62 = vadd.f32 %v2398_v6, %v8067_v41  ;;  %v2672_v41 = vld [vmem:[%s5170_s29 + $0x200] sm:$0xff] }
 0x3e9   : > { %3364 = vst [vmem:[%s5172_s26 + $0x398] sm:$0xff] %v7122_v4  ;;  %2814 = vmax.xlane.f32.xlu1 %v6994_v33 }
 0x3ea   : > { %3183 = vst.msk [vmem:[%s5170_s29 + $0x1f0] sm:$0xff] %vm3120_vm2, %v3054_v60 }
 0x3eb   : > { %3218 = vst.msk [vmem:[%s5170_s29 + $0x308] sm:$0xff] %vm3120_vm2, %v3089_v14  ;;  %2944 = vmax.xlane.f32.xlu0 %v6777_v57 }
 0x3ec   : > { %3293 = vst [vmem:[%s5172_s26 + $0x160] sm:$0xff] %v7129_v62  ;;  %2948 = vmax.xlane.f32.xlu2 %v6841_v28  ;;  %v2863_v15 = vpop.xlane.xlu1 %2862 }
 0x3ed   : > { %v2488_v10 = vpop.f32.mrf.mxu2  ;;  %v2578_v22 = vpop.f32.mrf.mxu3  ;;  %v3055_v33 = vmax.f32 %v2671_v44, %v2863_v15 }
 0x3ee   : > { %v7146_v16 = vadd.f32 %v2488_v10, %v6429_v13  ;;  %v7149_v57 = vadd.f32 %v2578_v22, %v6673_v18  ;;  %v2933_v32 = vpop.xlane.xlu0 %2932  ;;  %v2707_v13 = vld [vmem:[%s5170_s29 + $0x318] sm:$0xff] }
 0x3ef   : > { %3184 = vst.msk [vmem:[%s5170_s29 + $0x1f8] sm:$0xff] %vm3120_vm2, %v3055_v33  ;;  %v3090_v28 = vmax.f32 %v2706_v0, %v2933_v32  ;;  %v2751_v63 = vpop.xlane.xlu2 %2750  ;;  %v2400_v8 = vpop.f32.mrf.mxu1  ;;  %v8069_v33 = vld [vmem:[#allocation37_spill] sm:$0xff]  ;;  %v2673_v32 = vld [vmem:[%s5170_s29 + $0x208] sm:$0xff] }
 0x3f0   : > { %3329 = vst [vmem:[%s5172_s26 + $0x280] sm:$0xff] %v7146_v16  ;;  %v2999_v11 = vmax.f32 %v2615_v58, %v2751_v63  ;;  %v7156_v52 = vadd.f32 %v2400_v8, %v8068_v48  ;;  %v2708_v8 = vld [vmem:[%s5170_s29 + $0x320] sm:$0xff] }
 0x3f1   : > { %3365 = vst [vmem:[%s5172_s26 + $0x3a0] sm:$0xff] %v7149_v57  ;;  %2886 = vmax.xlane.f32.xlu1 %v7011_v46 }
 0x3f2   : > { %3219 = vst.msk [vmem:[%s5170_s29 + $0x310] sm:$0xff] %vm3120_vm2, %v3090_v28 }
 0x3f3   : > { %3128 = vst.msk [vmem:[%s5170_s29 + $0x38] sm:$0xff] %vm3120_vm2, %v2999_v11  ;;  %2818 = vmax.xlane.f32.xlu0 %v7048_v40  ;;  %v8070_v11 = vld [vmem:[#allocation46_spill] sm:$0xff] }
 0x3f4   : > { %3294 = vst [vmem:[%s5172_s26 + $0x168] sm:$0xff] %v7156_v52  ;;  %2774 = vmax.xlane.f32.xlu2 %v6991_v38  ;;  %v2935_v18 = vpop.xlane.xlu1 %2934 }
 0x3f5   : > { %v2490_v3 = vpop.f32.mrf.mxu2  ;;  %v2580_v31 = vpop.f32.mrf.mxu3  ;;  %v3091_v46 = vmax.f32 %v2707_v13, %v2935_v18 }
 0x3f6   : > { %v7173_v20 = vadd.f32 %v2490_v3, %v6431_v36  ;;  %v7176_v40 = vadd.f32 %v2580_v31, %v6675_v1  ;;  %v2753_v9 = vpop.xlane.xlu0 %2752  ;;  %v2617_v36 = vld [vmem:[%s5170_s29 + $0x48] sm:$0xff]  ;;  %v8071_v31 = vld [vmem:[#allocation38_spill] sm:$0xff] }
 0x3f7   : > { %3220 = vst.msk [vmem:[%s5170_s29 + $0x318] sm:$0xff] %vm3120_vm2, %v3091_v46  ;;  %v3000_v38 = vmax.f32 %v2616_v2, %v2753_v9  ;;  %v2793_v51 = vpop.xlane.xlu2 %2792  ;;  %v2403_v12 = vpop.f32.mrf.mxu1  ;;  %v2709_v9 = vld [vmem:[%s5170_s29 + $0x328] sm:$0xff] }
 0x3f8   : > { %3330 = vst [vmem:[%s5172_s26 + $0x288] sm:$0xff] %v7173_v20  ;;  %v3020_v60 = vmax.f32 %v2636_v54, %v2793_v51  ;;  %v7183_v25 = vadd.f32 %v2403_v12, %v6267_v21  ;;  %v2637_v21 = vld [vmem:[%s5170_s29 + $0xe8] sm:$0xff]  ;;  %v2618_v12 = vld [vmem:[%s5170_s29 + $0x50] sm:$0xff] }
 0x3f9   : > { %3366 = vst [vmem:[%s5172_s26 + $0x3a8] sm:$0xff] %v7176_v40  ;;  %2952 = vmax.xlane.f32.xlu1 %v6909_v19 }
 0x3fa   : > { %3129 = vst.msk [vmem:[%s5170_s29 + $0x40] sm:$0xff] %vm3120_vm2, %v3000_v38 }
 0x3fb   : > { %3149 = vst.msk [vmem:[%s5170_s29 + $0xe0] sm:$0xff] %vm3120_vm2, %v3020_v60  ;;  %2890 = vmax.xlane.f32.xlu0 %v7065_v7  ;;  %v8072_v60 = vld [vmem:[#allocation47_spill] sm:$0xff] }
 0x3fc   : > { %3295 = vst [vmem:[%s5172_s26 + $0x170] sm:$0xff] %v7183_v25  ;;  %2816 = vmax.xlane.f32.xlu2 %v7021_v43  ;;  %v2755_v1 = vpop.xlane.xlu1 %2754 }
 0x3fd   : > { %v2493_v6 = vpop.f32.mrf.mxu2  ;;  %v2583_v14 = vpop.f32.mrf.mxu3  ;;  %v3001_v19 = vmax.f32 %v2617_v36, %v2755_v1 }
 0x3fe   : > { %v7200_v44 = vadd.f32 %v2493_v6, %v6433_v27  ;;  %v7203_v7 = vadd.f32 %v2583_v14, %v6705_v37  ;;  %v2795_v15 = vpop.xlane.xlu0 %2794  ;;  %v2638_v27 = vld [vmem:[%s5170_s29 + $0xf0] sm:$0xff] }
 0x3ff   : > { %3130 = vst.msk [vmem:[%s5170_s29 + $0x48] sm:$0xff] %vm3120_vm2, %v3001_v19  ;;  %v3021_v43 = vmax.f32 %v2637_v21, %v2795_v15  ;;  %v2865_v0 = vpop.xlane.xlu2 %2864  ;;  %v2405_v10 = vpop.f32.mrf.mxu1  ;;  %v8073_v19 = vld [vmem:[#allocation39_spill] sm:$0xff] }
 0x400   : > { %3331 = vst [vmem:[%s5172_s26 + $0x290] sm:$0xff] %v7200_v44  ;;  %v3056_v22 = vmax.f32 %v2672_v41, %v2865_v0  ;;  %v7210_v58 = vadd.f32 %v2405_v10, %v8069_v33  ;;  %v8074_v33 = vld [vmem:[#allocation48_spill] sm:$0xff] }
 0x401   : > { %3367 = vst [vmem:[%s5172_s26 + $0x3b0] sm:$0xff] %v7203_v7  ;;  %2820 = vmax.xlane.f32.xlu1 %v7075_v39 }
 0x402   : > { %3150 = vst.msk [vmem:[%s5170_s29 + $0xe8] sm:$0xff] %vm3120_vm2, %v3021_v43  ;;  %v2619_v43 = vld [vmem:[%s5170_s29 + $0x58] sm:$0xff] }
 0x403   : > { %3185 = vst.msk [vmem:[%s5170_s29 + $0x200] sm:$0xff] %vm3120_vm2, %v3056_v22  ;;  %2950 = vmax.xlane.f32.xlu0 %v6873_v45  ;;  %v2639_v22 = vld [vmem:[%s5170_s29 + $0xf8] sm:$0xff] }
 0x404   : > { %3296 = vst [vmem:[%s5172_s26 + $0x178] sm:$0xff] %v7210_v58  ;;  %2888 = vmax.xlane.f32.xlu2 %v7038_v30  ;;  %v2797_v37 = vpop.xlane.xlu1 %2796 }
 0x405   : > { %v2495_v28 = vpop.f32.mrf.mxu2  ;;  %v2585_v63 = vpop.f32.mrf.mxu3  ;;  %v3022_v39 = vmax.f32 %v2638_v27, %v2797_v37 }
 0x406   : > { %v7227_v48 = vadd.f32 %v2495_v28, %v8070_v11  ;;  %v7230_v45 = vadd.f32 %v2585_v63, %v6720_v61  ;;  %v2867_v13 = vpop.xlane.xlu0 %2866  ;;  %v2674_v61 = vld [vmem:[%s5170_s29 + $0x210] sm:$0xff] }
 0x407   : > { %3151 = vst.msk [vmem:[%s5170_s29 + $0xf0] sm:$0xff] %vm3120_vm2, %v3022_v39  ;;  %v3057_v30 = vmax.f32 %v2673_v32, %v2867_v13  ;;  %v2937_v18 = vpop.xlane.xlu2 %2936  ;;  %v2408_v2 = vpop.f32.mrf.mxu1  ;;  %v8075_v39 = vld [vmem:[#allocation40_spill] sm:$0xff]  ;;  %v2640_v13 = vld [vmem:[%s5170_s29 + $0x100] sm:$0xff] }
 0x408   : > { %3332 = vst [vmem:[%s5172_s26 + $0x298] sm:$0xff] %v7227_v48  ;;  %v3092_v3 = vmax.f32 %v2708_v8, %v2937_v18  ;;  %v7237_v46 = vadd.f32 %v2408_v2, %v8071_v31  ;;  %v2675_v2 = vld [vmem:[%s5170_s29 + $0x218] sm:$0xff] }
 0x409   : > { %3368 = vst [vmem:[%s5172_s26 + $0x3b8] sm:$0xff] %v7230_v45  ;;  %2892 = vmax.xlane.f32.xlu1 %v7092_v23 }
 0x40a   : > { %3186 = vst.msk [vmem:[%s5170_s29 + $0x208] sm:$0xff] %vm3120_vm2, %v3057_v30 }
 0x40b   : > { %3221 = vst.msk [vmem:[%s5170_s29 + $0x320] sm:$0xff] %vm3120_vm2, %v3092_v3  ;;  %2824 = vmax.xlane.f32.xlu0 %v7129_v62  ;;  %v8076_v3 = vld [vmem:[#allocation49_spill] sm:$0xff] }
 0x40c   : > { %3297 = vst [vmem:[%s5172_s26 + $0x180] sm:$0xff] %v7237_v46  ;;  %2954 = vmax.xlane.f32.xlu2 %v6944_v17  ;;  %v2869_v54 = vpop.xlane.xlu1 %2868 }
 0x40d   : > { %v2498_v38 = vpop.f32.mrf.mxu2  ;;  %v2588_v51 = vpop.f32.mrf.mxu3  ;;  %v3058_v23 = vmax.f32 %v2674_v61, %v2869_v54 }
 0x40e   : > { %v7254_v36 = vadd.f32 %v2498_v38, %v8072_v60  ;;  %v7257_v62 = vadd.f32 %v2588_v51, %v6722_v49  ;;  %v2939_v1 = vpop.xlane.xlu0 %2938  ;;  %v2710_v49 = vld [vmem:[%s5170_s29 + $0x330] sm:$0xff]  ;;  %v2676_v60 = vld [vmem:[%s5170_s29 + $0x220] sm:$0xff] }
 0x40f   : > { %3187 = vst.msk [vmem:[%s5170_s29 + $0x210] sm:$0xff] %vm3120_vm2, %v3058_v23  ;;  %v3093_v17 = vmax.f32 %v2709_v9, %v2939_v1  ;;  %v2757_v21 = vpop.xlane.xlu2 %2756  ;;  %v2410_v6 = vpop.f32.mrf.mxu1  ;;  %v8077_v51 = vld [vmem:[#allocation41_spill] sm:$0xff] }
 0x410   : > { %3333 = vst [vmem:[%s5172_s26 + $0x2a0] sm:$0xff] %v7254_v36  ;;  %v3002_v14 = vmax.f32 %v2618_v12, %v2757_v21  ;;  %v7264_v41 = vadd.f32 %v2410_v6, %v8073_v19  ;;  %v2711_v21 = vld [vmem:[%s5170_s29 + $0x338] sm:$0xff] }
 0x411   : > { %3369 = vst [vmem:[%s5172_s26 + $0x3c0] sm:$0xff] %v7257_v62  ;;  %2958 = vmax.xlane.f32.xlu1 %v7014_v34  ;;  %v8078_v6 = vld [vmem:[#allocation50_spill] sm:$0xff] }
 0x412   : > { %3222 = vst.msk [vmem:[%s5170_s29 + $0x328] sm:$0xff] %vm3120_vm2, %v3093_v17 }
 0x413   : > { %3131 = vst.msk [vmem:[%s5170_s29 + $0x50] sm:$0xff] %vm3120_vm2, %v3002_v14  ;;  %2896 = vmax.xlane.f32.xlu0 %v7146_v16 }
 0x414   : > { %3298 = vst [vmem:[%s5172_s26 + $0x188] sm:$0xff] %v7264_v41  ;;  %2822 = vmax.xlane.f32.xlu2 %v7102_v5  ;;  %v2941_v15 = vpop.xlane.xlu1 %2940 }
 0x415   : > { %v2500_v0 = vpop.f32.mrf.mxu2  ;;  %v2590_v10 = vpop.f32.mrf.mxu3  ;;  %v3094_v34 = vmax.f32 %v2710_v49, %v2941_v15 }
 0x416   : > { %v7281_v27 = vadd.f32 %v2500_v0, %v8074_v33  ;;  %v7284_v16 = vadd.f32 %v2590_v10, %v6756_v42  ;;  %v2759_v37 = vpop.xlane.xlu0 %2758  ;;  %v2620_v42 = vld [vmem:[%s5170_s29 + $0x60] sm:$0xff]  ;;  %v8079_v0 = vld [vmem:[#allocation42_spill] sm:$0xff] }
 0x417   : > { %3223 = vst.msk [vmem:[%s5170_s29 + $0x330] sm:$0xff] %vm3120_vm2, %v3094_v34  ;;  %v3003_v5 = vmax.f32 %v2619_v43, %v2759_v37  ;;  %v2799_v32 = vpop.xlane.xlu2 %2798  ;;  %v2413_v28 = vpop.f32.mrf.mxu1 }
 0x418   : > { %3334 = vst [vmem:[%s5172_s26 + $0x2a8] sm:$0xff] %v7281_v27  ;;  %v3023_v63 = vmax.f32 %v2639_v22, %v2799_v32  ;;  %v7291_v8 = vadd.f32 %v2413_v28, %v8075_v39  ;;  %v2622_v22 = vld [vmem:[%s5170_s29 + $0x70] sm:$0xff]  ;;  %v8080_v32 = vld [vmem:[#allocation51_spill] sm:$0xff] }
 0x419   : > { %3370 = vst [vmem:[%s5172_s26 + $0x3c8] sm:$0xff] %v7284_v16  ;;  %2826 = vmax.xlane.f32.xlu1 %v7156_v52 }
 0x41a   : > { %3132 = vst.msk [vmem:[%s5170_s29 + $0x58] sm:$0xff] %vm3120_vm2, %v3003_v5  ;;  %v2621_v5 = vld [vmem:[%s5170_s29 + $0x68] sm:$0xff] }
 0x41b   : > { %3152 = vst.msk [vmem:[%s5170_s29 + $0xf8] sm:$0xff] %vm3120_vm2, %v3023_v63  ;;  %2956 = vmax.xlane.f32.xlu0 %v6982_v35 }
 0x41c   : > { %3299 = vst [vmem:[%s5172_s26 + $0x190] sm:$0xff] %v7291_v8  ;;  %2894 = vmax.xlane.f32.xlu2 %v7119_v53  ;;  %v2761_v11 = vpop.xlane.xlu1 %2760 }
 0x41d   : > { %v2503_v30 = vpop.f32.mrf.mxu2  ;;  %v2593_v18 = vpop.f32.mrf.mxu3  ;;  %v3004_v52 = vmax.f32 %v2620_v42, %v2761_v11 }
 0x41e   : > { %v7308_v31 = vadd.f32 %v2503_v30, %v8076_v3  ;;  %v7311_v35 = vadd.f32 %v2593_v18, %v6763_v26  ;;  %v2801_v61 = vpop.xlane.xlu0 %2800  ;;  %v2641_v26 = vld [vmem:[%s5170_s29 + $0x108] sm:$0xff] }
 0x41f   : > { %3133 = vst.msk [vmem:[%s5170_s29 + $0x60] sm:$0xff] %vm3120_vm2, %v3004_v52  ;;  %v3024_v53 = vmax.f32 %v2640_v13, %v2801_v61  ;;  %v2871_v54 = vpop.xlane.xlu2 %2870  ;;  %v2415_v9 = vpop.f32.mrf.mxu1  ;;  %v8081_v13 = vld [vmem:[#allocation43_spill] sm:$0xff]  ;;  %v2643_v52 = vld [vmem:[%s5170_s29 + $0x118] sm:$0xff]  ;;  %v2642_v61 = vld [vmem:[%s5170_s29 + $0x110] sm:$0xff] }
 0x420   : > { %3335 = vst [vmem:[%s5172_s26 + $0x2b0] sm:$0xff] %v7308_v31  ;;  %v3059_v38 = vmax.f32 %v2675_v2, %v2871_v54  ;;  %v7318_v23 = vadd.f32 %v2415_v9, %v8077_v51 }
 0x421   : > { %3371 = vst [vmem:[%s5172_s26 + $0x3d0] sm:$0xff] %v7311_v35  ;;  %2898 = vmax.xlane.f32.xlu1 %v7173_v20 }
 0x422   : > { %3153 = vst.msk [vmem:[%s5170_s29 + $0x100] sm:$0xff] %vm3120_vm2, %v3024_v53  ;;  %v8082_v53 = vld [vmem:[#allocation52_spill] sm:$0xff] }
 0x423   : > { %3188 = vst.msk [vmem:[%s5170_s29 + $0x218] sm:$0xff] %vm3120_vm2, %v3059_v38  ;;  %2830 = vmax.xlane.f32.xlu0 %v7210_v58 }
 0x424   : > { %3300 = vst [vmem:[%s5172_s26 + $0x198] sm:$0xff] %v7318_v23  ;;  %2960 = vmax.xlane.f32.xlu2 %v7041_v56  ;;  %v2803_v12 = vpop.xlane.xlu1 %2802 }
 0x425   : > { %v2505_v1 = vpop.f32.mrf.mxu2  ;;  %v2595_v17 = vpop.f32.mrf.mxu3  ;;  %v3025_v20 = vmax.f32 %v2641_v26, %v2803_v12  ;;  %v8083_v12 = vld [vmem:[#allocation44_spill] sm:$0xff] }
 0x426   : > { %v7335_v14 = vadd.f32 %v2505_v1, %v8078_v6  ;;  %v7338_v58 = vadd.f32 %v2595_v17, %v6765_v29  ;;  %v2873_v19 = vpop.xlane.xlu0 %2872  ;;  %v2677_v29 = vld [vmem:[%s5170_s29 + $0x228] sm:$0xff]  ;;  %v2679_v17 = vld [vmem:[%s5170_s29 + $0x238] sm:$0xff]  ;;  %v2678_v6 = vld [vmem:[%s5170_s29 + $0x230] sm:$0xff] }
 0x427   : > { %3154 = vst.msk [vmem:[%s5170_s29 + $0x108] sm:$0xff] %vm3120_vm2, %v3025_v20  ;;  %v3060_v56 = vmax.f32 %v2676_v60, %v2873_v19  ;;  %v2943_v49 = vpop.xlane.xlu2 %2942  ;;  %v2418_v15 = vpop.f32.mrf.mxu1  ;;  %v8084_v19 = vld [vmem:[#allocation53_spill] sm:$0xff] }
 0x428   : > { %3336 = vst [vmem:[%s5172_s26 + $0x2b8] sm:$0xff] %v7335_v14  ;;  %v3095_v43 = vmax.f32 %v2711_v21, %v2943_v49  ;;  %v7345_v10 = vadd.f32 %v2418_v15, %v8079_v0 }
 0x429   : > { %3372 = vst [vmem:[%s5172_s26 + $0x3d8] sm:$0xff] %v7338_v58  ;;  %2964 = vmax.xlane.f32.xlu1 %v7095_v59 }
 0x42a   : > { %3189 = vst.msk [vmem:[%s5170_s29 + $0x220] sm:$0xff] %vm3120_vm2, %v3060_v56 }
 0x42b   : > { %3224 = vst.msk [vmem:[%s5170_s29 + $0x338] sm:$0xff] %vm3120_vm2, %v3095_v43  ;;  %2902 = vmax.xlane.f32.xlu0 %v7227_v48 }
 0x42c   : > { %3301 = vst [vmem:[%s5172_s26 + $0x1a0] sm:$0xff] %v7345_v10  ;;  %2828 = vmax.xlane.f32.xlu2 %v7183_v25  ;;  %v2875_v34 = vpop.xlane.xlu1 %2874 }
 0x42d   : > { %v2508_v33 = vpop.f32.mrf.mxu2  ;;  %v2598_v37 = vpop.f32.mrf.mxu3  ;;  %v3061_v59 = vmax.f32 %v2677_v29, %v2875_v34  ;;  %v8085_v29 = vld [vmem:[#allocation45_spill] sm:$0xff] }
 0x42e   : > { %v7362_v28 = vadd.f32 %v2508_v33, %v8080_v32  ;;  %v7365_v48 = vadd.f32 %v2598_v37, %v6789_v24  ;;  %v2765_v63 = vpop.xlane.xlu0 %2764  ;;  %v2623_v24 = vld [vmem:[%s5170_s29 + $0x78] sm:$0xff]  ;;  %v2625_v33 = vld [vmem:[%s5170_s29 + $0x88] sm:$0xff] }
 0x42f   : > { %3190 = vst.msk [vmem:[%s5170_s29 + $0x228] sm:$0xff] %vm3120_vm2, %v3061_v59  ;;  %v3006_v25 = vmax.f32 %v2622_v22, %v2765_v63  ;;  %v2763_v39 = vpop.xlane.xlu2 %2762  ;;  %v2420_v42 = vpop.f32.mrf.mxu1  ;;  %v8086_v32 = vld [vmem:[#allocation54_spill] sm:$0xff] }
 0x430   : > { %3337 = vst [vmem:[%s5172_s26 + $0x2c0] sm:$0xff] %v7362_v28  ;;  %v3005_v11 = vmax.f32 %v2621_v5, %v2763_v39  ;;  %v7372_v30 = vadd.f32 %v2420_v42, %v8081_v13  ;;  %v2624_v5 = vld [vmem:[%s5170_s29 + $0x80] sm:$0xff]  ;;  %v2626_v13 = vld [vmem:[%s5170_s29 + $0x90] sm:$0xff] }
 0x431   : > { %3373 = vst [vmem:[%s5172_s26 + $0x3e0] sm:$0xff] %v7365_v48  ;;  %2832 = vmax.xlane.f32.xlu1 %v7237_v46 }
 0x432   : > { %3135 = vst.msk [vmem:[%s5170_s29 + $0x70] sm:$0xff] %vm3120_vm2, %v3006_v25  ;;  %v8087_v25 = vld [vmem:[#allocation11_spill] sm:$0xff] }
 0x433   : > { %3134 = vst.msk [vmem:[%s5170_s29 + $0x68] sm:$0xff] %vm3120_vm2, %v3005_v11  ;;  %2962 = vmax.xlane.f32.xlu0 %v7068_v47 }
 0x434   : > { %3302 = vst [vmem:[%s5172_s26 + $0x1a8] sm:$0xff] %v7372_v30  ;;  %2900 = vmax.xlane.f32.xlu2 %v7200_v44  ;;  %v2767_v18 = vpop.xlane.xlu1 %2766 }
 0x435   : > { %v2510_v2 = vpop.f32.mrf.mxu2  ;;  %v2600_v3 = vpop.f32.mrf.mxu3  ;;  %v3007_v46 = vmax.f32 %v2623_v24, %v2767_v18  ;;  %v2646_v18 = vld [vmem:[%s5170_s29 + $0x130] sm:$0xff] }
 0x436   : > { %v7389_v54 = vadd.f32 %v2510_v2, %v8082_v53  ;;  %v7392_v47 = vadd.f32 %v2600_v3, %v6796_v55  ;;  %v2807_v9 = vpop.xlane.xlu0 %2806  ;;  %v2644_v55 = vld [vmem:[%s5170_s29 + $0x120] sm:$0xff]  ;;  %v2645_v2 = vld [vmem:[%s5170_s29 + $0x128] sm:$0xff]  ;;  %v2682_v53 = vld [vmem:[%s5170_s29 + $0x250] sm:$0xff] }
 0x437   : > { %3136 = vst.msk [vmem:[%s5170_s29 + $0x78] sm:$0xff] %vm3120_vm2, %v3007_v46  ;;  %v3027_v44 = vmax.f32 %v2643_v52, %v2807_v9  ;;  %v2805_v38 = vpop.xlane.xlu2 %2804  ;;  %v2423_v51 = vpop.f32.mrf.mxu1 }
 0x438   : > { %3338 = vst [vmem:[%s5172_s26 + $0x2c8] sm:$0xff] %v7389_v54  ;;  %v3026_v26 = vmax.f32 %v2642_v61, %v2805_v38  ;;  %v7399_v60 = vadd.f32 %v2423_v51, %v8083_v12  ;;  %v2712_v12 = vld [vmem:[%s5170_s29 + $0x340] sm:$0xff] }
 0x439   : > { %3374 = vst [vmem:[%s5172_s26 + $0x3e8] sm:$0xff] %v7392_v47  ;;  %2904 = vmax.xlane.f32.xlu1 %v7254_v36 }
 0x43a   : > { %3156 = vst.msk [vmem:[%s5170_s29 + $0x118] sm:$0xff] %vm3120_vm2, %v3027_v44  ;;  %v2681_v44 = vld [vmem:[%s5170_s29 + $0x248] sm:$0xff] }
 0x43b   : > { %3155 = vst.msk [vmem:[%s5170_s29 + $0x110] sm:$0xff] %vm3120_vm2, %v3026_v26  ;;  %2836 = vmax.xlane.f32.xlu0 %v7291_v8 }
 0x43c   : > { %3303 = vst [vmem:[%s5172_s26 + $0x1b0] sm:$0xff] %v7399_v60  ;;  %2966 = vmax.xlane.f32.xlu2 %v7122_v4  ;;  %v2809_v1 = vpop.xlane.xlu1 %2808 }
 0x43d   : > { %v2513_v20 = vpop.f32.mrf.mxu2  ;;  %v2603_v21 = vpop.f32.mrf.mxu3  ;;  %v3028_v36 = vmax.f32 %v2644_v55, %v2809_v1  ;;  %v2714_v1 = vld [vmem:[%s5170_s29 + $0x350] sm:$0xff] }
 0x43e   : > { %v7416_v56 = vadd.f32 %v2513_v20, %v8084_v19  ;;  %v7419_v8 = vadd.f32 %v2603_v21, %v6798_v50  ;;  %v2879_v49 = vpop.xlane.xlu0 %2878  ;;  %v2680_v50 = vld [vmem:[%s5170_s29 + $0x240] sm:$0xff]  ;;  %v2627_v19 = vld [vmem:[%s5170_s29 + $0x98] sm:$0xff] }
 0x43f   : > { %3157 = vst.msk [vmem:[%s5170_s29 + $0x120] sm:$0xff] %vm3120_vm2, %v3028_v36  ;;  %v3063_v4 = vmax.f32 %v2679_v17, %v2879_v49  ;;  %v2877_v15 = vpop.xlane.xlu2 %2876  ;;  %v2425_v43 = vpop.f32.mrf.mxu1  ;;  %v2649_v36 = vld [vmem:[%s5170_s29 + $0x148] sm:$0xff] }
 0x440   : > { %3339 = vst [vmem:[%s5172_s26 + $0x2d0] sm:$0xff] %v7416_v56  ;;  %v3062_v0 = vmax.f32 %v2678_v6, %v2877_v15  ;;  %v7426_v34 = vadd.f32 %v2425_v43, %v8085_v29  ;;  %v2685_v43 = vld [vmem:[%s5170_s29 + $0x268] sm:$0xff]  ;;  %v2648_v29 = vld [vmem:[%s5170_s29 + $0x140] sm:$0xff] }
 0x441   : > { %3375 = vst [vmem:[%s5172_s26 + $0x3f0] sm:$0xff] %v7419_v8  ;;  %2970 = vmax.xlane.f32.xlu1 %v7176_v40 }
 0x442   : > { %3192 = vst.msk [vmem:[%s5170_s29 + $0x238] sm:$0xff] %vm3120_vm2, %v3063_v4 }
 0x443   : > { %3191 = vst.msk [vmem:[%s5170_s29 + $0x230] sm:$0xff] %vm3120_vm2, %v3062_v0  ;;  %2908 = vmax.xlane.f32.xlu0 %v7308_v31 }
 0x444   : > { %3304 = vst [vmem:[%s5172_s26 + $0x1b8] sm:$0xff] %v7426_v34  ;;  %2834 = vmax.xlane.f32.xlu2 %v7264_v41  ;;  %v2881_v22 = vpop.xlane.xlu1 %2880 }
 0x445   : > { %v2515_v37 = vpop.f32.mrf.mxu2  ;;  %v2605_v40 = vpop.f32.mrf.mxu3  ;;  %v3064_v59 = vmax.f32 %v2680_v50, %v2881_v22 }
 0x446   : > { %v7443_v63 = vadd.f32 %v2515_v37, %v8086_v32  ;;  %v7446_v31 = vadd.f32 %v2605_v40, %v8087_v25  ;;  %v2771_v39 = vpop.xlane.xlu0 %2770  ;;  %v2715_v37 = vld [vmem:[%s5170_s29 + $0x358] sm:$0xff] }
 0x447   : > { %3193 = vst.msk [vmem:[%s5170_s29 + $0x240] sm:$0xff] %vm3120_vm2, %v3064_v59  ;;  %v3009_v41 = vmax.f32 %v2625_v33, %v2771_v39  ;;  %v2769_v42 = vpop.xlane.xlu2 %2768  ;;  %v2684_v59 = vld [vmem:[%s5170_s29 + $0x260] sm:$0xff] }
 0x448   : > { %3340 = vst [vmem:[%s5172_s26 + $0x2d8] sm:$0xff] %v7443_v63  ;;  %v3008_v11 = vmax.f32 %v2624_v5, %v2769_v42  ;;  %v2652_v39 = vld [vmem:[%s5170_s29 + $0x160] sm:$0xff]  ;;  %v2717_v42 = vld [vmem:[%s5170_s29 + $0x368] sm:$0xff] }
 0x449   : > { %3376 = vst [vmem:[%s5172_s26 + $0x3f8] sm:$0xff] %v7446_v31  ;;  %2838 = vmax.xlane.f32.xlu1 %v7318_v23 }
 0x44a   : > { %3138 = vst.msk [vmem:[%s5170_s29 + $0x88] sm:$0xff] %vm3120_vm2, %v3009_v41 }
 0x44b   : > { %3137 = vst.msk [vmem:[%s5170_s29 + $0x80] sm:$0xff] %vm3120_vm2, %v3008_v11  ;;  %2968 = vmax.xlane.f32.xlu0 %v7149_v57  ;;  %v2713_v57 = vld [vmem:[%s5170_s29 + $0x348] sm:$0xff] }
 0x44c   : > { %2906 = vmax.xlane.f32.xlu2 %v7281_v27  ;;  %v2773_v24 = vpop.xlane.xlu1 %2772 }
 0x44d   : > { %v3010_v52 = vmax.f32 %v2626_v13, %v2773_v24 }
 0x44e   : > { %v2813_v3 = vpop.xlane.xlu0 %2812 }
 0x44f   : > { %3139 = vst.msk [vmem:[%s5170_s29 + $0x90] sm:$0xff] %vm3120_vm2, %v3010_v52  ;;  %v3030_v23 = vmax.f32 %v2646_v18, %v2813_v3  ;;  %v2811_v46 = vpop.xlane.xlu2 %2810  ;;  %v2688_v52 = vld [vmem:[%s5170_s29 + $0x280] sm:$0xff]  ;;  %v2651_v3 = vld [vmem:[%s5170_s29 + $0x158] sm:$0xff] }
 0x450   : > { %v3029_v61 = vmax.f32 %v2645_v2, %v2811_v46 }
 0x451   : > { %3159 = vst.msk [vmem:[%s5170_s29 + $0x130] sm:$0xff] %vm3120_vm2, %v3030_v23  ;;  %2910 = vmax.xlane.f32.xlu1 %v7335_v14 }
 0x452   : > { %3158 = vst.msk [vmem:[%s5170_s29 + $0x128] sm:$0xff] %vm3120_vm2, %v3029_v61 }
 0x453   : > { %2842 = vmax.xlane.f32.xlu0 %v7372_v30 }
 0x454   : > { %2972 = vmax.xlane.f32.xlu2 %v7203_v7  ;;  %v2947_v27 = vpop.xlane.xlu1 %2946  ;;  %v2647_v7 = vld [vmem:[%s5170_s29 + $0x138] sm:$0xff] }
 0x455   : > { %v3097_v9 = vmax.f32 %v2713_v57, %v2947_v27 }
 0x456   : > { %v2885_v38 = vpop.xlane.xlu0 %2884 }
 0x457   : > { %3226 = vst.msk [vmem:[%s5170_s29 + $0x348] sm:$0xff] %vm3120_vm2, %v3097_v9  ;;  %v3066_v14 = vmax.f32 %v2682_v53, %v2885_v38  ;;  %v2883_v51 = vpop.xlane.xlu2 %2882  ;;  %v2718_v53 = vld [vmem:[%s5170_s29 + $0x370] sm:$0xff] }
 0x458   : > { %v3065_v26 = vmax.f32 %v2681_v44, %v2883_v51  ;;  %v2687_v44 = vld [vmem:[%s5170_s29 + $0x278] sm:$0xff] }
 0x459   : > { %3195 = vst.msk [vmem:[%s5170_s29 + $0x250] sm:$0xff] %vm3120_vm2, %v3066_v14  ;;  %2976 = vmax.xlane.f32.xlu1 %v7257_v62 }
 0x45a   : > { %3194 = vst.msk [vmem:[%s5170_s29 + $0x248] sm:$0xff] %vm3120_vm2, %v3065_v26 }
 0x45b   : > { %2914 = vmax.xlane.f32.xlu0 %v7389_v54 }
 0x45c   : > { %2840 = vmax.xlane.f32.xlu2 %v7345_v10  ;;  %v2815_v30 = vpop.xlane.xlu1 %2814  ;;  %v2683_v10 = vld [vmem:[%s5170_s29 + $0x258] sm:$0xff] }
 0x45d   : > { %v3031_v55 = vmax.f32 %v2647_v7, %v2815_v30  ;;  %v2655_v30 = vld [vmem:[%s5170_s29 + $0x178] sm:$0xff] }
 0x45e   : > { %v2945_v17 = vpop.xlane.xlu0 %2944 }
 0x45f   : > { %3160 = vst.msk [vmem:[%s5170_s29 + $0x138] sm:$0xff] %vm3120_vm2, %v3031_v55  ;;  %v3096_v62 = vmax.f32 %v2712_v12, %v2945_v17  ;;  %v2949_v20 = vpop.xlane.xlu2 %2948  ;;  %v2720_v55 = vld [vmem:[%s5170_s29 + $0x380] sm:$0xff] }
 0x460   : > { %v3098_v21 = vmax.f32 %v2714_v1, %v2949_v20 }
 0x461   : > { %3225 = vst.msk [vmem:[%s5170_s29 + $0x340] sm:$0xff] %vm3120_vm2, %v3096_v62  ;;  %2844 = vmax.xlane.f32.xlu1 %v7399_v60 }
 0x462   : > { %3227 = vst.msk [vmem:[%s5170_s29 + $0x350] sm:$0xff] %vm3120_vm2, %v3098_v21  ;;  %v2722_v21 = vld [vmem:[%s5170_s29 + $0x390] sm:$0xff] }
 0x463   : > { %2974 = vmax.xlane.f32.xlu0 %v7230_v45  ;;  %v2716_v45 = vld [vmem:[%s5170_s29 + $0x360] sm:$0xff] }
 0x464   : > { %2912 = vmax.xlane.f32.xlu2 %v7362_v28  ;;  %v2887_v54 = vpop.xlane.xlu1 %2886 }
 0x465   : > { %v3067_v6 = vmax.f32 %v2683_v10, %v2887_v54  ;;  %v2691_v54 = vld [vmem:[%s5170_s29 + $0x298] sm:$0xff] }
 0x466   : > { %v2819_v49 = vpop.xlane.xlu0 %2818 }
 0x467   : > { %3196 = vst.msk [vmem:[%s5170_s29 + $0x258] sm:$0xff] %vm3120_vm2, %v3067_v6  ;;  %v3033_v60 = vmax.f32 %v2649_v36, %v2819_v49  ;;  %v2775_v4 = vpop.xlane.xlu2 %2774  ;;  %v2654_v6 = vld [vmem:[%s5170_s29 + $0x170] sm:$0xff] }
 0x468   : > { %v3011_v15 = vmax.f32 %v2627_v19, %v2775_v4 }
 0x469   : > { %3162 = vst.msk [vmem:[%s5170_s29 + $0x148] sm:$0xff] %vm3120_vm2, %v3033_v60  ;;  %2916 = vmax.xlane.f32.xlu1 %v7416_v56 }
 0x46a   : > { %3140 = vst.msk [vmem:[%s5170_s29 + $0x98] sm:$0xff] %vm3120_vm2, %v3011_v15  ;;  %v2656_v15 = vld [vmem:[%s5170_s29 + $0x180] sm:$0xff] }
 0x46b   : > { %2980 = vmax.xlane.f32.xlu0 %v7311_v35 }
 0x46c   : > { %2978 = vmax.xlane.f32.xlu2 %v7284_v16  ;;  %v2953_v28 = vpop.xlane.xlu1 %2952  ;;  %v2650_v16 = vld [vmem:[%s5170_s29 + $0x150] sm:$0xff] }
 0x46d   : > { %v3100_v0 = vmax.f32 %v2716_v45, %v2953_v28  ;;  %v2721_v28 = vld [vmem:[%s5170_s29 + $0x388] sm:$0xff] }
 0x46e   : > { %v2891_v50 = vpop.xlane.xlu0 %2890 }
 0x46f   : > { %3229 = vst.msk [vmem:[%s5170_s29 + $0x360] sm:$0xff] %vm3120_vm2, %v3100_v0  ;;  %v3069_v56 = vmax.f32 %v2685_v43, %v2891_v50  ;;  %v2817_v22 = vpop.xlane.xlu2 %2816  ;;  %v2690_v0 = vld [vmem:[%s5170_s29 + $0x290] sm:$0xff] }
 0x470   : > { %v3032_v33 = vmax.f32 %v2648_v29, %v2817_v22 }
 0x471   : > { %3198 = vst.msk [vmem:[%s5170_s29 + $0x268] sm:$0xff] %vm3120_vm2, %v3069_v56  ;;  %2982 = vmax.xlane.f32.xlu1 %v7338_v58 }
 0x472   : > { %3161 = vst.msk [vmem:[%s5170_s29 + $0x140] sm:$0xff] %vm3120_vm2, %v3032_v33  ;;  %v2692_v33 = vld [vmem:[%s5170_s29 + $0x2a0] sm:$0xff] }
 0x473   : > { %2986 = vmax.xlane.f32.xlu0 %v7392_v47 }
 0x474   : > { %2984 = vmax.xlane.f32.xlu2 %v7365_v48  ;;  %v2821_v35 = vpop.xlane.xlu1 %2820  ;;  %v2686_v48 = vld [vmem:[%s5170_s29 + $0x270] sm:$0xff] }
 0x475   : > { %v3034_v40 = vmax.f32 %v2650_v16, %v2821_v35  ;;  %v2658_v35 = vld [vmem:[%s5170_s29 + $0x190] sm:$0xff] }
 0x476   : > { %v2951_v5 = vpop.xlane.xlu0 %2950 }
 0x477   : > { %3163 = vst.msk [vmem:[%s5170_s29 + $0x150] sm:$0xff] %vm3120_vm2, %v3034_v40  ;;  %v3099_v58 = vmax.f32 %v2715_v37, %v2951_v5  ;;  %v2889_v32 = vpop.xlane.xlu2 %2888  ;;  %v2723_v40 = vld [vmem:[%s5170_s29 + $0x398] sm:$0xff] }
 0x478   : > { %v3068_v25 = vmax.f32 %v2684_v59, %v2889_v32 }
 0x479   : > { %3228 = vst.msk [vmem:[%s5170_s29 + $0x358] sm:$0xff] %vm3120_vm2, %v3099_v58  ;;  %2988 = vmax.xlane.f32.xlu1 %v7419_v8 }
 0x47a   : > { %3197 = vst.msk [vmem:[%s5170_s29 + $0x260] sm:$0xff] %vm3120_vm2, %v3068_v25  ;;  %v2725_v25 = vld [vmem:[%s5170_s29 + $0x3a8] sm:$0xff] }
 0x47c   : > { %2846 = vmax.xlane.f32.xlu2 %v7426_v34  ;;  %v2893_v47 = vpop.xlane.xlu1 %2892  ;;  %v2719_v34 = vld [vmem:[%s5170_s29 + $0x378] sm:$0xff] }
 0x47d   : > { %v3070_v41 = vmax.f32 %v2686_v48, %v2893_v47  ;;  %v2694_v47 = vld [vmem:[%s5170_s29 + $0x2b0] sm:$0xff] }
 0x47e   : > { %v2825_v11 = vpop.xlane.xlu0 %2824 }
 0x47f   : > { %3199 = vst.msk [vmem:[%s5170_s29 + $0x270] sm:$0xff] %vm3120_vm2, %v3070_v41  ;;  %v3036_v13 = vmax.f32 %v2652_v39, %v2825_v11  ;;  %v2955_v24 = vpop.xlane.xlu2 %2954  ;;  %v2657_v41 = vld [vmem:[%s5170_s29 + $0x188] sm:$0xff] }
 0x480   : > { %v3101_v8 = vmax.f32 %v2717_v42, %v2955_v24 }
 0x481   : > { %3165 = vst.msk [vmem:[%s5170_s29 + $0x160] sm:$0xff] %vm3120_vm2, %v3036_v13 }
 0x482   : > { %3230 = vst.msk [vmem:[%s5170_s29 + $0x368] sm:$0xff] %vm3120_vm2, %v3101_v8  ;;  %v2659_v8 = vld [vmem:[%s5170_s29 + $0x198] sm:$0xff] }
 0x484   : > { %2918 = vmax.xlane.f32.xlu2 %v7443_v63  ;;  %v2959_v18 = vpop.xlane.xlu1 %2958  ;;  %v2653_v63 = vld [vmem:[%s5170_s29 + $0x168] sm:$0xff] }
 0x485   : > { %v3103_v2 = vmax.f32 %v2719_v34, %v2959_v18  ;;  %v2724_v18 = vld [vmem:[%s5170_s29 + $0x3a0] sm:$0xff] }
 0x486   : > { %v2897_v23 = vpop.xlane.xlu0 %2896 }
 0x487   : > { %3232 = vst.msk [vmem:[%s5170_s29 + $0x378] sm:$0xff] %vm3120_vm2, %v3103_v2  ;;  %v3072_v46 = vmax.f32 %v2688_v52, %v2897_v23  ;;  %v2823_v61 = vpop.xlane.xlu2 %2822  ;;  %v2693_v2 = vld [vmem:[%s5170_s29 + $0x2a8] sm:$0xff] }
 0x488   : > { %v3035_v57 = vmax.f32 %v2651_v3, %v2823_v61 }
 0x489   : > { %3201 = vst.msk [vmem:[%s5170_s29 + $0x280] sm:$0xff] %vm3120_vm2, %v3072_v46 }
 0x48a   : > { %3164 = vst.msk [vmem:[%s5170_s29 + $0x158] sm:$0xff] %vm3120_vm2, %v3035_v57  ;;  %v2695_v57 = vld [vmem:[%s5170_s29 + $0x2b8] sm:$0xff] }
 0x48c   : > { %2990 = vmax.xlane.f32.xlu2 %v7446_v31  ;;  %v2827_v27 = vpop.xlane.xlu1 %2826  ;;  %v2689_v31 = vld [vmem:[%s5170_s29 + $0x288] sm:$0xff] }
 0x48d   : > { %v3037_v9 = vmax.f32 %v2653_v63, %v2827_v27  ;;  %v2661_v27 = vld [vmem:[%s5170_s29 + $0x1a8] sm:$0xff] }
 0x48e   : > { %v2957_v38 = vpop.xlane.xlu0 %2956 }
 0x48f   : > { %3166 = vst.msk [vmem:[%s5170_s29 + $0x168] sm:$0xff] %vm3120_vm2, %v3037_v9  ;;  %v3102_v14 = vmax.f32 %v2718_v53, %v2957_v38  ;;  %v2895_v51 = vpop.xlane.xlu2 %2894  ;;  %v2726_v9 = vld [vmem:[%s5170_s29 + $0x3b0] sm:$0xff] }
 0x490   : > { %v3071_v26 = vmax.f32 %v2687_v44, %v2895_v51 }
 0x491   : > { %3231 = vst.msk [vmem:[%s5170_s29 + $0x370] sm:$0xff] %vm3120_vm2, %v3102_v14 }
 0x492   : > { %3200 = vst.msk [vmem:[%s5170_s29 + $0x278] sm:$0xff] %vm3120_vm2, %v3071_v26  ;;  %v2728_v26 = vld [vmem:[%s5170_s29 + $0x3c0] sm:$0xff] }
 0x494   : > { %v2899_v7 = vpop.xlane.xlu1 %2898 }
 0x495   : > { %v3073_v12 = vmax.f32 %v2689_v31, %v2899_v7  ;;  %v2697_v7 = vld [vmem:[%s5170_s29 + $0x2c8] sm:$0xff] }
 0x496   : > { %v2831_v1 = vpop.xlane.xlu0 %2830 }
 0x497   : > { %3202 = vst.msk [vmem:[%s5170_s29 + $0x288] sm:$0xff] %vm3120_vm2, %v3073_v12  ;;  %v3039_v17 = vmax.f32 %v2655_v30, %v2831_v1  ;;  %v2961_v62 = vpop.xlane.xlu2 %2960  ;;  %v2660_v12 = vld [vmem:[%s5170_s29 + $0x1a0] sm:$0xff] }
 0x498   : > { %v3104_v20 = vmax.f32 %v2720_v55, %v2961_v62 }
 0x499   : > { %3168 = vst.msk [vmem:[%s5170_s29 + $0x178] sm:$0xff] %vm3120_vm2, %v3039_v17 }
 0x49a   : > { %3233 = vst.msk [vmem:[%s5170_s29 + $0x380] sm:$0xff] %vm3120_vm2, %v3104_v20  ;;  %v2662_v20 = vld [vmem:[%s5170_s29 + $0x1b0] sm:$0xff] }
 0x49c   : > { %v2965_v10 = vpop.xlane.xlu1 %2964 }
 0x49d   : > { %v3106_v36 = vmax.f32 %v2722_v21, %v2965_v10  ;;  %v2727_v10 = vld [vmem:[%s5170_s29 + $0x3b8] sm:$0xff] }
 0x49e   : > { %v2903_v19 = vpop.xlane.xlu0 %2902 }
 0x49f   : > { %3235 = vst.msk [vmem:[%s5170_s29 + $0x390] sm:$0xff] %vm3120_vm2, %v3106_v36  ;;  %v3075_v49 = vmax.f32 %v2691_v54, %v2903_v19  ;;  %v2829_v60 = vpop.xlane.xlu2 %2828  ;;  %v2696_v36 = vld [vmem:[%s5170_s29 + $0x2c0] sm:$0xff] }
 0x4a0   : > { %v3038_v4 = vmax.f32 %v2654_v6, %v2829_v60 }
 0x4a1   : > { %3204 = vst.msk [vmem:[%s5170_s29 + $0x298] sm:$0xff] %vm3120_vm2, %v3075_v49 }
 0x4a2   : > { %3167 = vst.msk [vmem:[%s5170_s29 + $0x170] sm:$0xff] %vm3120_vm2, %v3038_v4  ;;  %v2698_v4 = vld [vmem:[%s5170_s29 + $0x2d0] sm:$0xff] }
 0x4a4   : > { %v2833_v45 = vpop.xlane.xlu1 %2832 }
 0x4a5   : > { %v3040_v43 = vmax.f32 %v2656_v15, %v2833_v45  ;;  %v2730_v45 = vld [vmem:[%s5170_s29 + $0x3d0] sm:$0xff] }
 0x4a6   : > { %v2963_v29 = vpop.xlane.xlu0 %2962 }
 0x4a7   : > { %3169 = vst.msk [vmem:[%s5170_s29 + $0x180] sm:$0xff] %vm3120_vm2, %v3040_v43  ;;  %v3105_v50 = vmax.f32 %v2721_v28, %v2963_v29  ;;  %v2901_v56 = vpop.xlane.xlu2 %2900  ;;  %v2729_v43 = vld [vmem:[%s5170_s29 + $0x3c8] sm:$0xff] }
 0x4a8   : > { %v3074_v22 = vmax.f32 %v2690_v0, %v2901_v56 }
 0x4a9   : > { %3234 = vst.msk [vmem:[%s5170_s29 + $0x388] sm:$0xff] %vm3120_vm2, %v3105_v50 }
 0x4aa   : > { %3203 = vst.msk [vmem:[%s5170_s29 + $0x290] sm:$0xff] %vm3120_vm2, %v3074_v22  ;;  %v2731_v22 = vld [vmem:[%s5170_s29 + $0x3d8] sm:$0xff] }
 0x4ac   : > { %v2905_v16 = vpop.xlane.xlu1 %2904 }
 0x4ad   : > { %v3076_v37 = vmax.f32 %v2692_v33, %v2905_v16  ;;  %v2733_v16 = vld [vmem:[%s5170_s29 + $0x3e8] sm:$0xff] }
 0x4ae   : > { %v2837_v59 = vpop.xlane.xlu0 %2836 }
 0x4af   : > { %3205 = vst.msk [vmem:[%s5170_s29 + $0x2a0] sm:$0xff] %vm3120_vm2, %v3076_v37  ;;  %v3042_v5 = vmax.f32 %v2658_v35, %v2837_v59  ;;  %v2967_v58 = vpop.xlane.xlu2 %2966  ;;  %v2732_v37 = vld [vmem:[%s5170_s29 + $0x3e0] sm:$0xff] }
 0x4b0   : > { %v3107_v32 = vmax.f32 %v2723_v40, %v2967_v58 }
 0x4b1   : > { %3171 = vst.msk [vmem:[%s5170_s29 + $0x190] sm:$0xff] %vm3120_vm2, %v3042_v5 }
 0x4b2   : > { %3236 = vst.msk [vmem:[%s5170_s29 + $0x398] sm:$0xff] %vm3120_vm2, %v3107_v32  ;;  %v2734_v32 = vld [vmem:[%s5170_s29 + $0x3f0] sm:$0xff] }
 0x4b4   : > { %v2971_v48 = vpop.xlane.xlu1 %2970 }
 0x4b5   : > { %v3109_v39 = vmax.f32 %v2725_v25, %v2971_v48 }
 0x4b6   : > { %v2909_v42 = vpop.xlane.xlu0 %2908 }
 0x4b7   : > { %3238 = vst.msk [vmem:[%s5170_s29 + $0x3a8] sm:$0xff] %vm3120_vm2, %v3109_v39  ;;  %v3078_v11 = vmax.f32 %v2694_v47, %v2909_v42  ;;  %v2835_v13 = vpop.xlane.xlu2 %2834  ;;  %v2663_v47 = vld [vmem:[%s5170_s29 + $0x1b8] sm:$0xff] }
 0x4b8   : > { %v3041_v24 = vmax.f32 %v2657_v41, %v2835_v13  ;;  %v2699_v42 = vld [vmem:[%s5170_s29 + $0x2d8] sm:$0xff] }
 0x4b9   : > { %3207 = vst.msk [vmem:[%s5170_s29 + $0x2b0] sm:$0xff] %vm3120_vm2, %v3078_v11 }
 0x4ba   : > { %3170 = vst.msk [vmem:[%s5170_s29 + $0x188] sm:$0xff] %vm3120_vm2, %v3041_v24  ;;  %v2735_v24 = vld [vmem:[%s5170_s29 + $0x3f8] sm:$0xff] }
 0x4bc   : > { %v2839_v34 = vpop.xlane.xlu1 %2838 }
 0x4bd   : > { %v3043_v52 = vmax.f32 %v2659_v8, %v2839_v34 }
 0x4be   : > { %v2969_v3 = vpop.xlane.xlu0 %2968 }
 0x4bf   : > { %3172 = vst.msk [vmem:[%s5170_s29 + $0x198] sm:$0xff] %vm3120_vm2, %v3043_v52  ;;  %v3108_v23 = vmax.f32 %v2724_v18, %v2969_v3  ;;  %v2907_v46 = vpop.xlane.xlu2 %2906 }
 0x4c0   : > { %v3077_v61 = vmax.f32 %v2693_v2, %v2907_v46 }
 0x4c1   : > { %3237 = vst.msk [vmem:[%s5170_s29 + $0x3a0] sm:$0xff] %vm3120_vm2, %v3108_v23 }
 0x4c2   : > { %3206 = vst.msk [vmem:[%s5170_s29 + $0x2a8] sm:$0xff] %vm3120_vm2, %v3077_v61 }
 0x4c4   : > { %v2911_v63 = vpop.xlane.xlu1 %2910 }
 0x4c5   : > { %v3079_v53 = vmax.f32 %v2695_v57, %v2911_v63 }
 0x4c6   : > { %v2843_v44 = vpop.xlane.xlu0 %2842 }
 0x4c7   : > { %3208 = vst.msk [vmem:[%s5170_s29 + $0x2b8] sm:$0xff] %vm3120_vm2, %v3079_v53  ;;  %v3045_v38 = vmax.f32 %v2661_v27, %v2843_v44  ;;  %v2973_v14 = vpop.xlane.xlu2 %2972 }
 0x4c8   : > { %v3110_v51 = vmax.f32 %v2726_v9, %v2973_v14 }
 0x4c9   : > { %3174 = vst.msk [vmem:[%s5170_s29 + $0x1a8] sm:$0xff] %vm3120_vm2, %v3045_v38 }
 0x4ca   : > { %3239 = vst.msk [vmem:[%s5170_s29 + $0x3b0] sm:$0xff] %vm3120_vm2, %v3110_v51 }
 0x4cc   : > { %v2977_v31 = vpop.xlane.xlu1 %2976 }
 0x4cd   : > { %v3112_v30 = vmax.f32 %v2728_v26, %v2977_v31 }
 0x4ce   : > { %v2915_v55 = vpop.xlane.xlu0 %2914 }
 0x4cf   : > { %3241 = vst.msk [vmem:[%s5170_s29 + $0x3c0] sm:$0xff] %vm3120_vm2, %v3112_v30  ;;  %v3081_v1 = vmax.f32 %v2697_v7, %v2915_v55  ;;  %v2841_v17 = vpop.xlane.xlu2 %2840 }
 0x4d0   : > { %v3044_v62 = vmax.f32 %v2660_v12, %v2841_v17 }
 0x4d1   : > { %3210 = vst.msk [vmem:[%s5170_s29 + $0x2c8] sm:$0xff] %vm3120_vm2, %v3081_v1 }
 0x4d2   : > { %3173 = vst.msk [vmem:[%s5170_s29 + $0x1a0] sm:$0xff] %vm3120_vm2, %v3044_v62 }
 0x4d4   : > { %v2845_v21 = vpop.xlane.xlu1 %2844 }
 0x4d5   : > { %v3046_v54 = vmax.f32 %v2662_v20, %v2845_v21 }
 0x4d6   : > { %v2975_v6 = vpop.xlane.xlu0 %2974 }
 0x4d7   : > { %3175 = vst.msk [vmem:[%s5170_s29 + $0x1b0] sm:$0xff] %vm3120_vm2, %v3046_v54  ;;  %v3111_v19 = vmax.f32 %v2727_v10, %v2975_v6  ;;  %v2913_v49 = vpop.xlane.xlu2 %2912 }
 0x4d8   : > { %v3080_v60 = vmax.f32 %v2696_v36, %v2913_v49 }
 0x4d9   : > { %3240 = vst.msk [vmem:[%s5170_s29 + $0x3b8] sm:$0xff] %vm3120_vm2, %v3111_v19 }
 0x4da   : > { %3209 = vst.msk [vmem:[%s5170_s29 + $0x2c0] sm:$0xff] %vm3120_vm2, %v3080_v60 }
 0x4dc   : > { %v2917_v15 = vpop.xlane.xlu1 %2916 }
 0x4dd   : > { %v3082_v28 = vmax.f32 %v2698_v4, %v2917_v15 }
 0x4de   : > { %v2981_v0 = vpop.xlane.xlu0 %2980 }
 0x4df   : > { %3211 = vst.msk [vmem:[%s5170_s29 + $0x2d0] sm:$0xff] %vm3120_vm2, %v3082_v28  ;;  %v3114_v29 = vmax.f32 %v2730_v45, %v2981_v0  ;;  %v2979_v50 = vpop.xlane.xlu2 %2978 }
 0x4e0   : > { %v3113_v56 = vmax.f32 %v2729_v43, %v2979_v50 }
 0x4e1   : > { %3243 = vst.msk [vmem:[%s5170_s29 + $0x3d0] sm:$0xff] %vm3120_vm2, %v3114_v29 }
 0x4e2   : > { %3242 = vst.msk [vmem:[%s5170_s29 + $0x3c8] sm:$0xff] %vm3120_vm2, %v3113_v56 }
 0x4e4   : > { %v2983_v33 = vpop.xlane.xlu1 %2982 }
 0x4e5   : > { %v3115_v35 = vmax.f32 %v2731_v22, %v2983_v33 }
 0x4e6   : > { %v2987_v40 = vpop.xlane.xlu0 %2986 }
 0x4e7   : > { %3244 = vst.msk [vmem:[%s5170_s29 + $0x3d8] sm:$0xff] %vm3120_vm2, %v3115_v35  ;;  %v3117_v59 = vmax.f32 %v2733_v16, %v2987_v40  ;;  %v2985_v5 = vpop.xlane.xlu2 %2984 }
 0x4e8   : > { %v3116_v58 = vmax.f32 %v2732_v37, %v2985_v5 }
 0x4e9   : > { %3246 = vst.msk [vmem:[%s5170_s29 + $0x3e8] sm:$0xff] %vm3120_vm2, %v3117_v59 }
 0x4ea   : > { %3245 = vst.msk [vmem:[%s5170_s29 + $0x3e0] sm:$0xff] %vm3120_vm2, %v3116_v58 }
 0x4ec   : > { %v2989_v25 = vpop.xlane.xlu1 %2988 }
 0x4ed   : > { %v3118_v48 = vmax.f32 %v2734_v32, %v2989_v25 }
 0x4ef   : > { %3247 = vst.msk [vmem:[%s5170_s29 + $0x3f0] sm:$0xff] %vm3120_vm2, %v3118_v48  ;;  %v2847_v39 = vpop.xlane.xlu2 %2846 }
 0x4f0   : > { %v3047_v41 = vmax.f32 %v2663_v47, %v2847_v39 }
 0x4f2   : > { %3176 = vst.msk [vmem:[%s5170_s29 + $0x1b8] sm:$0xff] %vm3120_vm2, %v3047_v41 }
 0x4f7   : > { %v2919_v11 = vpop.xlane.xlu2 %2918 }
 0x4f8   : > { %v3083_v13 = vmax.f32 %v2699_v42, %v2919_v11 }
 0x4fa   : > { %3212 = vst.msk [vmem:[%s5170_s29 + $0x2d8] sm:$0xff] %vm3120_vm2, %v3083_v13 }
 0x4ff   : > { %v2991_v8 = vpop.xlane.xlu2 %2990 }
 0x500   : > { %v3119_v34 = vmax.f32 %v2735_v24, %v2991_v8 }
 0x502   : > { %3248 = vst.msk [vmem:[%s5170_s29 + $0x3f8] sm:$0xff] %vm3120_vm2, %v3119_v34 }
 0x503 PF: > { %p4734_p1 = scmp.ne.s32.totalorder %s5010_s30, 1 }
 0x505   : > { %3380 = sbr.rel (%p4734_p1) target bundleno = 1746 (0x6d2), region = 60 }
 0x50a   : > { %v3385_v18 = vld [vmem:[%s5170_s29 + $0x20] sm:$0xff]  ;;  %v3383_v52 = vld [vmem:[%s5170_s29 + $0x10] sm:$0xff]  ;;  %v5032_v3 = vmov 0   ;;  %v3386_v23 = vld [vmem:[%s5170_s29 + $0x28] sm:$0xff] }
 0x50b   : > { %v3381_v2 = vld [vmem:[%s5170_s29] sm:$0xff]  ;;  %4931 = vset.pattern.permute.xlu2 %v5032_v3  ;;  %4930 = vset.pattern.permute.xlu1 %v5032_v3  ;;  %v3384_v46 = vld [vmem:[%s5170_s29 + $0x18] sm:$0xff]  ;;  %v3382_v61 = vld [vmem:[%s5170_s29 + $0x8] sm:$0xff] }
 0x50c   : > { %4929 = vset.pattern.permute.xlu0 %v5032_v3  ;;  %3531 = vperm.xlu2 %4931, %v3385_v18   ;;  %v3389_v57 = vld [vmem:[%s5170_s29 + $0x40] sm:$0xff]  ;;  %v3388_v63 = vld [vmem:[%s5170_s29 + $0x38] sm:$0xff]  ;;  %v3387_v27 = vld [vmem:[%s5170_s29 + $0x30] sm:$0xff] }
 0x50d   : > { %3521 = vperm.xlu1 %4930, %v3383_v52   ;;  %3511 = vperm.xlu0 %4929, %v3381_v2   ;;  %v3392_v53 = vld [vmem:[%s5170_s29 + $0x58] sm:$0xff]  ;;  %v3391_v9 = vld [vmem:[%s5170_s29 + $0x50] sm:$0xff]  ;;  %v3390_v44 = vld [vmem:[%s5170_s29 + $0x48] sm:$0xff] }
 0x50e   : > { %v3395_v38 = vld [vmem:[%s5170_s29 + $0x70] sm:$0xff]  ;;  %v3394_v14 = vld [vmem:[%s5170_s29 + $0x68] sm:$0xff]  ;;  %v3393_v51 = vld [vmem:[%s5170_s29 + $0x60] sm:$0xff] }
 0x50f   : > { %v3398_v26 = vld [vmem:[%s5170_s29 + $0x88] sm:$0xff]  ;;  %v3397_v31 = vld [vmem:[%s5170_s29 + $0x80] sm:$0xff]  ;;  %v3396_v7 = vld [vmem:[%s5170_s29 + $0x78] sm:$0xff] }
 0x510   : > { %v3401_v30 = vld [vmem:[%s5170_s29 + $0xa0] sm:$0xff]  ;;  %v3400_v12 = vld [vmem:[%s5170_s29 + $0x98] sm:$0xff]  ;;  %v3399_v55 = vld [vmem:[%s5170_s29 + $0x90] sm:$0xff] }
 0x511   : > { %v3404_v1 = vld [vmem:[%s5170_s29 + $0xb8] sm:$0xff]  ;;  %v3403_v17 = vld [vmem:[%s5170_s29 + $0xb0] sm:$0xff]  ;;  %v3402_v62 = vld [vmem:[%s5170_s29 + $0xa8] sm:$0xff] }
 0x512   : > { %v3407_v20 = vld [vmem:[%s5170_s29 + $0xd0] sm:$0xff]  ;;  %v3406_v21 = vld [vmem:[%s5170_s29 + $0xc8] sm:$0xff]  ;;  %v3405_v10 = vld [vmem:[%s5170_s29 + $0xc0] sm:$0xff] }
 0x513   : > { %v3410_v54 = vld [vmem:[%s5170_s29 + $0xe8] sm:$0xff]  ;;  %v3409_v36 = vld [vmem:[%s5170_s29 + $0xe0] sm:$0xff]  ;;  %v3408_v6 = vld [vmem:[%s5170_s29 + $0xd8] sm:$0xff] }
 0x514   : > { %3536 = vperm.xlu2 %4931, %v3386_v23   ;;  %v3413_v19 = vld [vmem:[%s5170_s29 + $0x100] sm:$0xff]  ;;  %v3412_v49 = vld [vmem:[%s5170_s29 + $0xf8] sm:$0xff]  ;;  %v3411_v60 = vld [vmem:[%s5170_s29 + $0xf0] sm:$0xff] }
 0x515   : > { %3526 = vperm.xlu1 %4930, %v3384_v46   ;;  %3516 = vperm.xlu0 %4929, %v3382_v61   ;;  %v3416_v4 = vld [vmem:[%s5170_s29 + $0x118] sm:$0xff]  ;;  %v3415_v15 = vld [vmem:[%s5170_s29 + $0x110] sm:$0xff]  ;;  %v3414_v45 = vld [vmem:[%s5170_s29 + $0x108] sm:$0xff] }
 0x516   : > { %v3419_v43 = vld [vmem:[%s5170_s29 + $0x130] sm:$0xff]  ;;  %v3418_v0 = vld [vmem:[%s5170_s29 + $0x128] sm:$0xff]  ;;  %v3417_v29 = vld [vmem:[%s5170_s29 + $0x120] sm:$0xff] }
 0x517   : > { %v3422_v56 = vld [vmem:[%s5170_s29 + $0x148] sm:$0xff]  ;;  %v3421_v22 = vld [vmem:[%s5170_s29 + $0x140] sm:$0xff]  ;;  %v3420_v33 = vld [vmem:[%s5170_s29 + $0x138] sm:$0xff] }
 0x518   : > { %v3425_v35 = vld [vmem:[%s5170_s29 + $0x160] sm:$0xff]  ;;  %v3424_v37 = vld [vmem:[%s5170_s29 + $0x158] sm:$0xff]  ;;  %v3423_v40 = vld [vmem:[%s5170_s29 + $0x150] sm:$0xff] }
 0x519   : > { %v3428_v32 = vld [vmem:[%s5170_s29 + $0x178] sm:$0xff]  ;;  %v3427_v25 = vld [vmem:[%s5170_s29 + $0x170] sm:$0xff]  ;;  %v3426_v48 = vld [vmem:[%s5170_s29 + $0x168] sm:$0xff] }
 0x51a   : > { %v3431_v42 = vld [vmem:[%s5170_s29 + $0x190] sm:$0xff]  ;;  %v3430_v11 = vld [vmem:[%s5170_s29 + $0x188] sm:$0xff]  ;;  %v3429_v13 = vld [vmem:[%s5170_s29 + $0x180] sm:$0xff] }
 0x51b   : > { %v3434_v18 = vld [vmem:[%s5170_s29 + $0x1a8] sm:$0xff]  ;;  %v3433_v52 = vld [vmem:[%s5170_s29 + $0x1a0] sm:$0xff]  ;;  %v3432_v2 = vld [vmem:[%s5170_s29 + $0x198] sm:$0xff] }
 0x51c   : > { %3551 = vperm.xlu2 %4931, %v3389_v57   ;;  %v3437_v61 = vld [vmem:[%s5170_s29 + $0x1c0] sm:$0xff]  ;;  %v3436_v57 = vld [vmem:[%s5170_s29 + $0x1b8] sm:$0xff] }
 0x51d   : > { %3546 = vperm.xlu1 %4930, %v3388_v63   ;;  %3541 = vperm.xlu0 %4929, %v3387_v27   ;;  %v3435_v63 = vld [vmem:[%s5170_s29 + $0x1b0] sm:$0xff] }
 0x524   : > { %3566 = vperm.xlu2 %4931, %v3392_v53  }
 0x525   : > { %3561 = vperm.xlu1 %4930, %v3391_v9   ;;  %3556 = vperm.xlu0 %4929, %v3390_v44   ;;  %v3440_v44 = vld [vmem:[%s5170_s29 + $0x1d8] sm:$0xff] }
 0x52c   : > { %3581 = vperm.xlu2 %4931, %v3395_v38   ;;  %v3439_v38 = vld [vmem:[%s5170_s29 + $0x1d0] sm:$0xff] }
 0x52d   : > { %3576 = vperm.xlu1 %4930, %v3394_v14   ;;  %3571 = vperm.xlu0 %4929, %v3393_v51   ;;  %v3438_v14 = vld [vmem:[%s5170_s29 + $0x1c8] sm:$0xff] }
 0x534   : > { %3596 = vperm.xlu2 %4931, %v3398_v26  }
 0x535   : > { %3591 = vperm.xlu1 %4930, %v3397_v31   ;;  %3586 = vperm.xlu0 %4929, %v3396_v7   ;;  %v3443_v7 = vld [vmem:[%s5170_s29 + $0x1f0] sm:$0xff] }
 0x53c   : > { %3611 = vperm.xlu2 %4931, %v3401_v30   ;;  %v3442_v30 = vld [vmem:[%s5170_s29 + $0x1e8] sm:$0xff] }
 0x53d   : > { %3606 = vperm.xlu1 %4930, %v3400_v12   ;;  %3601 = vperm.xlu0 %4929, %v3399_v55   ;;  %v3441_v12 = vld [vmem:[%s5170_s29 + $0x1e0] sm:$0xff] }
 0x544   : > { %3626 = vperm.xlu2 %4931, %v3404_v1  }
 0x545   : > { %3621 = vperm.xlu1 %4930, %v3403_v17   ;;  %3616 = vperm.xlu0 %4929, %v3402_v62   ;;  %v3446_v62 = vld [vmem:[%s5170_s29 + $0x208] sm:$0xff] }
 0x54c   : > { %3641 = vperm.xlu2 %4931, %v3407_v20   ;;  %v3445_v20 = vld [vmem:[%s5170_s29 + $0x200] sm:$0xff] }
 0x54d   : > { %3636 = vperm.xlu1 %4930, %v3406_v21   ;;  %3631 = vperm.xlu0 %4929, %v3405_v10   ;;  %v3444_v21 = vld [vmem:[%s5170_s29 + $0x1f8] sm:$0xff] }
 0x554   : > { %3656 = vperm.xlu2 %4931, %v3410_v54  }
 0x555   : > { %3651 = vperm.xlu1 %4930, %v3409_v36   ;;  %3646 = vperm.xlu0 %4929, %v3408_v6   ;;  %v3449_v6 = vld [vmem:[%s5170_s29 + $0x220] sm:$0xff] }
 0x55c   : > { %3671 = vperm.xlu2 %4931, %v3413_v19   ;;  %v3448_v19 = vld [vmem:[%s5170_s29 + $0x218] sm:$0xff] }
 0x55d   : > { %3666 = vperm.xlu1 %4930, %v3412_v49   ;;  %3661 = vperm.xlu0 %4929, %v3411_v60   ;;  %v3447_v49 = vld [vmem:[%s5170_s29 + $0x210] sm:$0xff] }
 0x564   : > { %3686 = vperm.xlu2 %4931, %v3416_v4  }
 0x565   : > { %3681 = vperm.xlu1 %4930, %v3415_v15   ;;  %3676 = vperm.xlu0 %4929, %v3414_v45   ;;  %v3452_v45 = vld [vmem:[%s5170_s29 + $0x238] sm:$0xff] }
 0x566   : > { %v3532_v28 = vpop.permute.xlu2 %3531 }
 0x567   : > { %4153 = vst [vmem:[%s5172_s26 + $0x20] sm:$0xff] %v3532_v28  ;;  %v3451_v28 = vld [vmem:[%s5170_s29 + $0x230] sm:$0xff] }
 0x56c   : > { %3701 = vperm.xlu2 %4931, %v3419_v43   ;;  %v3450_v43 = vld [vmem:[%s5170_s29 + $0x228] sm:$0xff] }
 0x56d   : > { %3696 = vperm.xlu1 %4930, %v3418_v0   ;;  %3691 = vperm.xlu0 %4929, %v3417_v29  }
 0x56e   : > { %v3537_v50 = vpop.permute.xlu2 %3536 }
 0x56f   : > { %4154 = vst [vmem:[%s5172_s26 + $0x28] sm:$0xff] %v3537_v50 }
 0x574   : > { %3716 = vperm.xlu2 %4931, %v3422_v56   ;;  %v3455_v56 = vld [vmem:[%s5170_s29 + $0x250] sm:$0xff] }
 0x575   : > { %3711 = vperm.xlu1 %4930, %v3421_v22   ;;  %3706 = vperm.xlu0 %4929, %v3420_v33   ;;  %v3454_v22 = vld [vmem:[%s5170_s29 + $0x248] sm:$0xff]  ;;  %v3453_v33 = vld [vmem:[%s5170_s29 + $0x240] sm:$0xff] }
 0x576   : > { %v3552_v16 = vpop.permute.xlu2 %3551 }
 0x577   : > { %4157 = vst [vmem:[%s5172_s26 + $0x40] sm:$0xff] %v3552_v16 }
 0x57c   : > { %3731 = vperm.xlu2 %4931, %v3425_v35  }
 0x57d   : > { %3726 = vperm.xlu1 %4930, %v3424_v37   ;;  %3721 = vperm.xlu0 %4929, %v3423_v40   ;;  %v3458_v40 = vld [vmem:[%s5170_s29 + $0x268] sm:$0xff] }
 0x57e   : > { %v3567_v59 = vpop.permute.xlu2 %3566 }
 0x57f   : > { %4160 = vst [vmem:[%s5172_s26 + $0x58] sm:$0xff] %v3567_v59  ;;  %v3522_v5 = vpop.permute.xlu1 %3521  ;;  %v3512_v58 = vpop.permute.xlu0 %3511  ;;  %v3457_v59 = vld [vmem:[%s5170_s29 + $0x260] sm:$0xff] }
 0x580   : > { %4151 = vst [vmem:[%s5172_s26 + $0x10] sm:$0xff] %v3522_v5  ;;  %v3456_v5 = vld [vmem:[%s5170_s29 + $0x258] sm:$0xff] }
 0x581   : > { %4149 = vst [vmem:[%s5172_s26] sm:$0xff] %v3512_v58 }
 0x584   : > { %3746 = vperm.xlu2 %4931, %v3428_v32  }
 0x585   : > { %3741 = vperm.xlu1 %4930, %v3427_v25   ;;  %3736 = vperm.xlu0 %4929, %v3426_v48   ;;  %v3461_v48 = vld [vmem:[%s5170_s29 + $0x280] sm:$0xff] }
 0x586   : > { %v3582_v47 = vpop.permute.xlu2 %3581 }
 0x587   : > { %4163 = vst [vmem:[%s5172_s26 + $0x70] sm:$0xff] %v3582_v47  ;;  %v3527_v39 = vpop.permute.xlu1 %3526  ;;  %v3517_v41 = vpop.permute.xlu0 %3516  ;;  %v3460_v47 = vld [vmem:[%s5170_s29 + $0x278] sm:$0xff] }
 0x588   : > { %4152 = vst [vmem:[%s5172_s26 + $0x18] sm:$0xff] %v3527_v39  ;;  %v3459_v39 = vld [vmem:[%s5170_s29 + $0x270] sm:$0xff] }
 0x589   : > { %4150 = vst [vmem:[%s5172_s26 + $0x8] sm:$0xff] %v3517_v41 }
 0x58c   : > { %3761 = vperm.xlu2 %4931, %v3431_v42  }
 0x58d   : > { %3756 = vperm.xlu1 %4930, %v3430_v11   ;;  %3751 = vperm.xlu0 %4929, %v3429_v13   ;;  %v3464_v13 = vld [vmem:[%s5170_s29 + $0x298] sm:$0xff] }
 0x58e   : > { %v3597_v24 = vpop.permute.xlu2 %3596 }
 0x58f   : > { %4166 = vst [vmem:[%s5172_s26 + $0x88] sm:$0xff] %v3597_v24  ;;  %v3547_v8 = vpop.permute.xlu1 %3546  ;;  %v3542_v34 = vpop.permute.xlu0 %3541  ;;  %v3463_v24 = vld [vmem:[%s5170_s29 + $0x290] sm:$0xff] }
 0x590   : > { %4156 = vst [vmem:[%s5172_s26 + $0x38] sm:$0xff] %v3547_v8  ;;  %v3462_v8 = vld [vmem:[%s5170_s29 + $0x288] sm:$0xff] }
 0x591   : > { %4155 = vst [vmem:[%s5172_s26 + $0x30] sm:$0xff] %v3542_v34 }
 0x594   : > { %3776 = vperm.xlu2 %4931, %v3434_v18  }
 0x595   : > { %3771 = vperm.xlu1 %4930, %v3433_v52   ;;  %3766 = vperm.xlu0 %4929, %v3432_v2   ;;  %v3467_v2 = vld [vmem:[%s5170_s29 + $0x2b0] sm:$0xff] }
 0x596   : > { %v3612_v3 = vpop.permute.xlu2 %3611 }
 0x597   : > { %4169 = vst [vmem:[%s5172_s26 + $0xa0] sm:$0xff] %v3612_v3  ;;  %v3562_v23 = vpop.permute.xlu1 %3561  ;;  %v3557_v46 = vpop.permute.xlu0 %3556  ;;  %v3466_v3 = vld [vmem:[%s5170_s29 + $0x2a8] sm:$0xff] }
 0x598   : > { %4159 = vst [vmem:[%s5172_s26 + $0x50] sm:$0xff] %v3562_v23  ;;  %v3465_v23 = vld [vmem:[%s5170_s29 + $0x2a0] sm:$0xff] }
 0x599   : > { %4158 = vst [vmem:[%s5172_s26 + $0x48] sm:$0xff] %v3557_v46 }
 0x59c   : > { %3791 = vperm.xlu2 %4931, %v3437_v61  }
 0x59d   : > { %3786 = vperm.xlu1 %4930, %v3436_v57   ;;  %3781 = vperm.xlu0 %4929, %v3435_v63   ;;  %v3470_v63 = vld [vmem:[%s5170_s29 + $0x2c8] sm:$0xff] }
 0x59e   : > { %v3627_v27 = vpop.permute.xlu2 %3626 }
 0x59f   : > { %4172 = vst [vmem:[%s5172_s26 + $0xb8] sm:$0xff] %v3627_v27  ;;  %v3577_v53 = vpop.permute.xlu1 %3576  ;;  %v3572_v9 = vpop.permute.xlu0 %3571  ;;  %v3469_v27 = vld [vmem:[%s5170_s29 + $0x2c0] sm:$0xff] }
 0x5a0   : > { %4162 = vst [vmem:[%s5172_s26 + $0x68] sm:$0xff] %v3577_v53  ;;  %v3468_v53 = vld [vmem:[%s5170_s29 + $0x2b8] sm:$0xff] }
 0x5a1   : > { %4161 = vst [vmem:[%s5172_s26 + $0x60] sm:$0xff] %v3572_v9 }
 0x5a4   : > { %3806 = vperm.xlu2 %4931, %v3440_v44  }
 0x5a5   : > { %3801 = vperm.xlu1 %4930, %v3439_v38   ;;  %3796 = vperm.xlu0 %4929, %v3438_v14   ;;  %v3473_v14 = vld [vmem:[%s5170_s29 + $0x2e0] sm:$0xff] }
 0x5a6   : > { %v3642_v51 = vpop.permute.xlu2 %3641 }
 0x5a7   : > { %4175 = vst [vmem:[%s5172_s26 + $0xd0] sm:$0xff] %v3642_v51  ;;  %v3592_v26 = vpop.permute.xlu1 %3591  ;;  %v3587_v31 = vpop.permute.xlu0 %3586  ;;  %v3472_v51 = vld [vmem:[%s5170_s29 + $0x2d8] sm:$0xff] }
 0x5a8   : > { %4165 = vst [vmem:[%s5172_s26 + $0x80] sm:$0xff] %v3592_v26  ;;  %v3471_v26 = vld [vmem:[%s5170_s29 + $0x2d0] sm:$0xff] }
 0x5a9   : > { %4164 = vst [vmem:[%s5172_s26 + $0x78] sm:$0xff] %v3587_v31 }
 0x5ac   : > { %3821 = vperm.xlu2 %4931, %v3443_v7  }
 0x5ad   : > { %3816 = vperm.xlu1 %4930, %v3442_v30   ;;  %3811 = vperm.xlu0 %4929, %v3441_v12   ;;  %v3476_v12 = vld [vmem:[%s5170_s29 + $0x2f8] sm:$0xff] }
 0x5ae   : > { %v3657_v55 = vpop.permute.xlu2 %3656 }
 0x5af   : > { %4178 = vst [vmem:[%s5172_s26 + $0xe8] sm:$0xff] %v3657_v55  ;;  %v3607_v1 = vpop.permute.xlu1 %3606  ;;  %v3602_v17 = vpop.permute.xlu0 %3601  ;;  %v3475_v55 = vld [vmem:[%s5170_s29 + $0x2f0] sm:$0xff] }
 0x5b0   : > { %4168 = vst [vmem:[%s5172_s26 + $0x98] sm:$0xff] %v3607_v1  ;;  %v3474_v1 = vld [vmem:[%s5170_s29 + $0x2e8] sm:$0xff] }
 0x5b1   : > { %4167 = vst [vmem:[%s5172_s26 + $0x90] sm:$0xff] %v3602_v17 }
 0x5b4   : > { %3836 = vperm.xlu2 %4931, %v3446_v62  }
 0x5b5   : > { %3831 = vperm.xlu1 %4930, %v3445_v20   ;;  %3826 = vperm.xlu0 %4929, %v3444_v21   ;;  %v3479_v21 = vld [vmem:[%s5170_s29 + $0x310] sm:$0xff] }
 0x5b6   : > { %v3672_v10 = vpop.permute.xlu2 %3671 }
 0x5b7   : > { %4181 = vst [vmem:[%s5172_s26 + $0x100] sm:$0xff] %v3672_v10  ;;  %v3622_v54 = vpop.permute.xlu1 %3621  ;;  %v3617_v36 = vpop.permute.xlu0 %3616  ;;  %v3478_v10 = vld [vmem:[%s5170_s29 + $0x308] sm:$0xff] }
 0x5b8   : > { %4171 = vst [vmem:[%s5172_s26 + $0xb0] sm:$0xff] %v3622_v54  ;;  %v3477_v54 = vld [vmem:[%s5170_s29 + $0x300] sm:$0xff] }
 0x5b9   : > { %4170 = vst [vmem:[%s5172_s26 + $0xa8] sm:$0xff] %v3617_v36 }
 0x5bc   : > { %3851 = vperm.xlu2 %4931, %v3449_v6  }
 0x5bd   : > { %3846 = vperm.xlu1 %4930, %v3448_v19   ;;  %3841 = vperm.xlu0 %4929, %v3447_v49   ;;  %v3482_v49 = vld [vmem:[%s5170_s29 + $0x328] sm:$0xff] }
 0x5be   : > { %v3687_v60 = vpop.permute.xlu2 %3686 }
 0x5bf   : > { %4184 = vst [vmem:[%s5172_s26 + $0x118] sm:$0xff] %v3687_v60  ;;  %v3637_v4 = vpop.permute.xlu1 %3636  ;;  %v3632_v15 = vpop.permute.xlu0 %3631  ;;  %v3481_v60 = vld [vmem:[%s5170_s29 + $0x320] sm:$0xff] }
 0x5c0   : > { %4174 = vst [vmem:[%s5172_s26 + $0xc8] sm:$0xff] %v3637_v4  ;;  %v3480_v4 = vld [vmem:[%s5170_s29 + $0x318] sm:$0xff] }
 0x5c1   : > { %4173 = vst [vmem:[%s5172_s26 + $0xc0] sm:$0xff] %v3632_v15 }
 0x5c4   : > { %3866 = vperm.xlu2 %4931, %v3452_v45  }
 0x5c5   : > { %3861 = vperm.xlu1 %4930, %v3451_v28   ;;  %3856 = vperm.xlu0 %4929, %v3450_v43   ;;  %v3485_v43 = vld [vmem:[%s5170_s29 + $0x340] sm:$0xff] }
 0x5c6   : > { %v3702_v0 = vpop.permute.xlu2 %3701 }
 0x5c7   : > { %4187 = vst [vmem:[%s5172_s26 + $0x130] sm:$0xff] %v3702_v0  ;;  %v3652_v29 = vpop.permute.xlu1 %3651  ;;  %v3647_v50 = vpop.permute.xlu0 %3646  ;;  %v3484_v0 = vld [vmem:[%s5170_s29 + $0x338] sm:$0xff] }
 0x5c8   : > { %4177 = vst [vmem:[%s5172_s26 + $0xe0] sm:$0xff] %v3652_v29  ;;  %v3483_v29 = vld [vmem:[%s5170_s29 + $0x330] sm:$0xff] }
 0x5c9   : > { %4176 = vst [vmem:[%s5172_s26 + $0xd8] sm:$0xff] %v3647_v50 }
 0x5cc   : > { %3881 = vperm.xlu2 %4931, %v3455_v56  }
 0x5cd   : > { %3876 = vperm.xlu1 %4930, %v3454_v22   ;;  %3871 = vperm.xlu0 %4929, %v3453_v33   ;;  %v3488_v33 = vld [vmem:[%s5170_s29 + $0x358] sm:$0xff] }
 0x5ce   : > { %v3717_v16 = vpop.permute.xlu2 %3716 }
 0x5cf   : > { %4190 = vst [vmem:[%s5172_s26 + $0x148] sm:$0xff] %v3717_v16  ;;  %v3667_v35 = vpop.permute.xlu1 %3666  ;;  %v3662_v37 = vpop.permute.xlu0 %3661  ;;  %v3487_v16 = vld [vmem:[%s5170_s29 + $0x350] sm:$0xff] }
 0x5d0   : > { %4180 = vst [vmem:[%s5172_s26 + $0xf8] sm:$0xff] %v3667_v35  ;;  %v3486_v35 = vld [vmem:[%s5170_s29 + $0x348] sm:$0xff] }
 0x5d1   : > { %4179 = vst [vmem:[%s5172_s26 + $0xf0] sm:$0xff] %v3662_v37 }
 0x5d4   : > { %3896 = vperm.xlu2 %4931, %v3458_v40  }
 0x5d5   : > { %3891 = vperm.xlu1 %4930, %v3457_v59   ;;  %3886 = vperm.xlu0 %4929, %v3456_v5   ;;  %v3491_v5 = vld [vmem:[%s5170_s29 + $0x370] sm:$0xff] }
 0x5d6   : > { %v3732_v58 = vpop.permute.xlu2 %3731 }
 0x5d7   : > { %4193 = vst [vmem:[%s5172_s26 + $0x160] sm:$0xff] %v3732_v58  ;;  %v3682_v32 = vpop.permute.xlu1 %3681  ;;  %v3677_v25 = vpop.permute.xlu0 %3676  ;;  %v3490_v58 = vld [vmem:[%s5170_s29 + $0x368] sm:$0xff] }
 0x5d8   : > { %4183 = vst [vmem:[%s5172_s26 + $0x110] sm:$0xff] %v3682_v32  ;;  %v3489_v32 = vld [vmem:[%s5170_s29 + $0x360] sm:$0xff] }
 0x5d9   : > { %4182 = vst [vmem:[%s5172_s26 + $0x108] sm:$0xff] %v3677_v25 }
 0x5dc   : > { %3911 = vperm.xlu2 %4931, %v3461_v48  }
 0x5dd   : > { %3906 = vperm.xlu1 %4930, %v3460_v47   ;;  %3901 = vperm.xlu0 %4929, %v3459_v39   ;;  %v3494_v39 = vld [vmem:[%s5170_s29 + $0x388] sm:$0xff] }
 0x5de   : > { %v3747_v41 = vpop.permute.xlu2 %3746 }
 0x5df   : > { %4196 = vst [vmem:[%s5172_s26 + $0x178] sm:$0xff] %v3747_v41  ;;  %v3697_v42 = vpop.permute.xlu1 %3696  ;;  %v3692_v11 = vpop.permute.xlu0 %3691  ;;  %v3493_v41 = vld [vmem:[%s5170_s29 + $0x380] sm:$0xff] }
 0x5e0   : > { %4186 = vst [vmem:[%s5172_s26 + $0x128] sm:$0xff] %v3697_v42  ;;  %v3492_v42 = vld [vmem:[%s5170_s29 + $0x378] sm:$0xff] }
 0x5e1   : > { %4185 = vst [vmem:[%s5172_s26 + $0x120] sm:$0xff] %v3692_v11 }
 0x5e4   : > { %3926 = vperm.xlu2 %4931, %v3464_v13  }
 0x5e5   : > { %3921 = vperm.xlu1 %4930, %v3463_v24   ;;  %3916 = vperm.xlu0 %4929, %v3462_v8   ;;  %v3497_v8 = vld [vmem:[%s5170_s29 + $0x3a0] sm:$0xff] }
 0x5e6   : > { %v3762_v34 = vpop.permute.xlu2 %3761 }
 0x5e7   : > { %4199 = vst [vmem:[%s5172_s26 + $0x190] sm:$0xff] %v3762_v34  ;;  %v3712_v18 = vpop.permute.xlu1 %3711  ;;  %v3707_v52 = vpop.permute.xlu0 %3706  ;;  %v3496_v34 = vld [vmem:[%s5170_s29 + $0x398] sm:$0xff] }
 0x5e8   : > { %4189 = vst [vmem:[%s5172_s26 + $0x140] sm:$0xff] %v3712_v18  ;;  %v3495_v18 = vld [vmem:[%s5170_s29 + $0x390] sm:$0xff] }
 0x5e9   : > { %4188 = vst [vmem:[%s5172_s26 + $0x138] sm:$0xff] %v3707_v52 }
 0x5ec   : > { %3941 = vperm.xlu2 %4931, %v3467_v2  }
 0x5ed   : > { %3936 = vperm.xlu1 %4930, %v3466_v3   ;;  %3931 = vperm.xlu0 %4929, %v3465_v23   ;;  %v3500_v23 = vld [vmem:[%s5170_s29 + $0x3b8] sm:$0xff] }
 0x5ee   : > { %v3777_v46 = vpop.permute.xlu2 %3776 }
 0x5ef   : > { %4202 = vst [vmem:[%s5172_s26 + $0x1a8] sm:$0xff] %v3777_v46  ;;  %v3727_v61 = vpop.permute.xlu1 %3726  ;;  %v3722_v57 = vpop.permute.xlu0 %3721  ;;  %v3499_v46 = vld [vmem:[%s5170_s29 + $0x3b0] sm:$0xff] }
 0x5f0   : > { %4192 = vst [vmem:[%s5172_s26 + $0x158] sm:$0xff] %v3727_v61  ;;  %v3498_v61 = vld [vmem:[%s5170_s29 + $0x3a8] sm:$0xff] }
 0x5f1   : > { %4191 = vst [vmem:[%s5172_s26 + $0x150] sm:$0xff] %v3722_v57 }
 0x5f4   : > { %3956 = vperm.xlu2 %4931, %v3470_v63  }
 0x5f5   : > { %3951 = vperm.xlu1 %4930, %v3469_v27   ;;  %3946 = vperm.xlu0 %4929, %v3468_v53   ;;  %v3503_v53 = vld [vmem:[%s5170_s29 + $0x3d0] sm:$0xff] }
 0x5f6   : > { %v3792_v9 = vpop.permute.xlu2 %3791 }
 0x5f7   : > { %4205 = vst [vmem:[%s5172_s26 + $0x1c0] sm:$0xff] %v3792_v9  ;;  %v3742_v44 = vpop.permute.xlu1 %3741  ;;  %v3737_v38 = vpop.permute.xlu0 %3736  ;;  %v3502_v9 = vld [vmem:[%s5170_s29 + $0x3c8] sm:$0xff] }
 0x5f8   : > { %4195 = vst [vmem:[%s5172_s26 + $0x170] sm:$0xff] %v3742_v44  ;;  %v3501_v44 = vld [vmem:[%s5170_s29 + $0x3c0] sm:$0xff] }
 0x5f9   : > { %4194 = vst [vmem:[%s5172_s26 + $0x168] sm:$0xff] %v3737_v38 }
 0x5fc   : > { %3971 = vperm.xlu2 %4931, %v3473_v14  }
 0x5fd   : > { %3966 = vperm.xlu1 %4930, %v3472_v51   ;;  %3961 = vperm.xlu0 %4929, %v3471_v26   ;;  %v3506_v26 = vld [vmem:[%s5170_s29 + $0x3e8] sm:$0xff] }
 0x5fe   : > { %v3807_v31 = vpop.permute.xlu2 %3806 }
 0x5ff   : > { %4208 = vst [vmem:[%s5172_s26 + $0x1d8] sm:$0xff] %v3807_v31  ;;  %v3757_v7 = vpop.permute.xlu1 %3756  ;;  %v3752_v30 = vpop.permute.xlu0 %3751  ;;  %v3505_v31 = vld [vmem:[%s5170_s29 + $0x3e0] sm:$0xff] }
 0x600   : > { %4198 = vst [vmem:[%s5172_s26 + $0x188] sm:$0xff] %v3757_v7  ;;  %v3504_v7 = vld [vmem:[%s5170_s29 + $0x3d8] sm:$0xff] }
 0x601   : > { %4197 = vst [vmem:[%s5172_s26 + $0x180] sm:$0xff] %v3752_v30 }
 0x604   : > { %3986 = vperm.xlu2 %4931, %v3476_v12  }
 0x605   : > { %3981 = vperm.xlu1 %4930, %v3475_v55   ;;  %3976 = vperm.xlu0 %4929, %v3474_v1   ;;  %v3508_v1 = vld [vmem:[%s5170_s29 + $0x3f8] sm:$0xff] }
 0x606   : > { %v3822_v17 = vpop.permute.xlu2 %3821 }
 0x607   : > { %4211 = vst [vmem:[%s5172_s26 + $0x1f0] sm:$0xff] %v3822_v17  ;;  %v3772_v62 = vpop.permute.xlu1 %3771  ;;  %v3767_v20 = vpop.permute.xlu0 %3766  ;;  %v3507_v17 = vld [vmem:[%s5170_s29 + $0x3f0] sm:$0xff] }
 0x608   : > { %4201 = vst [vmem:[%s5172_s26 + $0x1a0] sm:$0xff] %v3772_v62 }
 0x609   : > { %4200 = vst [vmem:[%s5172_s26 + $0x198] sm:$0xff] %v3767_v20 }
 0x60c   : > { %4001 = vperm.xlu2 %4931, %v3479_v21  }
 0x60d   : > { %3996 = vperm.xlu1 %4930, %v3478_v10   ;;  %3991 = vperm.xlu0 %4929, %v3477_v54  }
 0x60e   : > { %v3837_v36 = vpop.permute.xlu2 %3836 }
 0x60f   : > { %4214 = vst [vmem:[%s5172_s26 + $0x208] sm:$0xff] %v3837_v36  ;;  %v3787_v6 = vpop.permute.xlu1 %3786  ;;  %v3782_v19 = vpop.permute.xlu0 %3781 }
 0x610   : > { %4204 = vst [vmem:[%s5172_s26 + $0x1b8] sm:$0xff] %v3787_v6 }
 0x611   : > { %4203 = vst [vmem:[%s5172_s26 + $0x1b0] sm:$0xff] %v3782_v19 }
 0x614   : > { %4016 = vperm.xlu2 %4931, %v3482_v49  }
 0x615   : > { %4011 = vperm.xlu1 %4930, %v3481_v60   ;;  %4006 = vperm.xlu0 %4929, %v3480_v4  }
 0x616   : > { %v3852_v15 = vpop.permute.xlu2 %3851 }
 0x617   : > { %4217 = vst [vmem:[%s5172_s26 + $0x220] sm:$0xff] %v3852_v15  ;;  %v3802_v45 = vpop.permute.xlu1 %3801  ;;  %v3797_v28 = vpop.permute.xlu0 %3796 }
 0x618   : > { %4207 = vst [vmem:[%s5172_s26 + $0x1d0] sm:$0xff] %v3802_v45 }
 0x619   : > { %4206 = vst [vmem:[%s5172_s26 + $0x1c8] sm:$0xff] %v3797_v28 }
 0x61c   : > { %4031 = vperm.xlu2 %4931, %v3485_v43  }
 0x61d   : > { %4026 = vperm.xlu1 %4930, %v3484_v0   ;;  %4021 = vperm.xlu0 %4929, %v3483_v29  }
 0x61e   : > { %v3867_v50 = vpop.permute.xlu2 %3866 }
 0x61f   : > { %4220 = vst [vmem:[%s5172_s26 + $0x238] sm:$0xff] %v3867_v50  ;;  %v3817_v56 = vpop.permute.xlu1 %3816  ;;  %v3812_v22 = vpop.permute.xlu0 %3811 }
 0x620   : > { %4210 = vst [vmem:[%s5172_s26 + $0x1e8] sm:$0xff] %v3817_v56 }
 0x621   : > { %4209 = vst [vmem:[%s5172_s26 + $0x1e0] sm:$0xff] %v3812_v22 }
 0x624   : > { %4046 = vperm.xlu2 %4931, %v3488_v33  }
 0x625   : > { %4041 = vperm.xlu1 %4930, %v3487_v16   ;;  %4036 = vperm.xlu0 %4929, %v3486_v35  }
 0x626   : > { %v3882_v37 = vpop.permute.xlu2 %3881 }
 0x627   : > { %4223 = vst [vmem:[%s5172_s26 + $0x250] sm:$0xff] %v3882_v37  ;;  %v3832_v40 = vpop.permute.xlu1 %3831  ;;  %v3827_v59 = vpop.permute.xlu0 %3826 }
 0x628   : > { %4213 = vst [vmem:[%s5172_s26 + $0x200] sm:$0xff] %v3832_v40 }
 0x629   : > { %4212 = vst [vmem:[%s5172_s26 + $0x1f8] sm:$0xff] %v3827_v59 }
 0x62c   : > { %4061 = vperm.xlu2 %4931, %v3491_v5  }
 0x62d   : > { %4056 = vperm.xlu1 %4930, %v3490_v58   ;;  %4051 = vperm.xlu0 %4929, %v3489_v32  }
 0x62e   : > { %v3897_v25 = vpop.permute.xlu2 %3896 }
 0x62f   : > { %4226 = vst [vmem:[%s5172_s26 + $0x268] sm:$0xff] %v3897_v25  ;;  %v3847_v48 = vpop.permute.xlu1 %3846  ;;  %v3842_v47 = vpop.permute.xlu0 %3841 }
 0x630   : > { %4216 = vst [vmem:[%s5172_s26 + $0x218] sm:$0xff] %v3847_v48 }
 0x631   : > { %4215 = vst [vmem:[%s5172_s26 + $0x210] sm:$0xff] %v3842_v47 }
 0x634   : > { %4076 = vperm.xlu2 %4931, %v3494_v39  }
 0x635   : > { %4071 = vperm.xlu1 %4930, %v3493_v41   ;;  %4066 = vperm.xlu0 %4929, %v3492_v42  }
 0x636   : > { %v3912_v11 = vpop.permute.xlu2 %3911 }
 0x637   : > { %4229 = vst [vmem:[%s5172_s26 + $0x280] sm:$0xff] %v3912_v11  ;;  %v3862_v13 = vpop.permute.xlu1 %3861  ;;  %v3857_v24 = vpop.permute.xlu0 %3856 }
 0x638   : > { %4219 = vst [vmem:[%s5172_s26 + $0x230] sm:$0xff] %v3862_v13 }
 0x639   : > { %4218 = vst [vmem:[%s5172_s26 + $0x228] sm:$0xff] %v3857_v24 }
 0x63c   : > { %4091 = vperm.xlu2 %4931, %v3497_v8  }
 0x63d   : > { %4086 = vperm.xlu1 %4930, %v3496_v34   ;;  %4081 = vperm.xlu0 %4929, %v3495_v18  }
 0x63e   : > { %v3927_v52 = vpop.permute.xlu2 %3926 }
 0x63f   : > { %4232 = vst [vmem:[%s5172_s26 + $0x298] sm:$0xff] %v3927_v52  ;;  %v3877_v2 = vpop.permute.xlu1 %3876  ;;  %v3872_v3 = vpop.permute.xlu0 %3871 }
 0x640   : > { %4222 = vst [vmem:[%s5172_s26 + $0x248] sm:$0xff] %v3877_v2 }
 0x641   : > { %4221 = vst [vmem:[%s5172_s26 + $0x240] sm:$0xff] %v3872_v3 }
 0x644   : > { %4106 = vperm.xlu2 %4931, %v3500_v23  }
 0x645   : > { %4101 = vperm.xlu1 %4930, %v3499_v46   ;;  %4096 = vperm.xlu0 %4929, %v3498_v61  }
 0x646   : > { %v3942_v57 = vpop.permute.xlu2 %3941 }
 0x647   : > { %4235 = vst [vmem:[%s5172_s26 + $0x2b0] sm:$0xff] %v3942_v57  ;;  %v3892_v63 = vpop.permute.xlu1 %3891  ;;  %v3887_v27 = vpop.permute.xlu0 %3886 }
 0x648   : > { %4225 = vst [vmem:[%s5172_s26 + $0x260] sm:$0xff] %v3892_v63 }
 0x649   : > { %4224 = vst [vmem:[%s5172_s26 + $0x258] sm:$0xff] %v3887_v27 }
 0x64c   : > { %4121 = vperm.xlu2 %4931, %v3503_v53  }
 0x64d   : > { %4116 = vperm.xlu1 %4930, %v3502_v9   ;;  %4111 = vperm.xlu0 %4929, %v3501_v44  }
 0x64e   : > { %v3957_v38 = vpop.permute.xlu2 %3956 }
 0x64f   : > { %4238 = vst [vmem:[%s5172_s26 + $0x2c8] sm:$0xff] %v3957_v38  ;;  %v3907_v14 = vpop.permute.xlu1 %3906  ;;  %v3902_v51 = vpop.permute.xlu0 %3901 }
 0x650   : > { %4228 = vst [vmem:[%s5172_s26 + $0x278] sm:$0xff] %v3907_v14 }
 0x651   : > { %4227 = vst [vmem:[%s5172_s26 + $0x270] sm:$0xff] %v3902_v51 }
 0x654   : > { %4136 = vperm.xlu2 %4931, %v3506_v26  }
 0x655   : > { %4131 = vperm.xlu1 %4930, %v3505_v31   ;;  %4126 = vperm.xlu0 %4929, %v3504_v7  }
 0x656   : > { %v3972_v30 = vpop.permute.xlu2 %3971 }
 0x657   : > { %4241 = vst [vmem:[%s5172_s26 + $0x2e0] sm:$0xff] %v3972_v30  ;;  %v3922_v12 = vpop.permute.xlu1 %3921  ;;  %v3917_v55 = vpop.permute.xlu0 %3916 }
 0x658   : > { %4231 = vst [vmem:[%s5172_s26 + $0x290] sm:$0xff] %v3922_v12 }
 0x659   : > { %4230 = vst [vmem:[%s5172_s26 + $0x288] sm:$0xff] %v3917_v55 }
 0x65d   : > { %4146 = vperm.xlu1 %4930, %v3508_v1   ;;  %4141 = vperm.xlu0 %4929, %v3507_v17  }
 0x65e   : > { %v3987_v62 = vpop.permute.xlu2 %3986 }
 0x65f   : > { %4244 = vst [vmem:[%s5172_s26 + $0x2f8] sm:$0xff] %v3987_v62  ;;  %v3937_v20 = vpop.permute.xlu1 %3936  ;;  %v3932_v21 = vpop.permute.xlu0 %3931 }
 0x660   : > { %4234 = vst [vmem:[%s5172_s26 + $0x2a8] sm:$0xff] %v3937_v20 }
 0x661   : > { %4233 = vst [vmem:[%s5172_s26 + $0x2a0] sm:$0xff] %v3932_v21 }
 0x666   : > { %v4002_v10 = vpop.permute.xlu2 %4001 }
 0x667   : > { %4247 = vst [vmem:[%s5172_s26 + $0x310] sm:$0xff] %v4002_v10  ;;  %v3952_v54 = vpop.permute.xlu1 %3951  ;;  %v3947_v36 = vpop.permute.xlu0 %3946 }
 0x668   : > { %4237 = vst [vmem:[%s5172_s26 + $0x2c0] sm:$0xff] %v3952_v54 }
 0x669   : > { %4236 = vst [vmem:[%s5172_s26 + $0x2b8] sm:$0xff] %v3947_v36 }
 0x66e   : > { %v4017_v6 = vpop.permute.xlu2 %4016 }
 0x66f   : > { %4250 = vst [vmem:[%s5172_s26 + $0x328] sm:$0xff] %v4017_v6  ;;  %v3967_v19 = vpop.permute.xlu1 %3966  ;;  %v3962_v49 = vpop.permute.xlu0 %3961 }
 0x670   : > { %4240 = vst [vmem:[%s5172_s26 + $0x2d8] sm:$0xff] %v3967_v19 }
 0x671   : > { %4239 = vst [vmem:[%s5172_s26 + $0x2d0] sm:$0xff] %v3962_v49 }
 0x676   : > { %v4032_v60 = vpop.permute.xlu2 %4031 }
 0x677   : > { %4253 = vst [vmem:[%s5172_s26 + $0x340] sm:$0xff] %v4032_v60  ;;  %v3982_v4 = vpop.permute.xlu1 %3981  ;;  %v3977_v15 = vpop.permute.xlu0 %3976 }
 0x678   : > { %4243 = vst [vmem:[%s5172_s26 + $0x2f0] sm:$0xff] %v3982_v4 }
 0x679   : > { %4242 = vst [vmem:[%s5172_s26 + $0x2e8] sm:$0xff] %v3977_v15 }
 0x67e   : > { %v4047_v45 = vpop.permute.xlu2 %4046 }
 0x67f   : > { %4256 = vst [vmem:[%s5172_s26 + $0x358] sm:$0xff] %v4047_v45  ;;  %v3997_v28 = vpop.permute.xlu1 %3996  ;;  %v3992_v43 = vpop.permute.xlu0 %3991 }
 0x680   : > { %4246 = vst [vmem:[%s5172_s26 + $0x308] sm:$0xff] %v3997_v28 }
 0x681   : > { %4245 = vst [vmem:[%s5172_s26 + $0x300] sm:$0xff] %v3992_v43 }
 0x686   : > { %v4062_v0 = vpop.permute.xlu2 %4061 }
 0x687   : > { %4259 = vst [vmem:[%s5172_s26 + $0x370] sm:$0xff] %v4062_v0  ;;  %v4012_v29 = vpop.permute.xlu1 %4011  ;;  %v4007_v50 = vpop.permute.xlu0 %4006 }
 0x688   : > { %4249 = vst [vmem:[%s5172_s26 + $0x320] sm:$0xff] %v4012_v29 }
 0x689   : > { %4248 = vst [vmem:[%s5172_s26 + $0x318] sm:$0xff] %v4007_v50 }
 0x68e   : > { %v4077_v56 = vpop.permute.xlu2 %4076 }
 0x68f   : > { %4262 = vst [vmem:[%s5172_s26 + $0x388] sm:$0xff] %v4077_v56  ;;  %v4027_v22 = vpop.permute.xlu1 %4026  ;;  %v4022_v33 = vpop.permute.xlu0 %4021 }
 0x690   : > { %4252 = vst [vmem:[%s5172_s26 + $0x338] sm:$0xff] %v4027_v22 }
 0x691   : > { %4251 = vst [vmem:[%s5172_s26 + $0x330] sm:$0xff] %v4022_v33 }
 0x696   : > { %v4092_v16 = vpop.permute.xlu2 %4091 }
 0x697   : > { %4265 = vst [vmem:[%s5172_s26 + $0x3a0] sm:$0xff] %v4092_v16  ;;  %v4042_v35 = vpop.permute.xlu1 %4041  ;;  %v4037_v37 = vpop.permute.xlu0 %4036 }
 0x698   : > { %4255 = vst [vmem:[%s5172_s26 + $0x350] sm:$0xff] %v4042_v35 }
 0x699   : > { %4254 = vst [vmem:[%s5172_s26 + $0x348] sm:$0xff] %v4037_v37 }
 0x69e   : > { %v4107_v40 = vpop.permute.xlu2 %4106 }
 0x69f   : > { %4268 = vst [vmem:[%s5172_s26 + $0x3b8] sm:$0xff] %v4107_v40  ;;  %v4057_v59 = vpop.permute.xlu1 %4056  ;;  %v4052_v5 = vpop.permute.xlu0 %4051 }
 0x6a0   : > { %4258 = vst [vmem:[%s5172_s26 + $0x368] sm:$0xff] %v4057_v59 }
 0x6a1   : > { %4257 = vst [vmem:[%s5172_s26 + $0x360] sm:$0xff] %v4052_v5 }
 0x6a6   : > { %v4122_v58 = vpop.permute.xlu2 %4121 }
 0x6a7   : > { %4271 = vst [vmem:[%s5172_s26 + $0x3d0] sm:$0xff] %v4122_v58  ;;  %v4072_v32 = vpop.permute.xlu1 %4071  ;;  %v4067_v25 = vpop.permute.xlu0 %4066 }
 0x6a8   : > { %4261 = vst [vmem:[%s5172_s26 + $0x380] sm:$0xff] %v4072_v32 }
 0x6a9   : > { %4260 = vst [vmem:[%s5172_s26 + $0x378] sm:$0xff] %v4067_v25 }
 0x6ae   : > { %v4137_v48 = vpop.permute.xlu2 %4136 }
 0x6af   : > { %4274 = vst [vmem:[%s5172_s26 + $0x3e8] sm:$0xff] %v4137_v48  ;;  %v4087_v47 = vpop.permute.xlu1 %4086  ;;  %v4082_v39 = vpop.permute.xlu0 %4081 }
 0x6b0   : > { %4264 = vst [vmem:[%s5172_s26 + $0x398] sm:$0xff] %v4087_v47 }
 0x6b1   : > { %4263 = vst [vmem:[%s5172_s26 + $0x390] sm:$0xff] %v4082_v39 }
 0x6b7   : > { %v4102_v41 = vpop.permute.xlu1 %4101  ;;  %v4097_v42 = vpop.permute.xlu0 %4096 }
 0x6b8   : > { %4267 = vst [vmem:[%s5172_s26 + $0x3b0] sm:$0xff] %v4102_v41 }
 0x6b9   : > { %4266 = vst [vmem:[%s5172_s26 + $0x3a8] sm:$0xff] %v4097_v42 }
 0x6bf   : > { %v4117_v11 = vpop.permute.xlu1 %4116  ;;  %v4112_v13 = vpop.permute.xlu0 %4111 }
 0x6c0   : > { %4270 = vst [vmem:[%s5172_s26 + $0x3c8] sm:$0xff] %v4117_v11 }
 0x6c1   : > { %4269 = vst [vmem:[%s5172_s26 + $0x3c0] sm:$0xff] %v4112_v13 }
 0x6c7   : > { %v4132_v24 = vpop.permute.xlu1 %4131  ;;  %v4127_v8 = vpop.permute.xlu0 %4126 }
 0x6c8   : > { %4273 = vst [vmem:[%s5172_s26 + $0x3e0] sm:$0xff] %v4132_v24 }
 0x6c9   : > { %4272 = vst [vmem:[%s5172_s26 + $0x3d8] sm:$0xff] %v4127_v8 }
 0x6cf   : > { %v4147_v34 = vpop.permute.xlu1 %4146  ;;  %v4142_v18 = vpop.permute.xlu0 %4141 }
 0x6d0   : > { %4276 = vst [vmem:[%s5172_s26 + $0x3f8] sm:$0xff] %v4147_v34 }
 0x6d1   : > { %4275 = vst [vmem:[%s5172_s26 + $0x3f0] sm:$0xff] %v4142_v18 }
 0x6d2 PF: > { %s4293_s29 = ssub.s32 1, %s5010_s30  ;;  %s4737_s15 = sshll.u32 %s5014_s9, 8 }
 0x6d3   : > { %s4736_s11 = sshll.u32 %s4293_s29, 7  ;;  %s4302_s25 = sshll.u32 %s5172_s26, 4  ;;  %s4303_s25 = int_to_ptr.vmem [resolvable:$true] %s4302_s25 }
 0x6d4   : > { %s4299_s16 = sadd.s32 %s4737_s15, %s4736_s11  ;;  %s8088_s20 = sand.u32 1, %s5002_s28  }
 0x6d5   : > { %s4738_s13 = sshll.u32 %s4299_s16, 3  ;;  %s4283_s22 = scalar_lea.sflag [#allocation3], %s8088_s20 }
 0x6d6   : > { %s4301_s17 = scalar_lea.hbm %s7983_s8, %s4738_s13  ;;  %s4952_s26 = scalar_lea.hbm %s7983_s8, 4096 }
 0x6d7   : > { %s4304_s19 = sshll.u32 %s4301_s17, 4  ;;  %s4305_s19 = int_to_ptr.hbm [resolvable:$true] %s4304_s19 }
 0x6d8   : > { %s4946_s18 = sshra.s32 %s4305_s19, 4  ;;  %s4947_s18 = int_to_ptr.hbm [resolvable:$true] %s4946_s18 }
 0x6d9   : > { %s4948_s10 = scalar_lea.hbm %s4947_s18, 1024  ;;  %p4953_p6 = scmp.lt.s32.totalorder %s4947_s18, %s7983_s8 }
 0x6da   : > { %p4949_p2 = scmp.ne.s32.totalorder %s4947_s18, %s4948_s10  ;;  %p4954_p7 = scmp.lt.s32.totalorder %s4952_s26, %s4948_s10 }
 0x6dc   : > { %p4950_p3 = pnand %p4949_p2, %p5132_p4  ;;  %p4955_p8 = por %p4954_p7, %p4953_p6 }
 0x6de   : > { %p4951_p5 = pneg %p4950_p3 }
 0x6e0   : > { %p4956_p10 = pnand %p4955_p8, %p4951_p5 }
 0x6e2   : > { %4959 = shalt.err (!%p4956_p10)
}
 0x6e3   : > { %s5033_s15 = smov 128   ;;  %s5034_s16 = smov 8  }
 0x6e4   : > { %4840 = dma.vmem_to_hbm [thread:$0]  (%p5132_p4), %s4303_s25, 16384, %s4305_s19, %s4283_s22, %s5033_s15, %s5033_s15, %s5034_s16  }
 0x6e5 PF: > { %p4846_p11 = scmp.ge.s32.totalorder %s5026_s12, 2  ;;  %s4327_s13 = sand.u32 1, %s4998_s27  }
 0x6e6   : > { %s4328_s23 = scalar_lea.sflag [#allocation3], %s4327_s13 }
 0x6e7   : > { %p4843_p12 = pnand %p4846_p11, %p5144_p9 }
 0x6e9   : > { %p4844_p13 = pneg %p4843_p12 }
 0x6eb   : > { %4993 = dma.done.wait (%p4844_p13), %s4328_s23, 16384  }
 0x6ec   : > { %4995 = vsyncadd (%p4844_p13), %s4328_s23, 4294950912  ;;  %s22_s12 = sadd.s32 1, %s5026_s12   ;;  %s8089_s14 = sld [smem:[#allocation5_spill]] }
 0x6ed   : > { %p19_p0 = scmp.ge.s32.totalorder %s22_s12, 6   ;;  %s8090_s29 = sld [smem:[#allocation10_spill]] }
 0x6ee   : > { %s8091_s30 = sld [smem:[#allocation6_spill]]  ;;  %s8095_s27 = smov %s5002_s28 }
 0x6ef   : > { %s8092_s9 = sld [smem:[#allocation7_spill]]  ;;  %21 = sbr.rel (!%p19_p0) target bundleno = 5 (0x5), region = 110 }
 0x6f0   : > { %s8093_s10 = sld [smem:[#allocation8_spill]] }
 0x6f1   : > { %s8094_s11 = sld [smem:[#allocation9_spill]] }
 0x6f2   : > { %s8096_s28 = smov %s8089_s14 }
 0x6f4   :  { %4334 = vsyncpa [#allocation3], 1 }
 0x6f5   :  { %4336 = vsyncpa [#allocation3 + $0x1], 1 }

</bundles_post_ra>
